<compile_context>
chip_gen: v5e
topology: v5e:2x2
jax: 0.10.0
libtpu: 0.0.40
codegen_flags: <defaults>
</compile_context>

<pallas_src>
import functools

import jax
import jax.numpy as jnp
from jax.experimental import pallas as pl
from jax.experimental.pallas import tpu as pltpu


# ---------------------------------------------------------------------------
# Small helpers
# ---------------------------------------------------------------------------
def _largest_divisor_at_most(n: int, cap: int) -> int:
    cap = max(1, min(cap, n))
    for d in range(cap, 0, -1):
        if n % d == 0:
            return d
    return 1


def _pick_b_block(batch: int, cap: int = 256) -> int:
    """Largest batch block (<= cap) honoring the (8,128) tiling rule."""
    if batch <= cap:
        return batch                      # block == full dim is always legal
    for d in range(cap, 7, -1):
        if batch % d == 0 and d % 8 == 0:
            return d
    return batch


def _default_vmem_limit_bytes() -> int:
    """Per-generation scoped-VMEM limit: capacity minus 16 MiB headroom."""
    try:
        cap = int(pltpu.get_tpu_info().vmem_capacity_bytes)
    except Exception:
        cap = 64 * 1024 * 1024            # conservative fallback (v7x size)
    return max(32 * 1024 * 1024, cap - 16 * 1024 * 1024)


def _resident_spec(block_shape, index_map):
    """BlockSpec for a constant-index (resident) input, single-buffered.

    Double-buffering a block whose index_map is constant is pure VMEM waste
    (f32 W_hh at H=1280 would be ~52 MB double-buffered -> over v7x VMEM)."""
    try:
        return pl.BlockSpec(block_shape, index_map,
                            pipeline_mode=pl.Buffered(buffer_count=1))
    except TypeError:                     # very old jax: no pipeline_mode kwarg
        return pl.BlockSpec(block_shape, index_map)


def _check_whh_resident(w_hh, vmem_limit_bytes):
    whh_bytes = int(w_hh.shape[0]) * int(w_hh.shape[1]) * w_hh.dtype.itemsize
    if whh_bytes > vmem_limit_bytes // 2:
        # TODO(synk): stream W_hh over (K, 4H) tiles with pltpu.emit_pipeline
        # (manual double-buffered DMA) for module-scale hidden sizes.
        raise NotImplementedError(
            f"W_hh ({whh_bytes/2**20:.1f} MiB) does not fit the resident-VMEM "
            "design; streamed K/N tiling is required at this scale.")


# ---------------------------------------------------------------------------
# LSTM cell (shared by both kernels)
# ---------------------------------------------------------------------------
def _lstm_cell(gx_row, h, c, whh_ref, H):
    """One LSTM step.  Gate-by-gate so live vector state stays at (b, H)
    instead of (b, 4H) f32, and gate n's sigmoid/tanh (EUP) can overlap gate
    n+1's MXU push.  MXU accumulates in f32; h is cast to the weight dtype
    (bf16 on the default path)."""
    hb = h.astype(whh_ref.dtype)

    def gate(n):
        return gx_row[:, n * H:(n + 1) * H].astype(jnp.float32) + jnp.dot(
            hb, whh_ref[:, n * H:(n + 1) * H],
            preferred_element_type=jnp.float32)

    i = jax.nn.sigmoid(gate(0))           # PyTorch gate order: i, f, g, o
    f = jax.nn.sigmoid(gate(1))
    g = jnp.tanh(gate(2))
    o = jax.nn.sigmoid(gate(3))
    c_new = f * c + i * g
    h_new = o * jnp.tanh(c_new)
    return h_new, c_new


# ---------------------------------------------------------------------------
# Encoder-style kernel: gx precomputed per time step, T_blk steps per grid
# iteration, state carried in VMEM scratch across the (sequential) time axis.
# ---------------------------------------------------------------------------
def _lstm_seq_kernel(gx_ref, whh_ref, out_ref, h_ref, c_ref, *, return_sequence):
    # gx_ref : (t_blk, b_blk, 4H)  x_t @ W_ih + b   (bf16 or f32)
    # whh_ref: (H, 4H)             resident recurrent weight
    # out_ref: (t_blk, b_blk, H) if return_sequence else (b_blk, H)
    # h_ref, c_ref: (b_blk, H)     carried state (f32 VMEM scratch)
    t_idx = pl.program_id(1)

    @pl.when(t_idx == 0)
    def _init():                          # new batch block: reset carried state
        h_ref[...] = jnp.zeros_like(h_ref)
        c_ref[...] = jnp.zeros_like(c_ref)

    H = h_ref.shape[-1]
    t_blk = gx_ref.shape[0]

    def body(j, carry):
        h, c = carry
        h, c = _lstm_cell(gx_ref[j], h, c, whh_ref, H)
        if return_sequence:
            out_ref[j] = h.astype(out_ref.dtype)
        return h, c

    h, c = jax.lax.fori_loop(0, t_blk, body, (h_ref[...], c_ref[...]),
                             unroll=True)
    h_ref[...] = h
    c_ref[...] = c

    if not return_sequence:
        # Only the final hidden state is consumed -> write it once; the output
        # block is resident across the time axis (index_map (b, 0)), so no HBM
        # traffic happens until the batch block finishes.
        @pl.when(t_idx == pl.num_programs(1) - 1)
        def _store_final():
            out_ref[...] = h.astype(out_ref.dtype)


def lstm_recurrence(gates_x, w_hh, *, t_block=32, b_block=None,
                    return_sequence=True, vmem_limit_bytes=None):
    """Sequential LSTM recurrence given precomputed input pre-activations.

    gates_x : (T, B, 4H)  == x_t @ W_ih^T + b_ih + b_hh   (bf16 or f32)
    w_hh    : (H, 4H)     (PyTorch weight_hh_l0 transposed; bf16 default)
    Returns (T, B, H) hidden states, or (B, H) final hidden if
    return_sequence=False.  h0 = c0 = 0.
    """
    T, B, G4 = gates_x.shape
    H = w_hh.shape[0]
    assert G4 == 4 * H
    # NOTE: at module scale H should be a multiple of 128 so the per-gate
    # slices of W_hh / gx are lane-aligned (true for H=1280 / 16000).

    if b_block is None:
        b_block = _pick_b_block(B)
    assert B % b_block == 0
    assert b_block == B or b_block % 8 == 0

    t_block = _largest_divisor_at_most(T, t_block)   # no padding blocks
    n_t = T // t_block

    if vmem_limit_bytes is None:
        vmem_limit_bytes = _default_vmem_limit_bytes()
    _check_whh_resident(w_hh, vmem_limit_bytes)

    if return_sequence:
        out_shape = jax.ShapeDtypeStruct((T, B, H), jnp.float32)
        out_spec = pl.BlockSpec((t_block, b_block, H), lambda b, t: (t, b, 0))
    else:
        out_shape = jax.ShapeDtypeStruct((B, H), jnp.float32)
        out_spec = pl.BlockSpec((b_block, H), lambda b, t: (b, 0))

    kernel = functools.partial(_lstm_seq_kernel, return_sequence=return_sequence)

    return pl.pallas_call(
        kernel,
        out_shape=out_shape,
        grid_spec=pltpu.PrefetchScalarGridSpec(
            num_scalar_prefetch=0,
            grid=(B // b_block, n_t),
            in_specs=[
                pl.BlockSpec((t_block, b_block, G4), lambda b, t: (t, b, 0)),
                _resident_spec((H, G4), lambda b, t: (0, 0)),   # W_hh, 1-buffered
            ],
            out_specs=out_spec,
            scratch_shapes=[
                pltpu.VMEM((b_block, H), jnp.float32),   # h state
                pltpu.VMEM((b_block, H), jnp.float32),   # c state
            ],
        ),
        compiler_params=pltpu.CompilerParams(
            # Batch blocks are independent ("parallel"); with b_block == B the
            # axis has extent 1 so a tiny batch is never split across cores.
            # The time axis is a true recurrence -> must stay "arbitrary".
            dimension_semantics=("parallel", "arbitrary"),
            vmem_limit_bytes=vmem_limit_bytes,
        ),
    )(gates_x, w_hh)


# ---------------------------------------------------------------------------
# Decoder kernel: input is hidden.repeat(...) -> only B unique pre-activation
# rows exist.  They are kept as a small resident VMEM input and selected with
# (t_idx * t_blk + j) % B per step, so no (B*T, 1, 4D) HBM array is ever built.
# ---------------------------------------------------------------------------
def _lstm_repeat_kernel(gxu_ref, whh_ref, out_ref, h_ref, c_ref):
    # gxu_ref: (B, 4H)        unique pre-activations (resident, 1-buffered)
    # whh_ref: (H, 4H)        resident recurrent weight
    # out_ref: (t_blk, 1, H)  hidden states for this block of steps
    # h_ref, c_ref: (1, H)    carried state (f32 VMEM scratch)
    t_idx = pl.program_id(0)

    @pl.when(t_idx == 0)
    def _init():
        h_ref[...] = jnp.zeros_like(h_ref)
        c_ref[...] = jnp.zeros_like(c_ref)

    H = h_ref.shape[-1]
    t_blk = out_ref.shape[0]
    B = gxu_ref.shape[0]
    base = t_idx * t_blk

    def body(j, carry):
        h, c = carry
        row = (base + j) % B
        gx_row = gxu_ref[pl.ds(row, 1), :]            # (1, 4H)
        h, c = _lstm_cell(gx_row, h, c, whh_ref, H)
        out_ref[j] = h.astype(out_ref.dtype)
        return h, c

    h, c = jax.lax.fori_loop(0, t_blk, body, (h_ref[...], c_ref[...]),
                             unroll=True)
    h_ref[...] = h
    c_ref[...] = c


def lstm_repeat_recurrence(gx_unique, w_hh, total_steps, *, t_block=32,
                           vmem_limit_bytes=None):
    """LSTM over a length-`total_steps` sequence whose step-s input
    pre-activation is gx_unique[s % B].  Batch = 1 (matches hidden.repeat)."""
    B, G4 = gx_unique.shape
    H = w_hh.shape[0]
    assert G4 == 4 * H

    t_block = _largest_divisor_at_most(total_steps, t_block)
    n_t = total_steps // t_block

    if vmem_limit_bytes is None:
        vmem_limit_bytes = _default_vmem_limit_bytes()
    _check_whh_resident(w_hh, vmem_limit_bytes)

    return pl.pallas_call(
        _lstm_repeat_kernel,
        out_shape=jax.ShapeDtypeStruct((total_steps, 1, H), jnp.float32),
        grid_spec=pltpu.PrefetchScalarGridSpec(
            num_scalar_prefetch=0,
            grid=(n_t,),
            in_specs=[
                _resident_spec((B, G4), lambda t: (0, 0)),   # unique gx rows
                _resident_spec((H, G4), lambda t: (0, 0)),   # W_hh
            ],
            out_specs=pl.BlockSpec((t_block, 1, H), lambda t: (t, 0, 0)),
            scratch_shapes=[
                pltpu.VMEM((1, H), jnp.float32),   # h state
                pltpu.VMEM((1, H), jnp.float32),   # c state
            ],
        ),
        compiler_params=pltpu.CompilerParams(
            dimension_semantics=("arbitrary",),    # true recurrence
            vmem_limit_bytes=vmem_limit_bytes,
        ),
    )(gx_unique, w_hh)


# ---------------------------------------------------------------------------
# Parameter construction (deterministic, PyTorch LSTM shapes).  bf16 weights
# are the default (MXU bf16 rate + halved resident W_hh VMEM); bias stays f32.
# ---------------------------------------------------------------------------
def init_lstm_params(key, input_size, hidden_size, weight_dtype=jnp.bfloat16):
    k = 1.0 / float(hidden_size) ** 0.5
    k1, k2, k3, k4 = jax.random.split(key, 4)
    w_ih = jax.random.uniform(k1, (4 * hidden_size, input_size), jnp.float32, -k, k)
    w_hh = jax.random.uniform(k2, (4 * hidden_size, hidden_size), jnp.float32, -k, k)
    b_ih = jax.random.uniform(k3, (4 * hidden_size,), jnp.float32, -k, k)
    b_hh = jax.random.uniform(k4, (4 * hidden_size,), jnp.float32, -k, k)
    return {
        "w_ih": jnp.transpose(w_ih).astype(weight_dtype),   # (input, 4H)
        "w_hh": jnp.transpose(w_hh).astype(weight_dtype),   # (H, 4H)
        "b": (b_ih + b_hh)[None, :],                         # (1, 4H), f32
    }


def _gx_dtype(weights):
    return jnp.bfloat16 if weights.dtype == jnp.bfloat16 else jnp.float32


# ---------------------------------------------------------------------------
# Forward pass matching the PyTorch LSTMAutoencoder
# ---------------------------------------------------------------------------
def lstm_autoencoder_forward(x, enc_params, dec_params, *, t_block=32):
    """x: (B, T, input_size) -> (1, B*T, input_size), like the PyTorch module."""
    B, T, _ = x.shape

    # ---- encoder ----
    # Hoisted input projection: one big MXU-friendly GEMM in plain JAX instead
    # of T tiny per-step matmuls inside the recurrence.
    w_ih_e = enc_params["w_ih"]
    x_tbd = jnp.transpose(x, (1, 0, 2))                                # (T,B,D)
    gx_enc = (jnp.einsum("tbd,dg->tbg", x_tbd.astype(w_ih_e.dtype), w_ih_e,
                         preferred_element_type=jnp.float32)
              + enc_params["b"]).astype(_gx_dtype(w_ih_e))             # (T,B,4H)
    # Only the final hidden state is needed -> return_sequence=False (no
    # T*B*H HBM writeback).
    hidden = lstm_recurrence(gx_enc, enc_params["w_hh"], t_block=t_block,
                             return_sequence=False)                    # (B, H)

    # ---- hidden.repeat(1, seq_len, 1): decoder sees batch=1, length B*T,
    # step-s input = hidden[s % B].  Only B unique rows -> input projection is
    # computed ONCE as (B, H) @ (H, 4D); no tiled (B*T, 1, 4D) array.
    w_ih_d = dec_params["w_ih"]
    gx_dec_unique = (jnp.dot(hidden.astype(w_ih_d.dtype), w_ih_d,
                             preferred_element_type=jnp.float32)
                     + dec_params["b"]).astype(_gx_dtype(w_ih_d))      # (B, 4D)

    dec_hs = lstm_repeat_recurrence(gx_dec_unique, dec_params["w_hh"],
                                    B * T, t_block=t_block)            # (B*T,1,D)
    return jnp.transpose(dec_hs, (1, 0, 2))                            # (1,B*T,D)


# ---------------------------------------------------------------------------
# Pure-JAX reference (lax.scan) for the correctness check
# ---------------------------------------------------------------------------
def lstm_layer_ref(x_tbd, w_ih, w_hh, b):
    H = w_hh.shape[0]
    w_ih = w_ih.astype(jnp.float32)
    w_hh = w_hh.astype(jnp.float32)

    def step(carry, x_t):
        h, c = carry
        gates = x_t @ w_ih + h @ w_hh + b
        i = jax.nn.sigmoid(gates[:, 0 * H:1 * H])
        f = jax.nn.sigmoid(gates[:, 1 * H:2 * H])
        g = jnp.tanh(gates[:, 2 * H:3 * H])
        o = jax.nn.sigmoid(gates[:, 3 * H:4 * H])
        c = f * c + i * g
        h = o * jnp.tanh(c)
        return (h, c), h

    B = x_tbd.shape[1]
    h0 = jnp.zeros((B, H), jnp.float32)
    c0 = jnp.zeros((B, H), jnp.float32)
    _, hs = jax.lax.scan(step, (h0, c0), x_tbd.astype(jnp.float32))
    return hs


def lstm_autoencoder_ref(x, enc_params, dec_params):
    B, T, _ = x.shape
    enc_out = lstm_layer_ref(jnp.transpose(x, (1, 0, 2)),
                             enc_params["w_ih"], enc_params["w_hh"],
                             enc_params["b"])
    hidden = enc_out[-1]
    dec_in = jnp.tile(hidden, (T, 1))[:, None, :]
    dec_out = lstm_layer_ref(dec_in, dec_params["w_ih"], dec_params["w_hh"],
                             dec_params["b"])
    return jnp.transpose(dec_out, (1, 0, 2))


if __name__ == "__main__":
    # Small shapes consistent with the module (module uses 16000 / 1280).
    batch = 2
    seq_len = 8
    input_size = 16
    hidden_size = 32

    root = jax.random.PRNGKey(0)
    kx, kenc, kdec = jax.random.split(root, 3)
    x = jax.random.normal(kx, (batch, seq_len, input_size), jnp.float32)

    fwd = jax.jit(functools.partial(lstm_autoencoder_forward, t_block=32))

    # (1) f32 weights: tight numerical check of the recurrence kernels.
    enc32 = init_lstm_params(kenc, input_size, hidden_size, weight_dtype=jnp.float32)
    dec32 = init_lstm_params(kdec, hidden_size, input_size, weight_dtype=jnp.float32)
    out32 = jax.block_until_ready(fwd(x, enc32, dec32))
    assert out32.shape == (1, batch * seq_len, input_size), out32.shape
    ref32 = lstm_autoencoder_ref(x, enc32, dec32)
    err32 = float(jnp.max(jnp.abs(out32 - ref32)))
    assert jnp.allclose(out32, ref32, rtol=1e-4, atol=5e-4), err32

    # (2) bf16 weights (the default performance path): looser tolerance vs the
    # f32 lax.scan reference (bf16 rounding of x / h / gates_x).
    enc_bf = init_lstm_params(kenc, input_size, hidden_size)
    dec_bf = init_lstm_params(kdec, hidden_size, input_size)
    out_bf = jax.block_until_ready(fwd(x, enc_bf, dec_bf))
    assert out_bf.shape == (1, batch * seq_len, input_size), out_bf.shape
    ref_bf = lstm_autoencoder_ref(x, enc_bf, dec_bf)
    err_bf = float(jnp.max(jnp.abs(out_bf - ref_bf)))
    assert err_bf < 0.15, err_bf

    print("KERNEL_OK")
</pallas_src>

<mosaic_0001>
module attributes {stable_mosaic.version = 11 : i64} {
  func.func @_lstm_repeat_kernel(%arg0: i32, %arg1: memref<2x64xf32, #tpu.memory_space<vmem>>, %arg2: memref<16x64xf32, #tpu.memory_space<vmem>>, %arg3: memref<16x1x16xf32, #tpu.memory_space<vmem>>, %arg4: memref<1x16xf32, #tpu.memory_space<vmem>>, %arg5: memref<1x16xf32, #tpu.memory_space<vmem>>) attributes {dimension_semantics = [#tpu.dimension_semantics<arbitrary>], iteration_bounds = array<i64: 1>, scalar_prefetch = 0 : i64, scratch_operands = 2 : i64, tpu.core_type = #tpu.core_type<tc>, window_params = [{pipeline_mode = #tpu.pipeline_mode<synchronous>, transform_indices = @transform_0, window_bounds = array<i64: 2, 64>}, {pipeline_mode = #tpu.pipeline_mode<synchronous>, transform_indices = @transform_1, window_bounds = array<i64: 16, 64>}, {transform_indices = @transform_2, window_bounds = array<i64: 16, 1, 16>}]} {
    %c0_i32 = arith.constant 0 : i32
    %0 = arith.cmpi eq, %arg0, %c0_i32 : i32
    %1 = arith.extui %0 : i1 to i32
    %c0_i32_0 = arith.constant 0 : i32
    %2 = arith.cmpi ne, %1, %c0_i32_0 : i32
    scf.if %2 {
      %cst_390 = arith.constant 0.000000e+00 : f32
      %872 = vector.broadcast %cst_390 : f32 to vector<1x16xf32>
      %c0_391 = arith.constant 0 : index
      %c0_392 = arith.constant 0 : index
      %873 = vector.load %arg4[%c0_391, %c0_392] : memref<1x16xf32, #tpu.memory_space<vmem>>, vector<1x16xf32>
      tpu.vector_store %arg4[%c0_391, %c0_392], %872 {strides = array<i32>} : memref<1x16xf32, #tpu.memory_space<vmem>>, vector<1x16xf32>,
      %cst_393 = arith.constant 0.000000e+00 : f32
      %874 = vector.broadcast %cst_393 : f32 to vector<1x16xf32>
      %c0_394 = arith.constant 0 : index
      %c0_395 = arith.constant 0 : index
      %875 = vector.load %arg5[%c0_394, %c0_395] : memref<1x16xf32, #tpu.memory_space<vmem>>, vector<1x16xf32>
      tpu.vector_store %arg5[%c0_394, %c0_395], %874 {strides = array<i32>} : memref<1x16xf32, #tpu.memory_space<vmem>>, vector<1x16xf32>,
    } else {
    }
    %c16_i32 = arith.constant 16 : i32
    %3 = arith.muli %arg0, %c16_i32 : i32
    %c0 = arith.constant 0 : index
    %c0_1 = arith.constant 0 : index
    %4 = vector.load %arg4[%c0, %c0_1] : memref<1x16xf32, #tpu.memory_space<vmem>>, vector<1x16xf32>
    %c0_2 = arith.constant 0 : index
    %c0_3 = arith.constant 0 : index
    %5 = vector.load %arg5[%c0_2, %c0_3] : memref<1x16xf32, #tpu.memory_space<vmem>>, vector<1x16xf32>
    %c0_i32_4 = arith.constant 0 : i32
    %6 = arith.addi %3, %c0_i32_4 : i32
    %c2_i32 = arith.constant 2 : i32
    %c0_i32_5 = arith.constant 0 : i32
    %7 = arith.cmpi eq, %c2_i32, %c0_i32_5 : i32
    %c1_i32 = arith.constant 1 : i32
    %8 = arith.select %7, %c1_i32, %c2_i32 : i32
    %9 = arith.remsi %6, %8 : i32
    %c0_i32_6 = arith.constant 0 : i32
    %10 = arith.cmpi ne, %9, %c0_i32_6 : i32
    %c0_i32_7 = arith.constant 0 : i32
    %11 = arith.cmpi slt, %9, %c0_i32_7 : i32
    %c0_i32_8 = arith.constant 0 : i32
    %12 = arith.cmpi slt, %8, %c0_i32_8 : i32
    %13 = arith.xori %11, %12 : i1
    %14 = arith.andi %13, %10 : i1
    %15 = arith.addi %9, %8 : i32
    %16 = arith.select %14, %15, %9 : i32
    %17 = arith.index_cast %16 : i32 to index
    %c0_9 = arith.constant 0 : index
    %18 = vector.load %arg1[%17, %c0_9] : memref<2x64xf32, #tpu.memory_space<vmem>>, vector<1x64xf32>
    %19 = vector.extract_strided_slice %18 {offsets = [0, 0], sizes = [1, 16], strides = [1, 1]} : vector<1x64xf32> to vector<1x16xf32>
    %c0_10 = arith.constant 0 : index
    %c0_11 = arith.constant 0 : index
    %20 = vector.load %arg2[%c0_10, %c0_11] : memref<16x64xf32, #tpu.memory_space<vmem>>, vector<16x16xf32>
    %cst = arith.constant dense<0.000000e+00> : vector<1x16xf32>
    %21 = tpu.matmul %4, %20, %cst {dimension_numbers = #tpu.dot_dimension_numbers<[1], [0], [0], [1], [0, 0, 1, 1], [], []>} : vector<1x16xf32>, vector<16x16xf32>, vector<1x16xf32> -> vector<1x16xf32>
    %22 = arith.addf %19, %21 : vector<1x16xf32>
    %23 = arith.negf %22 : vector<1x16xf32>
    %24 = math.exp %23 : vector<1x16xf32>
    %cst_12 = arith.constant 1.000000e+00 : f32
    %25 = vector.broadcast %cst_12 : f32 to vector<1x16xf32>
    %26 = arith.addf %25, %24 : vector<1x16xf32>
    %27 = arith.divf %25, %26 : vector<1x16xf32>
    %28 = vector.extract_strided_slice %18 {offsets = [0, 16], sizes = [1, 16], strides = [1, 1]} : vector<1x64xf32> to vector<1x16xf32>
    %c0_13 = arith.constant 0 : index
    %c16 = arith.constant 16 : index
    %29 = vector.load %arg2[%c0_13, %c16] : memref<16x64xf32, #tpu.memory_space<vmem>>, vector<16x16xf32>
    %cst_14 = arith.constant dense<0.000000e+00> : vector<1x16xf32>
    %30 = tpu.matmul %4, %29, %cst_14 {dimension_numbers = #tpu.dot_dimension_numbers<[1], [0], [0], [1], [0, 0, 1, 1], [], []>} : vector<1x16xf32>, vector<16x16xf32>, vector<1x16xf32> -> vector<1x16xf32>
    %31 = arith.addf %28, %30 : vector<1x16xf32>
    %32 = arith.negf %31 : vector<1x16xf32>
    %33 = math.exp %32 : vector<1x16xf32>
    %cst_15 = arith.constant 1.000000e+00 : f32
    %34 = vector.broadcast %cst_15 : f32 to vector<1x16xf32>
    %35 = arith.addf %34, %33 : vector<1x16xf32>
    %36 = arith.divf %34, %35 : vector<1x16xf32>
    %37 = vector.extract_strided_slice %18 {offsets = [0, 32], sizes = [1, 16], strides = [1, 1]} : vector<1x64xf32> to vector<1x16xf32>
    %c0_16 = arith.constant 0 : index
    %c32 = arith.constant 32 : index
    %38 = vector.load %arg2[%c0_16, %c32] : memref<16x64xf32, #tpu.memory_space<vmem>>, vector<16x16xf32>
    %cst_17 = arith.constant dense<0.000000e+00> : vector<1x16xf32>
    %39 = tpu.matmul %4, %38, %cst_17 {dimension_numbers = #tpu.dot_dimension_numbers<[1], [0], [0], [1], [0, 0, 1, 1], [], []>} : vector<1x16xf32>, vector<16x16xf32>, vector<1x16xf32> -> vector<1x16xf32>
    %40 = arith.addf %37, %39 : vector<1x16xf32>
    %41 = math.tanh %40 : vector<1x16xf32>
    %42 = vector.extract_strided_slice %18 {offsets = [0, 48], sizes = [1, 16], strides = [1, 1]} : vector<1x64xf32> to vector<1x16xf32>
    %c0_18 = arith.constant 0 : index
    %c48 = arith.constant 48 : index
    %43 = vector.load %arg2[%c0_18, %c48] : memref<16x64xf32, #tpu.memory_space<vmem>>, vector<16x16xf32>
    %cst_19 = arith.constant dense<0.000000e+00> : vector<1x16xf32>
    %44 = tpu.matmul %4, %43, %cst_19 {dimension_numbers = #tpu.dot_dimension_numbers<[1], [0], [0], [1], [0, 0, 1, 1], [], []>} : vector<1x16xf32>, vector<16x16xf32>, vector<1x16xf32> -> vector<1x16xf32>
    %45 = arith.addf %42, %44 : vector<1x16xf32>
    %46 = arith.negf %45 : vector<1x16xf32>
    %47 = math.exp %46 : vector<1x16xf32>
    %cst_20 = arith.constant 1.000000e+00 : f32
    %48 = vector.broadcast %cst_20 : f32 to vector<1x16xf32>
    %49 = arith.addf %48, %47 : vector<1x16xf32>
    %50 = arith.divf %48, %49 : vector<1x16xf32>
    %51 = arith.mulf %36, %5 : vector<1x16xf32>
    %52 = arith.mulf %27, %41 : vector<1x16xf32>
    %53 = arith.addf %51, %52 : vector<1x16xf32>
    %54 = math.tanh %53 : vector<1x16xf32>
    %55 = arith.mulf %50, %54 : vector<1x16xf32>
    %56 = arith.index_cast %c0_i32_4 : i32 to index
    %c0_21 = arith.constant 0 : index
    %c0_22 = arith.constant 0 : index
    %57 = vector.load %arg3[%56, %c0_21, %c0_22] : memref<16x1x16xf32, #tpu.memory_space<vmem>>, vector<1x1x16xf32>
    %58 = vector.shape_cast %57 : vector<1x1x16xf32> to vector<1x16xf32>
    %59 = vector.shape_cast %55 : vector<1x16xf32> to vector<1x1x16xf32>
    tpu.vector_store %arg3[%56, %c0_21, %c0_22], %59 {strides = array<i32>} : memref<16x1x16xf32, #tpu.memory_space<vmem>>, vector<1x1x16xf32>,
    %c1_i32_23 = arith.constant 1 : i32
    %60 = arith.addi %3, %c1_i32_23 : i32
    %c2_i32_24 = arith.constant 2 : i32
    %c0_i32_25 = arith.constant 0 : i32
    %61 = arith.cmpi eq, %c2_i32_24, %c0_i32_25 : i32
    %c1_i32_26 = arith.constant 1 : i32
    %62 = arith.select %61, %c1_i32_26, %c2_i32_24 : i32
    %63 = arith.remsi %60, %62 : i32
    %c0_i32_27 = arith.constant 0 : i32
    %64 = arith.cmpi ne, %63, %c0_i32_27 : i32
    %c0_i32_28 = arith.constant 0 : i32
    %65 = arith.cmpi slt, %63, %c0_i32_28 : i32
    %c0_i32_29 = arith.constant 0 : i32
    %66 = arith.cmpi slt, %62, %c0_i32_29 : i32
    %67 = arith.xori %65, %66 : i1
    %68 = arith.andi %67, %64 : i1
    %69 = arith.addi %63, %62 : i32
    %70 = arith.select %68, %69, %63 : i32
    %71 = arith.index_cast %70 : i32 to index
    %c0_30 = arith.constant 0 : index
    %72 = vector.load %arg1[%71, %c0_30] : memref<2x64xf32, #tpu.memory_space<vmem>>, vector<1x64xf32>
    %73 = vector.extract_strided_slice %72 {offsets = [0, 0], sizes = [1, 16], strides = [1, 1]} : vector<1x64xf32> to vector<1x16xf32>
    %c0_31 = arith.constant 0 : index
    %c0_32 = arith.constant 0 : index
    %74 = vector.load %arg2[%c0_31, %c0_32] : memref<16x64xf32, #tpu.memory_space<vmem>>, vector<16x16xf32>
    %cst_33 = arith.constant dense<0.000000e+00> : vector<1x16xf32>
    %75 = tpu.matmul %55, %74, %cst_33 {dimension_numbers = #tpu.dot_dimension_numbers<[1], [0], [0], [1], [0, 0, 1, 1], [], []>} : vector<1x16xf32>, vector<16x16xf32>, vector<1x16xf32> -> vector<1x16xf32>
    %76 = arith.addf %73, %75 : vector<1x16xf32>
    %77 = arith.negf %76 : vector<1x16xf32>
    %78 = math.exp %77 : vector<1x16xf32>
    %cst_34 = arith.constant 1.000000e+00 : f32
    %79 = vector.broadcast %cst_34 : f32 to vector<1x16xf32>
    %80 = arith.addf %79, %78 : vector<1x16xf32>
    %81 = arith.divf %79, %80 : vector<1x16xf32>
    %82 = vector.extract_strided_slice %72 {offsets = [0, 16], sizes = [1, 16], strides = [1, 1]} : vector<1x64xf32> to vector<1x16xf32>
    %c0_35 = arith.constant 0 : index
    %c16_36 = arith.constant 16 : index
    %83 = vector.load %arg2[%c0_35, %c16_36] : memref<16x64xf32, #tpu.memory_space<vmem>>, vector<16x16xf32>
    %cst_37 = arith.constant dense<0.000000e+00> : vector<1x16xf32>
    %84 = tpu.matmul %55, %83, %cst_37 {dimension_numbers = #tpu.dot_dimension_numbers<[1], [0], [0], [1], [0, 0, 1, 1], [], []>} : vector<1x16xf32>, vector<16x16xf32>, vector<1x16xf32> -> vector<1x16xf32>
    %85 = arith.addf %82, %84 : vector<1x16xf32>
    %86 = arith.negf %85 : vector<1x16xf32>
    %87 = math.exp %86 : vector<1x16xf32>
    %cst_38 = arith.constant 1.000000e+00 : f32
    %88 = vector.broadcast %cst_38 : f32 to vector<1x16xf32>
    %89 = arith.addf %88, %87 : vector<1x16xf32>
    %90 = arith.divf %88, %89 : vector<1x16xf32>
    %91 = vector.extract_strided_slice %72 {offsets = [0, 32], sizes = [1, 16], strides = [1, 1]} : vector<1x64xf32> to vector<1x16xf32>
    %c0_39 = arith.constant 0 : index
    %c32_40 = arith.constant 32 : index
    %92 = vector.load %arg2[%c0_39, %c32_40] : memref<16x64xf32, #tpu.memory_space<vmem>>, vector<16x16xf32>
    %cst_41 = arith.constant dense<0.000000e+00> : vector<1x16xf32>
    %93 = tpu.matmul %55, %92, %cst_41 {dimension_numbers = #tpu.dot_dimension_numbers<[1], [0], [0], [1], [0, 0, 1, 1], [], []>} : vector<1x16xf32>, vector<16x16xf32>, vector<1x16xf32> -> vector<1x16xf32>
    %94 = arith.addf %91, %93 : vector<1x16xf32>
    %95 = math.tanh %94 : vector<1x16xf32>
    %96 = vector.extract_strided_slice %72 {offsets = [0, 48], sizes = [1, 16], strides = [1, 1]} : vector<1x64xf32> to vector<1x16xf32>
    %c0_42 = arith.constant 0 : index
    %c48_43 = arith.constant 48 : index
    %97 = vector.load %arg2[%c0_42, %c48_43] : memref<16x64xf32, #tpu.memory_space<vmem>>, vector<16x16xf32>
    %cst_44 = arith.constant dense<0.000000e+00> : vector<1x16xf32>
    %98 = tpu.matmul %55, %97, %cst_44 {dimension_numbers = #tpu.dot_dimension_numbers<[1], [0], [0], [1], [0, 0, 1, 1], [], []>} : vector<1x16xf32>, vector<16x16xf32>, vector<1x16xf32> -> vector<1x16xf32>
    %99 = arith.addf %96, %98 : vector<1x16xf32>
    %100 = arith.negf %99 : vector<1x16xf32>
    %101 = math.exp %100 : vector<1x16xf32>
    %cst_45 = arith.constant 1.000000e+00 : f32
    %102 = vector.broadcast %cst_45 : f32 to vector<1x16xf32>
    %103 = arith.addf %102, %101 : vector<1x16xf32>
    %104 = arith.divf %102, %103 : vector<1x16xf32>
    %105 = arith.mulf %90, %53 : vector<1x16xf32>
    %106 = arith.mulf %81, %95 : vector<1x16xf32>
    %107 = arith.addf %105, %106 : vector<1x16xf32>
    %108 = math.tanh %107 : vector<1x16xf32>
    %109 = arith.mulf %104, %108 : vector<1x16xf32>
    %110 = arith.index_cast %c1_i32_23 : i32 to index
    %c0_46 = arith.constant 0 : index
    %c0_47 = arith.constant 0 : index
    %111 = vector.load %arg3[%110, %c0_46, %c0_47] : memref<16x1x16xf32, #tpu.memory_space<vmem>>, vector<1x1x16xf32>
    %112 = vector.shape_cast %111 : vector<1x1x16xf32> to vector<1x16xf32>
    %113 = vector.shape_cast %109 : vector<1x16xf32> to vector<1x1x16xf32>
    tpu.vector_store %arg3[%110, %c0_46, %c0_47], %113 {strides = array<i32>} : memref<16x1x16xf32, #tpu.memory_space<vmem>>, vector<1x1x16xf32>,
    %c2_i32_48 = arith.constant 2 : i32
    %114 = arith.addi %3, %c2_i32_48 : i32
    %c2_i32_49 = arith.constant 2 : i32
    %c0_i32_50 = arith.constant 0 : i32
    %115 = arith.cmpi eq, %c2_i32_49, %c0_i32_50 : i32
    %c1_i32_51 = arith.constant 1 : i32
    %116 = arith.select %115, %c1_i32_51, %c2_i32_49 : i32
    %117 = arith.remsi %114, %116 : i32
    %c0_i32_52 = arith.constant 0 : i32
    %118 = arith.cmpi ne, %117, %c0_i32_52 : i32
    %c0_i32_53 = arith.constant 0 : i32
    %119 = arith.cmpi slt, %117, %c0_i32_53 : i32
    %c0_i32_54 = arith.constant 0 : i32
    %120 = arith.cmpi slt, %116, %c0_i32_54 : i32
    %121 = arith.xori %119, %120 : i1
    %122 = arith.andi %121, %118 : i1
    %123 = arith.addi %117, %116 : i32
    %124 = arith.select %122, %123, %117 : i32
    %125 = arith.index_cast %124 : i32 to index
    %c0_55 = arith.constant 0 : index
    %126 = vector.load %arg1[%125, %c0_55] : memref<2x64xf32, #tpu.memory_space<vmem>>, vector<1x64xf32>
    %127 = vector.extract_strided_slice %126 {offsets = [0, 0], sizes = [1, 16], strides = [1, 1]} : vector<1x64xf32> to vector<1x16xf32>
    %c0_56 = arith.constant 0 : index
    %c0_57 = arith.constant 0 : index
    %128 = vector.load %arg2[%c0_56, %c0_57] : memref<16x64xf32, #tpu.memory_space<vmem>>, vector<16x16xf32>
    %cst_58 = arith.constant dense<0.000000e+00> : vector<1x16xf32>
    %129 = tpu.matmul %109, %128, %cst_58 {dimension_numbers = #tpu.dot_dimension_numbers<[1], [0], [0], [1], [0, 0, 1, 1], [], []>} : vector<1x16xf32>, vector<16x16xf32>, vector<1x16xf32> -> vector<1x16xf32>
    %130 = arith.addf %127, %129 : vector<1x16xf32>
    %131 = arith.negf %130 : vector<1x16xf32>
    %132 = math.exp %131 : vector<1x16xf32>
    %cst_59 = arith.constant 1.000000e+00 : f32
    %133 = vector.broadcast %cst_59 : f32 to vector<1x16xf32>
    %134 = arith.addf %133, %132 : vector<1x16xf32>
    %135 = arith.divf %133, %134 : vector<1x16xf32>
    %136 = vector.extract_strided_slice %126 {offsets = [0, 16], sizes = [1, 16], strides = [1, 1]} : vector<1x64xf32> to vector<1x16xf32>
    %c0_60 = arith.constant 0 : index
    %c16_61 = arith.constant 16 : index
    %137 = vector.load %arg2[%c0_60, %c16_61] : memref<16x64xf32, #tpu.memory_space<vmem>>, vector<16x16xf32>
    %cst_62 = arith.constant dense<0.000000e+00> : vector<1x16xf32>
    %138 = tpu.matmul %109, %137, %cst_62 {dimension_numbers = #tpu.dot_dimension_numbers<[1], [0], [0], [1], [0, 0, 1, 1], [], []>} : vector<1x16xf32>, vector<16x16xf32>, vector<1x16xf32> -> vector<1x16xf32>
    %139 = arith.addf %136, %138 : vector<1x16xf32>
    %140 = arith.negf %139 : vector<1x16xf32>
    %141 = math.exp %140 : vector<1x16xf32>
    %cst_63 = arith.constant 1.000000e+00 : f32
    %142 = vector.broadcast %cst_63 : f32 to vector<1x16xf32>
    %143 = arith.addf %142, %141 : vector<1x16xf32>
    %144 = arith.divf %142, %143 : vector<1x16xf32>
    %145 = vector.extract_strided_slice %126 {offsets = [0, 32], sizes = [1, 16], strides = [1, 1]} : vector<1x64xf32> to vector<1x16xf32>
    %c0_64 = arith.constant 0 : index
    %c32_65 = arith.constant 32 : index
    %146 = vector.load %arg2[%c0_64, %c32_65] : memref<16x64xf32, #tpu.memory_space<vmem>>, vector<16x16xf32>
    %cst_66 = arith.constant dense<0.000000e+00> : vector<1x16xf32>
    %147 = tpu.matmul %109, %146, %cst_66 {dimension_numbers = #tpu.dot_dimension_numbers<[1], [0], [0], [1], [0, 0, 1, 1], [], []>} : vector<1x16xf32>, vector<16x16xf32>, vector<1x16xf32> -> vector<1x16xf32>
    %148 = arith.addf %145, %147 : vector<1x16xf32>
    %149 = math.tanh %148 : vector<1x16xf32>
    %150 = vector.extract_strided_slice %126 {offsets = [0, 48], sizes = [1, 16], strides = [1, 1]} : vector<1x64xf32> to vector<1x16xf32>
    %c0_67 = arith.constant 0 : index
    %c48_68 = arith.constant 48 : index
    %151 = vector.load %arg2[%c0_67, %c48_68] : memref<16x64xf32, #tpu.memory_space<vmem>>, vector<16x16xf32>
    %cst_69 = arith.constant dense<0.000000e+00> : vector<1x16xf32>
    %152 = tpu.matmul %109, %151, %cst_69 {dimension_numbers = #tpu.dot_dimension_numbers<[1], [0], [0], [1], [0, 0, 1, 1], [], []>} : vector<1x16xf32>, vector<16x16xf32>, vector<1x16xf32> -> vector<1x16xf32>
    %153 = arith.addf %150, %152 : vector<1x16xf32>
    %154 = arith.negf %153 : vector<1x16xf32>
    %155 = math.exp %154 : vector<1x16xf32>
    %cst_70 = arith.constant 1.000000e+00 : f32
    %156 = vector.broadcast %cst_70 : f32 to vector<1x16xf32>
    %157 = arith.addf %156, %155 : vector<1x16xf32>
    %158 = arith.divf %156, %157 : vector<1x16xf32>
    %159 = arith.mulf %144, %107 : vector<1x16xf32>
    %160 = arith.mulf %135, %149 : vector<1x16xf32>
    %161 = arith.addf %159, %160 : vector<1x16xf32>
    %162 = math.tanh %161 : vector<1x16xf32>
    %163 = arith.mulf %158, %162 : vector<1x16xf32>
    %164 = arith.index_cast %c2_i32_48 : i32 to index
    %c0_71 = arith.constant 0 : index
    %c0_72 = arith.constant 0 : index
    %165 = vector.load %arg3[%164, %c0_71, %c0_72] : memref<16x1x16xf32, #tpu.memory_space<vmem>>, vector<1x1x16xf32>
    %166 = vector.shape_cast %165 : vector<1x1x16xf32> to vector<1x16xf32>
    %167 = vector.shape_cast %163 : vector<1x16xf32> to vector<1x1x16xf32>
    tpu.vector_store %arg3[%164, %c0_71, %c0_72], %167 {strides = array<i32>} : memref<16x1x16xf32, #tpu.memory_space<vmem>>, vector<1x1x16xf32>,
    %c3_i32 = arith.constant 3 : i32
    %168 = arith.addi %3, %c3_i32 : i32
    %c2_i32_73 = arith.constant 2 : i32
    %c0_i32_74 = arith.constant 0 : i32
    %169 = arith.cmpi eq, %c2_i32_73, %c0_i32_74 : i32
    %c1_i32_75 = arith.constant 1 : i32
    %170 = arith.select %169, %c1_i32_75, %c2_i32_73 : i32
    %171 = arith.remsi %168, %170 : i32
    %c0_i32_76 = arith.constant 0 : i32
    %172 = arith.cmpi ne, %171, %c0_i32_76 : i32
    %c0_i32_77 = arith.constant 0 : i32
    %173 = arith.cmpi slt, %171, %c0_i32_77 : i32
    %c0_i32_78 = arith.constant 0 : i32
    %174 = arith.cmpi slt, %170, %c0_i32_78 : i32
    %175 = arith.xori %173, %174 : i1
    %176 = arith.andi %175, %172 : i1
    %177 = arith.addi %171, %170 : i32
    %178 = arith.select %176, %177, %171 : i32
    %179 = arith.index_cast %178 : i32 to index
    %c0_79 = arith.constant 0 : index
    %180 = vector.load %arg1[%179, %c0_79] : memref<2x64xf32, #tpu.memory_space<vmem>>, vector<1x64xf32>
    %181 = vector.extract_strided_slice %180 {offsets = [0, 0], sizes = [1, 16], strides = [1, 1]} : vector<1x64xf32> to vector<1x16xf32>
    %c0_80 = arith.constant 0 : index
    %c0_81 = arith.constant 0 : index
    %182 = vector.load %arg2[%c0_80, %c0_81] : memref<16x64xf32, #tpu.memory_space<vmem>>, vector<16x16xf32>
    %cst_82 = arith.constant dense<0.000000e+00> : vector<1x16xf32>
    %183 = tpu.matmul %163, %182, %cst_82 {dimension_numbers = #tpu.dot_dimension_numbers<[1], [0], [0], [1], [0, 0, 1, 1], [], []>} : vector<1x16xf32>, vector<16x16xf32>, vector<1x16xf32> -> vector<1x16xf32>
    %184 = arith.addf %181, %183 : vector<1x16xf32>
    %185 = arith.negf %184 : vector<1x16xf32>
    %186 = math.exp %185 : vector<1x16xf32>
    %cst_83 = arith.constant 1.000000e+00 : f32
    %187 = vector.broadcast %cst_83 : f32 to vector<1x16xf32>
    %188 = arith.addf %187, %186 : vector<1x16xf32>
    %189 = arith.divf %187, %188 : vector<1x16xf32>
    %190 = vector.extract_strided_slice %180 {offsets = [0, 16], sizes = [1, 16], strides = [1, 1]} : vector<1x64xf32> to vector<1x16xf32>
    %c0_84 = arith.constant 0 : index
    %c16_85 = arith.constant 16 : index
    %191 = vector.load %arg2[%c0_84, %c16_85] : memref<16x64xf32, #tpu.memory_space<vmem>>, vector<16x16xf32>
    %cst_86 = arith.constant dense<0.000000e+00> : vector<1x16xf32>
    %192 = tpu.matmul %163, %191, %cst_86 {dimension_numbers = #tpu.dot_dimension_numbers<[1], [0], [0], [1], [0, 0, 1, 1], [], []>} : vector<1x16xf32>, vector<16x16xf32>, vector<1x16xf32> -> vector<1x16xf32>
    %193 = arith.addf %190, %192 : vector<1x16xf32>
    %194 = arith.negf %193 : vector<1x16xf32>
    %195 = math.exp %194 : vector<1x16xf32>
    %cst_87 = arith.constant 1.000000e+00 : f32
    %196 = vector.broadcast %cst_87 : f32 to vector<1x16xf32>
    %197 = arith.addf %196, %195 : vector<1x16xf32>
    %198 = arith.divf %196, %197 : vector<1x16xf32>
    %199 = vector.extract_strided_slice %180 {offsets = [0, 32], sizes = [1, 16], strides = [1, 1]} : vector<1x64xf32> to vector<1x16xf32>
    %c0_88 = arith.constant 0 : index
    %c32_89 = arith.constant 32 : index
    %200 = vector.load %arg2[%c0_88, %c32_89] : memref<16x64xf32, #tpu.memory_space<vmem>>, vector<16x16xf32>
    %cst_90 = arith.constant dense<0.000000e+00> : vector<1x16xf32>
    %201 = tpu.matmul %163, %200, %cst_90 {dimension_numbers = #tpu.dot_dimension_numbers<[1], [0], [0], [1], [0, 0, 1, 1], [], []>} : vector<1x16xf32>, vector<16x16xf32>, vector<1x16xf32> -> vector<1x16xf32>
    %202 = arith.addf %199, %201 : vector<1x16xf32>
    %203 = math.tanh %202 : vector<1x16xf32>
    %204 = vector.extract_strided_slice %180 {offsets = [0, 48], sizes = [1, 16], strides = [1, 1]} : vector<1x64xf32> to vector<1x16xf32>
    %c0_91 = arith.constant 0 : index
    %c48_92 = arith.constant 48 : index
    %205 = vector.load %arg2[%c0_91, %c48_92] : memref<16x64xf32, #tpu.memory_space<vmem>>, vector<16x16xf32>
    %cst_93 = arith.constant dense<0.000000e+00> : vector<1x16xf32>
    %206 = tpu.matmul %163, %205, %cst_93 {dimension_numbers = #tpu.dot_dimension_numbers<[1], [0], [0], [1], [0, 0, 1, 1], [], []>} : vector<1x16xf32>, vector<16x16xf32>, vector<1x16xf32> -> vector<1x16xf32>
    %207 = arith.addf %204, %206 : vector<1x16xf32>
    %208 = arith.negf %207 : vector<1x16xf32>
    %209 = math.exp %208 : vector<1x16xf32>
    %cst_94 = arith.constant 1.000000e+00 : f32
    %210 = vector.broadcast %cst_94 : f32 to vector<1x16xf32>
    %211 = arith.addf %210, %209 : vector<1x16xf32>
    %212 = arith.divf %210, %211 : vector<1x16xf32>
    %213 = arith.mulf %198, %161 : vector<1x16xf32>
    %214 = arith.mulf %189, %203 : vector<1x16xf32>
    %215 = arith.addf %213, %214 : vector<1x16xf32>
    %216 = math.tanh %215 : vector<1x16xf32>
    %217 = arith.mulf %212, %216 : vector<1x16xf32>
    %218 = arith.index_cast %c3_i32 : i32 to index
    %c0_95 = arith.constant 0 : index
    %c0_96 = arith.constant 0 : index
    %219 = vector.load %arg3[%218, %c0_95, %c0_96] : memref<16x1x16xf32, #tpu.memory_space<vmem>>, vector<1x1x16xf32>
    %220 = vector.shape_cast %219 : vector<1x1x16xf32> to vector<1x16xf32>
    %221 = vector.shape_cast %217 : vector<1x16xf32> to vector<1x1x16xf32>
    tpu.vector_store %arg3[%218, %c0_95, %c0_96], %221 {strides = array<i32>} : memref<16x1x16xf32, #tpu.memory_space<vmem>>, vector<1x1x16xf32>,
    %c4_i32 = arith.constant 4 : i32
    %222 = arith.addi %3, %c4_i32 : i32
    %c2_i32_97 = arith.constant 2 : i32
    %c0_i32_98 = arith.constant 0 : i32
    %223 = arith.cmpi eq, %c2_i32_97, %c0_i32_98 : i32
    %c1_i32_99 = arith.constant 1 : i32
    %224 = arith.select %223, %c1_i32_99, %c2_i32_97 : i32
    %225 = arith.remsi %222, %224 : i32
    %c0_i32_100 = arith.constant 0 : i32
    %226 = arith.cmpi ne, %225, %c0_i32_100 : i32
    %c0_i32_101 = arith.constant 0 : i32
    %227 = arith.cmpi slt, %225, %c0_i32_101 : i32
    %c0_i32_102 = arith.constant 0 : i32
    %228 = arith.cmpi slt, %224, %c0_i32_102 : i32
    %229 = arith.xori %227, %228 : i1
    %230 = arith.andi %229, %226 : i1
    %231 = arith.addi %225, %224 : i32
    %232 = arith.select %230, %231, %225 : i32
    %233 = arith.index_cast %232 : i32 to index
    %c0_103 = arith.constant 0 : index
    %234 = vector.load %arg1[%233, %c0_103] : memref<2x64xf32, #tpu.memory_space<vmem>>, vector<1x64xf32>
    %235 = vector.extract_strided_slice %234 {offsets = [0, 0], sizes = [1, 16], strides = [1, 1]} : vector<1x64xf32> to vector<1x16xf32>
    %c0_104 = arith.constant 0 : index
    %c0_105 = arith.constant 0 : index
    %236 = vector.load %arg2[%c0_104, %c0_105] : memref<16x64xf32, #tpu.memory_space<vmem>>, vector<16x16xf32>
    %cst_106 = arith.constant dense<0.000000e+00> : vector<1x16xf32>
    %237 = tpu.matmul %217, %236, %cst_106 {dimension_numbers = #tpu.dot_dimension_numbers<[1], [0], [0], [1], [0, 0, 1, 1], [], []>} : vector<1x16xf32>, vector<16x16xf32>, vector<1x16xf32> -> vector<1x16xf32>
    %238 = arith.addf %235, %237 : vector<1x16xf32>
    %239 = arith.negf %238 : vector<1x16xf32>
    %240 = math.exp %239 : vector<1x16xf32>
    %cst_107 = arith.constant 1.000000e+00 : f32
    %241 = vector.broadcast %cst_107 : f32 to vector<1x16xf32>
    %242 = arith.addf %241, %240 : vector<1x16xf32>
    %243 = arith.divf %241, %242 : vector<1x16xf32>
    %244 = vector.extract_strided_slice %234 {offsets = [0, 16], sizes = [1, 16], strides = [1, 1]} : vector<1x64xf32> to vector<1x16xf32>
    %c0_108 = arith.constant 0 : index
    %c16_109 = arith.constant 16 : index
    %245 = vector.load %arg2[%c0_108, %c16_109] : memref<16x64xf32, #tpu.memory_space<vmem>>, vector<16x16xf32>
    %cst_110 = arith.constant dense<0.000000e+00> : vector<1x16xf32>
    %246 = tpu.matmul %217, %245, %cst_110 {dimension_numbers = #tpu.dot_dimension_numbers<[1], [0], [0], [1], [0, 0, 1, 1], [], []>} : vector<1x16xf32>, vector<16x16xf32>, vector<1x16xf32> -> vector<1x16xf32>
    %247 = arith.addf %244, %246 : vector<1x16xf32>
    %248 = arith.negf %247 : vector<1x16xf32>
    %249 = math.exp %248 : vector<1x16xf32>
    %cst_111 = arith.constant 1.000000e+00 : f32
    %250 = vector.broadcast %cst_111 : f32 to vector<1x16xf32>
    %251 = arith.addf %250, %249 : vector<1x16xf32>
    %252 = arith.divf %250, %251 : vector<1x16xf32>
    %253 = vector.extract_strided_slice %234 {offsets = [0, 32], sizes = [1, 16], strides = [1, 1]} : vector<1x64xf32> to vector<1x16xf32>
    %c0_112 = arith.constant 0 : index
    %c32_113 = arith.constant 32 : index
    %254 = vector.load %arg2[%c0_112, %c32_113] : memref<16x64xf32, #tpu.memory_space<vmem>>, vector<16x16xf32>
    %cst_114 = arith.constant dense<0.000000e+00> : vector<1x16xf32>
    %255 = tpu.matmul %217, %254, %cst_114 {dimension_numbers = #tpu.dot_dimension_numbers<[1], [0], [0], [1], [0, 0, 1, 1], [], []>} : vector<1x16xf32>, vector<16x16xf32>, vector<1x16xf32> -> vector<1x16xf32>
    %256 = arith.addf %253, %255 : vector<1x16xf32>
    %257 = math.tanh %256 : vector<1x16xf32>
    %258 = vector.extract_strided_slice %234 {offsets = [0, 48], sizes = [1, 16], strides = [1, 1]} : vector<1x64xf32> to vector<1x16xf32>
    %c0_115 = arith.constant 0 : index
    %c48_116 = arith.constant 48 : index
    %259 = vector.load %arg2[%c0_115, %c48_116] : memref<16x64xf32, #tpu.memory_space<vmem>>, vector<16x16xf32>
    %cst_117 = arith.constant dense<0.000000e+00> : vector<1x16xf32>
    %260 = tpu.matmul %217, %259, %cst_117 {dimension_numbers = #tpu.dot_dimension_numbers<[1], [0], [0], [1], [0, 0, 1, 1], [], []>} : vector<1x16xf32>, vector<16x16xf32>, vector<1x16xf32> -> vector<1x16xf32>
    %261 = arith.addf %258, %260 : vector<1x16xf32>
    %262 = arith.negf %261 : vector<1x16xf32>
    %263 = math.exp %262 : vector<1x16xf32>
    %cst_118 = arith.constant 1.000000e+00 : f32
    %264 = vector.broadcast %cst_118 : f32 to vector<1x16xf32>
    %265 = arith.addf %264, %263 : vector<1x16xf32>
    %266 = arith.divf %264, %265 : vector<1x16xf32>
    %267 = arith.mulf %252, %215 : vector<1x16xf32>
    %268 = arith.mulf %243, %257 : vector<1x16xf32>
    %269 = arith.addf %267, %268 : vector<1x16xf32>
    %270 = math.tanh %269 : vector<1x16xf32>
    %271 = arith.mulf %266, %270 : vector<1x16xf32>
    %272 = arith.index_cast %c4_i32 : i32 to index
    %c0_119 = arith.constant 0 : index
    %c0_120 = arith.constant 0 : index
    %273 = vector.load %arg3[%272, %c0_119, %c0_120] : memref<16x1x16xf32, #tpu.memory_space<vmem>>, vector<1x1x16xf32>
    %274 = vector.shape_cast %273 : vector<1x1x16xf32> to vector<1x16xf32>
    %275 = vector.shape_cast %271 : vector<1x16xf32> to vector<1x1x16xf32>
    tpu.vector_store %arg3[%272, %c0_119, %c0_120], %275 {strides = array<i32>} : memref<16x1x16xf32, #tpu.memory_space<vmem>>, vector<1x1x16xf32>,
    %c5_i32 = arith.constant 5 : i32
    %276 = arith.addi %3, %c5_i32 : i32
    %c2_i32_121 = arith.constant 2 : i32
    %c0_i32_122 = arith.constant 0 : i32
    %277 = arith.cmpi eq, %c2_i32_121, %c0_i32_122 : i32
    %c1_i32_123 = arith.constant 1 : i32
    %278 = arith.select %277, %c1_i32_123, %c2_i32_121 : i32
    %279 = arith.remsi %276, %278 : i32
    %c0_i32_124 = arith.constant 0 : i32
    %280 = arith.cmpi ne, %279, %c0_i32_124 : i32
    %c0_i32_125 = arith.constant 0 : i32
    %281 = arith.cmpi slt, %279, %c0_i32_125 : i32
    %c0_i32_126 = arith.constant 0 : i32
    %282 = arith.cmpi slt, %278, %c0_i32_126 : i32
    %283 = arith.xori %281, %282 : i1
    %284 = arith.andi %283, %280 : i1
    %285 = arith.addi %279, %278 : i32
    %286 = arith.select %284, %285, %279 : i32
    %287 = arith.index_cast %286 : i32 to index
    %c0_127 = arith.constant 0 : index
    %288 = vector.load %arg1[%287, %c0_127] : memref<2x64xf32, #tpu.memory_space<vmem>>, vector<1x64xf32>
    %289 = vector.extract_strided_slice %288 {offsets = [0, 0], sizes = [1, 16], strides = [1, 1]} : vector<1x64xf32> to vector<1x16xf32>
    %c0_128 = arith.constant 0 : index
    %c0_129 = arith.constant 0 : index
    %290 = vector.load %arg2[%c0_128, %c0_129] : memref<16x64xf32, #tpu.memory_space<vmem>>, vector<16x16xf32>
    %cst_130 = arith.constant dense<0.000000e+00> : vector<1x16xf32>
    %291 = tpu.matmul %271, %290, %cst_130 {dimension_numbers = #tpu.dot_dimension_numbers<[1], [0], [0], [1], [0, 0, 1, 1], [], []>} : vector<1x16xf32>, vector<16x16xf32>, vector<1x16xf32> -> vector<1x16xf32>
    %292 = arith.addf %289, %291 : vector<1x16xf32>
    %293 = arith.negf %292 : vector<1x16xf32>
    %294 = math.exp %293 : vector<1x16xf32>
    %cst_131 = arith.constant 1.000000e+00 : f32
    %295 = vector.broadcast %cst_131 : f32 to vector<1x16xf32>
    %296 = arith.addf %295, %294 : vector<1x16xf32>
    %297 = arith.divf %295, %296 : vector<1x16xf32>
    %298 = vector.extract_strided_slice %288 {offsets = [0, 16], sizes = [1, 16], strides = [1, 1]} : vector<1x64xf32> to vector<1x16xf32>
    %c0_132 = arith.constant 0 : index
    %c16_133 = arith.constant 16 : index
    %299 = vector.load %arg2[%c0_132, %c16_133] : memref<16x64xf32, #tpu.memory_space<vmem>>, vector<16x16xf32>
    %cst_134 = arith.constant dense<0.000000e+00> : vector<1x16xf32>
    %300 = tpu.matmul %271, %299, %cst_134 {dimension_numbers = #tpu.dot_dimension_numbers<[1], [0], [0], [1], [0, 0, 1, 1], [], []>} : vector<1x16xf32>, vector<16x16xf32>, vector<1x16xf32> -> vector<1x16xf32>
    %301 = arith.addf %298, %300 : vector<1x16xf32>
    %302 = arith.negf %301 : vector<1x16xf32>
    %303 = math.exp %302 : vector<1x16xf32>
    %cst_135 = arith.constant 1.000000e+00 : f32
    %304 = vector.broadcast %cst_135 : f32 to vector<1x16xf32>
    %305 = arith.addf %304, %303 : vector<1x16xf32>
    %306 = arith.divf %304, %305 : vector<1x16xf32>
    %307 = vector.extract_strided_slice %288 {offsets = [0, 32], sizes = [1, 16], strides = [1, 1]} : vector<1x64xf32> to vector<1x16xf32>
    %c0_136 = arith.constant 0 : index
    %c32_137 = arith.constant 32 : index
    %308 = vector.load %arg2[%c0_136, %c32_137] : memref<16x64xf32, #tpu.memory_space<vmem>>, vector<16x16xf32>
    %cst_138 = arith.constant dense<0.000000e+00> : vector<1x16xf32>
    %309 = tpu.matmul %271, %308, %cst_138 {dimension_numbers = #tpu.dot_dimension_numbers<[1], [0], [0], [1], [0, 0, 1, 1], [], []>} : vector<1x16xf32>, vector<16x16xf32>, vector<1x16xf32> -> vector<1x16xf32>
    %310 = arith.addf %307, %309 : vector<1x16xf32>
    %311 = math.tanh %310 : vector<1x16xf32>
    %312 = vector.extract_strided_slice %288 {offsets = [0, 48], sizes = [1, 16], strides = [1, 1]} : vector<1x64xf32> to vector<1x16xf32>
    %c0_139 = arith.constant 0 : index
    %c48_140 = arith.constant 48 : index
    %313 = vector.load %arg2[%c0_139, %c48_140] : memref<16x64xf32, #tpu.memory_space<vmem>>, vector<16x16xf32>
    %cst_141 = arith.constant dense<0.000000e+00> : vector<1x16xf32>
    %314 = tpu.matmul %271, %313, %cst_141 {dimension_numbers = #tpu.dot_dimension_numbers<[1], [0], [0], [1], [0, 0, 1, 1], [], []>} : vector<1x16xf32>, vector<16x16xf32>, vector<1x16xf32> -> vector<1x16xf32>
    %315 = arith.addf %312, %314 : vector<1x16xf32>
    %316 = arith.negf %315 : vector<1x16xf32>
    %317 = math.exp %316 : vector<1x16xf32>
    %cst_142 = arith.constant 1.000000e+00 : f32
    %318 = vector.broadcast %cst_142 : f32 to vector<1x16xf32>
    %319 = arith.addf %318, %317 : vector<1x16xf32>
    %320 = arith.divf %318, %319 : vector<1x16xf32>
    %321 = arith.mulf %306, %269 : vector<1x16xf32>
    %322 = arith.mulf %297, %311 : vector<1x16xf32>
    %323 = arith.addf %321, %322 : vector<1x16xf32>
    %324 = math.tanh %323 : vector<1x16xf32>
    %325 = arith.mulf %320, %324 : vector<1x16xf32>
    %326 = arith.index_cast %c5_i32 : i32 to index
    %c0_143 = arith.constant 0 : index
    %c0_144 = arith.constant 0 : index
    %327 = vector.load %arg3[%326, %c0_143, %c0_144] : memref<16x1x16xf32, #tpu.memory_space<vmem>>, vector<1x1x16xf32>
    %328 = vector.shape_cast %327 : vector<1x1x16xf32> to vector<1x16xf32>
    %329 = vector.shape_cast %325 : vector<1x16xf32> to vector<1x1x16xf32>
    tpu.vector_store %arg3[%326, %c0_143, %c0_144], %329 {strides = array<i32>} : memref<16x1x16xf32, #tpu.memory_space<vmem>>, vector<1x1x16xf32>,
    %c6_i32 = arith.constant 6 : i32
    %330 = arith.addi %3, %c6_i32 : i32
    %c2_i32_145 = arith.constant 2 : i32
    %c0_i32_146 = arith.constant 0 : i32
    %331 = arith.cmpi eq, %c2_i32_145, %c0_i32_146 : i32
    %c1_i32_147 = arith.constant 1 : i32
    %332 = arith.select %331, %c1_i32_147, %c2_i32_145 : i32
    %333 = arith.remsi %330, %332 : i32
    %c0_i32_148 = arith.constant 0 : i32
    %334 = arith.cmpi ne, %333, %c0_i32_148 : i32
    %c0_i32_149 = arith.constant 0 : i32
    %335 = arith.cmpi slt, %333, %c0_i32_149 : i32
    %c0_i32_150 = arith.constant 0 : i32
    %336 = arith.cmpi slt, %332, %c0_i32_150 : i32
    %337 = arith.xori %335, %336 : i1
    %338 = arith.andi %337, %334 : i1
    %339 = arith.addi %333, %332 : i32
    %340 = arith.select %338, %339, %333 : i32
    %341 = arith.index_cast %340 : i32 to index
    %c0_151 = arith.constant 0 : index
    %342 = vector.load %arg1[%341, %c0_151] : memref<2x64xf32, #tpu.memory_space<vmem>>, vector<1x64xf32>
    %343 = vector.extract_strided_slice %342 {offsets = [0, 0], sizes = [1, 16], strides = [1, 1]} : vector<1x64xf32> to vector<1x16xf32>
    %c0_152 = arith.constant 0 : index
    %c0_153 = arith.constant 0 : index
    %344 = vector.load %arg2[%c0_152, %c0_153] : memref<16x64xf32, #tpu.memory_space<vmem>>, vector<16x16xf32>
    %cst_154 = arith.constant dense<0.000000e+00> : vector<1x16xf32>
    %345 = tpu.matmul %325, %344, %cst_154 {dimension_numbers = #tpu.dot_dimension_numbers<[1], [0], [0], [1], [0, 0, 1, 1], [], []>} : vector<1x16xf32>, vector<16x16xf32>, vector<1x16xf32> -> vector<1x16xf32>
    %346 = arith.addf %343, %345 : vector<1x16xf32>
    %347 = arith.negf %346 : vector<1x16xf32>
    %348 = math.exp %347 : vector<1x16xf32>
    %cst_155 = arith.constant 1.000000e+00 : f32
    %349 = vector.broadcast %cst_155 : f32 to vector<1x16xf32>
    %350 = arith.addf %349, %348 : vector<1x16xf32>
    %351 = arith.divf %349, %350 : vector<1x16xf32>
    %352 = vector.extract_strided_slice %342 {offsets = [0, 16], sizes = [1, 16], strides = [1, 1]} : vector<1x64xf32> to vector<1x16xf32>
    %c0_156 = arith.constant 0 : index
    %c16_157 = arith.constant 16 : index
    %353 = vector.load %arg2[%c0_156, %c16_157] : memref<16x64xf32, #tpu.memory_space<vmem>>, vector<16x16xf32>
    %cst_158 = arith.constant dense<0.000000e+00> : vector<1x16xf32>
    %354 = tpu.matmul %325, %353, %cst_158 {dimension_numbers = #tpu.dot_dimension_numbers<[1], [0], [0], [1], [0, 0, 1, 1], [], []>} : vector<1x16xf32>, vector<16x16xf32>, vector<1x16xf32> -> vector<1x16xf32>
    %355 = arith.addf %352, %354 : vector<1x16xf32>
    %356 = arith.negf %355 : vector<1x16xf32>
    %357 = math.exp %356 : vector<1x16xf32>
    %cst_159 = arith.constant 1.000000e+00 : f32
    %358 = vector.broadcast %cst_159 : f32 to vector<1x16xf32>
    %359 = arith.addf %358, %357 : vector<1x16xf32>
    %360 = arith.divf %358, %359 : vector<1x16xf32>
    %361 = vector.extract_strided_slice %342 {offsets = [0, 32], sizes = [1, 16], strides = [1, 1]} : vector<1x64xf32> to vector<1x16xf32>
    %c0_160 = arith.constant 0 : index
    %c32_161 = arith.constant 32 : index
    %362 = vector.load %arg2[%c0_160, %c32_161] : memref<16x64xf32, #tpu.memory_space<vmem>>, vector<16x16xf32>
    %cst_162 = arith.constant dense<0.000000e+00> : vector<1x16xf32>
    %363 = tpu.matmul %325, %362, %cst_162 {dimension_numbers = #tpu.dot_dimension_numbers<[1], [0], [0], [1], [0, 0, 1, 1], [], []>} : vector<1x16xf32>, vector<16x16xf32>, vector<1x16xf32> -> vector<1x16xf32>
    %364 = arith.addf %361, %363 : vector<1x16xf32>
    %365 = math.tanh %364 : vector<1x16xf32>
    %366 = vector.extract_strided_slice %342 {offsets = [0, 48], sizes = [1, 16], strides = [1, 1]} : vector<1x64xf32> to vector<1x16xf32>
    %c0_163 = arith.constant 0 : index
    %c48_164 = arith.constant 48 : index
    %367 = vector.load %arg2[%c0_163, %c48_164] : memref<16x64xf32, #tpu.memory_space<vmem>>, vector<16x16xf32>
    %cst_165 = arith.constant dense<0.000000e+00> : vector<1x16xf32>
    %368 = tpu.matmul %325, %367, %cst_165 {dimension_numbers = #tpu.dot_dimension_numbers<[1], [0], [0], [1], [0, 0, 1, 1], [], []>} : vector<1x16xf32>, vector<16x16xf32>, vector<1x16xf32> -> vector<1x16xf32>
    %369 = arith.addf %366, %368 : vector<1x16xf32>
    %370 = arith.negf %369 : vector<1x16xf32>
    %371 = math.exp %370 : vector<1x16xf32>
    %cst_166 = arith.constant 1.000000e+00 : f32
    %372 = vector.broadcast %cst_166 : f32 to vector<1x16xf32>
    %373 = arith.addf %372, %371 : vector<1x16xf32>
    %374 = arith.divf %372, %373 : vector<1x16xf32>
    %375 = arith.mulf %360, %323 : vector<1x16xf32>
    %376 = arith.mulf %351, %365 : vector<1x16xf32>
    %377 = arith.addf %375, %376 : vector<1x16xf32>
    %378 = math.tanh %377 : vector<1x16xf32>
    %379 = arith.mulf %374, %378 : vector<1x16xf32>
    %380 = arith.index_cast %c6_i32 : i32 to index
    %c0_167 = arith.constant 0 : index
    %c0_168 = arith.constant 0 : index
    %381 = vector.load %arg3[%380, %c0_167, %c0_168] : memref<16x1x16xf32, #tpu.memory_space<vmem>>, vector<1x1x16xf32>
    %382 = vector.shape_cast %381 : vector<1x1x16xf32> to vector<1x16xf32>
    %383 = vector.shape_cast %379 : vector<1x16xf32> to vector<1x1x16xf32>
    tpu.vector_store %arg3[%380, %c0_167, %c0_168], %383 {strides = array<i32>} : memref<16x1x16xf32, #tpu.memory_space<vmem>>, vector<1x1x16xf32>,
    %c7_i32 = arith.constant 7 : i32
    %384 = arith.addi %3, %c7_i32 : i32
    %c2_i32_169 = arith.constant 2 : i32
    %c0_i32_170 = arith.constant 0 : i32
    %385 = arith.cmpi eq, %c2_i32_169, %c0_i32_170 : i32
    %c1_i32_171 = arith.constant 1 : i32
    %386 = arith.select %385, %c1_i32_171, %c2_i32_169 : i32
    %387 = arith.remsi %384, %386 : i32
    %c0_i32_172 = arith.constant 0 : i32
    %388 = arith.cmpi ne, %387, %c0_i32_172 : i32
    %c0_i32_173 = arith.constant 0 : i32
    %389 = arith.cmpi slt, %387, %c0_i32_173 : i32
    %c0_i32_174 = arith.constant 0 : i32
    %390 = arith.cmpi slt, %386, %c0_i32_174 : i32
    %391 = arith.xori %389, %390 : i1
    %392 = arith.andi %391, %388 : i1
    %393 = arith.addi %387, %386 : i32
    %394 = arith.select %392, %393, %387 : i32
    %395 = arith.index_cast %394 : i32 to index
    %c0_175 = arith.constant 0 : index
    %396 = vector.load %arg1[%395, %c0_175] : memref<2x64xf32, #tpu.memory_space<vmem>>, vector<1x64xf32>
    %397 = vector.extract_strided_slice %396 {offsets = [0, 0], sizes = [1, 16], strides = [1, 1]} : vector<1x64xf32> to vector<1x16xf32>
    %c0_176 = arith.constant 0 : index
    %c0_177 = arith.constant 0 : index
    %398 = vector.load %arg2[%c0_176, %c0_177] : memref<16x64xf32, #tpu.memory_space<vmem>>, vector<16x16xf32>
    %cst_178 = arith.constant dense<0.000000e+00> : vector<1x16xf32>
    %399 = tpu.matmul %379, %398, %cst_178 {dimension_numbers = #tpu.dot_dimension_numbers<[1], [0], [0], [1], [0, 0, 1, 1], [], []>} : vector<1x16xf32>, vector<16x16xf32>, vector<1x16xf32> -> vector<1x16xf32>
    %400 = arith.addf %397, %399 : vector<1x16xf32>
    %401 = arith.negf %400 : vector<1x16xf32>
    %402 = math.exp %401 : vector<1x16xf32>
    %cst_179 = arith.constant 1.000000e+00 : f32
    %403 = vector.broadcast %cst_179 : f32 to vector<1x16xf32>
    %404 = arith.addf %403, %402 : vector<1x16xf32>
    %405 = arith.divf %403, %404 : vector<1x16xf32>
    %406 = vector.extract_strided_slice %396 {offsets = [0, 16], sizes = [1, 16], strides = [1, 1]} : vector<1x64xf32> to vector<1x16xf32>
    %c0_180 = arith.constant 0 : index
    %c16_181 = arith.constant 16 : index
    %407 = vector.load %arg2[%c0_180, %c16_181] : memref<16x64xf32, #tpu.memory_space<vmem>>, vector<16x16xf32>
    %cst_182 = arith.constant dense<0.000000e+00> : vector<1x16xf32>
    %408 = tpu.matmul %379, %407, %cst_182 {dimension_numbers = #tpu.dot_dimension_numbers<[1], [0], [0], [1], [0, 0, 1, 1], [], []>} : vector<1x16xf32>, vector<16x16xf32>, vector<1x16xf32> -> vector<1x16xf32>
    %409 = arith.addf %406, %408 : vector<1x16xf32>
    %410 = arith.negf %409 : vector<1x16xf32>
    %411 = math.exp %410 : vector<1x16xf32>
    %cst_183 = arith.constant 1.000000e+00 : f32
    %412 = vector.broadcast %cst_183 : f32 to vector<1x16xf32>
    %413 = arith.addf %412, %411 : vector<1x16xf32>
    %414 = arith.divf %412, %413 : vector<1x16xf32>
    %415 = vector.extract_strided_slice %396 {offsets = [0, 32], sizes = [1, 16], strides = [1, 1]} : vector<1x64xf32> to vector<1x16xf32>
    %c0_184 = arith.constant 0 : index
    %c32_185 = arith.constant 32 : index
    %416 = vector.load %arg2[%c0_184, %c32_185] : memref<16x64xf32, #tpu.memory_space<vmem>>, vector<16x16xf32>
    %cst_186 = arith.constant dense<0.000000e+00> : vector<1x16xf32>
    %417 = tpu.matmul %379, %416, %cst_186 {dimension_numbers = #tpu.dot_dimension_numbers<[1], [0], [0], [1], [0, 0, 1, 1], [], []>} : vector<1x16xf32>, vector<16x16xf32>, vector<1x16xf32> -> vector<1x16xf32>
    %418 = arith.addf %415, %417 : vector<1x16xf32>
    %419 = math.tanh %418 : vector<1x16xf32>
    %420 = vector.extract_strided_slice %396 {offsets = [0, 48], sizes = [1, 16], strides = [1, 1]} : vector<1x64xf32> to vector<1x16xf32>
    %c0_187 = arith.constant 0 : index
    %c48_188 = arith.constant 48 : index
    %421 = vector.load %arg2[%c0_187, %c48_188] : memref<16x64xf32, #tpu.memory_space<vmem>>, vector<16x16xf32>
    %cst_189 = arith.constant dense<0.000000e+00> : vector<1x16xf32>
    %422 = tpu.matmul %379, %421, %cst_189 {dimension_numbers = #tpu.dot_dimension_numbers<[1], [0], [0], [1], [0, 0, 1, 1], [], []>} : vector<1x16xf32>, vector<16x16xf32>, vector<1x16xf32> -> vector<1x16xf32>
    %423 = arith.addf %420, %422 : vector<1x16xf32>
    %424 = arith.negf %423 : vector<1x16xf32>
    %425 = math.exp %424 : vector<1x16xf32>
    %cst_190 = arith.constant 1.000000e+00 : f32
    %426 = vector.broadcast %cst_190 : f32 to vector<1x16xf32>
    %427 = arith.addf %426, %425 : vector<1x16xf32>
    %428 = arith.divf %426, %427 : vector<1x16xf32>
    %429 = arith.mulf %414, %377 : vector<1x16xf32>
    %430 = arith.mulf %405, %419 : vector<1x16xf32>
    %431 = arith.addf %429, %430 : vector<1x16xf32>
    %432 = math.tanh %431 : vector<1x16xf32>
    %433 = arith.mulf %428, %432 : vector<1x16xf32>
    %434 = arith.index_cast %c7_i32 : i32 to index
    %c0_191 = arith.constant 0 : index
    %c0_192 = arith.constant 0 : index
    %435 = vector.load %arg3[%434, %c0_191, %c0_192] : memref<16x1x16xf32, #tpu.memory_space<vmem>>, vector<1x1x16xf32>
    %436 = vector.shape_cast %435 : vector<1x1x16xf32> to vector<1x16xf32>
    %437 = vector.shape_cast %433 : vector<1x16xf32> to vector<1x1x16xf32>
    tpu.vector_store %arg3[%434, %c0_191, %c0_192], %437 {strides = array<i32>} : memref<16x1x16xf32, #tpu.memory_space<vmem>>, vector<1x1x16xf32>,
    %c8_i32 = arith.constant 8 : i32
    %438 = arith.addi %3, %c8_i32 : i32
    %c2_i32_193 = arith.constant 2 : i32
    %c0_i32_194 = arith.constant 0 : i32
    %439 = arith.cmpi eq, %c2_i32_193, %c0_i32_194 : i32
    %c1_i32_195 = arith.constant 1 : i32
    %440 = arith.select %439, %c1_i32_195, %c2_i32_193 : i32
    %441 = arith.remsi %438, %440 : i32
    %c0_i32_196 = arith.constant 0 : i32
    %442 = arith.cmpi ne, %441, %c0_i32_196 : i32
    %c0_i32_197 = arith.constant 0 : i32
    %443 = arith.cmpi slt, %441, %c0_i32_197 : i32
    %c0_i32_198 = arith.constant 0 : i32
    %444 = arith.cmpi slt, %440, %c0_i32_198 : i32
    %445 = arith.xori %443, %444 : i1
    %446 = arith.andi %445, %442 : i1
    %447 = arith.addi %441, %440 : i32
    %448 = arith.select %446, %447, %441 : i32
    %449 = arith.index_cast %448 : i32 to index
    %c0_199 = arith.constant 0 : index
    %450 = vector.load %arg1[%449, %c0_199] : memref<2x64xf32, #tpu.memory_space<vmem>>, vector<1x64xf32>
    %451 = vector.extract_strided_slice %450 {offsets = [0, 0], sizes = [1, 16], strides = [1, 1]} : vector<1x64xf32> to vector<1x16xf32>
    %c0_200 = arith.constant 0 : index
    %c0_201 = arith.constant 0 : index
    %452 = vector.load %arg2[%c0_200, %c0_201] : memref<16x64xf32, #tpu.memory_space<vmem>>, vector<16x16xf32>
    %cst_202 = arith.constant dense<0.000000e+00> : vector<1x16xf32>
    %453 = tpu.matmul %433, %452, %cst_202 {dimension_numbers = #tpu.dot_dimension_numbers<[1], [0], [0], [1], [0, 0, 1, 1], [], []>} : vector<1x16xf32>, vector<16x16xf32>, vector<1x16xf32> -> vector<1x16xf32>
    %454 = arith.addf %451, %453 : vector<1x16xf32>
    %455 = arith.negf %454 : vector<1x16xf32>
    %456 = math.exp %455 : vector<1x16xf32>
    %cst_203 = arith.constant 1.000000e+00 : f32
    %457 = vector.broadcast %cst_203 : f32 to vector<1x16xf32>
    %458 = arith.addf %457, %456 : vector<1x16xf32>
    %459 = arith.divf %457, %458 : vector<1x16xf32>
    %460 = vector.extract_strided_slice %450 {offsets = [0, 16], sizes = [1, 16], strides = [1, 1]} : vector<1x64xf32> to vector<1x16xf32>
    %c0_204 = arith.constant 0 : index
    %c16_205 = arith.constant 16 : index
    %461 = vector.load %arg2[%c0_204, %c16_205] : memref<16x64xf32, #tpu.memory_space<vmem>>, vector<16x16xf32>
    %cst_206 = arith.constant dense<0.000000e+00> : vector<1x16xf32>
    %462 = tpu.matmul %433, %461, %cst_206 {dimension_numbers = #tpu.dot_dimension_numbers<[1], [0], [0], [1], [0, 0, 1, 1], [], []>} : vector<1x16xf32>, vector<16x16xf32>, vector<1x16xf32> -> vector<1x16xf32>
    %463 = arith.addf %460, %462 : vector<1x16xf32>
    %464 = arith.negf %463 : vector<1x16xf32>
    %465 = math.exp %464 : vector<1x16xf32>
    %cst_207 = arith.constant 1.000000e+00 : f32
    %466 = vector.broadcast %cst_207 : f32 to vector<1x16xf32>
    %467 = arith.addf %466, %465 : vector<1x16xf32>
    %468 = arith.divf %466, %467 : vector<1x16xf32>
    %469 = vector.extract_strided_slice %450 {offsets = [0, 32], sizes = [1, 16], strides = [1, 1]} : vector<1x64xf32> to vector<1x16xf32>
    %c0_208 = arith.constant 0 : index
    %c32_209 = arith.constant 32 : index
    %470 = vector.load %arg2[%c0_208, %c32_209] : memref<16x64xf32, #tpu.memory_space<vmem>>, vector<16x16xf32>
    %cst_210 = arith.constant dense<0.000000e+00> : vector<1x16xf32>
    %471 = tpu.matmul %433, %470, %cst_210 {dimension_numbers = #tpu.dot_dimension_numbers<[1], [0], [0], [1], [0, 0, 1, 1], [], []>} : vector<1x16xf32>, vector<16x16xf32>, vector<1x16xf32> -> vector<1x16xf32>
    %472 = arith.addf %469, %471 : vector<1x16xf32>
    %473 = math.tanh %472 : vector<1x16xf32>
    %474 = vector.extract_strided_slice %450 {offsets = [0, 48], sizes = [1, 16], strides = [1, 1]} : vector<1x64xf32> to vector<1x16xf32>
    %c0_211 = arith.constant 0 : index
    %c48_212 = arith.constant 48 : index
    %475 = vector.load %arg2[%c0_211, %c48_212] : memref<16x64xf32, #tpu.memory_space<vmem>>, vector<16x16xf32>
    %cst_213 = arith.constant dense<0.000000e+00> : vector<1x16xf32>
    %476 = tpu.matmul %433, %475, %cst_213 {dimension_numbers = #tpu.dot_dimension_numbers<[1], [0], [0], [1], [0, 0, 1, 1], [], []>} : vector<1x16xf32>, vector<16x16xf32>, vector<1x16xf32> -> vector<1x16xf32>
    %477 = arith.addf %474, %476 : vector<1x16xf32>
    %478 = arith.negf %477 : vector<1x16xf32>
    %479 = math.exp %478 : vector<1x16xf32>
    %cst_214 = arith.constant 1.000000e+00 : f32
    %480 = vector.broadcast %cst_214 : f32 to vector<1x16xf32>
    %481 = arith.addf %480, %479 : vector<1x16xf32>
    %482 = arith.divf %480, %481 : vector<1x16xf32>
    %483 = arith.mulf %468, %431 : vector<1x16xf32>
    %484 = arith.mulf %459, %473 : vector<1x16xf32>
    %485 = arith.addf %483, %484 : vector<1x16xf32>
    %486 = math.tanh %485 : vector<1x16xf32>
    %487 = arith.mulf %482, %486 : vector<1x16xf32>
    %488 = arith.index_cast %c8_i32 : i32 to index
    %c0_215 = arith.constant 0 : index
    %c0_216 = arith.constant 0 : index
    %489 = vector.load %arg3[%488, %c0_215, %c0_216] : memref<16x1x16xf32, #tpu.memory_space<vmem>>, vector<1x1x16xf32>
    %490 = vector.shape_cast %489 : vector<1x1x16xf32> to vector<1x16xf32>
    %491 = vector.shape_cast %487 : vector<1x16xf32> to vector<1x1x16xf32>
    tpu.vector_store %arg3[%488, %c0_215, %c0_216], %491 {strides = array<i32>} : memref<16x1x16xf32, #tpu.memory_space<vmem>>, vector<1x1x16xf32>,
    %c9_i32 = arith.constant 9 : i32
    %492 = arith.addi %3, %c9_i32 : i32
    %c2_i32_217 = arith.constant 2 : i32
    %c0_i32_218 = arith.constant 0 : i32
    %493 = arith.cmpi eq, %c2_i32_217, %c0_i32_218 : i32
    %c1_i32_219 = arith.constant 1 : i32
    %494 = arith.select %493, %c1_i32_219, %c2_i32_217 : i32
    %495 = arith.remsi %492, %494 : i32
    %c0_i32_220 = arith.constant 0 : i32
    %496 = arith.cmpi ne, %495, %c0_i32_220 : i32
    %c0_i32_221 = arith.constant 0 : i32
    %497 = arith.cmpi slt, %495, %c0_i32_221 : i32
    %c0_i32_222 = arith.constant 0 : i32
    %498 = arith.cmpi slt, %494, %c0_i32_222 : i32
    %499 = arith.xori %497, %498 : i1
    %500 = arith.andi %499, %496 : i1
    %501 = arith.addi %495, %494 : i32
    %502 = arith.select %500, %501, %495 : i32
    %503 = arith.index_cast %502 : i32 to index
    %c0_223 = arith.constant 0 : index
    %504 = vector.load %arg1[%503, %c0_223] : memref<2x64xf32, #tpu.memory_space<vmem>>, vector<1x64xf32>
    %505 = vector.extract_strided_slice %504 {offsets = [0, 0], sizes = [1, 16], strides = [1, 1]} : vector<1x64xf32> to vector<1x16xf32>
    %c0_224 = arith.constant 0 : index
    %c0_225 = arith.constant 0 : index
    %506 = vector.load %arg2[%c0_224, %c0_225] : memref<16x64xf32, #tpu.memory_space<vmem>>, vector<16x16xf32>
    %cst_226 = arith.constant dense<0.000000e+00> : vector<1x16xf32>
    %507 = tpu.matmul %487, %506, %cst_226 {dimension_numbers = #tpu.dot_dimension_numbers<[1], [0], [0], [1], [0, 0, 1, 1], [], []>} : vector<1x16xf32>, vector<16x16xf32>, vector<1x16xf32> -> vector<1x16xf32>
    %508 = arith.addf %505, %507 : vector<1x16xf32>
    %509 = arith.negf %508 : vector<1x16xf32>
    %510 = math.exp %509 : vector<1x16xf32>
    %cst_227 = arith.constant 1.000000e+00 : f32
    %511 = vector.broadcast %cst_227 : f32 to vector<1x16xf32>
    %512 = arith.addf %511, %510 : vector<1x16xf32>
    %513 = arith.divf %511, %512 : vector<1x16xf32>
    %514 = vector.extract_strided_slice %504 {offsets = [0, 16], sizes = [1, 16], strides = [1, 1]} : vector<1x64xf32> to vector<1x16xf32>
    %c0_228 = arith.constant 0 : index
    %c16_229 = arith.constant 16 : index
    %515 = vector.load %arg2[%c0_228, %c16_229] : memref<16x64xf32, #tpu.memory_space<vmem>>, vector<16x16xf32>
    %cst_230 = arith.constant dense<0.000000e+00> : vector<1x16xf32>
    %516 = tpu.matmul %487, %515, %cst_230 {dimension_numbers = #tpu.dot_dimension_numbers<[1], [0], [0], [1], [0, 0, 1, 1], [], []>} : vector<1x16xf32>, vector<16x16xf32>, vector<1x16xf32> -> vector<1x16xf32>
    %517 = arith.addf %514, %516 : vector<1x16xf32>
    %518 = arith.negf %517 : vector<1x16xf32>
    %519 = math.exp %518 : vector<1x16xf32>
    %cst_231 = arith.constant 1.000000e+00 : f32
    %520 = vector.broadcast %cst_231 : f32 to vector<1x16xf32>
    %521 = arith.addf %520, %519 : vector<1x16xf32>
    %522 = arith.divf %520, %521 : vector<1x16xf32>
    %523 = vector.extract_strided_slice %504 {offsets = [0, 32], sizes = [1, 16], strides = [1, 1]} : vector<1x64xf32> to vector<1x16xf32>
    %c0_232 = arith.constant 0 : index
    %c32_233 = arith.constant 32 : index
    %524 = vector.load %arg2[%c0_232, %c32_233] : memref<16x64xf32, #tpu.memory_space<vmem>>, vector<16x16xf32>
    %cst_234 = arith.constant dense<0.000000e+00> : vector<1x16xf32>
    %525 = tpu.matmul %487, %524, %cst_234 {dimension_numbers = #tpu.dot_dimension_numbers<[1], [0], [0], [1], [0, 0, 1, 1], [], []>} : vector<1x16xf32>, vector<16x16xf32>, vector<1x16xf32> -> vector<1x16xf32>
    %526 = arith.addf %523, %525 : vector<1x16xf32>
    %527 = math.tanh %526 : vector<1x16xf32>
    %528 = vector.extract_strided_slice %504 {offsets = [0, 48], sizes = [1, 16], strides = [1, 1]} : vector<1x64xf32> to vector<1x16xf32>
    %c0_235 = arith.constant 0 : index
    %c48_236 = arith.constant 48 : index
    %529 = vector.load %arg2[%c0_235, %c48_236] : memref<16x64xf32, #tpu.memory_space<vmem>>, vector<16x16xf32>
    %cst_237 = arith.constant dense<0.000000e+00> : vector<1x16xf32>
    %530 = tpu.matmul %487, %529, %cst_237 {dimension_numbers = #tpu.dot_dimension_numbers<[1], [0], [0], [1], [0, 0, 1, 1], [], []>} : vector<1x16xf32>, vector<16x16xf32>, vector<1x16xf32> -> vector<1x16xf32>
    %531 = arith.addf %528, %530 : vector<1x16xf32>
    %532 = arith.negf %531 : vector<1x16xf32>
    %533 = math.exp %532 : vector<1x16xf32>
    %cst_238 = arith.constant 1.000000e+00 : f32
    %534 = vector.broadcast %cst_238 : f32 to vector<1x16xf32>
    %535 = arith.addf %534, %533 : vector<1x16xf32>
    %536 = arith.divf %534, %535 : vector<1x16xf32>
    %537 = arith.mulf %522, %485 : vector<1x16xf32>
    %538 = arith.mulf %513, %527 : vector<1x16xf32>
    %539 = arith.addf %537, %538 : vector<1x16xf32>
    %540 = math.tanh %539 : vector<1x16xf32>
    %541 = arith.mulf %536, %540 : vector<1x16xf32>
    %542 = arith.index_cast %c9_i32 : i32 to index
    %c0_239 = arith.constant 0 : index
    %c0_240 = arith.constant 0 : index
    %543 = vector.load %arg3[%542, %c0_239, %c0_240] : memref<16x1x16xf32, #tpu.memory_space<vmem>>, vector<1x1x16xf32>
    %544 = vector.shape_cast %543 : vector<1x1x16xf32> to vector<1x16xf32>
    %545 = vector.shape_cast %541 : vector<1x16xf32> to vector<1x1x16xf32>
    tpu.vector_store %arg3[%542, %c0_239, %c0_240], %545 {strides = array<i32>} : memref<16x1x16xf32, #tpu.memory_space<vmem>>, vector<1x1x16xf32>,
    %c10_i32 = arith.constant 10 : i32
    %546 = arith.addi %3, %c10_i32 : i32
    %c2_i32_241 = arith.constant 2 : i32
    %c0_i32_242 = arith.constant 0 : i32
    %547 = arith.cmpi eq, %c2_i32_241, %c0_i32_242 : i32
    %c1_i32_243 = arith.constant 1 : i32
    %548 = arith.select %547, %c1_i32_243, %c2_i32_241 : i32
    %549 = arith.remsi %546, %548 : i32
    %c0_i32_244 = arith.constant 0 : i32
    %550 = arith.cmpi ne, %549, %c0_i32_244 : i32
    %c0_i32_245 = arith.constant 0 : i32
    %551 = arith.cmpi slt, %549, %c0_i32_245 : i32
    %c0_i32_246 = arith.constant 0 : i32
    %552 = arith.cmpi slt, %548, %c0_i32_246 : i32
    %553 = arith.xori %551, %552 : i1
    %554 = arith.andi %553, %550 : i1
    %555 = arith.addi %549, %548 : i32
    %556 = arith.select %554, %555, %549 : i32
    %557 = arith.index_cast %556 : i32 to index
    %c0_247 = arith.constant 0 : index
    %558 = vector.load %arg1[%557, %c0_247] : memref<2x64xf32, #tpu.memory_space<vmem>>, vector<1x64xf32>
    %559 = vector.extract_strided_slice %558 {offsets = [0, 0], sizes = [1, 16], strides = [1, 1]} : vector<1x64xf32> to vector<1x16xf32>
    %c0_248 = arith.constant 0 : index
    %c0_249 = arith.constant 0 : index
    %560 = vector.load %arg2[%c0_248, %c0_249] : memref<16x64xf32, #tpu.memory_space<vmem>>, vector<16x16xf32>
    %cst_250 = arith.constant dense<0.000000e+00> : vector<1x16xf32>
    %561 = tpu.matmul %541, %560, %cst_250 {dimension_numbers = #tpu.dot_dimension_numbers<[1], [0], [0], [1], [0, 0, 1, 1], [], []>} : vector<1x16xf32>, vector<16x16xf32>, vector<1x16xf32> -> vector<1x16xf32>
    %562 = arith.addf %559, %561 : vector<1x16xf32>
    %563 = arith.negf %562 : vector<1x16xf32>
    %564 = math.exp %563 : vector<1x16xf32>
    %cst_251 = arith.constant 1.000000e+00 : f32
    %565 = vector.broadcast %cst_251 : f32 to vector<1x16xf32>
    %566 = arith.addf %565, %564 : vector<1x16xf32>
    %567 = arith.divf %565, %566 : vector<1x16xf32>
    %568 = vector.extract_strided_slice %558 {offsets = [0, 16], sizes = [1, 16], strides = [1, 1]} : vector<1x64xf32> to vector<1x16xf32>
    %c0_252 = arith.constant 0 : index
    %c16_253 = arith.constant 16 : index
    %569 = vector.load %arg2[%c0_252, %c16_253] : memref<16x64xf32, #tpu.memory_space<vmem>>, vector<16x16xf32>
    %cst_254 = arith.constant dense<0.000000e+00> : vector<1x16xf32>
    %570 = tpu.matmul %541, %569, %cst_254 {dimension_numbers = #tpu.dot_dimension_numbers<[1], [0], [0], [1], [0, 0, 1, 1], [], []>} : vector<1x16xf32>, vector<16x16xf32>, vector<1x16xf32> -> vector<1x16xf32>
    %571 = arith.addf %568, %570 : vector<1x16xf32>
    %572 = arith.negf %571 : vector<1x16xf32>
    %573 = math.exp %572 : vector<1x16xf32>
    %cst_255 = arith.constant 1.000000e+00 : f32
    %574 = vector.broadcast %cst_255 : f32 to vector<1x16xf32>
    %575 = arith.addf %574, %573 : vector<1x16xf32>
    %576 = arith.divf %574, %575 : vector<1x16xf32>
    %577 = vector.extract_strided_slice %558 {offsets = [0, 32], sizes = [1, 16], strides = [1, 1]} : vector<1x64xf32> to vector<1x16xf32>
    %c0_256 = arith.constant 0 : index
    %c32_257 = arith.constant 32 : index
    %578 = vector.load %arg2[%c0_256, %c32_257] : memref<16x64xf32, #tpu.memory_space<vmem>>, vector<16x16xf32>
    %cst_258 = arith.constant dense<0.000000e+00> : vector<1x16xf32>
    %579 = tpu.matmul %541, %578, %cst_258 {dimension_numbers = #tpu.dot_dimension_numbers<[1], [0], [0], [1], [0, 0, 1, 1], [], []>} : vector<1x16xf32>, vector<16x16xf32>, vector<1x16xf32> -> vector<1x16xf32>
    %580 = arith.addf %577, %579 : vector<1x16xf32>
    %581 = math.tanh %580 : vector<1x16xf32>
    %582 = vector.extract_strided_slice %558 {offsets = [0, 48], sizes = [1, 16], strides = [1, 1]} : vector<1x64xf32> to vector<1x16xf32>
    %c0_259 = arith.constant 0 : index
    %c48_260 = arith.constant 48 : index
    %583 = vector.load %arg2[%c0_259, %c48_260] : memref<16x64xf32, #tpu.memory_space<vmem>>, vector<16x16xf32>
    %cst_261 = arith.constant dense<0.000000e+00> : vector<1x16xf32>
    %584 = tpu.matmul %541, %583, %cst_261 {dimension_numbers = #tpu.dot_dimension_numbers<[1], [0], [0], [1], [0, 0, 1, 1], [], []>} : vector<1x16xf32>, vector<16x16xf32>, vector<1x16xf32> -> vector<1x16xf32>
    %585 = arith.addf %582, %584 : vector<1x16xf32>
    %586 = arith.negf %585 : vector<1x16xf32>
    %587 = math.exp %586 : vector<1x16xf32>
    %cst_262 = arith.constant 1.000000e+00 : f32
    %588 = vector.broadcast %cst_262 : f32 to vector<1x16xf32>
    %589 = arith.addf %588, %587 : vector<1x16xf32>
    %590 = arith.divf %588, %589 : vector<1x16xf32>
    %591 = arith.mulf %576, %539 : vector<1x16xf32>
    %592 = arith.mulf %567, %581 : vector<1x16xf32>
    %593 = arith.addf %591, %592 : vector<1x16xf32>
    %594 = math.tanh %593 : vector<1x16xf32>
    %595 = arith.mulf %590, %594 : vector<1x16xf32>
    %596 = arith.index_cast %c10_i32 : i32 to index
    %c0_263 = arith.constant 0 : index
    %c0_264 = arith.constant 0 : index
    %597 = vector.load %arg3[%596, %c0_263, %c0_264] : memref<16x1x16xf32, #tpu.memory_space<vmem>>, vector<1x1x16xf32>
    %598 = vector.shape_cast %597 : vector<1x1x16xf32> to vector<1x16xf32>
    %599 = vector.shape_cast %595 : vector<1x16xf32> to vector<1x1x16xf32>
    tpu.vector_store %arg3[%596, %c0_263, %c0_264], %599 {strides = array<i32>} : memref<16x1x16xf32, #tpu.memory_space<vmem>>, vector<1x1x16xf32>,
    %c11_i32 = arith.constant 11 : i32
    %600 = arith.addi %3, %c11_i32 : i32
    %c2_i32_265 = arith.constant 2 : i32
    %c0_i32_266 = arith.constant 0 : i32
    %601 = arith.cmpi eq, %c2_i32_265, %c0_i32_266 : i32
    %c1_i32_267 = arith.constant 1 : i32
    %602 = arith.select %601, %c1_i32_267, %c2_i32_265 : i32
    %603 = arith.remsi %600, %602 : i32
    %c0_i32_268 = arith.constant 0 : i32
    %604 = arith.cmpi ne, %603, %c0_i32_268 : i32
    %c0_i32_269 = arith.constant 0 : i32
    %605 = arith.cmpi slt, %603, %c0_i32_269 : i32
    %c0_i32_270 = arith.constant 0 : i32
    %606 = arith.cmpi slt, %602, %c0_i32_270 : i32
    %607 = arith.xori %605, %606 : i1
    %608 = arith.andi %607, %604 : i1
    %609 = arith.addi %603, %602 : i32
    %610 = arith.select %608, %609, %603 : i32
    %611 = arith.index_cast %610 : i32 to index
    %c0_271 = arith.constant 0 : index
    %612 = vector.load %arg1[%611, %c0_271] : memref<2x64xf32, #tpu.memory_space<vmem>>, vector<1x64xf32>
    %613 = vector.extract_strided_slice %612 {offsets = [0, 0], sizes = [1, 16], strides = [1, 1]} : vector<1x64xf32> to vector<1x16xf32>
    %c0_272 = arith.constant 0 : index
    %c0_273 = arith.constant 0 : index
    %614 = vector.load %arg2[%c0_272, %c0_273] : memref<16x64xf32, #tpu.memory_space<vmem>>, vector<16x16xf32>
    %cst_274 = arith.constant dense<0.000000e+00> : vector<1x16xf32>
    %615 = tpu.matmul %595, %614, %cst_274 {dimension_numbers = #tpu.dot_dimension_numbers<[1], [0], [0], [1], [0, 0, 1, 1], [], []>} : vector<1x16xf32>, vector<16x16xf32>, vector<1x16xf32> -> vector<1x16xf32>
    %616 = arith.addf %613, %615 : vector<1x16xf32>
    %617 = arith.negf %616 : vector<1x16xf32>
    %618 = math.exp %617 : vector<1x16xf32>
    %cst_275 = arith.constant 1.000000e+00 : f32
    %619 = vector.broadcast %cst_275 : f32 to vector<1x16xf32>
    %620 = arith.addf %619, %618 : vector<1x16xf32>
    %621 = arith.divf %619, %620 : vector<1x16xf32>
    %622 = vector.extract_strided_slice %612 {offsets = [0, 16], sizes = [1, 16], strides = [1, 1]} : vector<1x64xf32> to vector<1x16xf32>
    %c0_276 = arith.constant 0 : index
    %c16_277 = arith.constant 16 : index
    %623 = vector.load %arg2[%c0_276, %c16_277] : memref<16x64xf32, #tpu.memory_space<vmem>>, vector<16x16xf32>
    %cst_278 = arith.constant dense<0.000000e+00> : vector<1x16xf32>
    %624 = tpu.matmul %595, %623, %cst_278 {dimension_numbers = #tpu.dot_dimension_numbers<[1], [0], [0], [1], [0, 0, 1, 1], [], []>} : vector<1x16xf32>, vector<16x16xf32>, vector<1x16xf32> -> vector<1x16xf32>
    %625 = arith.addf %622, %624 : vector<1x16xf32>
    %626 = arith.negf %625 : vector<1x16xf32>
    %627 = math.exp %626 : vector<1x16xf32>
    %cst_279 = arith.constant 1.000000e+00 : f32
    %628 = vector.broadcast %cst_279 : f32 to vector<1x16xf32>
    %629 = arith.addf %628, %627 : vector<1x16xf32>
    %630 = arith.divf %628, %629 : vector<1x16xf32>
    %631 = vector.extract_strided_slice %612 {offsets = [0, 32], sizes = [1, 16], strides = [1, 1]} : vector<1x64xf32> to vector<1x16xf32>
    %c0_280 = arith.constant 0 : index
    %c32_281 = arith.constant 32 : index
    %632 = vector.load %arg2[%c0_280, %c32_281] : memref<16x64xf32, #tpu.memory_space<vmem>>, vector<16x16xf32>
    %cst_282 = arith.constant dense<0.000000e+00> : vector<1x16xf32>
    %633 = tpu.matmul %595, %632, %cst_282 {dimension_numbers = #tpu.dot_dimension_numbers<[1], [0], [0], [1], [0, 0, 1, 1], [], []>} : vector<1x16xf32>, vector<16x16xf32>, vector<1x16xf32> -> vector<1x16xf32>
    %634 = arith.addf %631, %633 : vector<1x16xf32>
    %635 = math.tanh %634 : vector<1x16xf32>
    %636 = vector.extract_strided_slice %612 {offsets = [0, 48], sizes = [1, 16], strides = [1, 1]} : vector<1x64xf32> to vector<1x16xf32>
    %c0_283 = arith.constant 0 : index
    %c48_284 = arith.constant 48 : index
    %637 = vector.load %arg2[%c0_283, %c48_284] : memref<16x64xf32, #tpu.memory_space<vmem>>, vector<16x16xf32>
    %cst_285 = arith.constant dense<0.000000e+00> : vector<1x16xf32>
    %638 = tpu.matmul %595, %637, %cst_285 {dimension_numbers = #tpu.dot_dimension_numbers<[1], [0], [0], [1], [0, 0, 1, 1], [], []>} : vector<1x16xf32>, vector<16x16xf32>, vector<1x16xf32> -> vector<1x16xf32>
    %639 = arith.addf %636, %638 : vector<1x16xf32>
    %640 = arith.negf %639 : vector<1x16xf32>
    %641 = math.exp %640 : vector<1x16xf32>
    %cst_286 = arith.constant 1.000000e+00 : f32
    %642 = vector.broadcast %cst_286 : f32 to vector<1x16xf32>
    %643 = arith.addf %642, %641 : vector<1x16xf32>
    %644 = arith.divf %642, %643 : vector<1x16xf32>
    %645 = arith.mulf %630, %593 : vector<1x16xf32>
    %646 = arith.mulf %621, %635 : vector<1x16xf32>
    %647 = arith.addf %645, %646 : vector<1x16xf32>
    %648 = math.tanh %647 : vector<1x16xf32>
    %649 = arith.mulf %644, %648 : vector<1x16xf32>
    %650 = arith.index_cast %c11_i32 : i32 to index
    %c0_287 = arith.constant 0 : index
    %c0_288 = arith.constant 0 : index
    %651 = vector.load %arg3[%650, %c0_287, %c0_288] : memref<16x1x16xf32, #tpu.memory_space<vmem>>, vector<1x1x16xf32>
    %652 = vector.shape_cast %651 : vector<1x1x16xf32> to vector<1x16xf32>
    %653 = vector.shape_cast %649 : vector<1x16xf32> to vector<1x1x16xf32>
    tpu.vector_store %arg3[%650, %c0_287, %c0_288], %653 {strides = array<i32>} : memref<16x1x16xf32, #tpu.memory_space<vmem>>, vector<1x1x16xf32>,
    %c12_i32 = arith.constant 12 : i32
    %654 = arith.addi %3, %c12_i32 : i32
    %c2_i32_289 = arith.constant 2 : i32
    %c0_i32_290 = arith.constant 0 : i32
    %655 = arith.cmpi eq, %c2_i32_289, %c0_i32_290 : i32
    %c1_i32_291 = arith.constant 1 : i32
    %656 = arith.select %655, %c1_i32_291, %c2_i32_289 : i32
    %657 = arith.remsi %654, %656 : i32
    %c0_i32_292 = arith.constant 0 : i32
    %658 = arith.cmpi ne, %657, %c0_i32_292 : i32
    %c0_i32_293 = arith.constant 0 : i32
    %659 = arith.cmpi slt, %657, %c0_i32_293 : i32
    %c0_i32_294 = arith.constant 0 : i32
    %660 = arith.cmpi slt, %656, %c0_i32_294 : i32
    %661 = arith.xori %659, %660 : i1
    %662 = arith.andi %661, %658 : i1
    %663 = arith.addi %657, %656 : i32
    %664 = arith.select %662, %663, %657 : i32
    %665 = arith.index_cast %664 : i32 to index
    %c0_295 = arith.constant 0 : index
    %666 = vector.load %arg1[%665, %c0_295] : memref<2x64xf32, #tpu.memory_space<vmem>>, vector<1x64xf32>
    %667 = vector.extract_strided_slice %666 {offsets = [0, 0], sizes = [1, 16], strides = [1, 1]} : vector<1x64xf32> to vector<1x16xf32>
    %c0_296 = arith.constant 0 : index
    %c0_297 = arith.constant 0 : index
    %668 = vector.load %arg2[%c0_296, %c0_297] : memref<16x64xf32, #tpu.memory_space<vmem>>, vector<16x16xf32>
    %cst_298 = arith.constant dense<0.000000e+00> : vector<1x16xf32>
    %669 = tpu.matmul %649, %668, %cst_298 {dimension_numbers = #tpu.dot_dimension_numbers<[1], [0], [0], [1], [0, 0, 1, 1], [], []>} : vector<1x16xf32>, vector<16x16xf32>, vector<1x16xf32> -> vector<1x16xf32>
    %670 = arith.addf %667, %669 : vector<1x16xf32>
    %671 = arith.negf %670 : vector<1x16xf32>
    %672 = math.exp %671 : vector<1x16xf32>
    %cst_299 = arith.constant 1.000000e+00 : f32
    %673 = vector.broadcast %cst_299 : f32 to vector<1x16xf32>
    %674 = arith.addf %673, %672 : vector<1x16xf32>
    %675 = arith.divf %673, %674 : vector<1x16xf32>
    %676 = vector.extract_strided_slice %666 {offsets = [0, 16], sizes = [1, 16], strides = [1, 1]} : vector<1x64xf32> to vector<1x16xf32>
    %c0_300 = arith.constant 0 : index
    %c16_301 = arith.constant 16 : index
    %677 = vector.load %arg2[%c0_300, %c16_301] : memref<16x64xf32, #tpu.memory_space<vmem>>, vector<16x16xf32>
    %cst_302 = arith.constant dense<0.000000e+00> : vector<1x16xf32>
    %678 = tpu.matmul %649, %677, %cst_302 {dimension_numbers = #tpu.dot_dimension_numbers<[1], [0], [0], [1], [0, 0, 1, 1], [], []>} : vector<1x16xf32>, vector<16x16xf32>, vector<1x16xf32> -> vector<1x16xf32>
    %679 = arith.addf %676, %678 : vector<1x16xf32>
    %680 = arith.negf %679 : vector<1x16xf32>
    %681 = math.exp %680 : vector<1x16xf32>
    %cst_303 = arith.constant 1.000000e+00 : f32
    %682 = vector.broadcast %cst_303 : f32 to vector<1x16xf32>
    %683 = arith.addf %682, %681 : vector<1x16xf32>
    %684 = arith.divf %682, %683 : vector<1x16xf32>
    %685 = vector.extract_strided_slice %666 {offsets = [0, 32], sizes = [1, 16], strides = [1, 1]} : vector<1x64xf32> to vector<1x16xf32>
    %c0_304 = arith.constant 0 : index
    %c32_305 = arith.constant 32 : index
    %686 = vector.load %arg2[%c0_304, %c32_305] : memref<16x64xf32, #tpu.memory_space<vmem>>, vector<16x16xf32>
    %cst_306 = arith.constant dense<0.000000e+00> : vector<1x16xf32>
    %687 = tpu.matmul %649, %686, %cst_306 {dimension_numbers = #tpu.dot_dimension_numbers<[1], [0], [0], [1], [0, 0, 1, 1], [], []>} : vector<1x16xf32>, vector<16x16xf32>, vector<1x16xf32> -> vector<1x16xf32>
    %688 = arith.addf %685, %687 : vector<1x16xf32>
    %689 = math.tanh %688 : vector<1x16xf32>
    %690 = vector.extract_strided_slice %666 {offsets = [0, 48], sizes = [1, 16], strides = [1, 1]} : vector<1x64xf32> to vector<1x16xf32>
    %c0_307 = arith.constant 0 : index
    %c48_308 = arith.constant 48 : index
    %691 = vector.load %arg2[%c0_307, %c48_308] : memref<16x64xf32, #tpu.memory_space<vmem>>, vector<16x16xf32>
    %cst_309 = arith.constant dense<0.000000e+00> : vector<1x16xf32>
    %692 = tpu.matmul %649, %691, %cst_309 {dimension_numbers = #tpu.dot_dimension_numbers<[1], [0], [0], [1], [0, 0, 1, 1], [], []>} : vector<1x16xf32>, vector<16x16xf32>, vector<1x16xf32> -> vector<1x16xf32>
    %693 = arith.addf %690, %692 : vector<1x16xf32>
    %694 = arith.negf %693 : vector<1x16xf32>
    %695 = math.exp %694 : vector<1x16xf32>
    %cst_310 = arith.constant 1.000000e+00 : f32
    %696 = vector.broadcast %cst_310 : f32 to vector<1x16xf32>
    %697 = arith.addf %696, %695 : vector<1x16xf32>
    %698 = arith.divf %696, %697 : vector<1x16xf32>
    %699 = arith.mulf %684, %647 : vector<1x16xf32>
    %700 = arith.mulf %675, %689 : vector<1x16xf32>
    %701 = arith.addf %699, %700 : vector<1x16xf32>
    %702 = math.tanh %701 : vector<1x16xf32>
    %703 = arith.mulf %698, %702 : vector<1x16xf32>
    %704 = arith.index_cast %c12_i32 : i32 to index
    %c0_311 = arith.constant 0 : index
    %c0_312 = arith.constant 0 : index
    %705 = vector.load %arg3[%704, %c0_311, %c0_312] : memref<16x1x16xf32, #tpu.memory_space<vmem>>, vector<1x1x16xf32>
    %706 = vector.shape_cast %705 : vector<1x1x16xf32> to vector<1x16xf32>
    %707 = vector.shape_cast %703 : vector<1x16xf32> to vector<1x1x16xf32>
    tpu.vector_store %arg3[%704, %c0_311, %c0_312], %707 {strides = array<i32>} : memref<16x1x16xf32, #tpu.memory_space<vmem>>, vector<1x1x16xf32>,
    %c13_i32 = arith.constant 13 : i32
    %708 = arith.addi %3, %c13_i32 : i32
    %c2_i32_313 = arith.constant 2 : i32
    %c0_i32_314 = arith.constant 0 : i32
    %709 = arith.cmpi eq, %c2_i32_313, %c0_i32_314 : i32
    %c1_i32_315 = arith.constant 1 : i32
    %710 = arith.select %709, %c1_i32_315, %c2_i32_313 : i32
    %711 = arith.remsi %708, %710 : i32
    %c0_i32_316 = arith.constant 0 : i32
    %712 = arith.cmpi ne, %711, %c0_i32_316 : i32
    %c0_i32_317 = arith.constant 0 : i32
    %713 = arith.cmpi slt, %711, %c0_i32_317 : i32
    %c0_i32_318 = arith.constant 0 : i32
    %714 = arith.cmpi slt, %710, %c0_i32_318 : i32
    %715 = arith.xori %713, %714 : i1
    %716 = arith.andi %715, %712 : i1
    %717 = arith.addi %711, %710 : i32
    %718 = arith.select %716, %717, %711 : i32
    %719 = arith.index_cast %718 : i32 to index
    %c0_319 = arith.constant 0 : index
    %720 = vector.load %arg1[%719, %c0_319] : memref<2x64xf32, #tpu.memory_space<vmem>>, vector<1x64xf32>
    %721 = vector.extract_strided_slice %720 {offsets = [0, 0], sizes = [1, 16], strides = [1, 1]} : vector<1x64xf32> to vector<1x16xf32>
    %c0_320 = arith.constant 0 : index
    %c0_321 = arith.constant 0 : index
    %722 = vector.load %arg2[%c0_320, %c0_321] : memref<16x64xf32, #tpu.memory_space<vmem>>, vector<16x16xf32>
    %cst_322 = arith.constant dense<0.000000e+00> : vector<1x16xf32>
    %723 = tpu.matmul %703, %722, %cst_322 {dimension_numbers = #tpu.dot_dimension_numbers<[1], [0], [0], [1], [0, 0, 1, 1], [], []>} : vector<1x16xf32>, vector<16x16xf32>, vector<1x16xf32> -> vector<1x16xf32>
    %724 = arith.addf %721, %723 : vector<1x16xf32>
    %725 = arith.negf %724 : vector<1x16xf32>
    %726 = math.exp %725 : vector<1x16xf32>
    %cst_323 = arith.constant 1.000000e+00 : f32
    %727 = vector.broadcast %cst_323 : f32 to vector<1x16xf32>
    %728 = arith.addf %727, %726 : vector<1x16xf32>
    %729 = arith.divf %727, %728 : vector<1x16xf32>
    %730 = vector.extract_strided_slice %720 {offsets = [0, 16], sizes = [1, 16], strides = [1, 1]} : vector<1x64xf32> to vector<1x16xf32>
    %c0_324 = arith.constant 0 : index
    %c16_325 = arith.constant 16 : index
    %731 = vector.load %arg2[%c0_324, %c16_325] : memref<16x64xf32, #tpu.memory_space<vmem>>, vector<16x16xf32>
    %cst_326 = arith.constant dense<0.000000e+00> : vector<1x16xf32>
    %732 = tpu.matmul %703, %731, %cst_326 {dimension_numbers = #tpu.dot_dimension_numbers<[1], [0], [0], [1], [0, 0, 1, 1], [], []>} : vector<1x16xf32>, vector<16x16xf32>, vector<1x16xf32> -> vector<1x16xf32>
    %733 = arith.addf %730, %732 : vector<1x16xf32>
    %734 = arith.negf %733 : vector<1x16xf32>
    %735 = math.exp %734 : vector<1x16xf32>
    %cst_327 = arith.constant 1.000000e+00 : f32
    %736 = vector.broadcast %cst_327 : f32 to vector<1x16xf32>
    %737 = arith.addf %736, %735 : vector<1x16xf32>
    %738 = arith.divf %736, %737 : vector<1x16xf32>
    %739 = vector.extract_strided_slice %720 {offsets = [0, 32], sizes = [1, 16], strides = [1, 1]} : vector<1x64xf32> to vector<1x16xf32>
    %c0_328 = arith.constant 0 : index
    %c32_329 = arith.constant 32 : index
    %740 = vector.load %arg2[%c0_328, %c32_329] : memref<16x64xf32, #tpu.memory_space<vmem>>, vector<16x16xf32>
    %cst_330 = arith.constant dense<0.000000e+00> : vector<1x16xf32>
    %741 = tpu.matmul %703, %740, %cst_330 {dimension_numbers = #tpu.dot_dimension_numbers<[1], [0], [0], [1], [0, 0, 1, 1], [], []>} : vector<1x16xf32>, vector<16x16xf32>, vector<1x16xf32> -> vector<1x16xf32>
    %742 = arith.addf %739, %741 : vector<1x16xf32>
    %743 = math.tanh %742 : vector<1x16xf32>
    %744 = vector.extract_strided_slice %720 {offsets = [0, 48], sizes = [1, 16], strides = [1, 1]} : vector<1x64xf32> to vector<1x16xf32>
    %c0_331 = arith.constant 0 : index
    %c48_332 = arith.constant 48 : index
    %745 = vector.load %arg2[%c0_331, %c48_332] : memref<16x64xf32, #tpu.memory_space<vmem>>, vector<16x16xf32>
    %cst_333 = arith.constant dense<0.000000e+00> : vector<1x16xf32>
    %746 = tpu.matmul %703, %745, %cst_333 {dimension_numbers = #tpu.dot_dimension_numbers<[1], [0], [0], [1], [0, 0, 1, 1], [], []>} : vector<1x16xf32>, vector<16x16xf32>, vector<1x16xf32> -> vector<1x16xf32>
    %747 = arith.addf %744, %746 : vector<1x16xf32>
    %748 = arith.negf %747 : vector<1x16xf32>
    %749 = math.exp %748 : vector<1x16xf32>
    %cst_334 = arith.constant 1.000000e+00 : f32
    %750 = vector.broadcast %cst_334 : f32 to vector<1x16xf32>
    %751 = arith.addf %750, %749 : vector<1x16xf32>
    %752 = arith.divf %750, %751 : vector<1x16xf32>
    %753 = arith.mulf %738, %701 : vector<1x16xf32>
    %754 = arith.mulf %729, %743 : vector<1x16xf32>
    %755 = arith.addf %753, %754 : vector<1x16xf32>
    %756 = math.tanh %755 : vector<1x16xf32>
    %757 = arith.mulf %752, %756 : vector<1x16xf32>
    %758 = arith.index_cast %c13_i32 : i32 to index
    %c0_335 = arith.constant 0 : index
    %c0_336 = arith.constant 0 : index
    %759 = vector.load %arg3[%758, %c0_335, %c0_336] : memref<16x1x16xf32, #tpu.memory_space<vmem>>, vector<1x1x16xf32>
    %760 = vector.shape_cast %759 : vector<1x1x16xf32> to vector<1x16xf32>
    %761 = vector.shape_cast %757 : vector<1x16xf32> to vector<1x1x16xf32>
    tpu.vector_store %arg3[%758, %c0_335, %c0_336], %761 {strides = array<i32>} : memref<16x1x16xf32, #tpu.memory_space<vmem>>, vector<1x1x16xf32>,
    %c14_i32 = arith.constant 14 : i32
    %762 = arith.addi %3, %c14_i32 : i32
    %c2_i32_337 = arith.constant 2 : i32
    %c0_i32_338 = arith.constant 0 : i32
    %763 = arith.cmpi eq, %c2_i32_337, %c0_i32_338 : i32
    %c1_i32_339 = arith.constant 1 : i32
    %764 = arith.select %763, %c1_i32_339, %c2_i32_337 : i32
    %765 = arith.remsi %762, %764 : i32
    %c0_i32_340 = arith.constant 0 : i32
    %766 = arith.cmpi ne, %765, %c0_i32_340 : i32
    %c0_i32_341 = arith.constant 0 : i32
    %767 = arith.cmpi slt, %765, %c0_i32_341 : i32
    %c0_i32_342 = arith.constant 0 : i32
    %768 = arith.cmpi slt, %764, %c0_i32_342 : i32
    %769 = arith.xori %767, %768 : i1
    %770 = arith.andi %769, %766 : i1
    %771 = arith.addi %765, %764 : i32
    %772 = arith.select %770, %771, %765 : i32
    %773 = arith.index_cast %772 : i32 to index
    %c0_343 = arith.constant 0 : index
    %774 = vector.load %arg1[%773, %c0_343] : memref<2x64xf32, #tpu.memory_space<vmem>>, vector<1x64xf32>
    %775 = vector.extract_strided_slice %774 {offsets = [0, 0], sizes = [1, 16], strides = [1, 1]} : vector<1x64xf32> to vector<1x16xf32>
    %c0_344 = arith.constant 0 : index
    %c0_345 = arith.constant 0 : index
    %776 = vector.load %arg2[%c0_344, %c0_345] : memref<16x64xf32, #tpu.memory_space<vmem>>, vector<16x16xf32>
    %cst_346 = arith.constant dense<0.000000e+00> : vector<1x16xf32>
    %777 = tpu.matmul %757, %776, %cst_346 {dimension_numbers = #tpu.dot_dimension_numbers<[1], [0], [0], [1], [0, 0, 1, 1], [], []>} : vector<1x16xf32>, vector<16x16xf32>, vector<1x16xf32> -> vector<1x16xf32>
    %778 = arith.addf %775, %777 : vector<1x16xf32>
    %779 = arith.negf %778 : vector<1x16xf32>
    %780 = math.exp %779 : vector<1x16xf32>
    %cst_347 = arith.constant 1.000000e+00 : f32
    %781 = vector.broadcast %cst_347 : f32 to vector<1x16xf32>
    %782 = arith.addf %781, %780 : vector<1x16xf32>
    %783 = arith.divf %781, %782 : vector<1x16xf32>
    %784 = vector.extract_strided_slice %774 {offsets = [0, 16], sizes = [1, 16], strides = [1, 1]} : vector<1x64xf32> to vector<1x16xf32>
    %c0_348 = arith.constant 0 : index
    %c16_349 = arith.constant 16 : index
    %785 = vector.load %arg2[%c0_348, %c16_349] : memref<16x64xf32, #tpu.memory_space<vmem>>, vector<16x16xf32>
    %cst_350 = arith.constant dense<0.000000e+00> : vector<1x16xf32>
    %786 = tpu.matmul %757, %785, %cst_350 {dimension_numbers = #tpu.dot_dimension_numbers<[1], [0], [0], [1], [0, 0, 1, 1], [], []>} : vector<1x16xf32>, vector<16x16xf32>, vector<1x16xf32> -> vector<1x16xf32>
    %787 = arith.addf %784, %786 : vector<1x16xf32>
    %788 = arith.negf %787 : vector<1x16xf32>
    %789 = math.exp %788 : vector<1x16xf32>
    %cst_351 = arith.constant 1.000000e+00 : f32
    %790 = vector.broadcast %cst_351 : f32 to vector<1x16xf32>
    %791 = arith.addf %790, %789 : vector<1x16xf32>
    %792 = arith.divf %790, %791 : vector<1x16xf32>
    %793 = vector.extract_strided_slice %774 {offsets = [0, 32], sizes = [1, 16], strides = [1, 1]} : vector<1x64xf32> to vector<1x16xf32>
    %c0_352 = arith.constant 0 : index
    %c32_353 = arith.constant 32 : index
    %794 = vector.load %arg2[%c0_352, %c32_353] : memref<16x64xf32, #tpu.memory_space<vmem>>, vector<16x16xf32>
    %cst_354 = arith.constant dense<0.000000e+00> : vector<1x16xf32>
    %795 = tpu.matmul %757, %794, %cst_354 {dimension_numbers = #tpu.dot_dimension_numbers<[1], [0], [0], [1], [0, 0, 1, 1], [], []>} : vector<1x16xf32>, vector<16x16xf32>, vector<1x16xf32> -> vector<1x16xf32>
    %796 = arith.addf %793, %795 : vector<1x16xf32>
    %797 = math.tanh %796 : vector<1x16xf32>
    %798 = vector.extract_strided_slice %774 {offsets = [0, 48], sizes = [1, 16], strides = [1, 1]} : vector<1x64xf32> to vector<1x16xf32>
    %c0_355 = arith.constant 0 : index
    %c48_356 = arith.constant 48 : index
    %799 = vector.load %arg2[%c0_355, %c48_356] : memref<16x64xf32, #tpu.memory_space<vmem>>, vector<16x16xf32>
    %cst_357 = arith.constant dense<0.000000e+00> : vector<1x16xf32>
    %800 = tpu.matmul %757, %799, %cst_357 {dimension_numbers = #tpu.dot_dimension_numbers<[1], [0], [0], [1], [0, 0, 1, 1], [], []>} : vector<1x16xf32>, vector<16x16xf32>, vector<1x16xf32> -> vector<1x16xf32>
    %801 = arith.addf %798, %800 : vector<1x16xf32>
    %802 = arith.negf %801 : vector<1x16xf32>
    %803 = math.exp %802 : vector<1x16xf32>
    %cst_358 = arith.constant 1.000000e+00 : f32
    %804 = vector.broadcast %cst_358 : f32 to vector<1x16xf32>
    %805 = arith.addf %804, %803 : vector<1x16xf32>
    %806 = arith.divf %804, %805 : vector<1x16xf32>
    %807 = arith.mulf %792, %755 : vector<1x16xf32>
    %808 = arith.mulf %783, %797 : vector<1x16xf32>
    %809 = arith.addf %807, %808 : vector<1x16xf32>
    %810 = math.tanh %809 : vector<1x16xf32>
    %811 = arith.mulf %806, %810 : vector<1x16xf32>
    %812 = arith.index_cast %c14_i32 : i32 to index
    %c0_359 = arith.constant 0 : index
    %c0_360 = arith.constant 0 : index
    %813 = vector.load %arg3[%812, %c0_359, %c0_360] : memref<16x1x16xf32, #tpu.memory_space<vmem>>, vector<1x1x16xf32>
    %814 = vector.shape_cast %813 : vector<1x1x16xf32> to vector<1x16xf32>
    %815 = vector.shape_cast %811 : vector<1x16xf32> to vector<1x1x16xf32>
    tpu.vector_store %arg3[%812, %c0_359, %c0_360], %815 {strides = array<i32>} : memref<16x1x16xf32, #tpu.memory_space<vmem>>, vector<1x1x16xf32>,
    %c15_i32 = arith.constant 15 : i32
    %816 = arith.addi %3, %c15_i32 : i32
    %c2_i32_361 = arith.constant 2 : i32
    %c0_i32_362 = arith.constant 0 : i32
    %817 = arith.cmpi eq, %c2_i32_361, %c0_i32_362 : i32
    %c1_i32_363 = arith.constant 1 : i32
    %818 = arith.select %817, %c1_i32_363, %c2_i32_361 : i32
    %819 = arith.remsi %816, %818 : i32
    %c0_i32_364 = arith.constant 0 : i32
    %820 = arith.cmpi ne, %819, %c0_i32_364 : i32
    %c0_i32_365 = arith.constant 0 : i32
    %821 = arith.cmpi slt, %819, %c0_i32_365 : i32
    %c0_i32_366 = arith.constant 0 : i32
    %822 = arith.cmpi slt, %818, %c0_i32_366 : i32
    %823 = arith.xori %821, %822 : i1
    %824 = arith.andi %823, %820 : i1
    %825 = arith.addi %819, %818 : i32
    %826 = arith.select %824, %825, %819 : i32
    %827 = arith.index_cast %826 : i32 to index
    %c0_367 = arith.constant 0 : index
    %828 = vector.load %arg1[%827, %c0_367] : memref<2x64xf32, #tpu.memory_space<vmem>>, vector<1x64xf32>
    %829 = vector.extract_strided_slice %828 {offsets = [0, 0], sizes = [1, 16], strides = [1, 1]} : vector<1x64xf32> to vector<1x16xf32>
    %c0_368 = arith.constant 0 : index
    %c0_369 = arith.constant 0 : index
    %830 = vector.load %arg2[%c0_368, %c0_369] : memref<16x64xf32, #tpu.memory_space<vmem>>, vector<16x16xf32>
    %cst_370 = arith.constant dense<0.000000e+00> : vector<1x16xf32>
    %831 = tpu.matmul %811, %830, %cst_370 {dimension_numbers = #tpu.dot_dimension_numbers<[1], [0], [0], [1], [0, 0, 1, 1], [], []>} : vector<1x16xf32>, vector<16x16xf32>, vector<1x16xf32> -> vector<1x16xf32>
    %832 = arith.addf %829, %831 : vector<1x16xf32>
    %833 = arith.negf %832 : vector<1x16xf32>
    %834 = math.exp %833 : vector<1x16xf32>
    %cst_371 = arith.constant 1.000000e+00 : f32
    %835 = vector.broadcast %cst_371 : f32 to vector<1x16xf32>
    %836 = arith.addf %835, %834 : vector<1x16xf32>
    %837 = arith.divf %835, %836 : vector<1x16xf32>
    %838 = vector.extract_strided_slice %828 {offsets = [0, 16], sizes = [1, 16], strides = [1, 1]} : vector<1x64xf32> to vector<1x16xf32>
    %c0_372 = arith.constant 0 : index
    %c16_373 = arith.constant 16 : index
    %839 = vector.load %arg2[%c0_372, %c16_373] : memref<16x64xf32, #tpu.memory_space<vmem>>, vector<16x16xf32>
    %cst_374 = arith.constant dense<0.000000e+00> : vector<1x16xf32>
    %840 = tpu.matmul %811, %839, %cst_374 {dimension_numbers = #tpu.dot_dimension_numbers<[1], [0], [0], [1], [0, 0, 1, 1], [], []>} : vector<1x16xf32>, vector<16x16xf32>, vector<1x16xf32> -> vector<1x16xf32>
    %841 = arith.addf %838, %840 : vector<1x16xf32>
    %842 = arith.negf %841 : vector<1x16xf32>
    %843 = math.exp %842 : vector<1x16xf32>
    %cst_375 = arith.constant 1.000000e+00 : f32
    %844 = vector.broadcast %cst_375 : f32 to vector<1x16xf32>
    %845 = arith.addf %844, %843 : vector<1x16xf32>
    %846 = arith.divf %844, %845 : vector<1x16xf32>
    %847 = vector.extract_strided_slice %828 {offsets = [0, 32], sizes = [1, 16], strides = [1, 1]} : vector<1x64xf32> to vector<1x16xf32>
    %c0_376 = arith.constant 0 : index
    %c32_377 = arith.constant 32 : index
    %848 = vector.load %arg2[%c0_376, %c32_377] : memref<16x64xf32, #tpu.memory_space<vmem>>, vector<16x16xf32>
    %cst_378 = arith.constant dense<0.000000e+00> : vector<1x16xf32>
    %849 = tpu.matmul %811, %848, %cst_378 {dimension_numbers = #tpu.dot_dimension_numbers<[1], [0], [0], [1], [0, 0, 1, 1], [], []>} : vector<1x16xf32>, vector<16x16xf32>, vector<1x16xf32> -> vector<1x16xf32>
    %850 = arith.addf %847, %849 : vector<1x16xf32>
    %851 = math.tanh %850 : vector<1x16xf32>
    %852 = vector.extract_strided_slice %828 {offsets = [0, 48], sizes = [1, 16], strides = [1, 1]} : vector<1x64xf32> to vector<1x16xf32>
    %c0_379 = arith.constant 0 : index
    %c48_380 = arith.constant 48 : index
    %853 = vector.load %arg2[%c0_379, %c48_380] : memref<16x64xf32, #tpu.memory_space<vmem>>, vector<16x16xf32>
    %cst_381 = arith.constant dense<0.000000e+00> : vector<1x16xf32>
    %854 = tpu.matmul %811, %853, %cst_381 {dimension_numbers = #tpu.dot_dimension_numbers<[1], [0], [0], [1], [0, 0, 1, 1], [], []>} : vector<1x16xf32>, vector<16x16xf32>, vector<1x16xf32> -> vector<1x16xf32>
    %855 = arith.addf %852, %854 : vector<1x16xf32>
    %856 = arith.negf %855 : vector<1x16xf32>
    %857 = math.exp %856 : vector<1x16xf32>
    %cst_382 = arith.constant 1.000000e+00 : f32
    %858 = vector.broadcast %cst_382 : f32 to vector<1x16xf32>
    %859 = arith.addf %858, %857 : vector<1x16xf32>
    %860 = arith.divf %858, %859 : vector<1x16xf32>
    %861 = arith.mulf %846, %809 : vector<1x16xf32>
    %862 = arith.mulf %837, %851 : vector<1x16xf32>
    %863 = arith.addf %861, %862 : vector<1x16xf32>
    %864 = math.tanh %863 : vector<1x16xf32>
    %865 = arith.mulf %860, %864 : vector<1x16xf32>
    %866 = arith.index_cast %c15_i32 : i32 to index
    %c0_383 = arith.constant 0 : index
    %c0_384 = arith.constant 0 : index
    %867 = vector.load %arg3[%866, %c0_383, %c0_384] : memref<16x1x16xf32, #tpu.memory_space<vmem>>, vector<1x1x16xf32>
    %868 = vector.shape_cast %867 : vector<1x1x16xf32> to vector<1x16xf32>
    %869 = vector.shape_cast %865 : vector<1x16xf32> to vector<1x1x16xf32>
    tpu.vector_store %arg3[%866, %c0_383, %c0_384], %869 {strides = array<i32>} : memref<16x1x16xf32, #tpu.memory_space<vmem>>, vector<1x1x16xf32>,
    %c16_i32_385 = arith.constant 16 : i32
    %c0_386 = arith.constant 0 : index
    %c0_387 = arith.constant 0 : index
    %870 = vector.load %arg4[%c0_386, %c0_387] : memref<1x16xf32, #tpu.memory_space<vmem>>, vector<1x16xf32>
    tpu.vector_store %arg4[%c0_386, %c0_387], %865 {strides = array<i32>} : memref<1x16xf32, #tpu.memory_space<vmem>>, vector<1x16xf32>,
    %c0_388 = arith.constant 0 : index
    %c0_389 = arith.constant 0 : index
    %871 = vector.load %arg5[%c0_388, %c0_389] : memref<1x16xf32, #tpu.memory_space<vmem>>, vector<1x16xf32>
    tpu.vector_store %arg5[%c0_388, %c0_389], %863 {strides = array<i32>} : memref<1x16xf32, #tpu.memory_space<vmem>>, vector<1x16xf32>,
    return
  }
  func.func @transform_0(%arg0: i32) -> (i32, i32) {
    %c0_i32 = arith.constant 0 : i32
    %c0_i32_0 = arith.constant 0 : i32
    %c0_i32_1 = arith.constant 0 : i32
    return %c0_i32, %c0_i32_0 : i32, i32
  }
  func.func @transform_1(%arg0: i32) -> (i32, i32) {
    %c0_i32 = arith.constant 0 : i32
    %c0_i32_0 = arith.constant 0 : i32
    %c0_i32_1 = arith.constant 0 : i32
    return %c0_i32, %c0_i32_0 : i32, i32
  }
  func.func @transform_2(%arg0: i32) -> (i32, i32, i32) {
    %c0_i32 = arith.constant 0 : i32
    %c0_i32_0 = arith.constant 0 : i32
    %c0_i32_1 = arith.constant 0 : i32
    return %arg0, %c0_i32, %c0_i32_0 : i32, i32, i32
  }
}

module attributes {stable_mosaic.version = 11 : i64} {
  func.func @_lstm_seq_kernel(%arg0: i32, %arg1: i32, %arg2: memref<8x2x128xf32, #tpu.memory_space<vmem>>, %arg3: memref<32x128xf32, #tpu.memory_space<vmem>>, %arg4: memref<2x32xf32, #tpu.memory_space<vmem>>, %arg5: memref<2x32xf32, #tpu.memory_space<vmem>>, %arg6: memref<2x32xf32, #tpu.memory_space<vmem>>) attributes {dimension_semantics = [#tpu.dimension_semantics<parallel>, #tpu.dimension_semantics<arbitrary>], iteration_bounds = array<i64: 1, 1>, scalar_prefetch = 0 : i64, scratch_operands = 2 : i64, tpu.core_type = #tpu.core_type<tc>, window_params = [{transform_indices = @transform_0, window_bounds = array<i64: 8, 2, 128>}, {pipeline_mode = #tpu.pipeline_mode<synchronous>, transform_indices = @transform_1, window_bounds = array<i64: 32, 128>}, {transform_indices = @transform_2, window_bounds = array<i64: 2, 32>}]} {
    %c0_i32 = arith.constant 0 : i32
    %0 = arith.cmpi eq, %arg1, %c0_i32 : i32
    %1 = arith.extui %0 : i1 to i32
    %c0_i32_0 = arith.constant 0 : i32
    %2 = arith.cmpi ne, %1, %c0_i32_0 : i32
    scf.if %2 {
      %cst_143 = arith.constant 0.000000e+00 : f32
      %330 = vector.broadcast %cst_143 : f32 to vector<2x32xf32>
      %c0_144 = arith.constant 0 : index
      %c0_145 = arith.constant 0 : index
      %331 = vector.load %arg5[%c0_144, %c0_145] : memref<2x32xf32, #tpu.memory_space<vmem>>, vector<2x32xf32>
      tpu.vector_store %arg5[%c0_144, %c0_145], %330 {strides = array<i32>} : memref<2x32xf32, #tpu.memory_space<vmem>>, vector<2x32xf32>,
      %cst_146 = arith.constant 0.000000e+00 : f32
      %332 = vector.broadcast %cst_146 : f32 to vector<2x32xf32>
      %c0_147 = arith.constant 0 : index
      %c0_148 = arith.constant 0 : index
      %333 = vector.load %arg6[%c0_147, %c0_148] : memref<2x32xf32, #tpu.memory_space<vmem>>, vector<2x32xf32>
      tpu.vector_store %arg6[%c0_147, %c0_148], %332 {strides = array<i32>} : memref<2x32xf32, #tpu.memory_space<vmem>>, vector<2x32xf32>,
    } else {
    }
    %c0 = arith.constant 0 : index
    %c0_1 = arith.constant 0 : index
    %3 = vector.load %arg5[%c0, %c0_1] : memref<2x32xf32, #tpu.memory_space<vmem>>, vector<2x32xf32>
    %c0_2 = arith.constant 0 : index
    %c0_3 = arith.constant 0 : index
    %4 = vector.load %arg6[%c0_2, %c0_3] : memref<2x32xf32, #tpu.memory_space<vmem>>, vector<2x32xf32>
    %c0_i32_4 = arith.constant 0 : i32
    %5 = arith.index_cast %c0_i32_4 : i32 to index
    %c0_5 = arith.constant 0 : index
    %c0_6 = arith.constant 0 : index
    %6 = vector.load %arg2[%5, %c0_5, %c0_6] : memref<8x2x128xf32, #tpu.memory_space<vmem>>, vector<1x2x128xf32>
    %7 = vector.shape_cast %6 : vector<1x2x128xf32> to vector<2x128xf32>
    %8 = vector.extract_strided_slice %7 {offsets = [0, 0], sizes = [2, 32], strides = [1, 1]} : vector<2x128xf32> to vector<2x32xf32>
    %c0_7 = arith.constant 0 : index
    %c0_8 = arith.constant 0 : index
    %9 = vector.load %arg3[%c0_7, %c0_8] : memref<32x128xf32, #tpu.memory_space<vmem>>, vector<32x32xf32>
    %cst = arith.constant dense<0.000000e+00> : vector<2x32xf32>
    %10 = tpu.matmul %3, %9, %cst {dimension_numbers = #tpu.dot_dimension_numbers<[1], [0], [0], [1], [0, 0, 1, 1], [], []>} : vector<2x32xf32>, vector<32x32xf32>, vector<2x32xf32> -> vector<2x32xf32>
    %11 = arith.addf %8, %10 : vector<2x32xf32>
    %12 = arith.negf %11 : vector<2x32xf32>
    %13 = math.exp %12 : vector<2x32xf32>
    %cst_9 = arith.constant 1.000000e+00 : f32
    %14 = vector.broadcast %cst_9 : f32 to vector<2x32xf32>
    %15 = arith.addf %14, %13 : vector<2x32xf32>
    %16 = arith.divf %14, %15 : vector<2x32xf32>
    %17 = vector.extract_strided_slice %7 {offsets = [0, 32], sizes = [2, 32], strides = [1, 1]} : vector<2x128xf32> to vector<2x32xf32>
    %c0_10 = arith.constant 0 : index
    %c32 = arith.constant 32 : index
    %18 = vector.load %arg3[%c0_10, %c32] : memref<32x128xf32, #tpu.memory_space<vmem>>, vector<32x32xf32>
    %cst_11 = arith.constant dense<0.000000e+00> : vector<2x32xf32>
    %19 = tpu.matmul %3, %18, %cst_11 {dimension_numbers = #tpu.dot_dimension_numbers<[1], [0], [0], [1], [0, 0, 1, 1], [], []>} : vector<2x32xf32>, vector<32x32xf32>, vector<2x32xf32> -> vector<2x32xf32>
    %20 = arith.addf %17, %19 : vector<2x32xf32>
    %21 = arith.negf %20 : vector<2x32xf32>
    %22 = math.exp %21 : vector<2x32xf32>
    %cst_12 = arith.constant 1.000000e+00 : f32
    %23 = vector.broadcast %cst_12 : f32 to vector<2x32xf32>
    %24 = arith.addf %23, %22 : vector<2x32xf32>
    %25 = arith.divf %23, %24 : vector<2x32xf32>
    %26 = vector.extract_strided_slice %7 {offsets = [0, 64], sizes = [2, 32], strides = [1, 1]} : vector<2x128xf32> to vector<2x32xf32>
    %c0_13 = arith.constant 0 : index
    %c64 = arith.constant 64 : index
    %27 = vector.load %arg3[%c0_13, %c64] : memref<32x128xf32, #tpu.memory_space<vmem>>, vector<32x32xf32>
    %cst_14 = arith.constant dense<0.000000e+00> : vector<2x32xf32>
    %28 = tpu.matmul %3, %27, %cst_14 {dimension_numbers = #tpu.dot_dimension_numbers<[1], [0], [0], [1], [0, 0, 1, 1], [], []>} : vector<2x32xf32>, vector<32x32xf32>, vector<2x32xf32> -> vector<2x32xf32>
    %29 = arith.addf %26, %28 : vector<2x32xf32>
    %30 = math.tanh %29 : vector<2x32xf32>
    %31 = vector.extract_strided_slice %7 {offsets = [0, 96], sizes = [2, 32], strides = [1, 1]} : vector<2x128xf32> to vector<2x32xf32>
    %c0_15 = arith.constant 0 : index
    %c96 = arith.constant 96 : index
    %32 = vector.load %arg3[%c0_15, %c96] : memref<32x128xf32, #tpu.memory_space<vmem>>, vector<32x32xf32>
    %cst_16 = arith.constant dense<0.000000e+00> : vector<2x32xf32>
    %33 = tpu.matmul %3, %32, %cst_16 {dimension_numbers = #tpu.dot_dimension_numbers<[1], [0], [0], [1], [0, 0, 1, 1], [], []>} : vector<2x32xf32>, vector<32x32xf32>, vector<2x32xf32> -> vector<2x32xf32>
    %34 = arith.addf %31, %33 : vector<2x32xf32>
    %35 = arith.negf %34 : vector<2x32xf32>
    %36 = math.exp %35 : vector<2x32xf32>
    %cst_17 = arith.constant 1.000000e+00 : f32
    %37 = vector.broadcast %cst_17 : f32 to vector<2x32xf32>
    %38 = arith.addf %37, %36 : vector<2x32xf32>
    %39 = arith.divf %37, %38 : vector<2x32xf32>
    %40 = arith.mulf %25, %4 : vector<2x32xf32>
    %41 = arith.mulf %16, %30 : vector<2x32xf32>
    %42 = arith.addf %40, %41 : vector<2x32xf32>
    %43 = math.tanh %42 : vector<2x32xf32>
    %44 = arith.mulf %39, %43 : vector<2x32xf32>
    %c1_i32 = arith.constant 1 : i32
    %45 = arith.index_cast %c1_i32 : i32 to index
    %c0_18 = arith.constant 0 : index
    %c0_19 = arith.constant 0 : index
    %46 = vector.load %arg2[%45, %c0_18, %c0_19] : memref<8x2x128xf32, #tpu.memory_space<vmem>>, vector<1x2x128xf32>
    %47 = vector.shape_cast %46 : vector<1x2x128xf32> to vector<2x128xf32>
    %48 = vector.extract_strided_slice %47 {offsets = [0, 0], sizes = [2, 32], strides = [1, 1]} : vector<2x128xf32> to vector<2x32xf32>
    %c0_20 = arith.constant 0 : index
    %c0_21 = arith.constant 0 : index
    %49 = vector.load %arg3[%c0_20, %c0_21] : memref<32x128xf32, #tpu.memory_space<vmem>>, vector<32x32xf32>
    %cst_22 = arith.constant dense<0.000000e+00> : vector<2x32xf32>
    %50 = tpu.matmul %44, %49, %cst_22 {dimension_numbers = #tpu.dot_dimension_numbers<[1], [0], [0], [1], [0, 0, 1, 1], [], []>} : vector<2x32xf32>, vector<32x32xf32>, vector<2x32xf32> -> vector<2x32xf32>
    %51 = arith.addf %48, %50 : vector<2x32xf32>
    %52 = arith.negf %51 : vector<2x32xf32>
    %53 = math.exp %52 : vector<2x32xf32>
    %cst_23 = arith.constant 1.000000e+00 : f32
    %54 = vector.broadcast %cst_23 : f32 to vector<2x32xf32>
    %55 = arith.addf %54, %53 : vector<2x32xf32>
    %56 = arith.divf %54, %55 : vector<2x32xf32>
    %57 = vector.extract_strided_slice %47 {offsets = [0, 32], sizes = [2, 32], strides = [1, 1]} : vector<2x128xf32> to vector<2x32xf32>
    %c0_24 = arith.constant 0 : index
    %c32_25 = arith.constant 32 : index
    %58 = vector.load %arg3[%c0_24, %c32_25] : memref<32x128xf32, #tpu.memory_space<vmem>>, vector<32x32xf32>
    %cst_26 = arith.constant dense<0.000000e+00> : vector<2x32xf32>
    %59 = tpu.matmul %44, %58, %cst_26 {dimension_numbers = #tpu.dot_dimension_numbers<[1], [0], [0], [1], [0, 0, 1, 1], [], []>} : vector<2x32xf32>, vector<32x32xf32>, vector<2x32xf32> -> vector<2x32xf32>
    %60 = arith.addf %57, %59 : vector<2x32xf32>
    %61 = arith.negf %60 : vector<2x32xf32>
    %62 = math.exp %61 : vector<2x32xf32>
    %cst_27 = arith.constant 1.000000e+00 : f32
    %63 = vector.broadcast %cst_27 : f32 to vector<2x32xf32>
    %64 = arith.addf %63, %62 : vector<2x32xf32>
    %65 = arith.divf %63, %64 : vector<2x32xf32>
    %66 = vector.extract_strided_slice %47 {offsets = [0, 64], sizes = [2, 32], strides = [1, 1]} : vector<2x128xf32> to vector<2x32xf32>
    %c0_28 = arith.constant 0 : index
    %c64_29 = arith.constant 64 : index
    %67 = vector.load %arg3[%c0_28, %c64_29] : memref<32x128xf32, #tpu.memory_space<vmem>>, vector<32x32xf32>
    %cst_30 = arith.constant dense<0.000000e+00> : vector<2x32xf32>
    %68 = tpu.matmul %44, %67, %cst_30 {dimension_numbers = #tpu.dot_dimension_numbers<[1], [0], [0], [1], [0, 0, 1, 1], [], []>} : vector<2x32xf32>, vector<32x32xf32>, vector<2x32xf32> -> vector<2x32xf32>
    %69 = arith.addf %66, %68 : vector<2x32xf32>
    %70 = math.tanh %69 : vector<2x32xf32>
    %71 = vector.extract_strided_slice %47 {offsets = [0, 96], sizes = [2, 32], strides = [1, 1]} : vector<2x128xf32> to vector<2x32xf32>
    %c0_31 = arith.constant 0 : index
    %c96_32 = arith.constant 96 : index
    %72 = vector.load %arg3[%c0_31, %c96_32] : memref<32x128xf32, #tpu.memory_space<vmem>>, vector<32x32xf32>
    %cst_33 = arith.constant dense<0.000000e+00> : vector<2x32xf32>
    %73 = tpu.matmul %44, %72, %cst_33 {dimension_numbers = #tpu.dot_dimension_numbers<[1], [0], [0], [1], [0, 0, 1, 1], [], []>} : vector<2x32xf32>, vector<32x32xf32>, vector<2x32xf32> -> vector<2x32xf32>
    %74 = arith.addf %71, %73 : vector<2x32xf32>
    %75 = arith.negf %74 : vector<2x32xf32>
    %76 = math.exp %75 : vector<2x32xf32>
    %cst_34 = arith.constant 1.000000e+00 : f32
    %77 = vector.broadcast %cst_34 : f32 to vector<2x32xf32>
    %78 = arith.addf %77, %76 : vector<2x32xf32>
    %79 = arith.divf %77, %78 : vector<2x32xf32>
    %80 = arith.mulf %65, %42 : vector<2x32xf32>
    %81 = arith.mulf %56, %70 : vector<2x32xf32>
    %82 = arith.addf %80, %81 : vector<2x32xf32>
    %83 = math.tanh %82 : vector<2x32xf32>
    %84 = arith.mulf %79, %83 : vector<2x32xf32>
    %c2_i32 = arith.constant 2 : i32
    %85 = arith.index_cast %c2_i32 : i32 to index
    %c0_35 = arith.constant 0 : index
    %c0_36 = arith.constant 0 : index
    %86 = vector.load %arg2[%85, %c0_35, %c0_36] : memref<8x2x128xf32, #tpu.memory_space<vmem>>, vector<1x2x128xf32>
    %87 = vector.shape_cast %86 : vector<1x2x128xf32> to vector<2x128xf32>
    %88 = vector.extract_strided_slice %87 {offsets = [0, 0], sizes = [2, 32], strides = [1, 1]} : vector<2x128xf32> to vector<2x32xf32>
    %c0_37 = arith.constant 0 : index
    %c0_38 = arith.constant 0 : index
    %89 = vector.load %arg3[%c0_37, %c0_38] : memref<32x128xf32, #tpu.memory_space<vmem>>, vector<32x32xf32>
    %cst_39 = arith.constant dense<0.000000e+00> : vector<2x32xf32>
    %90 = tpu.matmul %84, %89, %cst_39 {dimension_numbers = #tpu.dot_dimension_numbers<[1], [0], [0], [1], [0, 0, 1, 1], [], []>} : vector<2x32xf32>, vector<32x32xf32>, vector<2x32xf32> -> vector<2x32xf32>
    %91 = arith.addf %88, %90 : vector<2x32xf32>
    %92 = arith.negf %91 : vector<2x32xf32>
    %93 = math.exp %92 : vector<2x32xf32>
    %cst_40 = arith.constant 1.000000e+00 : f32
    %94 = vector.broadcast %cst_40 : f32 to vector<2x32xf32>
    %95 = arith.addf %94, %93 : vector<2x32xf32>
    %96 = arith.divf %94, %95 : vector<2x32xf32>
    %97 = vector.extract_strided_slice %87 {offsets = [0, 32], sizes = [2, 32], strides = [1, 1]} : vector<2x128xf32> to vector<2x32xf32>
    %c0_41 = arith.constant 0 : index
    %c32_42 = arith.constant 32 : index
    %98 = vector.load %arg3[%c0_41, %c32_42] : memref<32x128xf32, #tpu.memory_space<vmem>>, vector<32x32xf32>
    %cst_43 = arith.constant dense<0.000000e+00> : vector<2x32xf32>
    %99 = tpu.matmul %84, %98, %cst_43 {dimension_numbers = #tpu.dot_dimension_numbers<[1], [0], [0], [1], [0, 0, 1, 1], [], []>} : vector<2x32xf32>, vector<32x32xf32>, vector<2x32xf32> -> vector<2x32xf32>
    %100 = arith.addf %97, %99 : vector<2x32xf32>
    %101 = arith.negf %100 : vector<2x32xf32>
    %102 = math.exp %101 : vector<2x32xf32>
    %cst_44 = arith.constant 1.000000e+00 : f32
    %103 = vector.broadcast %cst_44 : f32 to vector<2x32xf32>
    %104 = arith.addf %103, %102 : vector<2x32xf32>
    %105 = arith.divf %103, %104 : vector<2x32xf32>
    %106 = vector.extract_strided_slice %87 {offsets = [0, 64], sizes = [2, 32], strides = [1, 1]} : vector<2x128xf32> to vector<2x32xf32>
    %c0_45 = arith.constant 0 : index
    %c64_46 = arith.constant 64 : index
    %107 = vector.load %arg3[%c0_45, %c64_46] : memref<32x128xf32, #tpu.memory_space<vmem>>, vector<32x32xf32>
    %cst_47 = arith.constant dense<0.000000e+00> : vector<2x32xf32>
    %108 = tpu.matmul %84, %107, %cst_47 {dimension_numbers = #tpu.dot_dimension_numbers<[1], [0], [0], [1], [0, 0, 1, 1], [], []>} : vector<2x32xf32>, vector<32x32xf32>, vector<2x32xf32> -> vector<2x32xf32>
    %109 = arith.addf %106, %108 : vector<2x32xf32>
    %110 = math.tanh %109 : vector<2x32xf32>
    %111 = vector.extract_strided_slice %87 {offsets = [0, 96], sizes = [2, 32], strides = [1, 1]} : vector<2x128xf32> to vector<2x32xf32>
    %c0_48 = arith.constant 0 : index
    %c96_49 = arith.constant 96 : index
    %112 = vector.load %arg3[%c0_48, %c96_49] : memref<32x128xf32, #tpu.memory_space<vmem>>, vector<32x32xf32>
    %cst_50 = arith.constant dense<0.000000e+00> : vector<2x32xf32>
    %113 = tpu.matmul %84, %112, %cst_50 {dimension_numbers = #tpu.dot_dimension_numbers<[1], [0], [0], [1], [0, 0, 1, 1], [], []>} : vector<2x32xf32>, vector<32x32xf32>, vector<2x32xf32> -> vector<2x32xf32>
    %114 = arith.addf %111, %113 : vector<2x32xf32>
    %115 = arith.negf %114 : vector<2x32xf32>
    %116 = math.exp %115 : vector<2x32xf32>
    %cst_51 = arith.constant 1.000000e+00 : f32
    %117 = vector.broadcast %cst_51 : f32 to vector<2x32xf32>
    %118 = arith.addf %117, %116 : vector<2x32xf32>
    %119 = arith.divf %117, %118 : vector<2x32xf32>
    %120 = arith.mulf %105, %82 : vector<2x32xf32>
    %121 = arith.mulf %96, %110 : vector<2x32xf32>
    %122 = arith.addf %120, %121 : vector<2x32xf32>
    %123 = math.tanh %122 : vector<2x32xf32>
    %124 = arith.mulf %119, %123 : vector<2x32xf32>
    %c3_i32 = arith.constant 3 : i32
    %125 = arith.index_cast %c3_i32 : i32 to index
    %c0_52 = arith.constant 0 : index
    %c0_53 = arith.constant 0 : index
    %126 = vector.load %arg2[%125, %c0_52, %c0_53] : memref<8x2x128xf32, #tpu.memory_space<vmem>>, vector<1x2x128xf32>
    %127 = vector.shape_cast %126 : vector<1x2x128xf32> to vector<2x128xf32>
    %128 = vector.extract_strided_slice %127 {offsets = [0, 0], sizes = [2, 32], strides = [1, 1]} : vector<2x128xf32> to vector<2x32xf32>
    %c0_54 = arith.constant 0 : index
    %c0_55 = arith.constant 0 : index
    %129 = vector.load %arg3[%c0_54, %c0_55] : memref<32x128xf32, #tpu.memory_space<vmem>>, vector<32x32xf32>
    %cst_56 = arith.constant dense<0.000000e+00> : vector<2x32xf32>
    %130 = tpu.matmul %124, %129, %cst_56 {dimension_numbers = #tpu.dot_dimension_numbers<[1], [0], [0], [1], [0, 0, 1, 1], [], []>} : vector<2x32xf32>, vector<32x32xf32>, vector<2x32xf32> -> vector<2x32xf32>
    %131 = arith.addf %128, %130 : vector<2x32xf32>
    %132 = arith.negf %131 : vector<2x32xf32>
    %133 = math.exp %132 : vector<2x32xf32>
    %cst_57 = arith.constant 1.000000e+00 : f32
    %134 = vector.broadcast %cst_57 : f32 to vector<2x32xf32>
    %135 = arith.addf %134, %133 : vector<2x32xf32>
    %136 = arith.divf %134, %135 : vector<2x32xf32>
    %137 = vector.extract_strided_slice %127 {offsets = [0, 32], sizes = [2, 32], strides = [1, 1]} : vector<2x128xf32> to vector<2x32xf32>
    %c0_58 = arith.constant 0 : index
    %c32_59 = arith.constant 32 : index
    %138 = vector.load %arg3[%c0_58, %c32_59] : memref<32x128xf32, #tpu.memory_space<vmem>>, vector<32x32xf32>
    %cst_60 = arith.constant dense<0.000000e+00> : vector<2x32xf32>
    %139 = tpu.matmul %124, %138, %cst_60 {dimension_numbers = #tpu.dot_dimension_numbers<[1], [0], [0], [1], [0, 0, 1, 1], [], []>} : vector<2x32xf32>, vector<32x32xf32>, vector<2x32xf32> -> vector<2x32xf32>
    %140 = arith.addf %137, %139 : vector<2x32xf32>
    %141 = arith.negf %140 : vector<2x32xf32>
    %142 = math.exp %141 : vector<2x32xf32>
    %cst_61 = arith.constant 1.000000e+00 : f32
    %143 = vector.broadcast %cst_61 : f32 to vector<2x32xf32>
    %144 = arith.addf %143, %142 : vector<2x32xf32>
    %145 = arith.divf %143, %144 : vector<2x32xf32>
    %146 = vector.extract_strided_slice %127 {offsets = [0, 64], sizes = [2, 32], strides = [1, 1]} : vector<2x128xf32> to vector<2x32xf32>
    %c0_62 = arith.constant 0 : index
    %c64_63 = arith.constant 64 : index
    %147 = vector.load %arg3[%c0_62, %c64_63] : memref<32x128xf32, #tpu.memory_space<vmem>>, vector<32x32xf32>
    %cst_64 = arith.constant dense<0.000000e+00> : vector<2x32xf32>
    %148 = tpu.matmul %124, %147, %cst_64 {dimension_numbers = #tpu.dot_dimension_numbers<[1], [0], [0], [1], [0, 0, 1, 1], [], []>} : vector<2x32xf32>, vector<32x32xf32>, vector<2x32xf32> -> vector<2x32xf32>
    %149 = arith.addf %146, %148 : vector<2x32xf32>
    %150 = math.tanh %149 : vector<2x32xf32>
    %151 = vector.extract_strided_slice %127 {offsets = [0, 96], sizes = [2, 32], strides = [1, 1]} : vector<2x128xf32> to vector<2x32xf32>
    %c0_65 = arith.constant 0 : index
    %c96_66 = arith.constant 96 : index
    %152 = vector.load %arg3[%c0_65, %c96_66] : memref<32x128xf32, #tpu.memory_space<vmem>>, vector<32x32xf32>
    %cst_67 = arith.constant dense<0.000000e+00> : vector<2x32xf32>
    %153 = tpu.matmul %124, %152, %cst_67 {dimension_numbers = #tpu.dot_dimension_numbers<[1], [0], [0], [1], [0, 0, 1, 1], [], []>} : vector<2x32xf32>, vector<32x32xf32>, vector<2x32xf32> -> vector<2x32xf32>
    %154 = arith.addf %151, %153 : vector<2x32xf32>
    %155 = arith.negf %154 : vector<2x32xf32>
    %156 = math.exp %155 : vector<2x32xf32>
    %cst_68 = arith.constant 1.000000e+00 : f32
    %157 = vector.broadcast %cst_68 : f32 to vector<2x32xf32>
    %158 = arith.addf %157, %156 : vector<2x32xf32>
    %159 = arith.divf %157, %158 : vector<2x32xf32>
    %160 = arith.mulf %145, %122 : vector<2x32xf32>
    %161 = arith.mulf %136, %150 : vector<2x32xf32>
    %162 = arith.addf %160, %161 : vector<2x32xf32>
    %163 = math.tanh %162 : vector<2x32xf32>
    %164 = arith.mulf %159, %163 : vector<2x32xf32>
    %c4_i32 = arith.constant 4 : i32
    %165 = arith.index_cast %c4_i32 : i32 to index
    %c0_69 = arith.constant 0 : index
    %c0_70 = arith.constant 0 : index
    %166 = vector.load %arg2[%165, %c0_69, %c0_70] : memref<8x2x128xf32, #tpu.memory_space<vmem>>, vector<1x2x128xf32>
    %167 = vector.shape_cast %166 : vector<1x2x128xf32> to vector<2x128xf32>
    %168 = vector.extract_strided_slice %167 {offsets = [0, 0], sizes = [2, 32], strides = [1, 1]} : vector<2x128xf32> to vector<2x32xf32>
    %c0_71 = arith.constant 0 : index
    %c0_72 = arith.constant 0 : index
    %169 = vector.load %arg3[%c0_71, %c0_72] : memref<32x128xf32, #tpu.memory_space<vmem>>, vector<32x32xf32>
    %cst_73 = arith.constant dense<0.000000e+00> : vector<2x32xf32>
    %170 = tpu.matmul %164, %169, %cst_73 {dimension_numbers = #tpu.dot_dimension_numbers<[1], [0], [0], [1], [0, 0, 1, 1], [], []>} : vector<2x32xf32>, vector<32x32xf32>, vector<2x32xf32> -> vector<2x32xf32>
    %171 = arith.addf %168, %170 : vector<2x32xf32>
    %172 = arith.negf %171 : vector<2x32xf32>
    %173 = math.exp %172 : vector<2x32xf32>
    %cst_74 = arith.constant 1.000000e+00 : f32
    %174 = vector.broadcast %cst_74 : f32 to vector<2x32xf32>
    %175 = arith.addf %174, %173 : vector<2x32xf32>
    %176 = arith.divf %174, %175 : vector<2x32xf32>
    %177 = vector.extract_strided_slice %167 {offsets = [0, 32], sizes = [2, 32], strides = [1, 1]} : vector<2x128xf32> to vector<2x32xf32>
    %c0_75 = arith.constant 0 : index
    %c32_76 = arith.constant 32 : index
    %178 = vector.load %arg3[%c0_75, %c32_76] : memref<32x128xf32, #tpu.memory_space<vmem>>, vector<32x32xf32>
    %cst_77 = arith.constant dense<0.000000e+00> : vector<2x32xf32>
    %179 = tpu.matmul %164, %178, %cst_77 {dimension_numbers = #tpu.dot_dimension_numbers<[1], [0], [0], [1], [0, 0, 1, 1], [], []>} : vector<2x32xf32>, vector<32x32xf32>, vector<2x32xf32> -> vector<2x32xf32>
    %180 = arith.addf %177, %179 : vector<2x32xf32>
    %181 = arith.negf %180 : vector<2x32xf32>
    %182 = math.exp %181 : vector<2x32xf32>
    %cst_78 = arith.constant 1.000000e+00 : f32
    %183 = vector.broadcast %cst_78 : f32 to vector<2x32xf32>
    %184 = arith.addf %183, %182 : vector<2x32xf32>
    %185 = arith.divf %183, %184 : vector<2x32xf32>
    %186 = vector.extract_strided_slice %167 {offsets = [0, 64], sizes = [2, 32], strides = [1, 1]} : vector<2x128xf32> to vector<2x32xf32>
    %c0_79 = arith.constant 0 : index
    %c64_80 = arith.constant 64 : index
    %187 = vector.load %arg3[%c0_79, %c64_80] : memref<32x128xf32, #tpu.memory_space<vmem>>, vector<32x32xf32>
    %cst_81 = arith.constant dense<0.000000e+00> : vector<2x32xf32>
    %188 = tpu.matmul %164, %187, %cst_81 {dimension_numbers = #tpu.dot_dimension_numbers<[1], [0], [0], [1], [0, 0, 1, 1], [], []>} : vector<2x32xf32>, vector<32x32xf32>, vector<2x32xf32> -> vector<2x32xf32>
    %189 = arith.addf %186, %188 : vector<2x32xf32>
    %190 = math.tanh %189 : vector<2x32xf32>
    %191 = vector.extract_strided_slice %167 {offsets = [0, 96], sizes = [2, 32], strides = [1, 1]} : vector<2x128xf32> to vector<2x32xf32>
    %c0_82 = arith.constant 0 : index
    %c96_83 = arith.constant 96 : index
    %192 = vector.load %arg3[%c0_82, %c96_83] : memref<32x128xf32, #tpu.memory_space<vmem>>, vector<32x32xf32>
    %cst_84 = arith.constant dense<0.000000e+00> : vector<2x32xf32>
    %193 = tpu.matmul %164, %192, %cst_84 {dimension_numbers = #tpu.dot_dimension_numbers<[1], [0], [0], [1], [0, 0, 1, 1], [], []>} : vector<2x32xf32>, vector<32x32xf32>, vector<2x32xf32> -> vector<2x32xf32>
    %194 = arith.addf %191, %193 : vector<2x32xf32>
    %195 = arith.negf %194 : vector<2x32xf32>
    %196 = math.exp %195 : vector<2x32xf32>
    %cst_85 = arith.constant 1.000000e+00 : f32
    %197 = vector.broadcast %cst_85 : f32 to vector<2x32xf32>
    %198 = arith.addf %197, %196 : vector<2x32xf32>
    %199 = arith.divf %197, %198 : vector<2x32xf32>
    %200 = arith.mulf %185, %162 : vector<2x32xf32>
    %201 = arith.mulf %176, %190 : vector<2x32xf32>
    %202 = arith.addf %200, %201 : vector<2x32xf32>
    %203 = math.tanh %202 : vector<2x32xf32>
    %204 = arith.mulf %199, %203 : vector<2x32xf32>
    %c5_i32 = arith.constant 5 : i32
    %205 = arith.index_cast %c5_i32 : i32 to index
    %c0_86 = arith.constant 0 : index
    %c0_87 = arith.constant 0 : index
    %206 = vector.load %arg2[%205, %c0_86, %c0_87] : memref<8x2x128xf32, #tpu.memory_space<vmem>>, vector<1x2x128xf32>
    %207 = vector.shape_cast %206 : vector<1x2x128xf32> to vector<2x128xf32>
    %208 = vector.extract_strided_slice %207 {offsets = [0, 0], sizes = [2, 32], strides = [1, 1]} : vector<2x128xf32> to vector<2x32xf32>
    %c0_88 = arith.constant 0 : index
    %c0_89 = arith.constant 0 : index
    %209 = vector.load %arg3[%c0_88, %c0_89] : memref<32x128xf32, #tpu.memory_space<vmem>>, vector<32x32xf32>
    %cst_90 = arith.constant dense<0.000000e+00> : vector<2x32xf32>
    %210 = tpu.matmul %204, %209, %cst_90 {dimension_numbers = #tpu.dot_dimension_numbers<[1], [0], [0], [1], [0, 0, 1, 1], [], []>} : vector<2x32xf32>, vector<32x32xf32>, vector<2x32xf32> -> vector<2x32xf32>
    %211 = arith.addf %208, %210 : vector<2x32xf32>
    %212 = arith.negf %211 : vector<2x32xf32>
    %213 = math.exp %212 : vector<2x32xf32>
    %cst_91 = arith.constant 1.000000e+00 : f32
    %214 = vector.broadcast %cst_91 : f32 to vector<2x32xf32>
    %215 = arith.addf %214, %213 : vector<2x32xf32>
    %216 = arith.divf %214, %215 : vector<2x32xf32>
    %217 = vector.extract_strided_slice %207 {offsets = [0, 32], sizes = [2, 32], strides = [1, 1]} : vector<2x128xf32> to vector<2x32xf32>
    %c0_92 = arith.constant 0 : index
    %c32_93 = arith.constant 32 : index
    %218 = vector.load %arg3[%c0_92, %c32_93] : memref<32x128xf32, #tpu.memory_space<vmem>>, vector<32x32xf32>
    %cst_94 = arith.constant dense<0.000000e+00> : vector<2x32xf32>
    %219 = tpu.matmul %204, %218, %cst_94 {dimension_numbers = #tpu.dot_dimension_numbers<[1], [0], [0], [1], [0, 0, 1, 1], [], []>} : vector<2x32xf32>, vector<32x32xf32>, vector<2x32xf32> -> vector<2x32xf32>
    %220 = arith.addf %217, %219 : vector<2x32xf32>
    %221 = arith.negf %220 : vector<2x32xf32>
    %222 = math.exp %221 : vector<2x32xf32>
    %cst_95 = arith.constant 1.000000e+00 : f32
    %223 = vector.broadcast %cst_95 : f32 to vector<2x32xf32>
    %224 = arith.addf %223, %222 : vector<2x32xf32>
    %225 = arith.divf %223, %224 : vector<2x32xf32>
    %226 = vector.extract_strided_slice %207 {offsets = [0, 64], sizes = [2, 32], strides = [1, 1]} : vector<2x128xf32> to vector<2x32xf32>
    %c0_96 = arith.constant 0 : index
    %c64_97 = arith.constant 64 : index
    %227 = vector.load %arg3[%c0_96, %c64_97] : memref<32x128xf32, #tpu.memory_space<vmem>>, vector<32x32xf32>
    %cst_98 = arith.constant dense<0.000000e+00> : vector<2x32xf32>
    %228 = tpu.matmul %204, %227, %cst_98 {dimension_numbers = #tpu.dot_dimension_numbers<[1], [0], [0], [1], [0, 0, 1, 1], [], []>} : vector<2x32xf32>, vector<32x32xf32>, vector<2x32xf32> -> vector<2x32xf32>
    %229 = arith.addf %226, %228 : vector<2x32xf32>
    %230 = math.tanh %229 : vector<2x32xf32>
    %231 = vector.extract_strided_slice %207 {offsets = [0, 96], sizes = [2, 32], strides = [1, 1]} : vector<2x128xf32> to vector<2x32xf32>
    %c0_99 = arith.constant 0 : index
    %c96_100 = arith.constant 96 : index
    %232 = vector.load %arg3[%c0_99, %c96_100] : memref<32x128xf32, #tpu.memory_space<vmem>>, vector<32x32xf32>
    %cst_101 = arith.constant dense<0.000000e+00> : vector<2x32xf32>
    %233 = tpu.matmul %204, %232, %cst_101 {dimension_numbers = #tpu.dot_dimension_numbers<[1], [0], [0], [1], [0, 0, 1, 1], [], []>} : vector<2x32xf32>, vector<32x32xf32>, vector<2x32xf32> -> vector<2x32xf32>
    %234 = arith.addf %231, %233 : vector<2x32xf32>
    %235 = arith.negf %234 : vector<2x32xf32>
    %236 = math.exp %235 : vector<2x32xf32>
    %cst_102 = arith.constant 1.000000e+00 : f32
    %237 = vector.broadcast %cst_102 : f32 to vector<2x32xf32>
    %238 = arith.addf %237, %236 : vector<2x32xf32>
    %239 = arith.divf %237, %238 : vector<2x32xf32>
    %240 = arith.mulf %225, %202 : vector<2x32xf32>
    %241 = arith.mulf %216, %230 : vector<2x32xf32>
    %242 = arith.addf %240, %241 : vector<2x32xf32>
    %243 = math.tanh %242 : vector<2x32xf32>
    %244 = arith.mulf %239, %243 : vector<2x32xf32>
    %c6_i32 = arith.constant 6 : i32
    %245 = arith.index_cast %c6_i32 : i32 to index
    %c0_103 = arith.constant 0 : index
    %c0_104 = arith.constant 0 : index
    %246 = vector.load %arg2[%245, %c0_103, %c0_104] : memref<8x2x128xf32, #tpu.memory_space<vmem>>, vector<1x2x128xf32>
    %247 = vector.shape_cast %246 : vector<1x2x128xf32> to vector<2x128xf32>
    %248 = vector.extract_strided_slice %247 {offsets = [0, 0], sizes = [2, 32], strides = [1, 1]} : vector<2x128xf32> to vector<2x32xf32>
    %c0_105 = arith.constant 0 : index
    %c0_106 = arith.constant 0 : index
    %249 = vector.load %arg3[%c0_105, %c0_106] : memref<32x128xf32, #tpu.memory_space<vmem>>, vector<32x32xf32>
    %cst_107 = arith.constant dense<0.000000e+00> : vector<2x32xf32>
    %250 = tpu.matmul %244, %249, %cst_107 {dimension_numbers = #tpu.dot_dimension_numbers<[1], [0], [0], [1], [0, 0, 1, 1], [], []>} : vector<2x32xf32>, vector<32x32xf32>, vector<2x32xf32> -> vector<2x32xf32>
    %251 = arith.addf %248, %250 : vector<2x32xf32>
    %252 = arith.negf %251 : vector<2x32xf32>
    %253 = math.exp %252 : vector<2x32xf32>
    %cst_108 = arith.constant 1.000000e+00 : f32
    %254 = vector.broadcast %cst_108 : f32 to vector<2x32xf32>
    %255 = arith.addf %254, %253 : vector<2x32xf32>
    %256 = arith.divf %254, %255 : vector<2x32xf32>
    %257 = vector.extract_strided_slice %247 {offsets = [0, 32], sizes = [2, 32], strides = [1, 1]} : vector<2x128xf32> to vector<2x32xf32>
    %c0_109 = arith.constant 0 : index
    %c32_110 = arith.constant 32 : index
    %258 = vector.load %arg3[%c0_109, %c32_110] : memref<32x128xf32, #tpu.memory_space<vmem>>, vector<32x32xf32>
    %cst_111 = arith.constant dense<0.000000e+00> : vector<2x32xf32>
    %259 = tpu.matmul %244, %258, %cst_111 {dimension_numbers = #tpu.dot_dimension_numbers<[1], [0], [0], [1], [0, 0, 1, 1], [], []>} : vector<2x32xf32>, vector<32x32xf32>, vector<2x32xf32> -> vector<2x32xf32>
    %260 = arith.addf %257, %259 : vector<2x32xf32>
    %261 = arith.negf %260 : vector<2x32xf32>
    %262 = math.exp %261 : vector<2x32xf32>
    %cst_112 = arith.constant 1.000000e+00 : f32
    %263 = vector.broadcast %cst_112 : f32 to vector<2x32xf32>
    %264 = arith.addf %263, %262 : vector<2x32xf32>
    %265 = arith.divf %263, %264 : vector<2x32xf32>
    %266 = vector.extract_strided_slice %247 {offsets = [0, 64], sizes = [2, 32], strides = [1, 1]} : vector<2x128xf32> to vector<2x32xf32>
    %c0_113 = arith.constant 0 : index
    %c64_114 = arith.constant 64 : index
    %267 = vector.load %arg3[%c0_113, %c64_114] : memref<32x128xf32, #tpu.memory_space<vmem>>, vector<32x32xf32>
    %cst_115 = arith.constant dense<0.000000e+00> : vector<2x32xf32>
    %268 = tpu.matmul %244, %267, %cst_115 {dimension_numbers = #tpu.dot_dimension_numbers<[1], [0], [0], [1], [0, 0, 1, 1], [], []>} : vector<2x32xf32>, vector<32x32xf32>, vector<2x32xf32> -> vector<2x32xf32>
    %269 = arith.addf %266, %268 : vector<2x32xf32>
    %270 = math.tanh %269 : vector<2x32xf32>
    %271 = vector.extract_strided_slice %247 {offsets = [0, 96], sizes = [2, 32], strides = [1, 1]} : vector<2x128xf32> to vector<2x32xf32>
    %c0_116 = arith.constant 0 : index
    %c96_117 = arith.constant 96 : index
    %272 = vector.load %arg3[%c0_116, %c96_117] : memref<32x128xf32, #tpu.memory_space<vmem>>, vector<32x32xf32>
    %cst_118 = arith.constant dense<0.000000e+00> : vector<2x32xf32>
    %273 = tpu.matmul %244, %272, %cst_118 {dimension_numbers = #tpu.dot_dimension_numbers<[1], [0], [0], [1], [0, 0, 1, 1], [], []>} : vector<2x32xf32>, vector<32x32xf32>, vector<2x32xf32> -> vector<2x32xf32>
    %274 = arith.addf %271, %273 : vector<2x32xf32>
    %275 = arith.negf %274 : vector<2x32xf32>
    %276 = math.exp %275 : vector<2x32xf32>
    %cst_119 = arith.constant 1.000000e+00 : f32
    %277 = vector.broadcast %cst_119 : f32 to vector<2x32xf32>
    %278 = arith.addf %277, %276 : vector<2x32xf32>
    %279 = arith.divf %277, %278 : vector<2x32xf32>
    %280 = arith.mulf %265, %242 : vector<2x32xf32>
    %281 = arith.mulf %256, %270 : vector<2x32xf32>
    %282 = arith.addf %280, %281 : vector<2x32xf32>
    %283 = math.tanh %282 : vector<2x32xf32>
    %284 = arith.mulf %279, %283 : vector<2x32xf32>
    %c7_i32 = arith.constant 7 : i32
    %285 = arith.index_cast %c7_i32 : i32 to index
    %c0_120 = arith.constant 0 : index
    %c0_121 = arith.constant 0 : index
    %286 = vector.load %arg2[%285, %c0_120, %c0_121] : memref<8x2x128xf32, #tpu.memory_space<vmem>>, vector<1x2x128xf32>
    %287 = vector.shape_cast %286 : vector<1x2x128xf32> to vector<2x128xf32>
    %288 = vector.extract_strided_slice %287 {offsets = [0, 0], sizes = [2, 32], strides = [1, 1]} : vector<2x128xf32> to vector<2x32xf32>
    %c0_122 = arith.constant 0 : index
    %c0_123 = arith.constant 0 : index
    %289 = vector.load %arg3[%c0_122, %c0_123] : memref<32x128xf32, #tpu.memory_space<vmem>>, vector<32x32xf32>
    %cst_124 = arith.constant dense<0.000000e+00> : vector<2x32xf32>
    %290 = tpu.matmul %284, %289, %cst_124 {dimension_numbers = #tpu.dot_dimension_numbers<[1], [0], [0], [1], [0, 0, 1, 1], [], []>} : vector<2x32xf32>, vector<32x32xf32>, vector<2x32xf32> -> vector<2x32xf32>
    %291 = arith.addf %288, %290 : vector<2x32xf32>
    %292 = arith.negf %291 : vector<2x32xf32>
    %293 = math.exp %292 : vector<2x32xf32>
    %cst_125 = arith.constant 1.000000e+00 : f32
    %294 = vector.broadcast %cst_125 : f32 to vector<2x32xf32>
    %295 = arith.addf %294, %293 : vector<2x32xf32>
    %296 = arith.divf %294, %295 : vector<2x32xf32>
    %297 = vector.extract_strided_slice %287 {offsets = [0, 32], sizes = [2, 32], strides = [1, 1]} : vector<2x128xf32> to vector<2x32xf32>
    %c0_126 = arith.constant 0 : index
    %c32_127 = arith.constant 32 : index
    %298 = vector.load %arg3[%c0_126, %c32_127] : memref<32x128xf32, #tpu.memory_space<vmem>>, vector<32x32xf32>
    %cst_128 = arith.constant dense<0.000000e+00> : vector<2x32xf32>
    %299 = tpu.matmul %284, %298, %cst_128 {dimension_numbers = #tpu.dot_dimension_numbers<[1], [0], [0], [1], [0, 0, 1, 1], [], []>} : vector<2x32xf32>, vector<32x32xf32>, vector<2x32xf32> -> vector<2x32xf32>
    %300 = arith.addf %297, %299 : vector<2x32xf32>
    %301 = arith.negf %300 : vector<2x32xf32>
    %302 = math.exp %301 : vector<2x32xf32>
    %cst_129 = arith.constant 1.000000e+00 : f32
    %303 = vector.broadcast %cst_129 : f32 to vector<2x32xf32>
    %304 = arith.addf %303, %302 : vector<2x32xf32>
    %305 = arith.divf %303, %304 : vector<2x32xf32>
    %306 = vector.extract_strided_slice %287 {offsets = [0, 64], sizes = [2, 32], strides = [1, 1]} : vector<2x128xf32> to vector<2x32xf32>
    %c0_130 = arith.constant 0 : index
    %c64_131 = arith.constant 64 : index
    %307 = vector.load %arg3[%c0_130, %c64_131] : memref<32x128xf32, #tpu.memory_space<vmem>>, vector<32x32xf32>
    %cst_132 = arith.constant dense<0.000000e+00> : vector<2x32xf32>
    %308 = tpu.matmul %284, %307, %cst_132 {dimension_numbers = #tpu.dot_dimension_numbers<[1], [0], [0], [1], [0, 0, 1, 1], [], []>} : vector<2x32xf32>, vector<32x32xf32>, vector<2x32xf32> -> vector<2x32xf32>
    %309 = arith.addf %306, %308 : vector<2x32xf32>
    %310 = math.tanh %309 : vector<2x32xf32>
    %311 = vector.extract_strided_slice %287 {offsets = [0, 96], sizes = [2, 32], strides = [1, 1]} : vector<2x128xf32> to vector<2x32xf32>
    %c0_133 = arith.constant 0 : index
    %c96_134 = arith.constant 96 : index
    %312 = vector.load %arg3[%c0_133, %c96_134] : memref<32x128xf32, #tpu.memory_space<vmem>>, vector<32x32xf32>
    %cst_135 = arith.constant dense<0.000000e+00> : vector<2x32xf32>
    %313 = tpu.matmul %284, %312, %cst_135 {dimension_numbers = #tpu.dot_dimension_numbers<[1], [0], [0], [1], [0, 0, 1, 1], [], []>} : vector<2x32xf32>, vector<32x32xf32>, vector<2x32xf32> -> vector<2x32xf32>
    %314 = arith.addf %311, %313 : vector<2x32xf32>
    %315 = arith.negf %314 : vector<2x32xf32>
    %316 = math.exp %315 : vector<2x32xf32>
    %cst_136 = arith.constant 1.000000e+00 : f32
    %317 = vector.broadcast %cst_136 : f32 to vector<2x32xf32>
    %318 = arith.addf %317, %316 : vector<2x32xf32>
    %319 = arith.divf %317, %318 : vector<2x32xf32>
    %320 = arith.mulf %305, %282 : vector<2x32xf32>
    %321 = arith.mulf %296, %310 : vector<2x32xf32>
    %322 = arith.addf %320, %321 : vector<2x32xf32>
    %323 = math.tanh %322 : vector<2x32xf32>
    %324 = arith.mulf %319, %323 : vector<2x32xf32>
    %c8_i32 = arith.constant 8 : i32
    %c0_137 = arith.constant 0 : index
    %c0_138 = arith.constant 0 : index
    %325 = vector.load %arg5[%c0_137, %c0_138] : memref<2x32xf32, #tpu.memory_space<vmem>>, vector<2x32xf32>
    tpu.vector_store %arg5[%c0_137, %c0_138], %324 {strides = array<i32>} : memref<2x32xf32, #tpu.memory_space<vmem>>, vector<2x32xf32>,
    %c0_139 = arith.constant 0 : index
    %c0_140 = arith.constant 0 : index
    %326 = vector.load %arg6[%c0_139, %c0_140] : memref<2x32xf32, #tpu.memory_space<vmem>>, vector<2x32xf32>
    tpu.vector_store %arg6[%c0_139, %c0_140], %322 {strides = array<i32>} : memref<2x32xf32, #tpu.memory_space<vmem>>, vector<2x32xf32>,
    %c0_i32_141 = arith.constant 0 : i32
    %327 = arith.cmpi eq, %arg1, %c0_i32_141 : i32
    %328 = arith.extui %327 : i1 to i32
    %c0_i32_142 = arith.constant 0 : i32
    %329 = arith.cmpi ne, %328, %c0_i32_142 : i32
    scf.if %329 {
      %c0_143 = arith.constant 0 : index
      %c0_144 = arith.constant 0 : index
      %330 = vector.load %arg4[%c0_143, %c0_144] : memref<2x32xf32, #tpu.memory_space<vmem>>, vector<2x32xf32>
      tpu.vector_store %arg4[%c0_143, %c0_144], %324 {strides = array<i32>} : memref<2x32xf32, #tpu.memory_space<vmem>>, vector<2x32xf32>,
    } else {
    }
    return
  }
  func.func @transform_0(%arg0: i32, %arg1: i32) -> (i32, i32, i32) {
    %c0_i32 = arith.constant 0 : i32
    %c0_i32_0 = arith.constant 0 : i32
    return %arg1, %arg0, %c0_i32 : i32, i32, i32
  }
  func.func @transform_1(%arg0: i32, %arg1: i32) -> (i32, i32) {
    %c0_i32 = arith.constant 0 : i32
    %c0_i32_0 = arith.constant 0 : i32
    %c0_i32_1 = arith.constant 0 : i32
    return %c0_i32, %c0_i32_0 : i32, i32
  }
  func.func @transform_2(%arg0: i32, %arg1: i32) -> (i32, i32) {
    %c0_i32 = arith.constant 0 : i32
    %c0_i32_0 = arith.constant 0 : i32
    return %arg0, %c0_i32 : i32, i32
  }
}

</mosaic_0001>

<bundles_post_ra>
// kernel: lstm_autoencoder_forward.2
= control target key start
LH: loop header
LB: loop body
LE: loop exit
PB: predicated region body
PF: predicated region fallthrough
CT: control target
= control target key end

     0   :  { %s1738_s13 = smov 64   ;;  %vm15_vm0 = vcmask 254976   ;;  %v1739_v6 = vmov 0.0   ;;  %vm25_vm1 = vcmask 261120   ;;  %s1740_s18 = smov 96   ;;  %s2121_s1 = inlined_call_operand.vmem [shape: f32[32,128], index: 1, kind: input, shape index: {}]   ;;  %s2122_s0 = inlined_call_operand.vmem [shape: f32[8,2,128], index: 0, kind: input, shape index: {}]   ;;  %s2123_s2 = inlined_call_operand.vmem [shape: f32[2,32], index: 2, kind: output, shape index: {}]  }
   0x1   :  { %v1760_v0 = vld [vmem:[%s2121_s1 + $0x10] sm:$0xff]  ;;  %v1765_v1 = vld [vmem:[%s2121_s1 + $0x18] sm:$0xff]  ;;  %v1775_v3 = vld [vmem:[%s2121_s1] sm:$0xff]  ;;  %16 = vst.msk [vmem:[#allocation2] sm:$0x3] %vm15_vm0, %v1739_v6  ;;  %s1741_s19 = smov 32  }
   0x2   :  { %v1576_v2 = vpack.i.bf16 %v1760_v0, %v1765_v1  ;;  %41 = vmatpush.msra.mxu0 %v1765_v1  ;;  %v1780_v4 = vld [vmem:[%s2121_s1 + $0x8] sm:$0xff]  ;;  %17 = vst.msk [vmem:[#allocation3] sm:$0x3] %vm15_vm0, %v1739_v6  ;;  %v1872_v29 = vld [vmem:[%s2122_s0] sm:$0x3] }
   0x3   :  { %v1581_v5 = vpack.i.bf16 %v1775_v3, %v1780_v4 }
   0x4   :  { %1577 = vrot.lane.b32.xlu0 %v1576_v2, %s1738_s13  ;;  %42 = vmatpush.msra.mxu0 %v1760_v0 }
   0x5   :  { %1587 = vrot.lane.b32.xlu1 %v1576_v2, %s1740_s18  ;;  %1597 = vrot.lane.b32.xlu2 %v1576_v2, %s1741_s19 }
   0x6   :  { %43 = vmatpush.msra.mxu0 %v1780_v4 }
   0x8   :  { %44 = vmatpush.msra.mxu0 %v1775_v3  ;;  %v1793_v7 = vld [vmem:[#allocation2] sm:$0x3] }
   0x9   :  { %1509 = vmatmul.msk.f32.vlgmr.msra.gmra.mxu0 %vm25_vm1, %v1793_v7  ;;  %v19_v22 = vld [vmem:[#allocation3] sm:$0x3] }
   0xa   :  { %263 = vmatpush.msrb.mxu0 %v1765_v1 }
   0xc   :  { %264 = vmatpush.msrb.mxu0 %v1760_v0  ;;  %1582 = vrot.lane.b32.xlu0 %v1581_v5, %s1738_s13 }
   0xd   :  { %1592 = vrot.lane.b32.xlu1 %v1581_v5, %s1740_s18  ;;  %1602 = vrot.lane.b32.xlu2 %v1581_v5, %s1741_s19 }
   0xe   :  { %265 = vmatpush.msrb.mxu0 %v1780_v4 }
  0x10   :  { %266 = vmatpush.msrb.mxu0 %v1775_v3 }
  0x12   :  { %441 = vmatpush.msra.mxu0 %v1765_v1 }
  0x14   :  { %442 = vmatpush.msra.mxu0 %v1760_v0 }
  0x16   :  { %443 = vmatpush.msra.mxu0 %v1780_v4 }
  0x18   :  { %444 = vmatpush.msra.mxu0 %v1775_v3 }
  0x5f   :  { %v1598_v21 = vpop.permute.xlu2 %1597 }
  0x60   :  { %v1850_v23 = vunpack.i.h.bf16 %v1598_v21  ;;  %v1852_v24 = vunpack.i.l.bf16 %v1598_v21 }
  0x62   :  { %191 = vmatpush.msra.mxu3 %v1852_v24 }
  0x64   :  { %192 = vmatpush.msra.mxu3 %v1850_v23 }
  0x67   :  { %v1603_v25 = vpop.permute.xlu2 %1602 }
  0x68   :  { %v1857_v26 = vunpack.i.h.bf16 %v1603_v25  ;;  %v1859_v27 = vunpack.i.l.bf16 %v1603_v25 }
  0x6a   :  { %193 = vmatpush.msra.mxu3 %v1859_v27 }
  0x6c   :  { %194 = vmatpush.msra.mxu3 %v1857_v26 }
  0x6d   :  { %1514 = vmatmul.msk.f32.vlgmr.msra.gmra.mxu3 %vm25_vm1, %v1793_v7 }
  0x6e   :  { %373 = vmatpush.msrb.mxu3 %v1852_v24 }
  0x70   :  { %374 = vmatpush.msrb.mxu3 %v1850_v23 }
  0x72   :  { %375 = vmatpush.msrb.mxu3 %v1859_v27 }
  0x74   :  { %376 = vmatpush.msrb.mxu3 %v1857_v26 }
  0x76   :  { %v1578_v8 = vpop.permute.xlu0 %1577  ;;  %551 = vmatpush.msra.mxu3 %v1852_v24 }
  0x77   :  { %v1802_v9 = vunpack.i.l.bf16 %v1578_v8  ;;  %v1804_v10 = vunpack.i.h.bf16 %v1578_v8  ;;  %v1588_v14 = vpop.permute.xlu1 %1587 }
  0x78   :  { %v1825_v15 = vunpack.i.h.bf16 %v1588_v14  ;;  %v1827_v16 = vunpack.i.l.bf16 %v1588_v14  ;;  %552 = vmatpush.msra.mxu3 %v1850_v23 }
  0x79   :  { %153 = vmatpush.msra.mxu2 %v1802_v9 }
  0x7a   :  { %97 = vmatpush.msra.mxu1 %v1827_v16  ;;  %553 = vmatpush.msra.mxu3 %v1859_v27 }
  0x7b   :  { %154 = vmatpush.msra.mxu2 %v1804_v10 }
  0x7c   :  { %98 = vmatpush.msra.mxu1 %v1825_v15  ;;  %554 = vmatpush.msra.mxu3 %v1857_v26 }
  0x7e   :  { %v1583_v11 = vpop.permute.xlu0 %1582 }
  0x7f   :  { %v1809_v12 = vunpack.i.l.bf16 %v1583_v11  ;;  %v1811_v13 = vunpack.i.h.bf16 %v1583_v11  ;;  %v1593_v17 = vpop.permute.xlu1 %1592 }
  0x80   :  { %v1832_v18 = vunpack.i.h.bf16 %v1593_v17  ;;  %v1834_v19 = vunpack.i.l.bf16 %v1593_v17 }
  0x81   :  { %155 = vmatpush.msra.mxu2 %v1809_v12 }
  0x82   :  { %99 = vmatpush.msra.mxu1 %v1834_v19 }
  0x83   :  { %156 = vmatpush.msra.mxu2 %v1811_v13 }
  0x84   :  { %1513 = vmatmul.msk.f32.vlgmr.msra.gmra.mxu2 %vm25_vm1, %v1793_v7  ;;  %100 = vmatpush.msra.mxu1 %v1832_v18 }
  0x85   :  { %347 = vmatpush.msrb.mxu2 %v1802_v9  ;;  %1511 = vmatmul.msk.f32.vlgmr.msra.gmra.mxu1 %vm25_vm1, %v1793_v7 }
  0x86   :  { %303 = vmatpush.msrb.mxu1 %v1827_v16  ;;  %v46_v33 = vpop.f32.mrf.mxu0 }
  0x87   :  { %348 = vmatpush.msrb.mxu2 %v1804_v10  ;;  %v49_v34 = vadd.f32 %v46_v33, %v1872_v29 }
  0x88   :  { %304 = vmatpush.msrb.mxu1 %v1825_v15 }
  0x89   :  { %349 = vmatpush.msrb.mxu2 %v1809_v12  ;;  %v1510_v35 = vmul.f32 -1.442695, %v49_v34 }
  0x8a   :  { %305 = vmatpush.msrb.mxu1 %v1834_v19 }
  0x8b   :  { %350 = vmatpush.msrb.mxu2 %v1811_v13 }
  0x8c   :  { %306 = vmatpush.msrb.mxu1 %v1832_v18 }
  0x8d   :  { %525 = vmatpush.msra.mxu2 %v1802_v9 }
  0x8e   :  { %481 = vmatpush.msra.mxu1 %v1827_v16 }
  0x8f   :  { %526 = vmatpush.msra.mxu2 %v1804_v10 }
  0x90   :  { %482 = vmatpush.msra.mxu1 %v1825_v15 }
  0x91   :  { %527 = vmatpush.msra.mxu2 %v1809_v12 }
  0x92   :  { %483 = vmatpush.msra.mxu1 %v1834_v19 }
  0x93   :  { %528 = vmatpush.msra.mxu2 %v1811_v13 }
  0x94   :  { %484 = vmatpush.msra.mxu1 %v1832_v18 }
  0xf0   :  { %v196_v49 = vpop.f32.mrf.mxu3 }
 0x102   :  { %v102_v28 = vpop.f32.mrf.mxu1 }
 0x103   :  { %106 = vrot.lane.b32.xlu2 %v102_v28, %s1741_s19 }
 0x107   :  { %v158_v20 = vpop.f32.mrf.mxu2 }
 0x108   :  { %162 = vrot.lane.b32.xlu0 %v158_v20, %s1738_s13 }
 0x10b   :  { %200 = vrot.lane.b32.xlu2 %v196_v49, %s1740_s18 }
 0x110   :  { %224 = vrot.lane.b32.xlu0 %v19_v22, %s1741_s19 }
 0x15d   :  { %v107_v51 = vpop.permute.xlu2 %106 }
 0x15e   :  { %v109_v52 = vadd.f32 %v107_v51, %v1872_v29 }
 0x160   :  { %v1512_v53 = vmul.f32 -1.442695, %v109_v52 }
 0x165   :  { %v201_v17 = vpop.permute.xlu2 %200 }
 0x166   :  { %v203_v20 = vadd.f32 %v201_v17, %v1872_v29 }
 0x168   :  { %v1515_v21 = vmul.f32 -1.442695, %v203_v20 }
 0x17a   :  { %v163_v30 = vpop.permute.xlu0 %162 }
 0x17b   :  { %v165_v31 = vadd.f32 %v163_v30, %v1872_v29 }
 0x17d   :  { %1606 = vtanh.f32 %v165_v31 }
 0x17e   :  { %1608 = vpow2.f32 %v1510_v35 }
 0x182   :  { %v225_v5 = vpop.permute.xlu0 %224 }
 0x183   :  { %v1607_v32 = vpop.eup %1606 }
 0x184   :  { %229 = vrot.lane.b32.xlu1 %v1607_v32, %s1738_s13  ;;  %v1609_v36 = vpop.eup %1608 }
 0x185   :  { %v53_v37 = vadd.f32 1.0, %v1609_v36 }
 0x187   :  { %1610 = vrcp.f32 %v53_v37  ;;  %vm59_vm2 = vweird.f32 %v53_v37  ;;  %v65_v42 = vand.u32 2147483648, %v53_v37  ;;  %v63_v44 = vand.u32 2147483647, %v53_v37 }
 0x188   :  { %1612 = vpow2.f32 %v1512_v53 }
 0x189   :  { %v66_v45 = vor.u32 1.1754944e-38, %v65_v42  ;;  %vm64_vm5 = vcmp.eq.f32.partialorder %v63_v44, 8.507059e+37 }
 0x18d   :  { %v1611_v38 = vpop.eup %1610 }
 0x18e   :  { %v55_v39 = vmul.f32 %v1611_v38, %v53_v37  ;;  %vm60_vm3 = vweird.f32 %v1611_v38  ;;  %v1613_v54 = vpop.eup %1612 }
 0x18f   :  { %vm61_vm4 = vmor %vm59_vm2, %vm60_vm3  ;;  %v113_v55 = vadd.f32 1.0, %v1613_v54 }
 0x190   :  { %v56_v40 = vsub.f32 1.0, %v55_v39 }
 0x191   :  { %1614 = vrcp.f32 %v113_v55  ;;  %vm119_vm6 = vweird.f32 %v113_v55  ;;  %v125_v60 = vand.u32 2147483648, %v113_v55  ;;  %v123_v62 = vand.u32 2147483647, %v113_v55 }
 0x192   :  { %v57_v41 = vmul.f32 %v1611_v38, %v56_v40 }
 0x193   :  { %v126_v63 = vor.u32 1.1754944e-38, %v125_v60  ;;  %vm124_vm9 = vcmp.eq.f32.partialorder %v123_v62, 8.507059e+37 }
 0x194   :  { %v58_v43 = vadd.f32 %v1611_v38, %v57_v41 }
 0x196   :  { %v62_v46 = vsel %vm61_vm4, %v1611_v38, %v58_v43  ;;  %v1516_v43 = vld [vmem:[%s2122_s0 + $0x2] sm:$0x3] }
 0x197   :  { %v67_v48 = vsel %vm64_vm5, %v66_v45, %v62_v46  ;;  %v1615_v56 = vpop.eup %1614 }
 0x198   :  { %v115_v57 = vmul.f32 %v1615_v56, %v113_v55  ;;  %vm120_vm7 = vweird.f32 %v1615_v56 }
 0x199   :  { %vm121_vm8 = vmor %vm119_vm6, %vm120_vm7 }
 0x19a   :  { %v116_v58 = vsub.f32 1.0, %v115_v57 }
 0x19c   :  { %v117_v59 = vmul.f32 %v1615_v56, %v116_v58 }
 0x19e   :  { %v118_v61 = vadd.f32 %v1615_v56, %v117_v59 }
 0x1a0   :  { %v122_v2 = vsel %vm121_vm8, %v1615_v56, %v118_v61 }
 0x1a1   :  { %v127_v6 = vsel %vm124_vm9, %v126_v63, %v122_v2 }
 0x1a2   :  { %v227_v7 = vmul.f32 %v225_v5, %v127_v6 }
 0x1f6   :  { %v230_v47 = vpop.permute.xlu1 %229 }
 0x1f7   :  { %v232_v50 = vmul.f32 %v230_v47, %v67_v48 }
 0x1f9   :  { %234 = vrot.lane.b32.xlu1 %v232_v50, %s1741_s19 }
 0x26b   :  { %v235_v8 = vpop.permute.xlu1 %234 }
 0x26c   :  { %v1885_v11 = vadd.f32 %v235_v8, %v227_v7 }
 0x26e   :  { %1616 = vtanh.f32 %v1885_v11 }
 0x26f   :  { %1618 = vpow2.f32 %v1515_v21 }
 0x274   :  { %v1617_v14 = vpop.eup %1616 }
 0x275   :  { %240 = vrot.lane.b32.xlu0 %v1617_v14, %s1738_s13  ;;  %v1619_v22 = vpop.eup %1618 }
 0x276   :  { %v207_v25 = vadd.f32 1.0, %v1619_v22 }
 0x278   :  { %1620 = vrcp.f32 %v207_v25  ;;  %vm213_vm10 = vweird.f32 %v207_v25  ;;  %v219_v33 = vand.u32 2147483648, %v207_v25  ;;  %v217_v35 = vand.u32 2147483647, %v207_v25 }
 0x27a   :  { %v220_v36 = vor.u32 1.1754944e-38, %v219_v33  ;;  %vm218_vm13 = vcmp.eq.f32.partialorder %v217_v35, 8.507059e+37 }
 0x27e   :  { %v1621_v28 = vpop.eup %1620 }
 0x27f   :  { %v209_v30 = vmul.f32 %v1621_v28, %v207_v25  ;;  %vm214_vm11 = vweird.f32 %v1621_v28 }
 0x280   :  { %vm215_vm12 = vmor %vm213_vm10, %vm214_vm11 }
 0x281   :  { %v210_v31 = vsub.f32 1.0, %v209_v30 }
 0x283   :  { %v211_v32 = vmul.f32 %v1621_v28, %v210_v31 }
 0x285   :  { %v212_v34 = vadd.f32 %v1621_v28, %v211_v32 }
 0x287   :  { %v216_v37 = vsel %vm215_vm12, %v1621_v28, %v212_v34 }
 0x288   :  { %v221_v38 = vsel %vm218_vm13, %v220_v36, %v216_v37 }
 0x2e7   :  { %v241_v29 = vpop.permute.xlu0 %240 }
 0x2e8   :  { %v243_v39 = vmul.f32 %v241_v29, %v221_v38 }
 0x2ea   :  { %247 = vrot.lane.b32.xlu1 %v243_v39, %s1741_s19 }
 0x35c   :  { %v248_v40 = vpop.permute.xlu1 %247 }
 0x35d   :  { %1517 = vmatmul.msk.f32.vlgmr.msrb.gmra.mxu0 %vm25_vm1, %v248_v40  ;;  %1519 = vmatmul.msk.f32.vlgmr.msrb.gmra.mxu1 %vm25_vm1, %v248_v40 }
 0x35e   :  { %1521 = vmatmul.msk.f32.vlgmr.msrb.gmra.mxu2 %vm25_vm1, %v248_v40  ;;  %1522 = vmatmul.msk.f32.vlgmr.msrb.gmra.mxu3 %vm25_vm1, %v248_v40 }
 0x35f   :  { %659 = vmatpush.msrb.mxu1 %v1827_v16  ;;  %703 = vmatpush.msrb.mxu2 %v1802_v9 }
 0x360   :  { %729 = vmatpush.msrb.mxu3 %v1852_v24  ;;  %619 = vmatpush.msrb.mxu0 %v1765_v1 }
 0x361   :  { %660 = vmatpush.msrb.mxu1 %v1825_v15  ;;  %704 = vmatpush.msrb.mxu2 %v1804_v10 }
 0x362   :  { %730 = vmatpush.msrb.mxu3 %v1850_v23  ;;  %620 = vmatpush.msrb.mxu0 %v1760_v0 }
 0x363   :  { %661 = vmatpush.msrb.mxu1 %v1834_v19  ;;  %705 = vmatpush.msrb.mxu2 %v1809_v12 }
 0x364   :  { %731 = vmatpush.msrb.mxu3 %v1859_v27  ;;  %621 = vmatpush.msrb.mxu0 %v1780_v4 }
 0x365   :  { %662 = vmatpush.msrb.mxu1 %v1832_v18  ;;  %706 = vmatpush.msrb.mxu2 %v1811_v13 }
 0x366   :  { %732 = vmatpush.msrb.mxu3 %v1857_v26  ;;  %622 = vmatpush.msrb.mxu0 %v1775_v3 }
 0x3da   :  { %v308_v41 = vpop.f32.mrf.mxu1  ;;  %v268_v48 = vpop.f32.mrf.mxu0 }
 0x3db   :  { %312 = vrot.lane.b32.xlu1 %v308_v41, %s1741_s19  ;;  %v271_v49 = vadd.f32 %v1516_v43, %v268_v48 }
 0x3dd   :  { %v1518_v50 = vmul.f32 -1.442695, %v271_v49 }
 0x3e1   :  { %v352_v42 = vpop.f32.mrf.mxu2  ;;  %v378_v47 = vpop.f32.mrf.mxu3 }
 0x3e2   :  { %356 = vrot.lane.b32.xlu2 %v352_v42, %s1738_s13 }
 0x43c   :  { %v357_v44 = vpop.permute.xlu2 %356 }
 0x43d   :  { %v359_v45 = vadd.f32 %v1516_v43, %v357_v44 }
 0x43f   :  { %1622 = vtanh.f32 %v359_v45 }
 0x440   :  { %1624 = vpow2.f32 %v1518_v50 }
 0x445   :  { %v1623_v46 = vpop.eup %1622 }
 0x446   :  { %407 = vrot.lane.b32.xlu0 %v1623_v46, %s1738_s13  ;;  %v1625_v51 = vpop.eup %1624 }
 0x447   :  { %v275_v52 = vadd.f32 1.0, %v1625_v51 }
 0x449   :  { %1626 = vrcp.f32 %v275_v52  ;;  %v287_v58 = vand.u32 2147483648, %v275_v52  ;;  %vm281_vm15 = vweird.f32 %v275_v52  ;;  %v285_v59 = vand.u32 2147483647, %v275_v52 }
 0x44b   :  { %v288_v61 = vor.u32 1.1754944e-38, %v287_v58  ;;  %vm286_vm3 = vcmp.eq.f32.partialorder %v285_v59, 8.507059e+37 }
 0x44d   :  { %v313_v5 = vpop.permute.xlu1 %312 }
 0x44e   :  { %382 = vrot.lane.b32.xlu0 %v378_v47, %s1740_s18  ;;  %v315_v6 = vadd.f32 %v1516_v43, %v313_v5 }
 0x44f   :  { %v1627_v53 = vpop.eup %1626 }
 0x450   :  { %v277_v54 = vmul.f32 %v1627_v53, %v275_v52  ;;  %vm282_vm14 = vweird.f32 %v1627_v53  ;;  %v1520_v7 = vmul.f32 -1.442695, %v315_v6 }
 0x451   :  { %vm283_vm2 = vmor %vm281_vm15, %vm282_vm14 }
 0x452   :  { %v278_v55 = vsub.f32 1.0, %v277_v54  ;;  %1628 = vpow2.f32 %v1520_v7 }
 0x454   :  { %v279_v56 = vmul.f32 %v1627_v53, %v278_v55 }
 0x456   :  { %v280_v57 = vadd.f32 %v1627_v53, %v279_v56  ;;  %v1524_v56 = vld [vmem:[%s2122_s0 + $0x4] sm:$0x3] }
 0x458   :  { %v284_v60 = vsel %vm283_vm2, %v1627_v53, %v280_v57  ;;  %v1629_v8 = vpop.eup %1628 }
 0x459   :  { %v289_v63 = vsel %vm286_vm3, %v288_v61, %v284_v60  ;;  %v319_v14 = vadd.f32 1.0, %v1629_v8 }
 0x45b   :  { %1630 = vrcp.f32 %v319_v14  ;;  %v331_v28 = vand.u32 2147483648, %v319_v14  ;;  %vm325_vm5 = vweird.f32 %v319_v14  ;;  %v329_v30 = vand.u32 2147483647, %v319_v14 }
 0x45d   :  { %v332_v32 = vor.u32 1.1754944e-38, %v331_v28  ;;  %vm330_vm7 = vcmp.eq.f32.partialorder %v329_v30, 8.507059e+37 }
 0x461   :  { %v1631_v17 = vpop.eup %1630 }
 0x462   :  { %v321_v20 = vmul.f32 %v1631_v17, %v319_v14  ;;  %vm326_vm4 = vweird.f32 %v1631_v17 }
 0x463   :  { %vm327_vm6 = vmor %vm325_vm5, %vm326_vm4 }
 0x464   :  { %v322_v21 = vsub.f32 1.0, %v321_v20 }
 0x466   :  { %v323_v22 = vmul.f32 %v1631_v17, %v322_v21 }
 0x468   :  { %v324_v25 = vadd.f32 %v1631_v17, %v323_v22 }
 0x46a   :  { %v328_v31 = vsel %vm327_vm6, %v1631_v17, %v324_v25 }
 0x46b   :  { %v333_v33 = vsel %vm330_vm7, %v332_v32, %v328_v31 }
 0x46c   :  { %v405_v34 = vmul.f32 %v333_v33, %v1885_v11 }
 0x4b8   :  { %v408_v62 = vpop.permute.xlu0 %407 }
 0x4b9   :  { %v410_v2 = vmul.f32 %v408_v62, %v289_v63 }
 0x4bb   :  { %412 = vrot.lane.b32.xlu2 %v410_v2, %s1741_s19 }
 0x4c0   :  { %v383_v38 = vpop.permute.xlu0 %382 }
 0x4c1   :  { %v385_v29 = vadd.f32 %v1516_v43, %v383_v38 }
 0x4c3   :  { %v1523_v39 = vmul.f32 -1.442695, %v385_v29 }
 0x515   :  { %v413_v35 = vpop.permute.xlu2 %412 }
 0x516   :  { %v1920_v36 = vadd.f32 %v413_v35, %v405_v34 }
 0x518   :  { %1632 = vtanh.f32 %v1920_v36 }
 0x519   :  { %1634 = vpow2.f32 %v1523_v39 }
 0x51e   :  { %v1633_v37 = vpop.eup %1632 }
 0x51f   :  { %418 = vrot.lane.b32.xlu1 %v1633_v37, %s1738_s13  ;;  %v1635_v40 = vpop.eup %1634 }
 0x520   :  { %v389_v41 = vadd.f32 1.0, %v1635_v40 }
 0x522   :  { %1636 = vrcp.f32 %v389_v41  ;;  %v401_v47 = vand.u32 2147483648, %v389_v41  ;;  %vm395_vm9 = vweird.f32 %v389_v41  ;;  %v399_v48 = vand.u32 2147483647, %v389_v41 }
 0x524   :  { %v402_v50 = vor.u32 1.1754944e-38, %v401_v47  ;;  %vm400_vm11 = vcmp.eq.f32.partialorder %v399_v48, 8.507059e+37 }
 0x528   :  { %v1637_v42 = vpop.eup %1636 }
 0x529   :  { %v391_v44 = vmul.f32 %v1637_v42, %v389_v41  ;;  %vm396_vm8 = vweird.f32 %v1637_v42 }
 0x52a   :  { %vm397_vm10 = vmor %vm395_vm9, %vm396_vm8 }
 0x52b   :  { %v392_v45 = vsub.f32 1.0, %v391_v44 }
 0x52d   :  { %v393_v46 = vmul.f32 %v1637_v42, %v392_v45 }
 0x52f   :  { %v394_v11 = vadd.f32 %v1637_v42, %v393_v46 }
 0x531   :  { %v398_v49 = vsel %vm397_vm10, %v1637_v42, %v394_v11 }
 0x532   :  { %v403_v51 = vsel %vm400_vm11, %v402_v50, %v398_v49 }
 0x591   :  { %v419_v43 = vpop.permute.xlu1 %418 }
 0x592   :  { %v421_v52 = vmul.f32 %v419_v43, %v403_v51 }
 0x594   :  { %425 = vrot.lane.b32.xlu2 %v421_v52, %s1741_s19 }
 0x5ee   :  { %v426_v53 = vpop.permute.xlu2 %425 }
 0x5ef   :  { %1525 = vmatmul.msk.f32.vlgmr.msra.gmra.mxu0 %vm25_vm1, %v426_v53  ;;  %1527 = vmatmul.msk.f32.vlgmr.msra.gmra.mxu1 %vm25_vm1, %v426_v53 }
 0x5f0   :  { %1529 = vmatmul.msk.f32.vlgmr.msra.gmra.mxu2 %vm25_vm1, %v426_v53  ;;  %1530 = vmatmul.msk.f32.vlgmr.msra.gmra.mxu3 %vm25_vm1, %v426_v53 }
 0x5f1   :  { %837 = vmatpush.msra.mxu1 %v1827_v16  ;;  %881 = vmatpush.msra.mxu2 %v1802_v9 }
 0x5f2   :  { %907 = vmatpush.msra.mxu3 %v1852_v24  ;;  %797 = vmatpush.msra.mxu0 %v1765_v1 }
 0x5f3   :  { %838 = vmatpush.msra.mxu1 %v1825_v15  ;;  %882 = vmatpush.msra.mxu2 %v1804_v10 }
 0x5f4   :  { %908 = vmatpush.msra.mxu3 %v1850_v23  ;;  %798 = vmatpush.msra.mxu0 %v1760_v0 }
 0x5f5   :  { %839 = vmatpush.msra.mxu1 %v1834_v19  ;;  %883 = vmatpush.msra.mxu2 %v1809_v12 }
 0x5f6   :  { %909 = vmatpush.msra.mxu3 %v1859_v27  ;;  %799 = vmatpush.msra.mxu0 %v1780_v4 }
 0x5f7   :  { %840 = vmatpush.msra.mxu1 %v1832_v18  ;;  %884 = vmatpush.msra.mxu2 %v1811_v13 }
 0x5f8   :  { %910 = vmatpush.msra.mxu3 %v1857_v26  ;;  %800 = vmatpush.msra.mxu0 %v1775_v3 }
 0x66c   :  { %v486_v54 = vpop.f32.mrf.mxu1  ;;  %v446_v61 = vpop.f32.mrf.mxu0 }
 0x66d   :  { %490 = vrot.lane.b32.xlu2 %v486_v54, %s1741_s19  ;;  %v449_v62 = vadd.f32 %v1524_v56, %v446_v61 }
 0x66f   :  { %v1526_v63 = vmul.f32 -1.442695, %v449_v62 }
 0x673   :  { %v530_v55 = vpop.f32.mrf.mxu2  ;;  %v556_v60 = vpop.f32.mrf.mxu3 }
 0x674   :  { %534 = vrot.lane.b32.xlu0 %v530_v55, %s1738_s13 }
 0x6c7   :  { %v491_v32 = vpop.permute.xlu2 %490 }
 0x6c8   :  { %v493_v33 = vadd.f32 %v1524_v56, %v491_v32 }
 0x6ca   :  { %v1528_v34 = vmul.f32 -1.442695, %v493_v33 }
 0x6e6   :  { %v535_v57 = vpop.permute.xlu0 %534 }
 0x6e7   :  { %v537_v58 = vadd.f32 %v1524_v56, %v535_v57 }
 0x6e9   :  { %1638 = vtanh.f32 %v537_v58 }
 0x6ea   :  { %1640 = vpow2.f32 %v1526_v63 }
 0x6ef   :  { %v1639_v59 = vpop.eup %1638 }
 0x6f0   :  { %585 = vrot.lane.b32.xlu1 %v1639_v59, %s1738_s13  ;;  %v1641_v2 = vpop.eup %1640 }
 0x6f1   :  { %v453_v5 = vadd.f32 1.0, %v1641_v2 }
 0x6f3   :  { %1642 = vrcp.f32 %v453_v5  ;;  %v465_v20 = vand.u32 2147483648, %v453_v5  ;;  %vm459_vm13 = vweird.f32 %v453_v5  ;;  %v463_v21 = vand.u32 2147483647, %v453_v5 }
 0x6f4   :  { %1644 = vpow2.f32 %v1528_v34 }
 0x6f5   :  { %v466_v25 = vor.u32 1.1754944e-38, %v465_v20  ;;  %vm464_vm15 = vcmp.eq.f32.partialorder %v463_v21, 8.507059e+37 }
 0x6f8   :  { %560 = vrot.lane.b32.xlu1 %v556_v60, %s1740_s18 }
 0x6f9   :  { %v1643_v6 = vpop.eup %1642 }
 0x6fa   :  { %v455_v7 = vmul.f32 %v1643_v6, %v453_v5  ;;  %vm460_vm12 = vweird.f32 %v1643_v6  ;;  %v1645_v35 = vpop.eup %1644 }
 0x6fb   :  { %vm461_vm14 = vmor %vm459_vm13, %vm460_vm12  ;;  %v497_v37 = vadd.f32 1.0, %v1645_v35 }
 0x6fc   :  { %v456_v8 = vsub.f32 1.0, %v455_v7  ;;  %v1532_v7 = vld [vmem:[%s2122_s0 + $0x6] sm:$0x3] }
 0x6fd   :  { %1646 = vrcp.f32 %v497_v37  ;;  %v509_v42 = vand.u32 2147483648, %v497_v37  ;;  %vm503_vm3 = vweird.f32 %v497_v37  ;;  %v507_v44 = vand.u32 2147483647, %v497_v37 }
 0x6fe   :  { %v457_v14 = vmul.f32 %v1643_v6, %v456_v8 }
 0x6ff   :  { %v510_v46 = vor.u32 1.1754944e-38, %v509_v42  ;;  %vm508_vm5 = vcmp.eq.f32.partialorder %v507_v44, 8.507059e+37 }
 0x700   :  { %v458_v17 = vadd.f32 %v1643_v6, %v457_v14 }
 0x702   :  { %v462_v22 = vsel %vm461_vm14, %v1643_v6, %v458_v17 }
 0x703   :  { %v467_v30 = vsel %vm464_vm15, %v466_v25, %v462_v22  ;;  %v1647_v38 = vpop.eup %1646 }
 0x704   :  { %v499_v29 = vmul.f32 %v1647_v38, %v497_v37  ;;  %vm504_vm2 = vweird.f32 %v1647_v38 }
 0x705   :  { %vm505_vm4 = vmor %vm503_vm3, %vm504_vm2 }
 0x706   :  { %v500_v39 = vsub.f32 1.0, %v499_v29 }
 0x708   :  { %v501_v40 = vmul.f32 %v1647_v38, %v500_v39 }
 0x70a   :  { %v502_v41 = vadd.f32 %v1647_v38, %v501_v40 }
 0x70c   :  { %v506_v45 = vsel %vm505_vm4, %v1647_v38, %v502_v41 }
 0x70d   :  { %v511_v11 = vsel %vm508_vm5, %v510_v46, %v506_v45 }
 0x70e   :  { %v583_v47 = vmul.f32 %v511_v11, %v1920_v36 }
 0x762   :  { %v586_v28 = vpop.permute.xlu1 %585 }
 0x763   :  { %v588_v31 = vmul.f32 %v586_v28, %v467_v30 }
 0x765   :  { %590 = vrot.lane.b32.xlu0 %v588_v31, %s1741_s19 }
 0x76a   :  { %v561_v51 = vpop.permute.xlu1 %560 }
 0x76b   :  { %v563_v43 = vadd.f32 %v1524_v56, %v561_v51 }
 0x76d   :  { %v1531_v52 = vmul.f32 -1.442695, %v563_v43 }
 0x7d7   :  { %v591_v48 = vpop.permute.xlu0 %590 }
 0x7d8   :  { %v1954_v49 = vadd.f32 %v591_v48, %v583_v47 }
 0x7da   :  { %1648 = vtanh.f32 %v1954_v49 }
 0x7db   :  { %1650 = vpow2.f32 %v1531_v52 }
 0x7e0   :  { %v1649_v50 = vpop.eup %1648 }
 0x7e1   :  { %596 = vrot.lane.b32.xlu2 %v1649_v50, %s1738_s13  ;;  %v1651_v53 = vpop.eup %1650 }
 0x7e2   :  { %v567_v54 = vadd.f32 1.0, %v1651_v53 }
 0x7e4   :  { %1652 = vrcp.f32 %v567_v54  ;;  %v579_v60 = vand.u32 2147483648, %v567_v54  ;;  %vm573_vm7 = vweird.f32 %v567_v54  ;;  %v577_v61 = vand.u32 2147483647, %v567_v54 }
 0x7e6   :  { %v580_v63 = vor.u32 1.1754944e-38, %v579_v60  ;;  %vm578_vm9 = vcmp.eq.f32.partialorder %v577_v61, 8.507059e+37 }
 0x7ea   :  { %v1653_v55 = vpop.eup %1652 }
 0x7eb   :  { %v569_v57 = vmul.f32 %v1653_v55, %v567_v54  ;;  %vm574_vm6 = vweird.f32 %v1653_v55 }
 0x7ec   :  { %vm575_vm8 = vmor %vm573_vm7, %vm574_vm6 }
 0x7ed   :  { %v570_v58 = vsub.f32 1.0, %v569_v57 }
 0x7ef   :  { %v571_v59 = vmul.f32 %v1653_v55, %v570_v58 }
 0x7f1   :  { %v572_v36 = vadd.f32 %v1653_v55, %v571_v59 }
 0x7f3   :  { %v576_v62 = vsel %vm575_vm8, %v1653_v55, %v572_v36 }
 0x7f4   :  { %v581_v2 = vsel %vm578_vm9, %v580_v63, %v576_v62 }
 0x83b   :  { %v597_v56 = vpop.permute.xlu2 %596 }
 0x83c   :  { %v599_v5 = vmul.f32 %v597_v56, %v581_v2 }
 0x83e   :  { %603 = vrot.lane.b32.xlu0 %v599_v5, %s1741_s19 }
 0x8b0   :  { %v604_v6 = vpop.permute.xlu0 %603 }
 0x8b1   :  { %1533 = vmatmul.msk.f32.vlgmr.msrb.gmra.mxu0 %vm25_vm1, %v604_v6  ;;  %1535 = vmatmul.msk.f32.vlgmr.msrb.gmra.mxu1 %vm25_vm1, %v604_v6 }
 0x8b2   :  { %1537 = vmatmul.msk.f32.vlgmr.msrb.gmra.mxu2 %vm25_vm1, %v604_v6  ;;  %1538 = vmatmul.msk.f32.vlgmr.msrb.gmra.mxu3 %vm25_vm1, %v604_v6 }
 0x8b3   :  { %1015 = vmatpush.msrb.mxu1 %v1827_v16  ;;  %1059 = vmatpush.msrb.mxu2 %v1802_v9 }
 0x8b4   :  { %1085 = vmatpush.msrb.mxu3 %v1852_v24  ;;  %975 = vmatpush.msrb.mxu0 %v1765_v1 }
 0x8b5   :  { %1016 = vmatpush.msrb.mxu1 %v1825_v15  ;;  %1060 = vmatpush.msrb.mxu2 %v1804_v10 }
 0x8b6   :  { %1086 = vmatpush.msrb.mxu3 %v1850_v23  ;;  %976 = vmatpush.msrb.mxu0 %v1760_v0 }
 0x8b7   :  { %1017 = vmatpush.msrb.mxu1 %v1834_v19  ;;  %1061 = vmatpush.msrb.mxu2 %v1809_v12 }
 0x8b8   :  { %1087 = vmatpush.msrb.mxu3 %v1859_v27  ;;  %977 = vmatpush.msrb.mxu0 %v1780_v4 }
 0x8b9   :  { %1018 = vmatpush.msrb.mxu1 %v1832_v18  ;;  %1062 = vmatpush.msrb.mxu2 %v1811_v13 }
 0x8ba   :  { %1088 = vmatpush.msrb.mxu3 %v1857_v26  ;;  %978 = vmatpush.msrb.mxu0 %v1775_v3 }
 0x92e   :  { %v664_v1 = vpop.f32.mrf.mxu1  ;;  %v624_v3 = vpop.f32.mrf.mxu0 }
 0x92f   :  { %668 = vrot.lane.b32.xlu0 %v664_v1, %s1741_s19  ;;  %v627_v20 = vadd.f32 %v1532_v7, %v624_v3 }
 0x931   :  { %v1534_v21 = vmul.f32 -1.442695, %v627_v20 }
 0x935   :  { %v708_v0 = vpop.f32.mrf.mxu2  ;;  %v734_v17 = vpop.f32.mrf.mxu3 }
 0x936   :  { %712 = vrot.lane.b32.xlu1 %v708_v0, %s1738_s13 }
 0x9a1   :  { %v669_v41 = vpop.permute.xlu0 %668 }
 0x9a2   :  { %v671_v42 = vadd.f32 %v1532_v7, %v669_v41 }
 0x9a4   :  { %v1536_v44 = vmul.f32 -1.442695, %v671_v42 }
 0x9a8   :  { %v713_v8 = vpop.permute.xlu1 %712 }
 0x9a9   :  { %v715_v4 = vadd.f32 %v1532_v7, %v713_v8 }
 0x9ab   :  { %1654 = vtanh.f32 %v715_v4 }
 0x9ac   :  { %1656 = vpow2.f32 %v1534_v21  ;;  %v2003_v21 = vld [vmem:[%s2121_s1 + $0x18] sm:$0xff] }
 0x9b1   :  { %v1655_v14 = vpop.eup %1654 }
 0x9b2   :  { %763 = vrot.lane.b32.xlu2 %v1655_v14, %s1738_s13  ;;  %v1657_v22 = vpop.eup %1656 }
 0x9b3   :  { %v631_v25 = vadd.f32 1.0, %v1657_v22  ;;  %v2012_v22 = vld [vmem:[%s2121_s1 + $0x10] sm:$0xff] }
 0x9b5   :  { %1658 = vrcp.f32 %v631_v25  ;;  %v643_v34 = vand.u32 2147483648, %v631_v25  ;;  %vm637_vm11 = vweird.f32 %v631_v25  ;;  %v641_v35 = vand.u32 2147483647, %v631_v25 }
 0x9b6   :  { %1660 = vpow2.f32 %v1536_v44 }
 0x9b7   :  { %v644_v38 = vor.u32 1.1754944e-38, %v643_v34  ;;  %vm642_vm13 = vcmp.eq.f32.partialorder %v641_v35, 8.507059e+37 }
 0x9ba   :  { %738 = vrot.lane.b32.xlu2 %v734_v17, %s1740_s18 }
 0x9bb   :  { %v1659_v28 = vpop.eup %1658 }
 0x9bc   :  { %v633_v30 = vmul.f32 %v1659_v28, %v631_v25  ;;  %vm638_vm10 = vweird.f32 %v1659_v28  ;;  %v1661_v45 = vpop.eup %1660  ;;  %v2021_v25 = vld [vmem:[%s2121_s1 + $0x8] sm:$0xff] }
 0x9bd   :  { %vm639_vm12 = vmor %vm637_vm11, %vm638_vm10  ;;  %v675_v46 = vadd.f32 1.0, %v1661_v45 }
 0x9be   :  { %v634_v31 = vsub.f32 1.0, %v633_v30 }
 0x9bf   :  { %1662 = vrcp.f32 %v675_v46  ;;  %v687_v43 = vand.u32 2147483648, %v675_v46  ;;  %vm681_vm15 = vweird.f32 %v675_v46  ;;  %v685_v52 = vand.u32 2147483647, %v675_v46 }
 0x9c0   :  { %v635_v32 = vmul.f32 %v1659_v28, %v634_v31 }
 0x9c1   :  { %v688_v54 = vor.u32 1.1754944e-38, %v687_v43  ;;  %vm686_vm3 = vcmp.eq.f32.partialorder %v685_v52, 8.507059e+37 }
 0x9c2   :  { %v636_v33 = vadd.f32 %v1659_v28, %v635_v32  ;;  %v1540_v32 = vld [vmem:[%s2122_s0 + $0x8] sm:$0x3] }
 0x9c4   :  { %v640_v37 = vsel %vm639_vm12, %v1659_v28, %v636_v33  ;;  %v2030_v28 = vld [vmem:[%s2121_s1] sm:$0xff] }
 0x9c5   :  { %v645_v39 = vsel %vm642_vm13, %v644_v38, %v640_v37  ;;  %v1663_v11 = vpop.eup %1662 }
 0x9c6   :  { %v677_v47 = vmul.f32 %v1663_v11, %v675_v46  ;;  %vm682_vm14 = vweird.f32 %v1663_v11 }
 0x9c7   :  { %vm683_vm2 = vmor %vm681_vm15, %vm682_vm14 }
 0x9c8   :  { %v678_v48 = vsub.f32 1.0, %v677_v47 }
 0x9ca   :  { %v679_v50 = vmul.f32 %v1663_v11, %v678_v48 }
 0x9cc   :  { %v680_v51 = vadd.f32 %v1663_v11, %v679_v50 }
 0x9ce   :  { %v684_v53 = vsel %vm683_vm2, %v1663_v11, %v680_v51 }
 0x9cf   :  { %v689_v55 = vsel %vm686_vm3, %v688_v54, %v684_v53 }
 0x9d0   :  { %v761_v57 = vmul.f32 %v689_v55, %v1954_v49 }
 0xa0c   :  { %v764_v29 = vpop.permute.xlu2 %763 }
 0xa0d   :  { %v766_v40 = vmul.f32 %v764_v29, %v645_v39 }
 0xa0f   :  { %768 = vrot.lane.b32.xlu1 %v766_v40, %s1741_s19 }
 0xa14   :  { %v739_v60 = vpop.permute.xlu2 %738 }
 0xa15   :  { %v741_v61 = vadd.f32 %v1532_v7, %v739_v60 }
 0xa17   :  { %v1539_v62 = vmul.f32 -1.442695, %v741_v61 }
 0xa81   :  { %v769_v58 = vpop.permute.xlu1 %768 }
 0xa82   :  { %v1988_v59 = vadd.f32 %v769_v58, %v761_v57 }
 0xa84   :  { %1664 = vtanh.f32 %v1988_v59 }
 0xa85   :  { %1666 = vpow2.f32 %v1539_v62 }
 0xa8a   :  { %v1665_v36 = vpop.eup %1664 }
 0xa8b   :  { %774 = vrot.lane.b32.xlu0 %v1665_v36, %s1738_s13  ;;  %v1667_v63 = vpop.eup %1666 }
 0xa8c   :  { %v745_v2 = vadd.f32 1.0, %v1667_v63 }
 0xa8e   :  { %1668 = vrcp.f32 %v745_v2  ;;  %v757_v0 = vand.u32 2147483648, %v745_v2  ;;  %vm751_vm5 = vweird.f32 %v745_v2  ;;  %v755_v8 = vand.u32 2147483647, %v745_v2 }
 0xa90   :  { %v758_v14 = vor.u32 1.1754944e-38, %v757_v0  ;;  %vm756_vm7 = vcmp.eq.f32.partialorder %v755_v8, 8.507059e+37 }
 0xa94   :  { %v1669_v56 = vpop.eup %1668 }
 0xa95   :  { %v747_v5 = vmul.f32 %v1669_v56, %v745_v2  ;;  %vm752_vm4 = vweird.f32 %v1669_v56 }
 0xa96   :  { %vm753_vm6 = vmor %vm751_vm5, %vm752_vm4 }
 0xa97   :  { %v748_v6 = vsub.f32 1.0, %v747_v5 }
 0xa99   :  { %v749_v1 = vmul.f32 %v1669_v56, %v748_v6 }
 0xa9b   :  { %v750_v49 = vadd.f32 %v1669_v56, %v749_v1 }
 0xa9d   :  { %v754_v4 = vsel %vm753_vm6, %v1669_v56, %v750_v49 }
 0xa9e   :  { %v759_v17 = vsel %vm756_vm7, %v758_v14, %v754_v4 }
 0xafd   :  { %v775_v7 = vpop.permute.xlu0 %774 }
 0xafe   :  { %v777_v3 = vmul.f32 %v775_v7, %v759_v17 }
 0xb00   :  { %781 = vrot.lane.b32.xlu1 %v777_v3, %s1741_s19 }
 0xb72   :  { %v782_v20 = vpop.permute.xlu1 %781 }
 0xb73   :  { %1541 = vmatmul.msk.f32.vlgmr.msra.gmra.mxu0 %vm25_vm1, %v782_v20  ;;  %1543 = vmatmul.msk.f32.vlgmr.msra.gmra.mxu1 %vm25_vm1, %v782_v20 }
 0xb74   :  { %1545 = vmatmul.msk.f32.vlgmr.msra.gmra.mxu2 %vm25_vm1, %v782_v20  ;;  %1546 = vmatmul.msk.f32.vlgmr.msra.gmra.mxu3 %vm25_vm1, %v782_v20 }
 0xb75   :  { %1193 = vmatpush.msra.mxu1 %v1827_v16  ;;  %1237 = vmatpush.msra.mxu2 %v1802_v9 }
 0xb76   :  { %1263 = vmatpush.msra.mxu3 %v1852_v24  ;;  %1153 = vmatpush.msra.mxu0 %v2003_v21 }
 0xb77   :  { %1194 = vmatpush.msra.mxu1 %v1825_v15  ;;  %1238 = vmatpush.msra.mxu2 %v1804_v10 }
 0xb78   :  { %1264 = vmatpush.msra.mxu3 %v1850_v23  ;;  %1154 = vmatpush.msra.mxu0 %v2012_v22 }
 0xb79   :  { %1195 = vmatpush.msra.mxu1 %v1834_v19  ;;  %1239 = vmatpush.msra.mxu2 %v1809_v12 }
 0xb7a   :  { %1265 = vmatpush.msra.mxu3 %v1859_v27  ;;  %1155 = vmatpush.msra.mxu0 %v2021_v25 }
 0xb7b   :  { %1196 = vmatpush.msra.mxu1 %v1832_v18  ;;  %1240 = vmatpush.msra.mxu2 %v1811_v13 }
 0xb7c   :  { %1266 = vmatpush.msra.mxu3 %v1857_v26  ;;  %1156 = vmatpush.msra.mxu0 %v2030_v28 }
 0xbf0   :  { %v842_v30 = vpop.f32.mrf.mxu1  ;;  %v802_v38 = vpop.f32.mrf.mxu0 }
 0xbf1   :  { %846 = vrot.lane.b32.xlu1 %v842_v30, %s1741_s19  ;;  %v805_v29 = vadd.f32 %v1540_v32, %v802_v38 }
 0xbf3   :  { %v1542_v39 = vmul.f32 -1.442695, %v805_v29 }
 0xbf7   :  { %v886_v31 = vpop.f32.mrf.mxu2  ;;  %v912_v37 = vpop.f32.mrf.mxu3 }
 0xbf8   :  { %890 = vrot.lane.b32.xlu2 %v886_v31, %s1738_s13 }
 0xc52   :  { %v891_v33 = vpop.permute.xlu2 %890 }
 0xc53   :  { %v893_v34 = vadd.f32 %v1540_v32, %v891_v33 }
 0xc55   :  { %1670 = vtanh.f32 %v893_v34 }
 0xc56   :  { %1672 = vpow2.f32 %v1542_v39 }
 0xc5b   :  { %v1671_v35 = vpop.eup %1670 }
 0xc5c   :  { %941 = vrot.lane.b32.xlu0 %v1671_v35, %s1738_s13  ;;  %v1673_v40 = vpop.eup %1672 }
 0xc5d   :  { %v809_v41 = vadd.f32 1.0, %v1673_v40 }
 0xc5f   :  { %1674 = vrcp.f32 %v809_v41  ;;  %v821_v47 = vand.u32 2147483648, %v809_v41  ;;  %vm815_vm9 = vweird.f32 %v809_v41  ;;  %v819_v48 = vand.u32 2147483647, %v809_v41 }
 0xc61   :  { %v822_v51 = vor.u32 1.1754944e-38, %v821_v47  ;;  %vm820_vm11 = vcmp.eq.f32.partialorder %v819_v48, 8.507059e+37 }
 0xc63   :  { %v847_v54 = vpop.permute.xlu1 %846 }
 0xc64   :  { %916 = vrot.lane.b32.xlu0 %v912_v37, %s1740_s18  ;;  %v849_v55 = vadd.f32 %v1540_v32, %v847_v54 }
 0xc65   :  { %v1675_v42 = vpop.eup %1674 }
 0xc66   :  { %v811_v44 = vmul.f32 %v1675_v42, %v809_v41  ;;  %vm816_vm8 = vweird.f32 %v1675_v42  ;;  %v1544_v57 = vmul.f32 -1.442695, %v849_v55 }
 0xc67   :  { %vm817_vm10 = vmor %vm815_vm9, %vm816_vm8 }
 0xc68   :  { %v812_v45 = vsub.f32 1.0, %v811_v44  ;;  %1676 = vpow2.f32 %v1544_v57 }
 0xc6a   :  { %v813_v46 = vmul.f32 %v1675_v42, %v812_v45 }
 0xc6c   :  { %v814_v11 = vadd.f32 %v1675_v42, %v813_v46 }
 0xc6e   :  { %v818_v50 = vsel %vm817_vm10, %v1675_v42, %v814_v11  ;;  %v1677_v58 = vpop.eup %1676 }
 0xc6f   :  { %v823_v52 = vsel %vm820_vm11, %v822_v51, %v818_v50  ;;  %v853_v36 = vadd.f32 1.0, %v1677_v58 }
 0xc71   :  { %1678 = vrcp.f32 %v853_v36  ;;  %v865_v56 = vand.u32 2147483648, %v853_v36  ;;  %vm859_vm13 = vweird.f32 %v853_v36  ;;  %v863_v5 = vand.u32 2147483647, %v853_v36 }
 0xc73   :  { %v866_v1 = vor.u32 1.1754944e-38, %v865_v56  ;;  %vm864_vm15 = vcmp.eq.f32.partialorder %v863_v5, 8.507059e+37 }
 0xc77   :  { %v1679_v60 = vpop.eup %1678 }
 0xc78   :  { %v855_v61 = vmul.f32 %v1679_v60, %v853_v36  ;;  %vm860_vm12 = vweird.f32 %v1679_v60 }
 0xc79   :  { %vm861_vm14 = vmor %vm859_vm13, %vm860_vm12 }
 0xc7a   :  { %v856_v62 = vsub.f32 1.0, %v855_v61 }
 0xc7c   :  { %v857_v63 = vmul.f32 %v1679_v60, %v856_v62 }
 0xc7e   :  { %v858_v2 = vadd.f32 %v1679_v60, %v857_v63 }
 0xc80   :  { %v862_v6 = vsel %vm861_vm14, %v1679_v60, %v858_v2 }
 0xc81   :  { %v867_v49 = vsel %vm864_vm15, %v866_v1, %v862_v6 }
 0xc82   :  { %v939_v0 = vmul.f32 %v867_v49, %v1988_v59 }
 0xcce   :  { %v942_v43 = vpop.permute.xlu0 %941 }
 0xccf   :  { %v944_v53 = vmul.f32 %v942_v43, %v823_v52 }
 0xcd1   :  { %946 = vrot.lane.b32.xlu2 %v944_v53, %s1741_s19 }
 0xcd6   :  { %v917_v17 = vpop.permute.xlu0 %916 }
 0xcd7   :  { %v919_v7 = vadd.f32 %v1540_v32, %v917_v17 }
 0xcd9   :  { %v1547_v3 = vmul.f32 -1.442695, %v919_v7 }
 0xd2b   :  { %v947_v8 = vpop.permute.xlu2 %946 }
 0xd2c   :  { %v2042_v4 = vadd.f32 %v947_v8, %v939_v0 }
 0xd2e   :  { %1680 = vtanh.f32 %v2042_v4 }
 0xd2f   :  { %1682 = vpow2.f32 %v1547_v3 }
 0xd34   :  { %v1681_v14 = vpop.eup %1680 }
 0xd35   :  { %952 = vrot.lane.b32.xlu1 %v1681_v14, %s1738_s13  ;;  %v1683_v20 = vpop.eup %1682 }
 0xd36   :  { %v923_v30 = vadd.f32 1.0, %v1683_v20 }
 0xd38   :  { %1684 = vrcp.f32 %v923_v30  ;;  %v935_v37 = vand.u32 2147483648, %v923_v30  ;;  %vm929_vm3 = vweird.f32 %v923_v30  ;;  %v933_v38 = vand.u32 2147483647, %v923_v30 }
 0xd3a   :  { %v936_v39 = vor.u32 1.1754944e-38, %v935_v37  ;;  %vm934_vm5 = vcmp.eq.f32.partialorder %v933_v38, 8.507059e+37 }
 0xd3e   :  { %v1685_v31 = vpop.eup %1684 }
 0xd3f   :  { %v925_v33 = vmul.f32 %v1685_v31, %v923_v30  ;;  %vm930_vm2 = vweird.f32 %v1685_v31 }
 0xd40   :  { %vm931_vm4 = vmor %vm929_vm3, %vm930_vm2 }
 0xd41   :  { %v926_v34 = vsub.f32 1.0, %v925_v33 }
 0xd43   :  { %v927_v35 = vmul.f32 %v1685_v31, %v926_v34 }
 0xd45   :  { %v928_v59 = vadd.f32 %v1685_v31, %v927_v35 }
 0xd47   :  { %v932_v29 = vsel %vm931_vm4, %v1685_v31, %v928_v59 }
 0xd48   :  { %v937_v40 = vsel %vm934_vm5, %v936_v39, %v932_v29 }
 0xda7   :  { %v953_v32 = vpop.permute.xlu1 %952 }
 0xda8   :  { %v955_v41 = vmul.f32 %v953_v32, %v937_v40 }
 0xdaa   :  { %959 = vrot.lane.b32.xlu2 %v955_v41, %s1741_s19 }
 0xe04   :  { %v960_v42 = vpop.permute.xlu2 %959 }
 0xe05   :  { %1549 = vmatmul.msk.f32.vlgmr.msrb.gmra.mxu0 %vm25_vm1, %v960_v42  ;;  %1551 = vmatmul.msk.f32.vlgmr.msrb.gmra.mxu1 %vm25_vm1, %v960_v42 }
 0xe06   :  { %1553 = vmatmul.msk.f32.vlgmr.msrb.gmra.mxu2 %vm25_vm1, %v960_v42  ;;  %1554 = vmatmul.msk.f32.vlgmr.msrb.gmra.mxu3 %vm25_vm1, %v960_v42  ;;  %v1556_v42 = vld [vmem:[%s2122_s0 + $0xc] sm:$0x3] }
 0xe07   :  { %1371 = vmatpush.msrb.mxu1 %v1827_v16  ;;  %1415 = vmatpush.msrb.mxu2 %v1802_v9 }
 0xe08   :  { %1441 = vmatpush.msrb.mxu3 %v1852_v24  ;;  %1331 = vmatpush.msrb.mxu0 %v2003_v21 }
 0xe09   :  { %1372 = vmatpush.msrb.mxu1 %v1825_v15  ;;  %1416 = vmatpush.msrb.mxu2 %v1804_v10 }
 0xe0a   :  { %1442 = vmatpush.msrb.mxu3 %v1850_v23  ;;  %1332 = vmatpush.msrb.mxu0 %v2012_v22 }
 0xe0b   :  { %1373 = vmatpush.msrb.mxu1 %v1834_v19  ;;  %1417 = vmatpush.msrb.mxu2 %v1809_v12  ;;  %v1548_v12 = vld [vmem:[%s2122_s0 + $0xa] sm:$0x3] }
 0xe0c   :  { %1443 = vmatpush.msrb.mxu3 %v1859_v27  ;;  %1333 = vmatpush.msrb.mxu0 %v2021_v25 }
 0xe0d   :  { %1374 = vmatpush.msrb.mxu1 %v1832_v18  ;;  %1418 = vmatpush.msrb.mxu2 %v1811_v13 }
 0xe0e   :  { %1444 = vmatpush.msrb.mxu3 %v1857_v26  ;;  %1334 = vmatpush.msrb.mxu0 %v2030_v28 }
 0xe82   :  { %v1020_v9 = vpop.f32.mrf.mxu1  ;;  %v980_v19 = vpop.f32.mrf.mxu0 }
 0xe83   :  { %1024 = vrot.lane.b32.xlu2 %v1020_v9, %s1741_s19  ;;  %v983_v23 = vadd.f32 %v1548_v12, %v980_v19 }
 0xe85   :  { %v1550_v24 = vmul.f32 -1.442695, %v983_v23 }
 0xe89   :  { %v1064_v10 = vpop.f32.mrf.mxu2  ;;  %v1090_v13 = vpop.f32.mrf.mxu3 }
 0xe8a   :  { %1068 = vrot.lane.b32.xlu0 %v1064_v10, %s1738_s13 }
 0xedd   :  { %v1025_v43 = vpop.permute.xlu2 %1024 }
 0xede   :  { %v1027_v52 = vadd.f32 %v1548_v12, %v1025_v43 }
 0xee0   :  { %v1552_v53 = vmul.f32 -1.442695, %v1027_v52 }
 0xefc   :  { %v1069_v15 = vpop.permute.xlu0 %1068 }
 0xefd   :  { %v1071_v16 = vadd.f32 %v1548_v12, %v1069_v15 }
 0xeff   :  { %1686 = vtanh.f32 %v1071_v16 }
 0xf00   :  { %1688 = vpow2.f32 %v1550_v24 }
 0xf05   :  { %v1687_v18 = vpop.eup %1686 }
 0xf06   :  { %1119 = vrot.lane.b32.xlu1 %v1687_v18, %s1738_s13  ;;  %v1689_v26 = vpop.eup %1688 }
 0xf07   :  { %v987_v27 = vadd.f32 1.0, %v1689_v26 }
 0xf09   :  { %1690 = vrcp.f32 %v987_v27  ;;  %v999_v45 = vand.u32 2147483648, %v987_v27  ;;  %vm993_vm7 = vweird.f32 %v987_v27  ;;  %v997_v46 = vand.u32 2147483647, %v987_v27 }
 0xf0a   :  { %1692 = vpow2.f32 %v1552_v53 }
 0xf0b   :  { %v1000_v47 = vor.u32 1.1754944e-38, %v999_v45  ;;  %vm998_vm9 = vcmp.eq.f32.partialorder %v997_v46, 8.507059e+37 }
 0xf0e   :  { %1094 = vrot.lane.b32.xlu1 %v1090_v13, %s1740_s18 }
 0xf0f   :  { %v1691_v21 = vpop.eup %1690 }
 0xf10   :  { %v989_v22 = vmul.f32 %v1691_v21, %v987_v27  ;;  %vm994_vm6 = vweird.f32 %v1691_v21  ;;  %v1693_v54 = vpop.eup %1692 }
 0xf11   :  { %vm995_vm8 = vmor %vm993_vm7, %vm994_vm6  ;;  %v1031_v55 = vadd.f32 1.0, %v1693_v54 }
 0xf12   :  { %v990_v25 = vsub.f32 1.0, %v989_v22 }
 0xf13   :  { %1694 = vrcp.f32 %v1031_v55  ;;  %v1043_v62 = vand.u32 2147483648, %v1031_v55  ;;  %vm1037_vm11 = vweird.f32 %v1031_v55  ;;  %v1041_v63 = vand.u32 2147483647, %v1031_v55 }
 0xf14   :  { %v991_v28 = vmul.f32 %v1691_v21, %v990_v25 }
 0xf15   :  { %v1044_v56 = vor.u32 1.1754944e-38, %v1043_v62  ;;  %vm1042_vm13 = vcmp.eq.f32.partialorder %v1041_v63, 8.507059e+37 }
 0xf16   :  { %v992_v44 = vadd.f32 %v1691_v21, %v991_v28 }
 0xf18   :  { %v996_v11 = vsel %vm995_vm8, %v1691_v21, %v992_v44 }
 0xf19   :  { %v1001_v50 = vsel %vm998_vm9, %v1000_v47, %v996_v11  ;;  %v1695_v57 = vpop.eup %1694 }
 0xf1a   :  { %v1033_v58 = vmul.f32 %v1695_v57, %v1031_v55  ;;  %vm1038_vm10 = vweird.f32 %v1695_v57 }
 0xf1b   :  { %vm1039_vm12 = vmor %vm1037_vm11, %vm1038_vm10 }
 0xf1c   :  { %v1034_v36 = vsub.f32 1.0, %v1033_v58 }
 0xf1e   :  { %v1035_v60 = vmul.f32 %v1695_v57, %v1034_v36 }
 0xf20   :  { %v1036_v61 = vadd.f32 %v1695_v57, %v1035_v60 }
 0xf22   :  { %v1040_v2 = vsel %vm1039_vm12, %v1695_v57, %v1036_v61 }
 0xf23   :  { %v1045_v5 = vsel %vm1042_vm13, %v1044_v56, %v1040_v2 }
 0xf24   :  { %v1117_v6 = vmul.f32 %v1045_v5, %v2042_v4 }
 0xf78   :  { %v1120_v48 = vpop.permute.xlu1 %1119 }
 0xf79   :  { %v1122_v51 = vmul.f32 %v1120_v48, %v1001_v50 }
 0xf7b   :  { %1124 = vrot.lane.b32.xlu0 %v1122_v51, %s1741_s19 }
 0xf80   :  { %v1095_v8 = vpop.permute.xlu1 %1094 }
 0xf81   :  { %v1097_v14 = vadd.f32 %v1548_v12, %v1095_v8 }
 0xf83   :  { %v1555_v17 = vmul.f32 -1.442695, %v1097_v14 }
 0xfed   :  { %v1125_v1 = vpop.permute.xlu0 %1124 }
 0xfee   :  { %v2076_v49 = vadd.f32 %v1125_v1, %v1117_v6 }
 0xff0   :  { %1696 = vtanh.f32 %v2076_v49 }
 0xff1   :  { %1698 = vpow2.f32 %v1555_v17 }
 0xff6   :  { %v1697_v0 = vpop.eup %1696 }
 0xff7   :  { %1130 = vrot.lane.b32.xlu2 %v1697_v0, %s1738_s13  ;;  %v1699_v7 = vpop.eup %1698 }
 0xff8   :  { %v1101_v3 = vadd.f32 1.0, %v1699_v7 }
 0xffa   :  { %1700 = vrcp.f32 %v1101_v3  ;;  %v1113_v34 = vand.u32 2147483648, %v1101_v3  ;;  %vm1107_vm15 = vweird.f32 %v1101_v3  ;;  %v1111_v35 = vand.u32 2147483647, %v1101_v3 }
 0xffc   :  { %v1114_v37 = vor.u32 1.1754944e-38, %v1113_v34  ;;  %vm1112_vm3 = vcmp.eq.f32.partialorder %v1111_v35, 8.507059e+37 }
0x1000   :  { %v1701_v20 = vpop.eup %1700 }
0x1001   :  { %v1103_v30 = vmul.f32 %v1701_v20, %v1101_v3  ;;  %vm1108_vm14 = vweird.f32 %v1701_v20 }
0x1002   :  { %vm1109_vm2 = vmor %vm1107_vm15, %vm1108_vm14 }
0x1003   :  { %v1104_v31 = vsub.f32 1.0, %v1103_v30 }
0x1005   :  { %v1105_v33 = vmul.f32 %v1701_v20, %v1104_v31 }
0x1007   :  { %v1106_v4 = vadd.f32 %v1701_v20, %v1105_v33 }
0x1009   :  { %v1110_v59 = vsel %vm1109_vm2, %v1701_v20, %v1106_v4 }
0x100a   :  { %v1115_v38 = vsel %vm1112_vm3, %v1114_v37, %v1110_v59 }
0x1051   :  { %v1131_v29 = vpop.permute.xlu2 %1130 }
0x1052   :  { %v1133_v39 = vmul.f32 %v1131_v29, %v1115_v38 }
0x1054   :  { %1137 = vrot.lane.b32.xlu0 %v1133_v39, %s1741_s19 }
0x10c6   :  { %v1138_v40 = vpop.permute.xlu0 %1137 }
0x10c7   :  { %1557 = vmatmul.msk.f32.vlgmr.msra.gmra.mxu0 %vm25_vm1, %v1138_v40  ;;  %1559 = vmatmul.msk.f32.vlgmr.msra.gmra.mxu1 %vm25_vm1, %v1138_v40 }
0x10c8   :  { %1561 = vmatmul.msk.f32.vlgmr.msra.gmra.mxu2 %vm25_vm1, %v1138_v40  ;;  %1562 = vmatmul.msk.f32.vlgmr.msra.gmra.mxu3 %vm25_vm1, %v1138_v40  ;;  %v1564_v40 = vld [vmem:[%s2122_s0 + $0xe] sm:$0x3] }
0x1144   :  { %v1198_v32 = vpop.f32.mrf.mxu1  ;;  %v1158_v16 = vpop.f32.mrf.mxu0 }
0x1145   :  { %1202 = vrot.lane.b32.xlu0 %v1198_v32, %s1741_s19  ;;  %v1161_v18 = vadd.f32 %v1556_v42, %v1158_v16 }
0x1147   :  { %v1558_v13 = vmul.f32 -1.442695, %v1161_v18 }
0x114b   :  { %v1242_v41 = vpop.f32.mrf.mxu2  ;;  %v1268_v15 = vpop.f32.mrf.mxu3 }
0x114c   :  { %1246 = vrot.lane.b32.xlu1 %v1242_v41, %s1738_s13 }
0x11b7   :  { %v1203_v48 = vpop.permute.xlu0 %1202 }
0x11b8   :  { %v1205_v50 = vadd.f32 %v1556_v42, %v1203_v48 }
0x11ba   :  { %v1560_v51 = vmul.f32 -1.442695, %v1205_v50 }
0x11be   :  { %v1247_v9 = vpop.permute.xlu1 %1246 }
0x11bf   :  { %v1249_v10 = vadd.f32 %v1556_v42, %v1247_v9 }
0x11c1   :  { %1702 = vtanh.f32 %v1249_v10 }
0x11c2   :  { %1704 = vpow2.f32 %v1558_v13 }
0x11c7   :  { %v1703_v12 = vpop.eup %1702 }
0x11c8   :  { %1297 = vrot.lane.b32.xlu2 %v1703_v12, %s1738_s13  ;;  %v1705_v19 = vpop.eup %1704 }
0x11c9   :  { %v1165_v23 = vadd.f32 1.0, %v1705_v19 }
0x11cb   :  { %1706 = vrcp.f32 %v1165_v23  ;;  %v1177_v25 = vand.u32 2147483648, %v1165_v23  ;;  %vm1171_vm5 = vweird.f32 %v1165_v23  ;;  %v1175_v28 = vand.u32 2147483647, %v1165_v23 }
0x11cc   :  { %1708 = vpow2.f32 %v1560_v51 }
0x11cd   :  { %v1178_v45 = vor.u32 1.1754944e-38, %v1177_v25  ;;  %vm1176_vm7 = vcmp.eq.f32.partialorder %v1175_v28, 8.507059e+37 }
0x11d0   :  { %1272 = vrot.lane.b32.xlu2 %v1268_v15, %s1740_s18 }
0x11d1   :  { %v1707_v24 = vpop.eup %1706 }
0x11d2   :  { %v1167_v26 = vmul.f32 %v1707_v24, %v1165_v23  ;;  %vm1172_vm4 = vweird.f32 %v1707_v24  ;;  %v1709_v43 = vpop.eup %1708 }
0x11d3   :  { %vm1173_vm6 = vmor %vm1171_vm5, %vm1172_vm4  ;;  %v1209_v52 = vadd.f32 1.0, %v1709_v43 }
0x11d4   :  { %v1168_v27 = vsub.f32 1.0, %v1167_v26 }
0x11d5   :  { %1710 = vrcp.f32 %v1209_v52  ;;  %v1221_v36 = vand.u32 2147483648, %v1209_v52  ;;  %vm1215_vm9 = vweird.f32 %v1209_v52  ;;  %v1219_v60 = vand.u32 2147483647, %v1209_v52 }
0x11d6   :  { %v1169_v21 = vmul.f32 %v1707_v24, %v1168_v27 }
0x11d7   :  { %v1222_v62 = vor.u32 1.1754944e-38, %v1221_v36  ;;  %vm1220_vm11 = vcmp.eq.f32.partialorder %v1219_v60, 8.507059e+37 }
0x11d8   :  { %v1170_v22 = vadd.f32 %v1707_v24, %v1169_v21 }
0x11da   :  { %v1174_v44 = vsel %vm1173_vm6, %v1707_v24, %v1170_v22 }
0x11db   :  { %v1179_v11 = vsel %vm1176_vm7, %v1178_v45, %v1174_v44  ;;  %v1711_v53 = vpop.eup %1710 }
0x11dc   :  { %v1211_v54 = vmul.f32 %v1711_v53, %v1209_v52  ;;  %vm1216_vm8 = vweird.f32 %v1711_v53 }
0x11dd   :  { %vm1217_vm10 = vmor %vm1215_vm9, %vm1216_vm8 }
0x11de   :  { %v1212_v55 = vsub.f32 1.0, %v1211_v54 }
0x11e0   :  { %v1213_v57 = vmul.f32 %v1711_v53, %v1212_v55 }
0x11e2   :  { %v1214_v58 = vadd.f32 %v1711_v53, %v1213_v57 }
0x11e4   :  { %v1218_v61 = vsel %vm1217_vm10, %v1711_v53, %v1214_v58 }
0x11e5   :  { %v1223_v63 = vsel %vm1220_vm11, %v1222_v62, %v1218_v61 }
0x11e6   :  { %v1295_v2 = vmul.f32 %v1223_v63, %v2076_v49 }
0x1222   :  { %v1298_v46 = vpop.permute.xlu2 %1297 }
0x1223   :  { %v1300_v47 = vmul.f32 %v1298_v46, %v1179_v11 }
0x1225   :  { %1302 = vrot.lane.b32.xlu1 %v1300_v47, %s1741_s19 }
0x122a   :  { %v1273_v1 = vpop.permute.xlu2 %1272 }
0x122b   :  { %v1275_v0 = vadd.f32 %v1556_v42, %v1273_v1 }
0x122d   :  { %v1563_v8 = vmul.f32 -1.442695, %v1275_v0 }
0x1297   :  { %v1303_v56 = vpop.permute.xlu1 %1302 }
0x1298   :  { %v2094_v5 = vadd.f32 %v1303_v56, %v1295_v2 }
0x129a   :  { %1712 = vtanh.f32 %v2094_v5 }
0x129b   :  { %1714 = vpow2.f32 %v1563_v8 }
0x12a0   :  { %v1713_v6 = vpop.eup %1712 }
0x12a1   :  { %1308 = vrot.lane.b32.xlu0 %v1713_v6, %s1738_s13  ;;  %v1715_v14 = vpop.eup %1714 }
0x12a2   :  { %v1279_v17 = vadd.f32 1.0, %v1715_v14 }
0x12a4   :  { %1716 = vrcp.f32 %v1279_v17  ;;  %v1291_v31 = vand.u32 2147483648, %v1279_v17  ;;  %vm1285_vm13 = vweird.f32 %v1279_v17  ;;  %v1289_v33 = vand.u32 2147483647, %v1279_v17 }
0x12a6   :  { %v1292_v34 = vor.u32 1.1754944e-38, %v1291_v31  ;;  %vm1290_vm15 = vcmp.eq.f32.partialorder %v1289_v33, 8.507059e+37 }
0x12aa   :  { %v1717_v7 = vpop.eup %1716 }
0x12ab   :  { %v1281_v3 = vmul.f32 %v1717_v7, %v1279_v17  ;;  %vm1286_vm12 = vweird.f32 %v1717_v7 }
0x12ac   :  { %vm1287_vm14 = vmor %vm1285_vm13, %vm1286_vm12 }
0x12ad   :  { %v1282_v20 = vsub.f32 1.0, %v1281_v3 }
0x12af   :  { %v1283_v30 = vmul.f32 %v1717_v7, %v1282_v20 }
0x12b1   :  { %v1284_v49 = vadd.f32 %v1717_v7, %v1283_v30 }
0x12b3   :  { %v1288_v4 = vsel %vm1287_vm14, %v1717_v7, %v1284_v49 }
0x12b4   :  { %v1293_v35 = vsel %vm1290_vm15, %v1292_v34, %v1288_v4 }
0x1313   :  { %v1309_v59 = vpop.permute.xlu0 %1308 }
0x1314   :  { %v1311_v37 = vmul.f32 %v1309_v59, %v1293_v35 }
0x1316   :  { %1315 = vrot.lane.b32.xlu1 %v1311_v37, %s1741_s19 }
0x1388   :  { %v1316_v38 = vpop.permute.xlu1 %1315 }
0x1389   :  { %1565 = vmatmul.msk.f32.vlgmr.msrb.gmra.mxu0 %vm25_vm1, %v1316_v38  ;;  %1567 = vmatmul.msk.f32.vlgmr.msrb.gmra.mxu1 %vm25_vm1, %v1316_v38 }
0x138a   :  { %1569 = vmatmul.msk.f32.vlgmr.msrb.gmra.mxu2 %vm25_vm1, %v1316_v38  ;;  %1570 = vmatmul.msk.f32.vlgmr.msrb.gmra.mxu3 %vm25_vm1, %v1316_v38 }
0x1406   :  { %v1376_v29 = vpop.f32.mrf.mxu1  ;;  %v1336_v10 = vpop.f32.mrf.mxu0 }
0x1407   :  { %1380 = vrot.lane.b32.xlu1 %v1376_v29, %s1741_s19  ;;  %v1339_v12 = vadd.f32 %v1564_v40, %v1336_v10 }
0x1409   :  { %v1566_v15 = vmul.f32 -1.442695, %v1339_v12 }
0x140d   :  { %v1420_v39 = vpop.f32.mrf.mxu2  ;;  %v1446_v9 = vpop.f32.mrf.mxu3 }
0x140e   :  { %1424 = vrot.lane.b32.xlu2 %v1420_v39, %s1738_s13 }
0x1468   :  { %v1425_v32 = vpop.permute.xlu2 %1424 }
0x1469   :  { %v1427_v41 = vadd.f32 %v1564_v40, %v1425_v32 }
0x146b   :  { %1718 = vtanh.f32 %v1427_v41 }
0x146c   :  { %1720 = vpow2.f32 %v1566_v15 }
0x1471   :  { %v1719_v42 = vpop.eup %1718 }
0x1472   :  { %1475 = vrot.lane.b32.xlu0 %v1719_v42, %s1738_s13  ;;  %v1721_v16 = vpop.eup %1720 }
0x1473   :  { %v1343_v18 = vadd.f32 1.0, %v1721_v16 }
0x1475   :  { %1722 = vrcp.f32 %v1343_v18  ;;  %v1355_v27 = vand.u32 2147483648, %v1343_v18  ;;  %vm1349_vm2 = vweird.f32 %v1343_v18  ;;  %v1353_v21 = vand.u32 2147483647, %v1343_v18 }
0x1477   :  { %v1356_v25 = vor.u32 1.1754944e-38, %v1355_v27  ;;  %vm1354_vm4 = vcmp.eq.f32.partialorder %v1353_v21, 8.507059e+37 }
0x1479   :  { %v1381_v46 = vpop.permute.xlu1 %1380 }
0x147a   :  { %1450 = vrot.lane.b32.xlu0 %v1446_v9, %s1740_s18  ;;  %v1383_v11 = vadd.f32 %v1564_v40, %v1381_v46 }
0x147b   :  { %v1723_v13 = vpop.eup %1722 }
0x147c   :  { %v1345_v19 = vmul.f32 %v1723_v13, %v1343_v18  ;;  %vm1350_vm1 = vweird.f32 %v1723_v13  ;;  %v1568_v47 = vmul.f32 -1.442695, %v1383_v11 }
0x147d   :  { %vm1351_vm3 = vmor %vm1349_vm2, %vm1350_vm1 }
0x147e   :  { %v1346_v23 = vsub.f32 1.0, %v1345_v19  ;;  %1724 = vpow2.f32 %v1568_v47 }
0x1480   :  { %v1347_v24 = vmul.f32 %v1723_v13, %v1346_v23 }
0x1482   :  { %v1348_v26 = vadd.f32 %v1723_v13, %v1347_v24 }
0x1484   :  { %v1352_v22 = vsel %vm1351_vm3, %v1723_v13, %v1348_v26  ;;  %v1725_v48 = vpop.eup %1724 }
0x1485   :  { %v1357_v44 = vsel %vm1354_vm4, %v1356_v25, %v1352_v22  ;;  %v1387_v50 = vadd.f32 1.0, %v1725_v48 }
0x1487   :  { %1726 = vrcp.f32 %v1387_v50  ;;  %v1399_v55 = vand.u32 2147483648, %v1387_v50  ;;  %vm1393_vm6 = vweird.f32 %v1387_v50  ;;  %v1397_v57 = vand.u32 2147483647, %v1387_v50 }
0x1489   :  { %v1400_v36 = vor.u32 1.1754944e-38, %v1399_v55  ;;  %vm1398_vm8 = vcmp.eq.f32.partialorder %v1397_v57, 8.507059e+37 }
0x148d   :  { %v1727_v51 = vpop.eup %1726 }
0x148e   :  { %v1389_v43 = vmul.f32 %v1727_v51, %v1387_v50  ;;  %vm1394_vm5 = vweird.f32 %v1727_v51 }
0x148f   :  { %vm1395_vm7 = vmor %vm1393_vm6, %vm1394_vm5 }
0x1490   :  { %v1390_v52 = vsub.f32 1.0, %v1389_v43 }
0x1492   :  { %v1391_v53 = vmul.f32 %v1727_v51, %v1390_v52 }
0x1494   :  { %v1392_v54 = vadd.f32 %v1727_v51, %v1391_v53 }
0x1496   :  { %v1396_v58 = vsel %vm1395_vm7, %v1727_v51, %v1392_v54 }
0x1497   :  { %v1401_v60 = vsel %vm1398_vm8, %v1400_v36, %v1396_v58 }
0x1498   :  { %v1473_v61 = vmul.f32 %v1401_v60, %v2094_v5 }
0x14e4   :  { %v1476_v28 = vpop.permute.xlu0 %1475 }
0x14e5   :  { %v1478_v45 = vmul.f32 %v1476_v28, %v1357_v44 }
0x14e7   :  { %1480 = vrot.lane.b32.xlu2 %v1478_v45, %s1741_s19 }
0x14ec   :  { %v1451_v56 = vpop.permute.xlu0 %1450 }
0x14ed   :  { %v1453_v6 = vadd.f32 %v1564_v40, %v1451_v56 }
0x14ef   :  { %v1571_v1 = vmul.f32 -1.442695, %v1453_v6 }
0x1541   :  { %v1481_v62 = vpop.permute.xlu2 %1480 }
0x1542   :  { %v1483_v63 = vadd.f32 %v1481_v62, %v1473_v61 }
0x1544   :  { %1728 = vtanh.f32 %v1483_v63  ;;  %1497 = vrot.lane.b32.xlu0 %v1483_v63, %s1740_s18 }
0x1545   :  { %1730 = vpow2.f32 %v1571_v1 }
0x154a   :  { %v1729_v2 = vpop.eup %1728 }
0x154b   :  { %1486 = vrot.lane.b32.xlu1 %v1729_v2, %s1738_s13  ;;  %v1731_v0 = vpop.eup %1730 }
0x154c   :  { %v1457_v8 = vadd.f32 1.0, %v1731_v0 }
0x154e   :  { %1732 = vrcp.f32 %v1457_v8  ;;  %v1469_v30 = vand.u32 2147483648, %v1457_v8  ;;  %vm1463_vm10 = vweird.f32 %v1457_v8  ;;  %v1467_v49 = vand.u32 2147483647, %v1457_v8 }
0x1550   :  { %v1470_v33 = vor.u32 1.1754944e-38, %v1469_v30  ;;  %vm1468_vm12 = vcmp.eq.f32.partialorder %v1467_v49, 8.507059e+37 }
0x1554   :  { %v1733_v14 = vpop.eup %1732 }
0x1555   :  { %v1459_v17 = vmul.f32 %v1733_v14, %v1457_v8  ;;  %vm1464_vm9 = vweird.f32 %v1733_v14 }
0x1556   :  { %vm1465_vm11 = vmor %vm1463_vm10, %vm1464_vm9 }
0x1557   :  { %v1460_v7 = vsub.f32 1.0, %v1459_v17 }
0x1559   :  { %v1461_v3 = vmul.f32 %v1733_v14, %v1460_v7 }
0x155b   :  { %v1462_v20 = vadd.f32 %v1733_v14, %v1461_v3 }
0x155d   :  { %v1466_v31 = vsel %vm1465_vm11, %v1733_v14, %v1462_v20 }
0x155e   :  { %v1471_v4 = vsel %vm1468_vm12, %v1470_v33, %v1466_v31 }
0x15b6   :  { %v1498_v5 = vpop.permute.xlu0 %1497 }
0x15b7   :  { %1500 = vst.msk [vmem:[#allocation3] sm:$0x3] %vm15_vm0, %v1498_v5 }
0x15bd   :  { %v1487_v34 = vpop.permute.xlu1 %1486 }
0x15be   :  { %v1489_v35 = vmul.f32 %v1487_v34, %v1471_v4 }
0x15c0   :  { %1491 = vrot.lane.b32.xlu2 %v1489_v35, %s1741_s19 }
0x161a   :  { %v1492_v59 = vpop.permute.xlu2 %1491 }
0x161b   :  { %1495 = vst.msk [vmem:[#allocation2] sm:$0x3] %vm15_vm0, %v1492_v59 }
0x161c   :  { %1504 = vst.msk [vmem:[%s2123_s2] sm:$0x3] %vm15_vm0, %v1492_v59 }

// kernel: lstm_autoencoder_forward.3
= control target key start
LH: loop header
LB: loop body
LE: loop exit
PB: predicated region body
PF: predicated region fallthrough
CT: control target
= control target key end

     0   :  { %s4772_s0 = inlined_call_operand.vmem [shape: f32[2,64], index: 0, kind: input, shape index: {}]   ;;  %s4773_s1 = inlined_call_operand.vmem [shape: f32[16,64], index: 1, kind: input, shape index: {}]   ;;  %s4774_s2 = inlined_call_operand.hbm [shape: f32[16,1,16], index: 2, kind: output, shape index: {}]  }
   0x1   :  { %v4203_v0 = vld [vmem:[%s4773_s1] sm:$0xff]  ;;  %v4208_v1 = vld [vmem:[%s4773_s1 + $0x8] sm:$0xff] }
   0x2   :  { %7 = vsyncpa [#allocation5], 0  ;;  %v4212_v2 = vpack.i.bf16 %v4203_v0, %v4208_v1  ;;  %56 = vmatpush.msra.mxu0 %v4208_v1  ;;  %s4176_s13 = smov 96   ;;  %s4177_s14 = smov 80   ;;  %vm16_vm0 = vcmask 122880   ;;  %v4179_v3 = vmov 0.0  }
   0x3   :  { %s4178_s15 = smov 112   ;;  %17 = vst.msk [vmem:[#allocation2] sm:$0x1] %vm16_vm0, %v4179_v3  ;;  %vm38_vm1 = vcmask 130048   ;;  %s4180_s16 = smov 32  }
   0x4   :  { %3654 = vrot.lane.b32.xlu0 %v4212_v2, %s4176_s13  ;;  %3664 = vrot.lane.b32.xlu1 %v4212_v2, %s4177_s14  ;;  %18 = vst.msk [vmem:[#allocation3] sm:$0x1] %vm16_vm0, %v4179_v3  ;;  %s4181_s17 = smov 16   ;;  %v4237_v16 = vld [vmem:[%s4772_s0] sm:$0x1]  ;;  %s4182_s20 = smov 48  }
   0x5   :  { %57 = vmatpush.msra.mxu0 %v4203_v0  ;;  %s4184_s12 = smov 1  }
   0x7   :  { %277 = vmatpush.msrb.mxu0 %v4208_v1 }
   0x9   :  { %278 = vmatpush.msrb.mxu0 %v4203_v0 }
   0xa   :  { %v20_v4 = vld [vmem:[#allocation2] sm:$0x1] }
   0xb   :  { %3524 = vmatmul.msk.f32.vlgmr.msra.gmra.mxu0 %vm38_vm1, %v20_v4  ;;  %v3893_v15 = vld [vmem:[#allocation3] ss:$0 sm:$0xff] }
   0xc   :  { %3659 = vrot.lane.b32.xlu0 %v4212_v2, %s4178_s15  ;;  %493 = vmatpush.msra.mxu0 %v4208_v1 }
   0xe   :  { %494 = vmatpush.msra.mxu0 %v4203_v0 }
  0x14   :  { %218 = vrot.lane.b32.xlu0 %v3893_v15, %s4181_s17 }
  0x76   :  { %v3655_v5 = vpop.permute.xlu0 %3654  ;;  %v3665_v9 = vpop.permute.xlu1 %3664 }
  0x77   :  { %v3656_v6 = vunpack.i.l.bf16 %v3655_v5  ;;  %v3657_v7 = vunpack.i.h.bf16 %v3655_v5  ;;  %v3666_v12 = vunpack.i.l.bf16 %v3665_v9  ;;  %v3667_v13 = vunpack.i.h.bf16 %v3665_v9 }
  0x79   :  { %154 = vmatpush.msra.mxu2 %v3656_v6  ;;  %186 = vmatpush.msra.mxu3 %v3666_v12 }
  0x7b   :  { %155 = vmatpush.msra.mxu2 %v3657_v7  ;;  %187 = vmatpush.msra.mxu3 %v3667_v13 }
  0x7c   :  { %3528 = vmatmul.msk.f32.vlgmr.msra.gmra.mxu2 %vm38_vm1, %v20_v4  ;;  %3529 = vmatmul.msk.f32.vlgmr.msra.gmra.mxu3 %vm38_vm1, %v20_v4 }
  0x7e   :  { %v3660_v8 = vpop.permute.xlu0 %3659 }
  0x7f   :  { %v3661_v10 = vunpack.i.l.bf16 %v3660_v8  ;;  %v3662_v11 = vunpack.i.h.bf16 %v3660_v8 }
  0x81   :  { %104 = vmatpush.msra.mxu1 %v3661_v10 }
  0x83   :  { %105 = vmatpush.msra.mxu1 %v3662_v11 }
  0x84   :  { %3526 = vmatmul.msk.f32.vlgmr.msra.gmra.mxu1 %vm38_vm1, %v20_v4 }
  0x86   :  { %v219_v53 = vpop.permute.xlu0 %218 }
  0x88   :  { %v59_v21 = vpop.f32.mrf.mxu0 }
  0x89   :  { %v62_v22 = vadd.f32 %v59_v21, %v4237_v16 }
  0x8b   :  { %v3525_v23 = vmul.f32 -1.442695, %v62_v22 }
  0xff   :  { %v157_v14 = vpop.f32.mrf.mxu2  ;;  %v189_v38 = vpop.f32.mrf.mxu3 }
 0x100   :  { %161 = vrot.lane.b32.xlu1 %v157_v14, %s4180_s16 }
 0x101   :  { %v107_v20 = vpop.f32.mrf.mxu1 }
 0x172   :  { %v162_v17 = vpop.permute.xlu1 %161 }
 0x173   :  { %v164_v18 = vadd.f32 %v162_v17, %v4237_v16 }
 0x175   :  { %3894 = vtanh.f32 %v164_v18 }
 0x176   :  { %3896 = vpow2.f32 %v3525_v23 }
 0x17b   :  { %v3895_v19 = vpop.eup %3894 }
 0x17c   :  { %223 = vrot.lane.b32.xlu2 %v3895_v19, %s4176_s13  ;;  %v3897_v24 = vpop.eup %3896 }
 0x17d   :  { %v66_v25 = vadd.f32 1.0, %v3897_v24 }
 0x17f   :  { %3898 = vrcp.f32 %v66_v25  ;;  %vm72_vm2 = vweird.f32 %v66_v25  ;;  %v78_v30 = vand.u32 2147483648, %v66_v25  ;;  %v76_v32 = vand.u32 2147483647, %v66_v25 }
 0x181   :  { %v79_v33 = vor.u32 1.1754944e-38, %v78_v30  ;;  %vm77_vm5 = vcmp.eq.f32.partialorder %v76_v32, 8.507059e+37 }
 0x184   :  { %111 = vrot.lane.b32.xlu2 %v107_v20, %s4181_s17 }
 0x185   :  { %v3899_v26 = vpop.eup %3898 }
 0x186   :  { %v68_v27 = vmul.f32 %v3899_v26, %v66_v25  ;;  %vm73_vm3 = vweird.f32 %v3899_v26 }
 0x187   :  { %vm74_vm4 = vmor %vm72_vm2, %vm73_vm3 }
 0x188   :  { %v69_v28 = vsub.f32 1.0, %v68_v27  ;;  %v4270_v27 = vld [vmem:[%s4772_s0 + $0x1] sm:$0x1] }
 0x18a   :  { %v70_v29 = vmul.f32 %v3899_v26, %v69_v28 }
 0x18c   :  { %v71_v31 = vadd.f32 %v3899_v26, %v70_v29  ;;  %193 = vrot.lane.b32.xlu2 %v189_v38, %s4182_s20 }
 0x18e   :  { %v75_v34 = vsel %vm74_vm4, %v3899_v26, %v71_v31 }
 0x18f   :  { %v80_v36 = vsel %vm77_vm5, %v79_v33, %v75_v34 }
 0x1d6   :  { %v224_v35 = vpop.permute.xlu2 %223 }
 0x1d7   :  { %v226_v37 = vmul.f32 %v224_v35, %v80_v36 }
 0x1d9   :  { %228 = vrot.lane.b32.xlu1 %v226_v37, %s4181_s17 }
 0x1de   :  { %v112_v39 = vpop.permute.xlu2 %111 }
 0x1df   :  { %v114_v40 = vadd.f32 %v112_v39, %v4237_v16 }
 0x1e1   :  { %3669 = vrot.lane.b32.xlu1 %v4212_v2, %s4176_s13  ;;  %v3527_v41 = vmul.f32 -1.442695, %v114_v40 }
 0x1e3   :  { %3900 = vpow2.f32 %v3527_v41 }
 0x1e6   :  { %v194_v59 = vpop.permute.xlu2 %193 }
 0x1e7   :  { %v196_v60 = vadd.f32 %v194_v59, %v4237_v16 }
 0x1e9   :  { %3679 = vrot.lane.b32.xlu1 %v4212_v2, %s4177_s14  ;;  %v3901_v42 = vpop.eup %3900  ;;  %v3530_v61 = vmul.f32 -1.442695, %v196_v60 }
 0x1ea   :  { %v118_v43 = vadd.f32 1.0, %v3901_v42 }
 0x1ec   :  { %3902 = vrcp.f32 %v118_v43  ;;  %vm124_vm6 = vweird.f32 %v118_v43  ;;  %v130_v48 = vand.u32 2147483648, %v118_v43  ;;  %v128_v50 = vand.u32 2147483647, %v118_v43 }
 0x1ee   :  { %v131_v51 = vor.u32 1.1754944e-38, %v130_v48  ;;  %vm129_vm9 = vcmp.eq.f32.partialorder %v128_v50, 8.507059e+37 }
 0x1f2   :  { %v3903_v44 = vpop.eup %3902 }
 0x1f3   :  { %v120_v45 = vmul.f32 %v3903_v44, %v118_v43  ;;  %vm125_vm7 = vweird.f32 %v3903_v44 }
 0x1f4   :  { %vm126_vm8 = vmor %vm124_vm6, %vm125_vm7 }
 0x1f5   :  { %v121_v46 = vsub.f32 1.0, %v120_v45 }
 0x1f7   :  { %v122_v47 = vmul.f32 %v3903_v44, %v121_v46 }
 0x1f9   :  { %v123_v49 = vadd.f32 %v3903_v44, %v122_v47 }
 0x1fb   :  { %v127_v52 = vsel %vm126_vm8, %v3903_v44, %v123_v49 }
 0x1fc   :  { %v132_v54 = vsel %vm129_vm9, %v131_v51, %v127_v52 }
 0x1fd   :  { %v221_v55 = vmul.f32 %v219_v53, %v132_v54 }
 0x24b   :  { %v229_v56 = vpop.permute.xlu1 %228 }
 0x24c   :  { %v4250_v57 = vadd.f32 %v229_v56, %v221_v55 }
 0x24e   :  { %3904 = vtanh.f32 %v4250_v57 }
 0x24f   :  { %3906 = vpow2.f32 %v3530_v61 }
 0x253   :  { %v3670_v3 = vpop.permute.xlu1 %3669 }
 0x254   :  { %v3905_v58 = vpop.eup %3904  ;;  %v3671_v4 = vunpack.i.l.bf16 %v3670_v3  ;;  %v3672_v5 = vunpack.i.h.bf16 %v3670_v3 }
 0x255   :  { %234 = vrot.lane.b32.xlu0 %v3905_v58, %s4180_s16  ;;  %v3907_v62 = vpop.eup %3906 }
 0x256   :  { %v200_v63 = vadd.f32 1.0, %v3907_v62  ;;  %375 = vmatpush.msrb.mxu2 %v3671_v4 }
 0x258   :  { %3908 = vrcp.f32 %v200_v63  ;;  %376 = vmatpush.msrb.mxu2 %v3672_v5  ;;  %vm206_vm10 = vweird.f32 %v200_v63  ;;  %v212_v12 = vand.u32 2147483648, %v200_v63  ;;  %v210_v14 = vand.u32 2147483647, %v200_v63 }
 0x25a   :  { %v213_v15 = vor.u32 1.1754944e-38, %v212_v12  ;;  %vm211_vm13 = vcmp.eq.f32.partialorder %v210_v14, 8.507059e+37 }
 0x25b   :  { %v3680_v7 = vpop.permute.xlu1 %3679 }
 0x25c   :  { %v3681_v8 = vunpack.i.l.bf16 %v3680_v7  ;;  %v3682_v23 = vunpack.i.h.bf16 %v3680_v7 }
 0x25d   :  { %3674 = vrot.lane.b32.xlu0 %v4212_v2, %s4178_s15 }
 0x25e   :  { %v3909_v6 = vpop.eup %3908  ;;  %407 = vmatpush.msrb.mxu3 %v3681_v8 }
 0x25f   :  { %v202_v9 = vmul.f32 %v3909_v6, %v200_v63  ;;  %vm207_vm11 = vweird.f32 %v3909_v6 }
 0x260   :  { %vm208_vm12 = vmor %vm206_vm10, %vm207_vm11  ;;  %408 = vmatpush.msrb.mxu3 %v3682_v23 }
 0x261   :  { %v203_v10 = vsub.f32 1.0, %v202_v9 }
 0x263   :  { %v204_v11 = vmul.f32 %v3909_v6, %v203_v10 }
 0x265   :  { %v205_v13 = vadd.f32 %v3909_v6, %v204_v11 }
 0x267   :  { %v209_v16 = vsel %vm208_vm12, %v3909_v6, %v205_v13 }
 0x268   :  { %v214_v17 = vsel %vm211_vm13, %v213_v15, %v209_v16 }
 0x2c7   :  { %v235_v18 = vpop.permute.xlu0 %234 }
 0x2c8   :  { %v237_v19 = vmul.f32 %v235_v18, %v214_v17 }
 0x2ca   :  { %239 = vrot.lane.b32.xlu2 %v237_v19, %s4177_s14 }
 0x2cf   :  { %v3675_v20 = vpop.permute.xlu0 %3674 }
 0x2d0   :  { %v3676_v21 = vunpack.i.l.bf16 %v3675_v20  ;;  %v3677_v22 = vunpack.i.h.bf16 %v3675_v20 }
 0x2d2   :  { %325 = vmatpush.msrb.mxu1 %v3676_v21 }
 0x2d4   :  { %326 = vmatpush.msrb.mxu1 %v3677_v22 }
 0x324   :  { %v240_v24 = vpop.permute.xlu2 %239 }
 0x325   :  { %243 = vst.msk [vmem:[#allocation4] sm:$0x1] %vm16_vm0, %v240_v24  ;;  %3532 = vmatmul.msk.f32.vlgmr.msrb.gmra.mxu0 %vm38_vm1, %v240_v24  ;;  %3534 = vmatmul.msk.f32.vlgmr.msrb.gmra.mxu1 %vm38_vm1, %v240_v24 }
 0x326   :  { %3536 = vmatmul.msk.f32.vlgmr.msrb.gmra.mxu2 %vm38_vm1, %v240_v24  ;;  %3537 = vmatmul.msk.f32.vlgmr.msrb.gmra.mxu3 %vm38_vm1, %v240_v24 }
 0x327   :  { %709 = vmatpush.msrb.mxu0 %v4208_v1 }
 0x329   :  { %710 = vmatpush.msrb.mxu0 %v4203_v0 }
 0x3a2   :  { %v328_v25 = vpop.f32.mrf.mxu1  ;;  %v280_v32 = vpop.f32.mrf.mxu0 }
 0x3a3   :  { %332 = vrot.lane.b32.xlu1 %v328_v25, %s4181_s17  ;;  %v283_v33 = vadd.f32 %v4270_v27, %v280_v32 }
 0x3a5   :  { %v3533_v34 = vmul.f32 -1.442695, %v283_v33 }
 0x3a9   :  { %v378_v26 = vpop.f32.mrf.mxu2  ;;  %v410_v31 = vpop.f32.mrf.mxu3 }
 0x3aa   :  { %382 = vrot.lane.b32.xlu2 %v378_v26, %s4180_s16 }
 0x404   :  { %v383_v28 = vpop.permute.xlu2 %382 }
 0x405   :  { %v385_v29 = vadd.f32 %v4270_v27, %v383_v28 }
 0x407   :  { %3910 = vtanh.f32 %v385_v29 }
 0x408   :  { %3912 = vpow2.f32 %v3533_v34 }
 0x40d   :  { %v3911_v30 = vpop.eup %3910 }
 0x40e   :  { %439 = vrot.lane.b32.xlu0 %v3911_v30, %s4176_s13  ;;  %v3913_v35 = vpop.eup %3912 }
 0x40f   :  { %v287_v36 = vadd.f32 1.0, %v3913_v35 }
 0x411   :  { %3914 = vrcp.f32 %v287_v36  ;;  %v299_v42 = vand.u32 2147483648, %v287_v36  ;;  %vm293_vm15 = vweird.f32 %v287_v36  ;;  %v297_v43 = vand.u32 2147483647, %v287_v36 }
 0x413   :  { %v300_v45 = vor.u32 1.1754944e-38, %v299_v42  ;;  %vm298_vm3 = vcmp.eq.f32.partialorder %v297_v43, 8.507059e+37 }
 0x415   :  { %v333_v49 = vpop.permute.xlu1 %332 }
 0x416   :  { %414 = vrot.lane.b32.xlu0 %v410_v31, %s4182_s20  ;;  %v335_v50 = vadd.f32 %v4270_v27, %v333_v49 }
 0x417   :  { %v3915_v37 = vpop.eup %3914 }
 0x418   :  { %v289_v38 = vmul.f32 %v3915_v37, %v287_v36  ;;  %vm294_vm14 = vweird.f32 %v3915_v37  ;;  %v3535_v51 = vmul.f32 -1.442695, %v335_v50  ;;  %v4303_v36 = vld [vmem:[%s4772_s0] sm:$0x1] }
 0x419   :  { %vm295_vm2 = vmor %vm293_vm15, %vm294_vm14 }
 0x41a   :  { %v290_v39 = vsub.f32 1.0, %v289_v38  ;;  %3916 = vpow2.f32 %v3535_v51 }
 0x41c   :  { %v291_v40 = vmul.f32 %v3915_v37, %v290_v39 }
 0x41e   :  { %v292_v41 = vadd.f32 %v3915_v37, %v291_v40 }
 0x420   :  { %v296_v44 = vsel %vm295_vm2, %v3915_v37, %v292_v41  ;;  %v3917_v52 = vpop.eup %3916 }
 0x421   :  { %v301_v46 = vsel %vm298_vm3, %v300_v45, %v296_v44  ;;  %v339_v53 = vadd.f32 1.0, %v3917_v52 }
 0x423   :  { %3918 = vrcp.f32 %v339_v53  ;;  %v351_v60 = vand.u32 2147483648, %v339_v53  ;;  %vm345_vm5 = vweird.f32 %v339_v53  ;;  %v349_v61 = vand.u32 2147483647, %v339_v53 }
 0x425   :  { %v352_v63 = vor.u32 1.1754944e-38, %v351_v60  ;;  %vm350_vm7 = vcmp.eq.f32.partialorder %v349_v61, 8.507059e+37 }
 0x429   :  { %v3919_v54 = vpop.eup %3918 }
 0x42a   :  { %v341_v55 = vmul.f32 %v3919_v54, %v339_v53  ;;  %vm346_vm4 = vweird.f32 %v3919_v54 }
 0x42b   :  { %vm347_vm6 = vmor %vm345_vm5, %vm346_vm4 }
 0x42c   :  { %v342_v56 = vsub.f32 1.0, %v341_v55 }
 0x42e   :  { %v343_v58 = vmul.f32 %v3919_v54, %v342_v56 }
 0x430   :  { %v344_v59 = vadd.f32 %v3919_v54, %v343_v58 }
 0x432   :  { %v348_v62 = vsel %vm347_vm6, %v3919_v54, %v344_v59 }
 0x433   :  { %v353_v3 = vsel %vm350_vm7, %v352_v63, %v348_v62 }
 0x434   :  { %v437_v4 = vmul.f32 %v353_v3, %v4250_v57 }
 0x480   :  { %v440_v47 = vpop.permute.xlu0 %439 }
 0x481   :  { %v442_v48 = vmul.f32 %v440_v47, %v301_v46 }
 0x483   :  { %444 = vrot.lane.b32.xlu2 %v442_v48, %s4181_s17 }
 0x488   :  { %v415_v8 = vpop.permute.xlu0 %414 }
 0x489   :  { %v417_v9 = vadd.f32 %v4270_v27, %v415_v8 }
 0x48b   :  { %3684 = vrot.lane.b32.xlu2 %v4212_v2, %s4176_s13  ;;  %v3538_v10 = vmul.f32 -1.442695, %v417_v9 }
 0x493   :  { %3694 = vrot.lane.b32.xlu2 %v4212_v2, %s4177_s14 }
 0x4dd   :  { %v445_v5 = vpop.permute.xlu2 %444 }
 0x4de   :  { %v4283_v6 = vadd.f32 %v445_v5, %v437_v4 }
 0x4e0   :  { %3920 = vtanh.f32 %v4283_v6 }
 0x4e1   :  { %3922 = vpow2.f32 %v3538_v10 }
 0x4e5   :  { %v3685_v13 = vpop.permute.xlu2 %3684 }
 0x4e6   :  { %v3921_v7 = vpop.eup %3920  ;;  %v3687_v57 = vunpack.i.h.bf16 %v3685_v13  ;;  %v3686_v14 = vunpack.i.l.bf16 %v3685_v13 }
 0x4e7   :  { %450 = vrot.lane.b32.xlu1 %v3921_v7, %s4180_s16  ;;  %v3923_v11 = vpop.eup %3922 }
 0x4e8   :  { %v421_v12 = vadd.f32 1.0, %v3923_v11  ;;  %591 = vmatpush.msra.mxu2 %v3686_v14 }
 0x4ea   :  { %3924 = vrcp.f32 %v421_v12  ;;  %592 = vmatpush.msra.mxu2 %v3687_v57  ;;  %v433_v23 = vand.u32 2147483648, %v421_v12  ;;  %vm427_vm9 = vweird.f32 %v421_v12  ;;  %v431_v24 = vand.u32 2147483647, %v421_v12 }
 0x4ec   :  { %v434_v26 = vor.u32 1.1754944e-38, %v433_v23  ;;  %vm432_vm11 = vcmp.eq.f32.partialorder %v431_v24, 8.507059e+37 }
 0x4ed   :  { %v3695_v16 = vpop.permute.xlu2 %3694 }
 0x4ee   :  { %v3697_v17 = vunpack.i.h.bf16 %v3695_v16  ;;  %v3696_v18 = vunpack.i.l.bf16 %v3695_v16 }
 0x4ef   :  { %3689 = vrot.lane.b32.xlu1 %v4212_v2, %s4178_s15 }
 0x4f0   :  { %v3925_v15 = vpop.eup %3924  ;;  %623 = vmatpush.msra.mxu3 %v3696_v18 }
 0x4f1   :  { %v423_v19 = vmul.f32 %v3925_v15, %v421_v12  ;;  %vm428_vm8 = vweird.f32 %v3925_v15 }
 0x4f2   :  { %624 = vmatpush.msra.mxu3 %v3697_v17  ;;  %vm429_vm10 = vmor %vm427_vm9, %vm428_vm8 }
 0x4f3   :  { %v424_v20 = vsub.f32 1.0, %v423_v19 }
 0x4f5   :  { %v425_v21 = vmul.f32 %v3925_v15, %v424_v20 }
 0x4f7   :  { %v426_v22 = vadd.f32 %v3925_v15, %v425_v21 }
 0x4f9   :  { %v430_v25 = vsel %vm429_vm10, %v3925_v15, %v426_v22 }
 0x4fa   :  { %v435_v28 = vsel %vm432_vm11, %v434_v26, %v430_v25 }
 0x559   :  { %v451_v27 = vpop.permute.xlu1 %450 }
 0x55a   :  { %v453_v29 = vmul.f32 %v451_v27, %v435_v28 }
 0x55c   :  { %455 = vrot.lane.b32.xlu0 %v453_v29, %s4177_s14 }
 0x561   :  { %v3690_v30 = vpop.permute.xlu1 %3689 }
 0x562   :  { %v3692_v31 = vunpack.i.h.bf16 %v3690_v30  ;;  %v3691_v32 = vunpack.i.l.bf16 %v3690_v30 }
 0x564   :  { %541 = vmatpush.msra.mxu1 %v3691_v32 }
 0x566   :  { %542 = vmatpush.msra.mxu1 %v3692_v31 }
 0x5ce   :  { %v456_v33 = vpop.permute.xlu0 %455 }
 0x5cf   :  { %459 = vst.msk [vmem:[#allocation4 + $0x1] sm:$0x1] %vm16_vm0, %v456_v33  ;;  %3539 = vmatmul.msk.f32.vlgmr.msra.gmra.mxu0 %vm38_vm1, %v456_v33  ;;  %3541 = vmatmul.msk.f32.vlgmr.msra.gmra.mxu1 %vm38_vm1, %v456_v33 }
 0x5d0   :  { %3543 = vmatmul.msk.f32.vlgmr.msra.gmra.mxu2 %vm38_vm1, %v456_v33  ;;  %3544 = vmatmul.msk.f32.vlgmr.msra.gmra.mxu3 %vm38_vm1, %v456_v33 }
 0x5d1   :  { %925 = vmatpush.msra.mxu0 %v4208_v1 }
 0x5d3   :  { %926 = vmatpush.msra.mxu0 %v4203_v0 }
 0x64c   :  { %v544_v34 = vpop.f32.mrf.mxu1  ;;  %v496_v0 = vpop.f32.mrf.mxu0 }
 0x64d   :  { %548 = vrot.lane.b32.xlu2 %v544_v34, %s4181_s17  ;;  %v499_v40 = vadd.f32 %v496_v0, %v4303_v36 }
 0x64f   :  { %v3540_v41 = vmul.f32 -1.442695, %v499_v40 }
 0x653   :  { %v594_v35 = vpop.f32.mrf.mxu2  ;;  %v626_v1 = vpop.f32.mrf.mxu3 }
 0x654   :  { %598 = vrot.lane.b32.xlu0 %v594_v35, %s4180_s16 }
 0x6a7   :  { %v549_v56 = vpop.permute.xlu2 %548 }
 0x6a8   :  { %v551_v58 = vadd.f32 %v549_v56, %v4303_v36 }
 0x6aa   :  { %v3542_v59 = vmul.f32 -1.442695, %v551_v58 }
 0x6c6   :  { %v599_v37 = vpop.permute.xlu0 %598 }
 0x6c7   :  { %v601_v38 = vadd.f32 %v599_v37, %v4303_v36 }
 0x6c9   :  { %3926 = vtanh.f32 %v601_v38 }
 0x6ca   :  { %3928 = vpow2.f32 %v3540_v41  ;;  %v4334_v41 = vld [vmem:[%s4772_s0 + $0x1] sm:$0x1] }
 0x6cf   :  { %v3927_v39 = vpop.eup %3926 }
 0x6d0   :  { %655 = vrot.lane.b32.xlu1 %v3927_v39, %s4176_s13  ;;  %v3929_v42 = vpop.eup %3928 }
 0x6d1   :  { %v503_v43 = vadd.f32 1.0, %v3929_v42 }
 0x6d3   :  { %3930 = vrcp.f32 %v503_v43  ;;  %v515_v49 = vand.u32 2147483648, %v503_v43  ;;  %vm509_vm13 = vweird.f32 %v503_v43  ;;  %v513_v50 = vand.u32 2147483647, %v503_v43 }
 0x6d4   :  { %3932 = vpow2.f32 %v3542_v59 }
 0x6d5   :  { %v516_v52 = vor.u32 1.1754944e-38, %v515_v49  ;;  %vm514_vm15 = vcmp.eq.f32.partialorder %v513_v50, 8.507059e+37 }
 0x6d8   :  { %630 = vrot.lane.b32.xlu1 %v626_v1, %s4182_s20 }
 0x6d9   :  { %v3931_v44 = vpop.eup %3930 }
 0x6da   :  { %v505_v45 = vmul.f32 %v3931_v44, %v503_v43  ;;  %vm510_vm12 = vweird.f32 %v3931_v44  ;;  %v3933_v60 = vpop.eup %3932 }
 0x6db   :  { %vm511_vm14 = vmor %vm509_vm13, %vm510_vm12  ;;  %v555_v61 = vadd.f32 1.0, %v3933_v60 }
 0x6dc   :  { %v506_v46 = vsub.f32 1.0, %v505_v45 }
 0x6dd   :  { %3934 = vrcp.f32 %v555_v61  ;;  %v567_v7 = vand.u32 2147483648, %v555_v61  ;;  %vm561_vm3 = vweird.f32 %v555_v61  ;;  %v565_v8 = vand.u32 2147483647, %v555_v61 }
 0x6de   :  { %v507_v47 = vmul.f32 %v3931_v44, %v506_v46 }
 0x6df   :  { %v568_v10 = vor.u32 1.1754944e-38, %v567_v7  ;;  %vm566_vm5 = vcmp.eq.f32.partialorder %v565_v8, 8.507059e+37 }
 0x6e0   :  { %v508_v48 = vadd.f32 %v3931_v44, %v507_v47 }
 0x6e2   :  { %v512_v51 = vsel %vm511_vm14, %v3931_v44, %v508_v48 }
 0x6e3   :  { %v517_v54 = vsel %vm514_vm15, %v516_v52, %v512_v51  ;;  %v3935_v62 = vpop.eup %3934 }
 0x6e4   :  { %v557_v63 = vmul.f32 %v3935_v62, %v555_v61  ;;  %vm562_vm2 = vweird.f32 %v3935_v62 }
 0x6e5   :  { %vm563_vm4 = vmor %vm561_vm3, %vm562_vm2 }
 0x6e6   :  { %v558_v3 = vsub.f32 1.0, %v557_v63 }
 0x6e8   :  { %v559_v4 = vmul.f32 %v3935_v62, %v558_v3 }
 0x6ea   :  { %v560_v5 = vadd.f32 %v3935_v62, %v559_v4 }
 0x6ec   :  { %v564_v9 = vsel %vm563_vm4, %v3935_v62, %v560_v5 }
 0x6ed   :  { %v569_v11 = vsel %vm566_vm5, %v568_v10, %v564_v9 }
 0x6ee   :  { %v653_v12 = vmul.f32 %v569_v11, %v4283_v6 }
 0x742   :  { %v656_v53 = vpop.permute.xlu1 %655 }
 0x743   :  { %v658_v55 = vmul.f32 %v656_v53, %v517_v54 }
 0x745   :  { %660 = vrot.lane.b32.xlu0 %v658_v55, %s4181_s17 }
 0x74a   :  { %v631_v15 = vpop.permute.xlu1 %630 }
 0x74b   :  { %v633_v16 = vadd.f32 %v631_v15, %v4303_v36 }
 0x74d   :  { %3699 = vrot.lane.b32.xlu0 %v4212_v2, %s4176_s13  ;;  %v3545_v17 = vmul.f32 -1.442695, %v633_v16 }
 0x755   :  { %3709 = vrot.lane.b32.xlu0 %v4212_v2, %s4177_s14 }
 0x7b7   :  { %v661_v13 = vpop.permute.xlu0 %660 }
 0x7b8   :  { %v4316_v57 = vadd.f32 %v661_v13, %v653_v12 }
 0x7ba   :  { %3936 = vtanh.f32 %v4316_v57 }
 0x7bb   :  { %3938 = vpow2.f32 %v3545_v17 }
 0x7bf   :  { %v3700_v20 = vpop.permute.xlu0 %3699 }
 0x7c0   :  { %v3937_v14 = vpop.eup %3936  ;;  %v3702_v6 = vunpack.i.h.bf16 %v3700_v20  ;;  %v3701_v21 = vunpack.i.l.bf16 %v3700_v20 }
 0x7c1   :  { %666 = vrot.lane.b32.xlu2 %v3937_v14, %s4180_s16  ;;  %v3939_v18 = vpop.eup %3938 }
 0x7c2   :  { %v637_v19 = vadd.f32 1.0, %v3939_v18  ;;  %807 = vmatpush.msrb.mxu2 %v3701_v21 }
 0x7c4   :  { %3940 = vrcp.f32 %v637_v19  ;;  %808 = vmatpush.msrb.mxu2 %v3702_v6  ;;  %v649_v30 = vand.u32 2147483648, %v637_v19  ;;  %vm643_vm7 = vweird.f32 %v637_v19  ;;  %v647_v31 = vand.u32 2147483647, %v637_v19 }
 0x7c6   :  { %v650_v33 = vor.u32 1.1754944e-38, %v649_v30  ;;  %vm648_vm9 = vcmp.eq.f32.partialorder %v647_v31, 8.507059e+37 }
 0x7c7   :  { %v3710_v23 = vpop.permute.xlu0 %3709 }
 0x7c8   :  { %v3712_v24 = vunpack.i.h.bf16 %v3710_v23  ;;  %v3711_v25 = vunpack.i.l.bf16 %v3710_v23 }
 0x7c9   :  { %3704 = vrot.lane.b32.xlu2 %v4212_v2, %s4178_s15 }
 0x7ca   :  { %v3941_v22 = vpop.eup %3940  ;;  %839 = vmatpush.msrb.mxu3 %v3711_v25 }
 0x7cb   :  { %v639_v26 = vmul.f32 %v3941_v22, %v637_v19  ;;  %vm644_vm6 = vweird.f32 %v3941_v22 }
 0x7cc   :  { %840 = vmatpush.msrb.mxu3 %v3712_v24  ;;  %vm645_vm8 = vmor %vm643_vm7, %vm644_vm6 }
 0x7cd   :  { %v640_v27 = vsub.f32 1.0, %v639_v26 }
 0x7cf   :  { %v641_v28 = vmul.f32 %v3941_v22, %v640_v27 }
 0x7d1   :  { %v642_v29 = vadd.f32 %v3941_v22, %v641_v28 }
 0x7d3   :  { %v646_v32 = vsel %vm645_vm8, %v3941_v22, %v642_v29 }
 0x7d4   :  { %v651_v34 = vsel %vm648_vm9, %v650_v33, %v646_v32 }
 0x81b   :  { %v667_v35 = vpop.permute.xlu2 %666 }
 0x81c   :  { %v669_v36 = vmul.f32 %v667_v35, %v651_v34 }
 0x81e   :  { %671 = vrot.lane.b32.xlu1 %v669_v36, %s4177_s14 }
 0x823   :  { %v3705_v37 = vpop.permute.xlu2 %3704 }
 0x824   :  { %v3707_v38 = vunpack.i.h.bf16 %v3705_v37  ;;  %v3706_v39 = vunpack.i.l.bf16 %v3705_v37 }
 0x826   :  { %757 = vmatpush.msrb.mxu1 %v3706_v39 }
 0x828   :  { %758 = vmatpush.msrb.mxu1 %v3707_v38 }
 0x890   :  { %v672_v1 = vpop.permute.xlu1 %671 }
 0x891   :  { %675 = vst.msk [vmem:[#allocation4 + $0x2] sm:$0x1] %vm16_vm0, %v672_v1  ;;  %3547 = vmatmul.msk.f32.vlgmr.msrb.gmra.mxu0 %vm38_vm1, %v672_v1  ;;  %3549 = vmatmul.msk.f32.vlgmr.msrb.gmra.mxu1 %vm38_vm1, %v672_v1 }
 0x892   :  { %3551 = vmatmul.msk.f32.vlgmr.msrb.gmra.mxu2 %vm38_vm1, %v672_v1  ;;  %3552 = vmatmul.msk.f32.vlgmr.msrb.gmra.mxu3 %vm38_vm1, %v672_v1 }
 0x90e   :  { %v760_v0 = vpop.f32.mrf.mxu1  ;;  %v712_v46 = vpop.f32.mrf.mxu0 }
 0x90f   :  { %764 = vrot.lane.b32.xlu0 %v760_v0, %s4181_s17  ;;  %v715_v47 = vadd.f32 %v4334_v41, %v712_v46 }
 0x911   :  { %v3548_v48 = vmul.f32 -1.442695, %v715_v47  ;;  %v4365_v47 = vld [vmem:[%s4772_s0] sm:$0x1] }
 0x915   :  { %v810_v40 = vpop.f32.mrf.mxu2  ;;  %v842_v45 = vpop.f32.mrf.mxu3 }
 0x916   :  { %814 = vrot.lane.b32.xlu1 %v810_v40, %s4180_s16 }
 0x981   :  { %v765_v3 = vpop.permute.xlu0 %764 }
 0x982   :  { %v767_v4 = vadd.f32 %v4334_v41, %v765_v3 }
 0x984   :  { %v3550_v5 = vmul.f32 -1.442695, %v767_v4 }
 0x988   :  { %v815_v42 = vpop.permute.xlu1 %814 }
 0x989   :  { %v817_v43 = vadd.f32 %v4334_v41, %v815_v42 }
 0x98b   :  { %3942 = vtanh.f32 %v817_v43 }
 0x98c   :  { %3944 = vpow2.f32 %v3548_v48 }
 0x991   :  { %v3943_v44 = vpop.eup %3942 }
 0x992   :  { %871 = vrot.lane.b32.xlu2 %v3943_v44, %s4176_s13  ;;  %v3945_v49 = vpop.eup %3944 }
 0x993   :  { %v719_v50 = vadd.f32 1.0, %v3945_v49 }
 0x995   :  { %3946 = vrcp.f32 %v719_v50  ;;  %v731_v56 = vand.u32 2147483648, %v719_v50  ;;  %vm725_vm11 = vweird.f32 %v719_v50  ;;  %v729_v58 = vand.u32 2147483647, %v719_v50 }
 0x996   :  { %3948 = vpow2.f32 %v3550_v5 }
 0x997   :  { %v732_v60 = vor.u32 1.1754944e-38, %v731_v56  ;;  %vm730_vm13 = vcmp.eq.f32.partialorder %v729_v58, 8.507059e+37 }
 0x99a   :  { %846 = vrot.lane.b32.xlu2 %v842_v45, %s4182_s20 }
 0x99b   :  { %v3947_v51 = vpop.eup %3946 }
 0x99c   :  { %v721_v52 = vmul.f32 %v3947_v51, %v719_v50  ;;  %vm726_vm10 = vweird.f32 %v3947_v51  ;;  %v3949_v7 = vpop.eup %3948 }
 0x99d   :  { %vm727_vm12 = vmor %vm725_vm11, %vm726_vm10  ;;  %v771_v8 = vadd.f32 1.0, %v3949_v7 }
 0x99e   :  { %v722_v53 = vsub.f32 1.0, %v721_v52 }
 0x99f   :  { %3950 = vrcp.f32 %v771_v8  ;;  %v783_v14 = vand.u32 2147483648, %v771_v8  ;;  %vm777_vm15 = vweird.f32 %v771_v8  ;;  %v781_v15 = vand.u32 2147483647, %v771_v8 }
 0x9a0   :  { %v723_v54 = vmul.f32 %v3947_v51, %v722_v53 }
 0x9a1   :  { %v784_v17 = vor.u32 1.1754944e-38, %v783_v14  ;;  %vm782_vm3 = vcmp.eq.f32.partialorder %v781_v15, 8.507059e+37 }
 0x9a2   :  { %v724_v55 = vadd.f32 %v3947_v51, %v723_v54 }
 0x9a4   :  { %v728_v59 = vsel %vm727_vm12, %v3947_v51, %v724_v55 }
 0x9a5   :  { %v733_v61 = vsel %vm730_vm13, %v732_v60, %v728_v59  ;;  %v3951_v9 = vpop.eup %3950 }
 0x9a6   :  { %v773_v10 = vmul.f32 %v3951_v9, %v771_v8  ;;  %vm778_vm14 = vweird.f32 %v3951_v9 }
 0x9a7   :  { %vm779_vm2 = vmor %vm777_vm15, %vm778_vm14 }
 0x9a8   :  { %v774_v11 = vsub.f32 1.0, %v773_v10 }
 0x9aa   :  { %v775_v12 = vmul.f32 %v3951_v9, %v774_v11 }
 0x9ac   :  { %v776_v13 = vadd.f32 %v3951_v9, %v775_v12 }
 0x9ae   :  { %v780_v16 = vsel %vm779_vm2, %v3951_v9, %v776_v13 }
 0x9af   :  { %v785_v18 = vsel %vm782_vm3, %v784_v17, %v780_v16  ;;  %v4376_v17 = vld [vmem:[%s4773_s1] sm:$0xff] }
 0x9b0   :  { %v869_v19 = vmul.f32 %v785_v18, %v4316_v57  ;;  %v4381_v18 = vld [vmem:[%s4773_s1 + $0x8] sm:$0xff] }
 0x9b1   :  { %1141 = vmatpush.msrb.mxu0 %v4381_v18 }
 0x9b3   :  { %1142 = vmatpush.msrb.mxu0 %v4376_v17 }
 0x9ec   :  { %v872_v62 = vpop.permute.xlu2 %871 }
 0x9ed   :  { %v874_v63 = vmul.f32 %v872_v62, %v733_v61 }
 0x9ef   :  { %876 = vrot.lane.b32.xlu1 %v874_v63, %s4181_s17 }
 0x9f4   :  { %v847_v22 = vpop.permute.xlu2 %846 }
 0x9f5   :  { %v849_v23 = vadd.f32 %v4334_v41, %v847_v22 }
 0x9f7   :  { %3714 = vrot.lane.b32.xlu1 %v4212_v2, %s4176_s13  ;;  %v3553_v24 = vmul.f32 -1.442695, %v849_v23 }
 0x9ff   :  { %3724 = vrot.lane.b32.xlu1 %v4212_v2, %s4177_s14 }
 0xa61   :  { %v877_v20 = vpop.permute.xlu1 %876 }
 0xa62   :  { %v4347_v6 = vadd.f32 %v877_v20, %v869_v19  ;;  %v4385_v19 = vpack.i.bf16 %v4376_v17, %v4381_v18 }
 0xa64   :  { %3952 = vtanh.f32 %v4347_v6 }
 0xa65   :  { %3954 = vpow2.f32 %v3553_v24 }
 0xa69   :  { %v3715_v27 = vpop.permute.xlu1 %3714 }
 0xa6a   :  { %v3953_v21 = vpop.eup %3952  ;;  %v3717_v57 = vunpack.i.h.bf16 %v3715_v27  ;;  %v3716_v28 = vunpack.i.l.bf16 %v3715_v27 }
 0xa6b   :  { %882 = vrot.lane.b32.xlu0 %v3953_v21, %s4180_s16  ;;  %v3955_v25 = vpop.eup %3954 }
 0xa6c   :  { %v853_v26 = vadd.f32 1.0, %v3955_v25  ;;  %1023 = vmatpush.msra.mxu2 %v3716_v28 }
 0xa6e   :  { %3956 = vrcp.f32 %v853_v26  ;;  %1024 = vmatpush.msra.mxu2 %v3717_v57  ;;  %v865_v36 = vand.u32 2147483648, %v853_v26  ;;  %vm859_vm5 = vweird.f32 %v853_v26  ;;  %v863_v37 = vand.u32 2147483647, %v853_v26 }
 0xa70   :  { %v866_v39 = vor.u32 1.1754944e-38, %v865_v36  ;;  %vm864_vm7 = vcmp.eq.f32.partialorder %v863_v37, 8.507059e+37 }
 0xa71   :  { %v3725_v30 = vpop.permute.xlu1 %3724 }
 0xa72   :  { %v3727_v31 = vunpack.i.h.bf16 %v3725_v30  ;;  %v3726_v32 = vunpack.i.l.bf16 %v3725_v30 }
 0xa73   :  { %3719 = vrot.lane.b32.xlu0 %v4212_v2, %s4178_s15 }
 0xa74   :  { %v3957_v29 = vpop.eup %3956  ;;  %1055 = vmatpush.msra.mxu3 %v3726_v32 }
 0xa75   :  { %v855_v33 = vmul.f32 %v3957_v29, %v853_v26  ;;  %vm860_vm4 = vweird.f32 %v3957_v29 }
 0xa76   :  { %1056 = vmatpush.msra.mxu3 %v3727_v31  ;;  %vm861_vm6 = vmor %vm859_vm5, %vm860_vm4 }
 0xa77   :  { %v856_v2 = vsub.f32 1.0, %v855_v33 }
 0xa79   :  { %v857_v34 = vmul.f32 %v3957_v29, %v856_v2 }
 0xa7b   :  { %v858_v35 = vadd.f32 %v3957_v29, %v857_v34 }
 0xa7d   :  { %v862_v38 = vsel %vm861_vm6, %v3957_v29, %v858_v35 }
 0xa7e   :  { %v867_v0 = vsel %vm864_vm7, %v866_v39, %v862_v38 }
 0xadd   :  { %v883_v1 = vpop.permute.xlu0 %882 }
 0xade   :  { %v885_v40 = vmul.f32 %v883_v1, %v867_v0 }
 0xae0   :  { %887 = vrot.lane.b32.xlu2 %v885_v40, %s4177_s14 }
 0xae5   :  { %v3720_v41 = vpop.permute.xlu0 %3719 }
 0xae6   :  { %v3722_v42 = vunpack.i.h.bf16 %v3720_v41  ;;  %v3721_v43 = vunpack.i.l.bf16 %v3720_v41 }
 0xae8   :  { %973 = vmatpush.msra.mxu1 %v3721_v43 }
 0xaea   :  { %974 = vmatpush.msra.mxu1 %v3722_v42 }
 0xb3a   :  { %v888_v44 = vpop.permute.xlu2 %887 }
 0xb3b   :  { %891 = vst.msk [vmem:[#allocation4 + $0x3] sm:$0x1] %vm16_vm0, %v888_v44  ;;  %3554 = vmatmul.msk.f32.vlgmr.msra.gmra.mxu0 %vm38_vm1, %v888_v44  ;;  %3556 = vmatmul.msk.f32.vlgmr.msra.gmra.mxu1 %vm38_vm1, %v888_v44 }
 0xb3c   :  { %3558 = vmatmul.msk.f32.vlgmr.msra.gmra.mxu2 %vm38_vm1, %v888_v44  ;;  %3559 = vmatmul.msk.f32.vlgmr.msra.gmra.mxu3 %vm38_vm1, %v888_v44 }
 0xb3d   :  { %1357 = vmatpush.msra.mxu0 %v4381_v18 }
 0xb3f   :  { %1358 = vmatpush.msra.mxu0 %v4376_v17 }
 0xbb8   :  { %v976_v45 = vpop.f32.mrf.mxu1  ;;  %v928_v52 = vpop.f32.mrf.mxu0 }
 0xbb9   :  { %980 = vrot.lane.b32.xlu1 %v976_v45, %s4181_s17  ;;  %v931_v53 = vadd.f32 %v928_v52, %v4365_v47 }
 0xbbb   :  { %v3555_v54 = vmul.f32 -1.442695, %v931_v53 }
 0xbbf   :  { %v1026_v46 = vpop.f32.mrf.mxu2  ;;  %v1058_v51 = vpop.f32.mrf.mxu3 }
 0xbc0   :  { %1030 = vrot.lane.b32.xlu2 %v1026_v46, %s4180_s16 }
 0xc1a   :  { %v1031_v48 = vpop.permute.xlu2 %1030 }
 0xc1b   :  { %v1033_v49 = vadd.f32 %v1031_v48, %v4365_v47 }
 0xc1d   :  { %3958 = vtanh.f32 %v1033_v49 }
 0xc1e   :  { %3960 = vpow2.f32 %v3555_v54 }
 0xc23   :  { %v3959_v50 = vpop.eup %3958 }
 0xc24   :  { %1087 = vrot.lane.b32.xlu0 %v3959_v50, %s4176_s13  ;;  %v3961_v55 = vpop.eup %3960 }
 0xc25   :  { %v935_v56 = vadd.f32 1.0, %v3961_v55 }
 0xc27   :  { %3962 = vrcp.f32 %v935_v56  ;;  %v947_v63 = vand.u32 2147483648, %v935_v56  ;;  %vm941_vm9 = vweird.f32 %v935_v56  ;;  %v945_v3 = vand.u32 2147483647, %v935_v56 }
 0xc29   :  { %v948_v5 = vor.u32 1.1754944e-38, %v947_v63  ;;  %vm946_vm11 = vcmp.eq.f32.partialorder %v945_v3, 8.507059e+37 }
 0xc2b   :  { %v981_v10 = vpop.permute.xlu1 %980 }
 0xc2c   :  { %1062 = vrot.lane.b32.xlu0 %v1058_v51, %s4182_s20  ;;  %v983_v11 = vadd.f32 %v981_v10, %v4365_v47 }
 0xc2d   :  { %v3963_v58 = vpop.eup %3962 }
 0xc2e   :  { %v937_v59 = vmul.f32 %v3963_v58, %v935_v56  ;;  %vm942_vm8 = vweird.f32 %v3963_v58  ;;  %v3557_v12 = vmul.f32 -1.442695, %v983_v11  ;;  %v4416_v56 = vld [vmem:[%s4772_s0 + $0x1] sm:$0x1] }
 0xc2f   :  { %vm943_vm10 = vmor %vm941_vm9, %vm942_vm8 }
 0xc30   :  { %v938_v60 = vsub.f32 1.0, %v937_v59  ;;  %3964 = vpow2.f32 %v3557_v12 }
 0xc32   :  { %v939_v61 = vmul.f32 %v3963_v58, %v938_v60 }
 0xc34   :  { %v940_v62 = vadd.f32 %v3963_v58, %v939_v61 }
 0xc36   :  { %v944_v4 = vsel %vm943_vm10, %v3963_v58, %v940_v62  ;;  %v3965_v13 = vpop.eup %3964 }
 0xc37   :  { %v949_v8 = vsel %vm946_vm11, %v948_v5, %v944_v4  ;;  %v987_v14 = vadd.f32 1.0, %v3965_v13 }
 0xc39   :  { %3966 = vrcp.f32 %v987_v14  ;;  %v999_v23 = vand.u32 2147483648, %v987_v14  ;;  %vm993_vm13 = vweird.f32 %v987_v14  ;;  %v997_v24 = vand.u32 2147483647, %v987_v14 }
 0xc3b   :  { %v1000_v26 = vor.u32 1.1754944e-38, %v999_v23  ;;  %vm998_vm15 = vcmp.eq.f32.partialorder %v997_v24, 8.507059e+37 }
 0xc3f   :  { %v3967_v15 = vpop.eup %3966 }
 0xc40   :  { %v989_v16 = vmul.f32 %v3967_v15, %v987_v14  ;;  %vm994_vm12 = vweird.f32 %v3967_v15 }
 0xc41   :  { %vm995_vm14 = vmor %vm993_vm13, %vm994_vm12 }
 0xc42   :  { %v990_v20 = vsub.f32 1.0, %v989_v16 }
 0xc44   :  { %v991_v21 = vmul.f32 %v3967_v15, %v990_v20 }
 0xc46   :  { %v992_v22 = vadd.f32 %v3967_v15, %v991_v21 }
 0xc48   :  { %v996_v25 = vsel %vm995_vm14, %v3967_v15, %v992_v22 }
 0xc49   :  { %v1001_v27 = vsel %vm998_vm15, %v1000_v26, %v996_v25 }
 0xc4a   :  { %v1085_v57 = vmul.f32 %v1001_v27, %v4347_v6 }
 0xc96   :  { %v1088_v7 = vpop.permute.xlu0 %1087 }
 0xc97   :  { %v1090_v9 = vmul.f32 %v1088_v7, %v949_v8 }
 0xc99   :  { %1092 = vrot.lane.b32.xlu2 %v1090_v9, %s4181_s17 }
 0xc9e   :  { %v1063_v31 = vpop.permute.xlu0 %1062 }
 0xc9f   :  { %v1065_v32 = vadd.f32 %v1063_v31, %v4365_v47 }
 0xca1   :  { %3729 = vrot.lane.b32.xlu2 %v4385_v19, %s4176_s13  ;;  %v3560_v33 = vmul.f32 -1.442695, %v1065_v32 }
 0xca9   :  { %3739 = vrot.lane.b32.xlu2 %v4385_v19, %s4177_s14 }
 0xcf3   :  { %v1093_v28 = vpop.permute.xlu2 %1092 }
 0xcf4   :  { %v4396_v29 = vadd.f32 %v1093_v28, %v1085_v57 }
 0xcf6   :  { %3968 = vtanh.f32 %v4396_v29 }
 0xcf7   :  { %3970 = vpow2.f32 %v3560_v33 }
 0xcfb   :  { %v3730_v35 = vpop.permute.xlu2 %3729 }
 0xcfc   :  { %v3969_v30 = vpop.eup %3968  ;;  %v3732_v6 = vunpack.i.h.bf16 %v3730_v35  ;;  %v3731_v36 = vunpack.i.l.bf16 %v3730_v35 }
 0xcfd   :  { %1098 = vrot.lane.b32.xlu1 %v3969_v30, %s4180_s16  ;;  %v3971_v2 = vpop.eup %3970 }
 0xcfe   :  { %v1069_v34 = vadd.f32 1.0, %v3971_v2  ;;  %1239 = vmatpush.msrb.mxu2 %v3731_v36 }
 0xd00   :  { %3972 = vrcp.f32 %v1069_v34  ;;  %1240 = vmatpush.msrb.mxu2 %v3732_v6  ;;  %v1081_v43 = vand.u32 2147483648, %v1069_v34  ;;  %vm1075_vm3 = vweird.f32 %v1069_v34  ;;  %v1079_v44 = vand.u32 2147483647, %v1069_v34 }
 0xd02   :  { %v1082_v46 = vor.u32 1.1754944e-38, %v1081_v43  ;;  %vm1080_vm5 = vcmp.eq.f32.partialorder %v1079_v44, 8.507059e+37 }
 0xd03   :  { %v3740_v38 = vpop.permute.xlu2 %3739 }
 0xd04   :  { %v3742_v39 = vunpack.i.h.bf16 %v3740_v38  ;;  %v3741_v1 = vunpack.i.l.bf16 %v3740_v38 }
 0xd05   :  { %3734 = vrot.lane.b32.xlu1 %v4385_v19, %s4178_s15 }
 0xd06   :  { %v3973_v37 = vpop.eup %3972  ;;  %1271 = vmatpush.msrb.mxu3 %v3741_v1 }
 0xd07   :  { %v1071_v0 = vmul.f32 %v3973_v37, %v1069_v34  ;;  %vm1076_vm2 = vweird.f32 %v3973_v37 }
 0xd08   :  { %1272 = vmatpush.msrb.mxu3 %v3742_v39  ;;  %vm1077_vm4 = vmor %vm1075_vm3, %vm1076_vm2 }
 0xd09   :  { %v1072_v40 = vsub.f32 1.0, %v1071_v0 }
 0xd0b   :  { %v1073_v41 = vmul.f32 %v3973_v37, %v1072_v40 }
 0xd0d   :  { %v1074_v42 = vadd.f32 %v3973_v37, %v1073_v41 }
 0xd0f   :  { %v1078_v45 = vsel %vm1077_vm4, %v3973_v37, %v1074_v42 }
 0xd10   :  { %v1083_v47 = vsel %vm1080_vm5, %v1082_v46, %v1078_v45 }
 0xd6f   :  { %v1099_v48 = vpop.permute.xlu1 %1098 }
 0xd70   :  { %v1101_v49 = vmul.f32 %v1099_v48, %v1083_v47 }
 0xd72   :  { %1103 = vrot.lane.b32.xlu0 %v1101_v49, %s4177_s14 }
 0xd77   :  { %v3735_v50 = vpop.permute.xlu1 %3734 }
 0xd78   :  { %v3737_v51 = vunpack.i.h.bf16 %v3735_v50  ;;  %v3736_v52 = vunpack.i.l.bf16 %v3735_v50 }
 0xd7a   :  { %1189 = vmatpush.msrb.mxu1 %v3736_v52 }
 0xd7c   :  { %1190 = vmatpush.msrb.mxu1 %v3737_v51 }
 0xde4   :  { %v1104_v53 = vpop.permute.xlu0 %1103 }
 0xde5   :  { %1107 = vst.msk [vmem:[#allocation4 + $0x4] sm:$0x1] %vm16_vm0, %v1104_v53  ;;  %3562 = vmatmul.msk.f32.vlgmr.msrb.gmra.mxu0 %vm38_vm1, %v1104_v53  ;;  %3564 = vmatmul.msk.f32.vlgmr.msrb.gmra.mxu1 %vm38_vm1, %v1104_v53 }
 0xde6   :  { %3566 = vmatmul.msk.f32.vlgmr.msrb.gmra.mxu2 %vm38_vm1, %v1104_v53  ;;  %3567 = vmatmul.msk.f32.vlgmr.msrb.gmra.mxu3 %vm38_vm1, %v1104_v53 }
 0xde7   :  { %1573 = vmatpush.msrb.mxu0 %v4381_v18 }
 0xde9   :  { %1574 = vmatpush.msrb.mxu0 %v4376_v17 }
 0xe62   :  { %v1192_v54 = vpop.f32.mrf.mxu1  ;;  %v1144_v62 = vpop.f32.mrf.mxu0 }
 0xe63   :  { %1196 = vrot.lane.b32.xlu2 %v1192_v54, %s4181_s17  ;;  %v1147_v63 = vadd.f32 %v4416_v56, %v1144_v62 }
 0xe65   :  { %v3563_v3 = vmul.f32 -1.442695, %v1147_v63 }
 0xe69   :  { %v1242_v55 = vpop.f32.mrf.mxu2  ;;  %v1274_v61 = vpop.f32.mrf.mxu3 }
 0xe6a   :  { %1246 = vrot.lane.b32.xlu0 %v1242_v55, %s4180_s16 }
 0xebd   :  { %v1197_v22 = vpop.permute.xlu2 %1196 }
 0xebe   :  { %v1199_v23 = vadd.f32 %v4416_v56, %v1197_v22 }
 0xec0   :  { %v3565_v24 = vmul.f32 -1.442695, %v1199_v23 }
 0xedc   :  { %v1247_v58 = vpop.permute.xlu0 %1246 }
 0xedd   :  { %v1249_v59 = vadd.f32 %v4416_v56, %v1247_v58 }
 0xedf   :  { %3974 = vtanh.f32 %v1249_v59 }
 0xee0   :  { %3976 = vpow2.f32 %v3563_v3 }
 0xee5   :  { %v3975_v60 = vpop.eup %3974 }
 0xee6   :  { %1303 = vrot.lane.b32.xlu1 %v3975_v60, %s4176_s13  ;;  %v3977_v4 = vpop.eup %3976 }
 0xee7   :  { %v1151_v5 = vadd.f32 1.0, %v3977_v4 }
 0xee9   :  { %3978 = vrcp.f32 %v1151_v5  ;;  %v1163_v12 = vand.u32 2147483648, %v1151_v5  ;;  %vm1157_vm7 = vweird.f32 %v1151_v5  ;;  %v1161_v13 = vand.u32 2147483647, %v1151_v5 }
 0xeea   :  { %3980 = vpow2.f32 %v3565_v24 }
 0xeeb   :  { %v1164_v15 = vor.u32 1.1754944e-38, %v1163_v12  ;;  %vm1162_vm9 = vcmp.eq.f32.partialorder %v1161_v13, 8.507059e+37 }
 0xeee   :  { %1278 = vrot.lane.b32.xlu1 %v1274_v61, %s4182_s20 }
 0xeef   :  { %v3979_v7 = vpop.eup %3978 }
 0xef0   :  { %v1153_v8 = vmul.f32 %v3979_v7, %v1151_v5  ;;  %vm1158_vm6 = vweird.f32 %v3979_v7  ;;  %v3981_v25 = vpop.eup %3980  ;;  %v4449_v5 = vld [vmem:[%s4772_s0] sm:$0x1] }
 0xef1   :  { %vm1159_vm8 = vmor %vm1157_vm7, %vm1158_vm6  ;;  %v1203_v26 = vadd.f32 1.0, %v3981_v25 }
 0xef2   :  { %v1154_v9 = vsub.f32 1.0, %v1153_v8 }
 0xef3   :  { %3982 = vrcp.f32 %v1203_v26  ;;  %v1215_v32 = vand.u32 2147483648, %v1203_v26  ;;  %vm1209_vm11 = vweird.f32 %v1203_v26  ;;  %v1213_v33 = vand.u32 2147483647, %v1203_v26 }
 0xef4   :  { %v1155_v10 = vmul.f32 %v3979_v7, %v1154_v9 }
 0xef5   :  { %v1216_v34 = vor.u32 1.1754944e-38, %v1215_v32  ;;  %vm1214_vm13 = vcmp.eq.f32.partialorder %v1213_v33, 8.507059e+37 }
 0xef6   :  { %v1156_v11 = vadd.f32 %v3979_v7, %v1155_v10 }
 0xef8   :  { %v1160_v14 = vsel %vm1159_vm8, %v3979_v7, %v1156_v11 }
 0xef9   :  { %v1165_v16 = vsel %vm1162_vm9, %v1164_v15, %v1160_v14  ;;  %v3983_v27 = vpop.eup %3982 }
 0xefa   :  { %v1205_v57 = vmul.f32 %v3983_v27, %v1203_v26  ;;  %vm1210_vm10 = vweird.f32 %v3983_v27 }
 0xefb   :  { %vm1211_vm12 = vmor %vm1209_vm11, %vm1210_vm10 }
 0xefc   :  { %v1206_v28 = vsub.f32 1.0, %v1205_v57 }
 0xefe   :  { %v1207_v30 = vmul.f32 %v3983_v27, %v1206_v28 }
 0xf00   :  { %v1208_v31 = vadd.f32 %v3983_v27, %v1207_v30 }
 0xf02   :  { %v1212_v2 = vsel %vm1211_vm12, %v3983_v27, %v1208_v31 }
 0xf03   :  { %v1217_v35 = vsel %vm1214_vm13, %v1216_v34, %v1212_v2 }
 0xf04   :  { %v1301_v6 = vmul.f32 %v1217_v35, %v4396_v29 }
 0xf58   :  { %v1304_v20 = vpop.permute.xlu1 %1303 }
 0xf59   :  { %v1306_v21 = vmul.f32 %v1304_v20, %v1165_v16 }
 0xf5b   :  { %1308 = vrot.lane.b32.xlu0 %v1306_v21, %s4181_s17 }
 0xf60   :  { %v1279_v39 = vpop.permute.xlu1 %1278 }
 0xf61   :  { %v1281_v1 = vadd.f32 %v4416_v56, %v1279_v39 }
 0xf63   :  { %3744 = vrot.lane.b32.xlu0 %v4385_v19, %s4176_s13  ;;  %v3568_v0 = vmul.f32 -1.442695, %v1281_v1 }
 0xf6b   :  { %3754 = vrot.lane.b32.xlu0 %v4385_v19, %s4177_s14 }
 0xfcd   :  { %v1309_v36 = vpop.permute.xlu0 %1308 }
 0xfce   :  { %v4429_v37 = vadd.f32 %v1309_v36, %v1301_v6 }
 0xfd0   :  { %3984 = vtanh.f32 %v4429_v37 }
 0xfd1   :  { %3986 = vpow2.f32 %v3568_v0 }
 0xfd5   :  { %v3745_v42 = vpop.permute.xlu0 %3744 }
 0xfd6   :  { %v3985_v38 = vpop.eup %3984  ;;  %v3747_v29 = vunpack.i.h.bf16 %v3745_v42  ;;  %v3746_v43 = vunpack.i.l.bf16 %v3745_v42 }
 0xfd7   :  { %1314 = vrot.lane.b32.xlu2 %v3985_v38, %s4180_s16  ;;  %v3987_v40 = vpop.eup %3986 }
 0xfd8   :  { %v1285_v41 = vadd.f32 1.0, %v3987_v40  ;;  %1455 = vmatpush.msra.mxu2 %v3746_v43 }
 0xfda   :  { %3988 = vrcp.f32 %v1285_v41  ;;  %1456 = vmatpush.msra.mxu2 %v3747_v29  ;;  %v1297_v52 = vand.u32 2147483648, %v1285_v41  ;;  %vm1291_vm15 = vweird.f32 %v1285_v41  ;;  %v1295_v53 = vand.u32 2147483647, %v1285_v41 }
 0xfdc   :  { %v1298_v55 = vor.u32 1.1754944e-38, %v1297_v52  ;;  %vm1296_vm3 = vcmp.eq.f32.partialorder %v1295_v53, 8.507059e+37 }
 0xfdd   :  { %v3755_v45 = vpop.permute.xlu0 %3754 }
 0xfde   :  { %v3757_v46 = vunpack.i.h.bf16 %v3755_v45  ;;  %v3756_v47 = vunpack.i.l.bf16 %v3755_v45 }
 0xfdf   :  { %3749 = vrot.lane.b32.xlu2 %v4385_v19, %s4178_s15 }
 0xfe0   :  { %v3989_v44 = vpop.eup %3988  ;;  %1487 = vmatpush.msra.mxu3 %v3756_v47 }
 0xfe1   :  { %v1287_v48 = vmul.f32 %v3989_v44, %v1285_v41  ;;  %vm1292_vm14 = vweird.f32 %v3989_v44 }
 0xfe2   :  { %1488 = vmatpush.msra.mxu3 %v3757_v46  ;;  %vm1293_vm2 = vmor %vm1291_vm15, %vm1292_vm14 }
 0xfe3   :  { %v1288_v49 = vsub.f32 1.0, %v1287_v48 }
 0xfe5   :  { %v1289_v50 = vmul.f32 %v3989_v44, %v1288_v49 }
 0xfe7   :  { %v1290_v51 = vadd.f32 %v3989_v44, %v1289_v50 }
 0xfe9   :  { %v1294_v54 = vsel %vm1293_vm2, %v3989_v44, %v1290_v51 }
 0xfea   :  { %v1299_v58 = vsel %vm1296_vm3, %v1298_v55, %v1294_v54 }
0x1031   :  { %v1315_v56 = vpop.permute.xlu2 %1314 }
0x1032   :  { %v1317_v59 = vmul.f32 %v1315_v56, %v1299_v58 }
0x1034   :  { %1319 = vrot.lane.b32.xlu1 %v1317_v59, %s4177_s14 }
0x1039   :  { %v3750_v60 = vpop.permute.xlu2 %3749 }
0x103a   :  { %v3752_v61 = vunpack.i.h.bf16 %v3750_v60  ;;  %v3751_v62 = vunpack.i.l.bf16 %v3750_v60 }
0x103c   :  { %1405 = vmatpush.msra.mxu1 %v3751_v62 }
0x103e   :  { %1406 = vmatpush.msra.mxu1 %v3752_v61 }
0x10a6   :  { %v1320_v63 = vpop.permute.xlu1 %1319 }
0x10a7   :  { %1323 = vst.msk [vmem:[#allocation4 + $0x5] sm:$0x1] %vm16_vm0, %v1320_v63  ;;  %3569 = vmatmul.msk.f32.vlgmr.msra.gmra.mxu0 %vm38_vm1, %v1320_v63  ;;  %3571 = vmatmul.msk.f32.vlgmr.msra.gmra.mxu1 %vm38_vm1, %v1320_v63 }
0x10a8   :  { %3573 = vmatmul.msk.f32.vlgmr.msra.gmra.mxu2 %vm38_vm1, %v1320_v63  ;;  %3574 = vmatmul.msk.f32.vlgmr.msra.gmra.mxu3 %vm38_vm1, %v1320_v63 }
0x10a9   :  { %1789 = vmatpush.msra.mxu0 %v4381_v18 }
0x10ab   :  { %1790 = vmatpush.msra.mxu0 %v4376_v17 }
0x1124   :  { %v1408_v3 = vpop.f32.mrf.mxu1  ;;  %v1360_v11 = vpop.f32.mrf.mxu0 }
0x1125   :  { %1412 = vrot.lane.b32.xlu0 %v1408_v3, %s4181_s17  ;;  %v1363_v12 = vadd.f32 %v1360_v11, %v4449_v5 }
0x1127   :  { %v3570_v13 = vmul.f32 -1.442695, %v1363_v12 }
0x112b   :  { %v1458_v4 = vpop.f32.mrf.mxu2  ;;  %v1490_v10 = vpop.f32.mrf.mxu3 }
0x112c   :  { %1462 = vrot.lane.b32.xlu1 %v1458_v4, %s4180_s16 }
0x1197   :  { %v1413_v31 = vpop.permute.xlu0 %1412 }
0x1198   :  { %v1415_v32 = vadd.f32 %v1413_v31, %v4449_v5 }
0x119a   :  { %v3572_v33 = vmul.f32 -1.442695, %v1415_v32 }
0x119e   :  { %v1463_v7 = vpop.permute.xlu1 %1462 }
0x119f   :  { %v1465_v8 = vadd.f32 %v1463_v7, %v4449_v5 }
0x11a1   :  { %3990 = vtanh.f32 %v1465_v8 }
0x11a2   :  { %3992 = vpow2.f32 %v3570_v13 }
0x11a7   :  { %v3991_v9 = vpop.eup %3990 }
0x11a8   :  { %1519 = vrot.lane.b32.xlu2 %v3991_v9, %s4176_s13  ;;  %v3993_v14 = vpop.eup %3992 }
0x11a9   :  { %v1367_v15 = vadd.f32 1.0, %v3993_v14 }
0x11ab   :  { %3994 = vrcp.f32 %v1367_v15  ;;  %v1379_v24 = vand.u32 2147483648, %v1367_v15  ;;  %vm1373_vm5 = vweird.f32 %v1367_v15  ;;  %v1377_v25 = vand.u32 2147483647, %v1367_v15 }
0x11ac   :  { %3996 = vpow2.f32 %v3572_v33 }
0x11ad   :  { %v1380_v27 = vor.u32 1.1754944e-38, %v1379_v24  ;;  %vm1378_vm7 = vcmp.eq.f32.partialorder %v1377_v25, 8.507059e+37 }
0x11b0   :  { %1494 = vrot.lane.b32.xlu2 %v1490_v10, %s4182_s20 }
0x11b1   :  { %v3995_v16 = vpop.eup %3994 }
0x11b2   :  { %v1369_v20 = vmul.f32 %v3995_v16, %v1367_v15  ;;  %vm1374_vm4 = vweird.f32 %v3995_v16  ;;  %v3997_v2 = vpop.eup %3996  ;;  %v4482_v15 = vld [vmem:[%s4772_s0 + $0x1] sm:$0x1] }
0x11b3   :  { %vm1375_vm6 = vmor %vm1373_vm5, %vm1374_vm4  ;;  %v1419_v34 = vadd.f32 1.0, %v3997_v2 }
0x11b4   :  { %v1370_v21 = vsub.f32 1.0, %v1369_v20 }
0x11b5   :  { %3998 = vrcp.f32 %v1419_v34  ;;  %v1431_v1 = vand.u32 2147483648, %v1419_v34  ;;  %vm1425_vm9 = vweird.f32 %v1419_v34  ;;  %v1429_v0 = vand.u32 2147483647, %v1419_v34 }
0x11b6   :  { %v1371_v22 = vmul.f32 %v3995_v16, %v1370_v21 }
0x11b7   :  { %v1432_v41 = vor.u32 1.1754944e-38, %v1431_v1  ;;  %vm1430_vm11 = vcmp.eq.f32.partialorder %v1429_v0, 8.507059e+37 }
0x11b8   :  { %v1372_v23 = vadd.f32 %v3995_v16, %v1371_v22 }
0x11ba   :  { %v1376_v26 = vsel %vm1375_vm6, %v3995_v16, %v1372_v23 }
0x11bb   :  { %v1381_v28 = vsel %vm1378_vm7, %v1380_v27, %v1376_v26  ;;  %v3999_v35 = vpop.eup %3998 }
0x11bc   :  { %v1421_v6 = vmul.f32 %v3999_v35, %v1419_v34  ;;  %vm1426_vm8 = vweird.f32 %v3999_v35 }
0x11bd   :  { %vm1427_vm10 = vmor %vm1425_vm9, %vm1426_vm8 }
0x11be   :  { %v1422_v36 = vsub.f32 1.0, %v1421_v6 }
0x11c0   :  { %v1423_v38 = vmul.f32 %v3999_v35, %v1422_v36 }
0x11c2   :  { %v1424_v39 = vadd.f32 %v3999_v35, %v1423_v38 }
0x11c4   :  { %v1428_v40 = vsel %vm1427_vm10, %v3999_v35, %v1424_v39 }
0x11c5   :  { %v1433_v42 = vsel %vm1430_vm11, %v1432_v41, %v1428_v40 }
0x11c6   :  { %v1517_v29 = vmul.f32 %v1433_v42, %v4429_v37 }
0x1202   :  { %v1520_v57 = vpop.permute.xlu2 %1519 }
0x1203   :  { %v1522_v30 = vmul.f32 %v1520_v57, %v1381_v28 }
0x1205   :  { %1524 = vrot.lane.b32.xlu1 %v1522_v30, %s4181_s17 }
0x120a   :  { %v1495_v46 = vpop.permute.xlu2 %1494 }
0x120b   :  { %v1497_v47 = vadd.f32 %v1495_v46, %v4449_v5 }
0x120d   :  { %3759 = vrot.lane.b32.xlu1 %v4385_v19, %s4176_s13  ;;  %v3575_v48 = vmul.f32 -1.442695, %v1497_v47 }
0x1215   :  { %3769 = vrot.lane.b32.xlu1 %v4385_v19, %s4177_s14 }
0x1277   :  { %v1525_v43 = vpop.permute.xlu1 %1524 }
0x1278   :  { %v4462_v44 = vadd.f32 %v1525_v43, %v1517_v29 }
0x127a   :  { %4000 = vtanh.f32 %v4462_v44 }
0x127b   :  { %4002 = vpow2.f32 %v3575_v48 }
0x127f   :  { %v3760_v51 = vpop.permute.xlu1 %3759 }
0x1280   :  { %v4001_v45 = vpop.eup %4000  ;;  %v3762_v37 = vunpack.i.h.bf16 %v3760_v51  ;;  %v3761_v52 = vunpack.i.l.bf16 %v3760_v51 }
0x1281   :  { %1530 = vrot.lane.b32.xlu0 %v4001_v45, %s4180_s16  ;;  %v4003_v49 = vpop.eup %4002 }
0x1282   :  { %v1501_v50 = vadd.f32 1.0, %v4003_v49  ;;  %1671 = vmatpush.msrb.mxu2 %v3761_v52 }
0x1284   :  { %4004 = vrcp.f32 %v1501_v50  ;;  %1672 = vmatpush.msrb.mxu2 %v3762_v37  ;;  %v1513_v62 = vand.u32 2147483648, %v1501_v50  ;;  %vm1507_vm13 = vweird.f32 %v1501_v50  ;;  %v1511_v63 = vand.u32 2147483647, %v1501_v50 }
0x1286   :  { %v1514_v4 = vor.u32 1.1754944e-38, %v1513_v62  ;;  %vm1512_vm15 = vcmp.eq.f32.partialorder %v1511_v63, 8.507059e+37 }
0x1287   :  { %v3770_v54 = vpop.permute.xlu1 %3769 }
0x1288   :  { %v3772_v55 = vunpack.i.h.bf16 %v3770_v54  ;;  %v3771_v56 = vunpack.i.l.bf16 %v3770_v54 }
0x1289   :  { %3764 = vrot.lane.b32.xlu0 %v4385_v19, %s4178_s15 }
0x128a   :  { %v4005_v53 = vpop.eup %4004  ;;  %1703 = vmatpush.msrb.mxu3 %v3771_v56 }
0x128b   :  { %v1503_v58 = vmul.f32 %v4005_v53, %v1501_v50  ;;  %vm1508_vm12 = vweird.f32 %v4005_v53 }
0x128c   :  { %1704 = vmatpush.msrb.mxu3 %v3772_v55  ;;  %vm1509_vm14 = vmor %vm1507_vm13, %vm1508_vm12 }
0x128d   :  { %v1504_v59 = vsub.f32 1.0, %v1503_v58 }
0x128f   :  { %v1505_v60 = vmul.f32 %v4005_v53, %v1504_v59 }
0x1291   :  { %v1506_v61 = vadd.f32 %v4005_v53, %v1505_v60 }
0x1293   :  { %v1510_v3 = vsel %vm1509_vm14, %v4005_v53, %v1506_v61 }
0x1294   :  { %v1515_v5 = vsel %vm1512_vm15, %v1514_v4, %v1510_v3 }
0x12f3   :  { %v1531_v7 = vpop.permute.xlu0 %1530 }
0x12f4   :  { %v1533_v8 = vmul.f32 %v1531_v7, %v1515_v5 }
0x12f6   :  { %1535 = vrot.lane.b32.xlu2 %v1533_v8, %s4177_s14 }
0x12fb   :  { %v3765_v9 = vpop.permute.xlu0 %3764 }
0x12fc   :  { %v3767_v10 = vunpack.i.h.bf16 %v3765_v9  ;;  %v3766_v11 = vunpack.i.l.bf16 %v3765_v9 }
0x12fe   :  { %1621 = vmatpush.msrb.mxu1 %v3766_v11 }
0x1300   :  { %1622 = vmatpush.msrb.mxu1 %v3767_v10 }
0x1350   :  { %v1536_v12 = vpop.permute.xlu2 %1535 }
0x1351   :  { %1539 = vst.msk [vmem:[#allocation4 + $0x6] sm:$0x1] %vm16_vm0, %v1536_v12  ;;  %3577 = vmatmul.msk.f32.vlgmr.msrb.gmra.mxu0 %vm38_vm1, %v1536_v12  ;;  %3579 = vmatmul.msk.f32.vlgmr.msrb.gmra.mxu1 %vm38_vm1, %v1536_v12 }
0x1352   :  { %3581 = vmatmul.msk.f32.vlgmr.msrb.gmra.mxu2 %vm38_vm1, %v1536_v12  ;;  %3582 = vmatmul.msk.f32.vlgmr.msrb.gmra.mxu3 %vm38_vm1, %v1536_v12 }
0x1353   :  { %2005 = vmatpush.msrb.mxu0 %v4381_v18 }
0x1355   :  { %2006 = vmatpush.msrb.mxu0 %v4376_v17 }
0x13ce   :  { %v1624_v13 = vpop.f32.mrf.mxu1  ;;  %v1576_v17 = vpop.f32.mrf.mxu0 }
0x13cf   :  { %1628 = vrot.lane.b32.xlu1 %v1624_v13, %s4181_s17  ;;  %v1579_v22 = vadd.f32 %v4482_v15, %v1576_v17 }
0x13d1   :  { %v3578_v23 = vmul.f32 -1.442695, %v1579_v22 }
0x13d5   :  { %v1674_v14 = vpop.f32.mrf.mxu2  ;;  %v1706_v18 = vpop.f32.mrf.mxu3 }
0x13d6   :  { %1678 = vrot.lane.b32.xlu2 %v1674_v14, %s4180_s16 }
0x1430   :  { %v1679_v16 = vpop.permute.xlu2 %1678 }
0x1431   :  { %v1681_v20 = vadd.f32 %v4482_v15, %v1679_v16 }
0x1433   :  { %4006 = vtanh.f32 %v1681_v20 }
0x1434   :  { %4008 = vpow2.f32 %v3578_v23  ;;  %v4513_v23 = vld [vmem:[%s4772_s0] sm:$0x1] }
0x1439   :  { %v4007_v21 = vpop.eup %4006 }
0x143a   :  { %1735 = vrot.lane.b32.xlu0 %v4007_v21, %s4176_s13  ;;  %v4009_v24 = vpop.eup %4008 }
0x143b   :  { %v1583_v25 = vadd.f32 1.0, %v4009_v24 }
0x143d   :  { %4010 = vrcp.f32 %v1583_v25  ;;  %v1595_v31 = vand.u32 2147483648, %v1583_v25  ;;  %vm1589_vm3 = vweird.f32 %v1583_v25  ;;  %v1593_v32 = vand.u32 2147483647, %v1583_v25 }
0x143f   :  { %v1596_v2 = vor.u32 1.1754944e-38, %v1595_v31  ;;  %vm1594_vm5 = vcmp.eq.f32.partialorder %v1593_v32, 8.507059e+37 }
0x1441   :  { %v1629_v36 = vpop.permute.xlu1 %1628 }
0x1442   :  { %1710 = vrot.lane.b32.xlu0 %v1706_v18, %s4182_s20  ;;  %v1631_v38 = vadd.f32 %v4482_v15, %v1629_v36 }
0x1443   :  { %v4011_v26 = vpop.eup %4010 }
0x1444   :  { %v1585_v27 = vmul.f32 %v4011_v26, %v1583_v25  ;;  %vm1590_vm2 = vweird.f32 %v4011_v26  ;;  %v3580_v39 = vmul.f32 -1.442695, %v1631_v38 }
0x1445   :  { %vm1591_vm4 = vmor %vm1589_vm3, %vm1590_vm2 }
0x1446   :  { %v1586_v57 = vsub.f32 1.0, %v1585_v27  ;;  %4012 = vpow2.f32 %v3580_v39 }
0x1448   :  { %v1587_v28 = vmul.f32 %v4011_v26, %v1586_v57 }
0x144a   :  { %v1588_v30 = vadd.f32 %v4011_v26, %v1587_v28 }
0x144c   :  { %v1592_v33 = vsel %vm1591_vm4, %v4011_v26, %v1588_v30  ;;  %v4013_v1 = vpop.eup %4012 }
0x144d   :  { %v1597_v34 = vsel %vm1594_vm5, %v1596_v2, %v1592_v33  ;;  %v1635_v0 = vadd.f32 1.0, %v4013_v1 }
0x144f   :  { %4014 = vrcp.f32 %v1635_v0  ;;  %v1647_v45 = vand.u32 2147483648, %v1635_v0  ;;  %vm1641_vm7 = vweird.f32 %v1635_v0  ;;  %v1645_v46 = vand.u32 2147483647, %v1635_v0 }
0x1451   :  { %v1648_v48 = vor.u32 1.1754944e-38, %v1647_v45  ;;  %vm1646_vm9 = vcmp.eq.f32.partialorder %v1645_v46, 8.507059e+37 }
0x1455   :  { %v4015_v40 = vpop.eup %4014 }
0x1456   :  { %v1637_v41 = vmul.f32 %v4015_v40, %v1635_v0  ;;  %vm1642_vm6 = vweird.f32 %v4015_v40 }
0x1457   :  { %vm1643_vm8 = vmor %vm1641_vm7, %vm1642_vm6 }
0x1458   :  { %v1638_v42 = vsub.f32 1.0, %v1637_v41 }
0x145a   :  { %v1639_v29 = vmul.f32 %v4015_v40, %v1638_v42 }
0x145c   :  { %v1640_v43 = vadd.f32 %v4015_v40, %v1639_v29 }
0x145e   :  { %v1644_v47 = vsel %vm1643_vm8, %v4015_v40, %v1640_v43 }
0x145f   :  { %v1649_v49 = vsel %vm1646_vm9, %v1648_v48, %v1644_v47 }
0x1460   :  { %v1733_v50 = vmul.f32 %v1649_v49, %v4462_v44 }
0x14ac   :  { %v1736_v35 = vpop.permute.xlu0 %1735 }
0x14ad   :  { %v1738_v6 = vmul.f32 %v1736_v35, %v1597_v34 }
0x14af   :  { %1740 = vrot.lane.b32.xlu2 %v1738_v6, %s4181_s17 }
0x14b4   :  { %v1711_v53 = vpop.permute.xlu0 %1710 }
0x14b5   :  { %v1713_v54 = vadd.f32 %v4482_v15, %v1711_v53 }
0x14b7   :  { %3774 = vrot.lane.b32.xlu2 %v4385_v19, %s4176_s13  ;;  %v3583_v55 = vmul.f32 -1.442695, %v1713_v54 }
0x14bf   :  { %3784 = vrot.lane.b32.xlu2 %v4385_v19, %s4177_s14 }
0x1509   :  { %v1741_v51 = vpop.permute.xlu2 %1740 }
0x150a   :  { %v4495_v37 = vadd.f32 %v1741_v51, %v1733_v50 }
0x150c   :  { %4016 = vtanh.f32 %v4495_v37 }
0x150d   :  { %4018 = vpow2.f32 %v3583_v55 }
0x1511   :  { %v3775_v59 = vpop.permute.xlu2 %3774 }
0x1512   :  { %v4017_v52 = vpop.eup %4016  ;;  %v3777_v44 = vunpack.i.h.bf16 %v3775_v59  ;;  %v3776_v60 = vunpack.i.l.bf16 %v3775_v59 }
0x1513   :  { %1746 = vrot.lane.b32.xlu1 %v4017_v52, %s4180_s16  ;;  %v4019_v56 = vpop.eup %4018 }
0x1514   :  { %v1717_v58 = vadd.f32 1.0, %v4019_v56  ;;  %1887 = vmatpush.msra.mxu2 %v3776_v60 }
0x1516   :  { %4020 = vrcp.f32 %v1717_v58  ;;  %1888 = vmatpush.msra.mxu2 %v3777_v44  ;;  %v1729_v9 = vand.u32 2147483648, %v1717_v58  ;;  %vm1723_vm11 = vweird.f32 %v1717_v58  ;;  %v1727_v10 = vand.u32 2147483647, %v1717_v58 }
0x1518   :  { %v1730_v12 = vor.u32 1.1754944e-38, %v1729_v9  ;;  %vm1728_vm13 = vcmp.eq.f32.partialorder %v1727_v10, 8.507059e+37 }
0x1519   :  { %v3785_v62 = vpop.permute.xlu2 %3784 }
0x151a   :  { %v3787_v63 = vunpack.i.h.bf16 %v3785_v62  ;;  %v3786_v3 = vunpack.i.l.bf16 %v3785_v62 }
0x151b   :  { %3779 = vrot.lane.b32.xlu1 %v4385_v19, %s4178_s15 }
0x151c   :  { %v4021_v61 = vpop.eup %4020  ;;  %1919 = vmatpush.msra.mxu3 %v3786_v3 }
0x151d   :  { %v1719_v4 = vmul.f32 %v4021_v61, %v1717_v58  ;;  %vm1724_vm10 = vweird.f32 %v4021_v61 }
0x151e   :  { %1920 = vmatpush.msra.mxu3 %v3787_v63  ;;  %vm1725_vm12 = vmor %vm1723_vm11, %vm1724_vm10 }
0x151f   :  { %v1720_v5 = vsub.f32 1.0, %v1719_v4 }
0x1521   :  { %v1721_v7 = vmul.f32 %v4021_v61, %v1720_v5 }
0x1523   :  { %v1722_v8 = vadd.f32 %v4021_v61, %v1721_v7 }
0x1525   :  { %v1726_v11 = vsel %vm1725_vm12, %v4021_v61, %v1722_v8 }
0x1526   :  { %v1731_v14 = vsel %vm1728_vm13, %v1730_v12, %v1726_v11 }
0x1585   :  { %v1747_v13 = vpop.permute.xlu1 %1746 }
0x1586   :  { %v1749_v15 = vmul.f32 %v1747_v13, %v1731_v14 }
0x1588   :  { %1751 = vrot.lane.b32.xlu0 %v1749_v15, %s4177_s14 }
0x158d   :  { %v3780_v16 = vpop.permute.xlu1 %3779 }
0x158e   :  { %v3782_v20 = vunpack.i.h.bf16 %v3780_v16  ;;  %v3781_v21 = vunpack.i.l.bf16 %v3780_v16 }
0x1590   :  { %1837 = vmatpush.msra.mxu1 %v3781_v21 }
0x1592   :  { %1838 = vmatpush.msra.mxu1 %v3782_v20 }
0x15fa   :  { %v1752_v18 = vpop.permute.xlu0 %1751 }
0x15fb   :  { %1755 = vst.msk [vmem:[#allocation4 + $0x7] sm:$0x1] %vm16_vm0, %v1752_v18  ;;  %3584 = vmatmul.msk.f32.vlgmr.msra.gmra.mxu0 %vm38_vm1, %v1752_v18  ;;  %3586 = vmatmul.msk.f32.vlgmr.msra.gmra.mxu1 %vm38_vm1, %v1752_v18 }
0x15fc   :  { %3588 = vmatmul.msk.f32.vlgmr.msra.gmra.mxu2 %vm38_vm1, %v1752_v18  ;;  %3589 = vmatmul.msk.f32.vlgmr.msra.gmra.mxu3 %vm38_vm1, %v1752_v18 }
0x1678   :  { %v1840_v17 = vpop.f32.mrf.mxu1  ;;  %v1792_v57 = vpop.f32.mrf.mxu0 }
0x1679   :  { %1844 = vrot.lane.b32.xlu2 %v1840_v17, %s4181_s17  ;;  %v1795_v28 = vadd.f32 %v1792_v57, %v4513_v23 }
0x167b   :  { %v3585_v30 = vmul.f32 -1.442695, %v1795_v28  ;;  %v4544_v28 = vld [vmem:[%s4772_s0 + $0x1] sm:$0x1] }
0x167f   :  { %v1890_v22 = vpop.f32.mrf.mxu2  ;;  %v1922_v27 = vpop.f32.mrf.mxu3 }
0x1680   :  { %1894 = vrot.lane.b32.xlu0 %v1890_v22, %s4180_s16 }
0x16d3   :  { %v1845_v42 = vpop.permute.xlu2 %1844 }
0x16d4   :  { %v1847_v29 = vadd.f32 %v1845_v42, %v4513_v23 }
0x16d6   :  { %v3587_v43 = vmul.f32 -1.442695, %v1847_v29 }
0x16f2   :  { %v1895_v24 = vpop.permute.xlu0 %1894 }
0x16f3   :  { %v1897_v25 = vadd.f32 %v1895_v24, %v4513_v23 }
0x16f5   :  { %4022 = vtanh.f32 %v1897_v25 }
0x16f6   :  { %4024 = vpow2.f32 %v3585_v30 }
0x16fb   :  { %v4023_v26 = vpop.eup %4022 }
0x16fc   :  { %1951 = vrot.lane.b32.xlu1 %v4023_v26, %s4176_s13  ;;  %v4025_v31 = vpop.eup %4024 }
0x16fd   :  { %v1799_v32 = vadd.f32 1.0, %v4025_v31 }
0x16ff   :  { %4026 = vrcp.f32 %v1799_v32  ;;  %v1811_v36 = vand.u32 2147483648, %v1799_v32  ;;  %vm1805_vm15 = vweird.f32 %v1799_v32  ;;  %v1809_v38 = vand.u32 2147483647, %v1799_v32 }
0x1700   :  { %4028 = vpow2.f32 %v3587_v43 }
0x1701   :  { %v1812_v1 = vor.u32 1.1754944e-38, %v1811_v36  ;;  %vm1810_vm3 = vcmp.eq.f32.partialorder %v1809_v38, 8.507059e+37 }
0x1704   :  { %1926 = vrot.lane.b32.xlu1 %v1922_v27, %s4182_s20 }
0x1705   :  { %v4027_v33 = vpop.eup %4026 }
0x1706   :  { %v1801_v2 = vmul.f32 %v4027_v33, %v1799_v32  ;;  %vm1806_vm14 = vweird.f32 %v4027_v33  ;;  %v4029_v45 = vpop.eup %4028 }
0x1707   :  { %vm1807_vm2 = vmor %vm1805_vm15, %vm1806_vm14  ;;  %v1851_v46 = vadd.f32 1.0, %v4029_v45 }
0x1708   :  { %v1802_v34 = vsub.f32 1.0, %v1801_v2 }
0x1709   :  { %4030 = vrcp.f32 %v1851_v46  ;;  %v1863_v52 = vand.u32 2147483648, %v1851_v46  ;;  %vm1857_vm5 = vweird.f32 %v1851_v46  ;;  %v1861_v53 = vand.u32 2147483647, %v1851_v46 }
0x170a   :  { %v1803_v35 = vmul.f32 %v4027_v33, %v1802_v34 }
0x170b   :  { %v1864_v55 = vor.u32 1.1754944e-38, %v1863_v52  ;;  %vm1862_vm7 = vcmp.eq.f32.partialorder %v1861_v53, 8.507059e+37 }
0x170c   :  { %v1804_v6 = vadd.f32 %v4027_v33, %v1803_v35 }
0x170e   :  { %v1808_v39 = vsel %vm1807_vm2, %v4027_v33, %v1804_v6 }
0x170f   :  { %v1813_v40 = vsel %vm1810_vm3, %v1812_v1, %v1808_v39  ;;  %v4031_v47 = vpop.eup %4030 }
0x1710   :  { %v1853_v48 = vmul.f32 %v4031_v47, %v1851_v46  ;;  %vm1858_vm4 = vweird.f32 %v4031_v47 }
0x1711   :  { %vm1859_vm6 = vmor %vm1857_vm5, %vm1858_vm4 }
0x1712   :  { %v1854_v49 = vsub.f32 1.0, %v1853_v48 }
0x1714   :  { %v1855_v50 = vmul.f32 %v4031_v47, %v1854_v49 }
0x1716   :  { %v1856_v51 = vadd.f32 %v4031_v47, %v1855_v50 }
0x1718   :  { %v1860_v54 = vsel %vm1859_vm6, %v4031_v47, %v1856_v51 }
0x1719   :  { %v1865_v56 = vsel %vm1862_vm7, %v1864_v55, %v1860_v54  ;;  %v4555_v55 = vld [vmem:[%s4773_s1] sm:$0xff] }
0x171a   :  { %v1949_v58 = vmul.f32 %v1865_v56, %v4495_v37  ;;  %v4560_v56 = vld [vmem:[%s4773_s1 + $0x8] sm:$0xff] }
0x171b   :  { %2221 = vmatpush.msra.mxu0 %v4560_v56 }
0x171d   :  { %2222 = vmatpush.msra.mxu0 %v4555_v55 }
0x176e   :  { %v1952_v0 = vpop.permute.xlu1 %1951 }
0x176f   :  { %v1954_v41 = vmul.f32 %v1952_v0, %v1813_v40 }
0x1771   :  { %1956 = vrot.lane.b32.xlu0 %v1954_v41, %s4181_s17 }
0x1776   :  { %v1927_v61 = vpop.permute.xlu1 %1926 }
0x1777   :  { %v1929_v62 = vadd.f32 %v1927_v61, %v4513_v23 }
0x1779   :  { %3789 = vrot.lane.b32.xlu0 %v4385_v19, %s4176_s13  ;;  %v3590_v63 = vmul.f32 -1.442695, %v1929_v62 }
0x1781   :  { %3799 = vrot.lane.b32.xlu0 %v4385_v19, %s4177_s14 }
0x17e3   :  { %v1957_v59 = vpop.permute.xlu0 %1956 }
0x17e4   :  { %v4526_v44 = vadd.f32 %v1957_v59, %v1949_v58  ;;  %v4564_v58 = vpack.i.bf16 %v4555_v55, %v4560_v56 }
0x17e6   :  { %4032 = vtanh.f32 %v4526_v44 }
0x17e7   :  { %4034 = vpow2.f32 %v3590_v63 }
0x17eb   :  { %v3790_v5 = vpop.permute.xlu0 %3789 }
0x17ec   :  { %v4033_v60 = vpop.eup %4032  ;;  %v3792_v37 = vunpack.i.h.bf16 %v3790_v5  ;;  %v3791_v7 = vunpack.i.l.bf16 %v3790_v5 }
0x17ed   :  { %1962 = vrot.lane.b32.xlu2 %v4033_v60, %s4180_s16  ;;  %v4035_v3 = vpop.eup %4034 }
0x17ee   :  { %v1933_v4 = vadd.f32 1.0, %v4035_v3  ;;  %2103 = vmatpush.msrb.mxu2 %v3791_v7 }
0x17f0   :  { %4036 = vrcp.f32 %v1933_v4  ;;  %2104 = vmatpush.msrb.mxu2 %v3792_v37  ;;  %v1945_v15 = vand.u32 2147483648, %v1933_v4  ;;  %vm1939_vm9 = vweird.f32 %v1933_v4  ;;  %v1943_v16 = vand.u32 2147483647, %v1933_v4 }
0x17f2   :  { %v1946_v21 = vor.u32 1.1754944e-38, %v1945_v15  ;;  %vm1944_vm11 = vcmp.eq.f32.partialorder %v1943_v16, 8.507059e+37 }
0x17f3   :  { %v3800_v9 = vpop.permute.xlu0 %3799 }
0x17f4   :  { %v3802_v10 = vunpack.i.h.bf16 %v3800_v9  ;;  %v3801_v11 = vunpack.i.l.bf16 %v3800_v9 }
0x17f5   :  { %3794 = vrot.lane.b32.xlu2 %v4385_v19, %s4178_s15 }
0x17f6   :  { %v4037_v8 = vpop.eup %4036  ;;  %2135 = vmatpush.msrb.mxu3 %v3801_v11 }
0x17f7   :  { %v1935_v12 = vmul.f32 %v4037_v8, %v1933_v4  ;;  %vm1940_vm8 = vweird.f32 %v4037_v8 }
0x17f8   :  { %2136 = vmatpush.msrb.mxu3 %v3802_v10  ;;  %vm1941_vm10 = vmor %vm1939_vm9, %vm1940_vm8 }
0x17f9   :  { %v1936_v19 = vsub.f32 1.0, %v1935_v12 }
0x17fb   :  { %v1937_v13 = vmul.f32 %v4037_v8, %v1936_v19 }
0x17fd   :  { %v1938_v14 = vadd.f32 %v4037_v8, %v1937_v13 }
0x17ff   :  { %v1942_v20 = vsel %vm1941_vm10, %v4037_v8, %v1938_v14 }
0x1800   :  { %v1947_v18 = vsel %vm1944_vm11, %v1946_v21, %v1942_v20 }
0x1847   :  { %v1963_v17 = vpop.permute.xlu2 %1962 }
0x1848   :  { %v1965_v22 = vmul.f32 %v1963_v17, %v1947_v18 }
0x184a   :  { %1967 = vrot.lane.b32.xlu1 %v1965_v22, %s4177_s14 }
0x184f   :  { %v3795_v23 = vpop.permute.xlu2 %3794 }
0x1850   :  { %v3797_v24 = vunpack.i.h.bf16 %v3795_v23  ;;  %v3796_v25 = vunpack.i.l.bf16 %v3795_v23 }
0x1852   :  { %2053 = vmatpush.msrb.mxu1 %v3796_v25 }
0x1854   :  { %2054 = vmatpush.msrb.mxu1 %v3797_v24 }
0x18bc   :  { %v1968_v26 = vpop.permute.xlu1 %1967 }
0x18bd   :  { %1971 = vst.msk [vmem:[#allocation4 + $0x8] sm:$0x1] %vm16_vm0, %v1968_v26  ;;  %3592 = vmatmul.msk.f32.vlgmr.msrb.gmra.mxu0 %vm38_vm1, %v1968_v26  ;;  %3594 = vmatmul.msk.f32.vlgmr.msrb.gmra.mxu1 %vm38_vm1, %v1968_v26 }
0x18be   :  { %3596 = vmatmul.msk.f32.vlgmr.msrb.gmra.mxu2 %vm38_vm1, %v1968_v26  ;;  %3597 = vmatmul.msk.f32.vlgmr.msrb.gmra.mxu3 %vm38_vm1, %v1968_v26 }
0x18bf   :  { %2437 = vmatpush.msrb.mxu0 %v4560_v56 }
0x18c1   :  { %2438 = vmatpush.msrb.mxu0 %v4555_v55 }
0x193a   :  { %v2056_v27 = vpop.f32.mrf.mxu1  ;;  %v2008_v2 = vpop.f32.mrf.mxu0 }
0x193b   :  { %2060 = vrot.lane.b32.xlu0 %v2056_v27, %s4181_s17  ;;  %v2011_v34 = vadd.f32 %v4544_v28, %v2008_v2 }
0x193d   :  { %v3593_v35 = vmul.f32 -1.442695, %v2011_v34 }
0x1941   :  { %v2106_v57 = vpop.f32.mrf.mxu2  ;;  %v2138_v33 = vpop.f32.mrf.mxu3 }
0x1942   :  { %2110 = vrot.lane.b32.xlu1 %v2106_v57, %s4180_s16 }
0x19ad   :  { %v2061_v48 = vpop.permute.xlu0 %2060 }
0x19ae   :  { %v2063_v49 = vadd.f32 %v4544_v28, %v2061_v48 }
0x19b0   :  { %v3595_v50 = vmul.f32 -1.442695, %v2063_v49 }
0x19b4   :  { %v2111_v30 = vpop.permute.xlu1 %2110 }
0x19b5   :  { %v2113_v31 = vadd.f32 %v4544_v28, %v2111_v30 }
0x19b7   :  { %4038 = vtanh.f32 %v2113_v31 }
0x19b8   :  { %4040 = vpow2.f32 %v3593_v35 }
0x19bd   :  { %v4039_v32 = vpop.eup %4038 }
0x19be   :  { %2167 = vrot.lane.b32.xlu2 %v4039_v32, %s4176_s13  ;;  %v4041_v6 = vpop.eup %4040 }
0x19bf   :  { %v2015_v36 = vadd.f32 1.0, %v4041_v6 }
0x19c1   :  { %4042 = vrcp.f32 %v2015_v36  ;;  %v2027_v41 = vand.u32 2147483648, %v2015_v36  ;;  %vm2021_vm13 = vweird.f32 %v2015_v36  ;;  %v2025_v42 = vand.u32 2147483647, %v2015_v36 }
0x19c2   :  { %4044 = vpow2.f32 %v3595_v50 }
0x19c3   :  { %v2028_v43 = vor.u32 1.1754944e-38, %v2027_v41  ;;  %vm2026_vm15 = vcmp.eq.f32.partialorder %v2025_v42, 8.507059e+37 }
0x19c6   :  { %2142 = vrot.lane.b32.xlu2 %v2138_v33, %s4182_s20 }
0x19c7   :  { %v4043_v38 = vpop.eup %4042 }
0x19c8   :  { %v2017_v39 = vmul.f32 %v4043_v38, %v2015_v36  ;;  %vm2022_vm12 = vweird.f32 %v4043_v38  ;;  %v4045_v51 = vpop.eup %4044  ;;  %v4595_v36 = vld [vmem:[%s4772_s0] sm:$0x1] }
0x19c9   :  { %vm2023_vm14 = vmor %vm2021_vm13, %vm2022_vm12  ;;  %v2067_v52 = vadd.f32 1.0, %v4045_v51 }
0x19ca   :  { %v2018_v1 = vsub.f32 1.0, %v2017_v39 }
0x19cb   :  { %4046 = vrcp.f32 %v2067_v52  ;;  %v2079_v62 = vand.u32 2147483648, %v2067_v52  ;;  %vm2073_vm3 = vweird.f32 %v2067_v52  ;;  %v2077_v63 = vand.u32 2147483647, %v2067_v52 }
0x19cc   :  { %v2019_v0 = vmul.f32 %v4043_v38, %v2018_v1 }
0x19cd   :  { %v2080_v4 = vor.u32 1.1754944e-38, %v2079_v62  ;;  %vm2078_vm5 = vcmp.eq.f32.partialorder %v2077_v63, 8.507059e+37 }
0x19ce   :  { %v2020_v40 = vadd.f32 %v4043_v38, %v2019_v0 }
0x19d0   :  { %v2024_v29 = vsel %vm2023_vm14, %v4043_v38, %v2020_v40 }
0x19d1   :  { %v2029_v45 = vsel %vm2026_vm15, %v2028_v43, %v2024_v29  ;;  %v4047_v53 = vpop.eup %4046 }
0x19d2   :  { %v2069_v54 = vmul.f32 %v4047_v53, %v2067_v52  ;;  %vm2074_vm2 = vweird.f32 %v4047_v53 }
0x19d3   :  { %vm2075_vm4 = vmor %vm2073_vm3, %vm2074_vm2 }
0x19d4   :  { %v2070_v59 = vsub.f32 1.0, %v2069_v54 }
0x19d6   :  { %v2071_v60 = vmul.f32 %v4047_v53, %v2070_v59 }
0x19d8   :  { %v2072_v61 = vadd.f32 %v4047_v53, %v2071_v60 }
0x19da   :  { %v2076_v3 = vsel %vm2075_vm4, %v4047_v53, %v2072_v61 }
0x19db   :  { %v2081_v5 = vsel %vm2078_vm5, %v2080_v4, %v2076_v3 }
0x19dc   :  { %v2165_v37 = vmul.f32 %v2081_v5, %v4526_v44 }
0x1a18   :  { %v2168_v46 = vpop.permute.xlu2 %2167 }
0x1a19   :  { %v2170_v47 = vmul.f32 %v2168_v46, %v2029_v45 }
0x1a1b   :  { %2172 = vrot.lane.b32.xlu1 %v2170_v47, %s4181_s17 }
0x1a20   :  { %v2143_v10 = vpop.permute.xlu2 %2142 }
0x1a21   :  { %v2145_v11 = vadd.f32 %v4544_v28, %v2143_v10 }
0x1a23   :  { %3804 = vrot.lane.b32.xlu1 %v4564_v58, %s4176_s13  ;;  %v3598_v12 = vmul.f32 -1.442695, %v2145_v11 }
0x1a2b   :  { %3814 = vrot.lane.b32.xlu1 %v4564_v58, %s4177_s14 }
0x1a8d   :  { %v2173_v7 = vpop.permute.xlu1 %2172 }
0x1a8e   :  { %v4575_v8 = vadd.f32 %v2173_v7, %v2165_v37 }
0x1a90   :  { %4048 = vtanh.f32 %v4575_v8 }
0x1a91   :  { %4050 = vpow2.f32 %v3598_v12 }
0x1a95   :  { %v3805_v14 = vpop.permute.xlu1 %3804 }
0x1a96   :  { %v4049_v9 = vpop.eup %4048  ;;  %v3807_v44 = vunpack.i.h.bf16 %v3805_v14  ;;  %v3806_v15 = vunpack.i.l.bf16 %v3805_v14 }
0x1a97   :  { %2178 = vrot.lane.b32.xlu0 %v4049_v9, %s4180_s16  ;;  %v4051_v19 = vpop.eup %4050 }
0x1a98   :  { %v2149_v13 = vadd.f32 1.0, %v4051_v19  ;;  %2319 = vmatpush.msra.mxu2 %v3806_v15 }
0x1a9a   :  { %4052 = vrcp.f32 %v2149_v13  ;;  %2320 = vmatpush.msra.mxu2 %v3807_v44  ;;  %v2161_v25 = vand.u32 2147483648, %v2149_v13  ;;  %vm2155_vm7 = vweird.f32 %v2149_v13  ;;  %v2159_v26 = vand.u32 2147483647, %v2149_v13 }
0x1a9c   :  { %v2162_v57 = vor.u32 1.1754944e-38, %v2161_v25  ;;  %vm2160_vm9 = vcmp.eq.f32.partialorder %v2159_v26, 8.507059e+37 }
0x1a9d   :  { %v3815_v20 = vpop.permute.xlu1 %3814 }
0x1a9e   :  { %v3817_v21 = vunpack.i.h.bf16 %v3815_v20  ;;  %v3816_v18 = vunpack.i.l.bf16 %v3815_v20 }
0x1a9f   :  { %3809 = vrot.lane.b32.xlu0 %v4564_v58, %s4178_s15 }
0x1aa0   :  { %v4053_v16 = vpop.eup %4052  ;;  %2351 = vmatpush.msra.mxu3 %v3816_v18 }
0x1aa1   :  { %v2151_v17 = vmul.f32 %v4053_v16, %v2149_v13  ;;  %vm2156_vm6 = vweird.f32 %v4053_v16 }
0x1aa2   :  { %2352 = vmatpush.msra.mxu3 %v3817_v21  ;;  %vm2157_vm8 = vmor %vm2155_vm7, %vm2156_vm6 }
0x1aa3   :  { %v2152_v22 = vsub.f32 1.0, %v2151_v17 }
0x1aa5   :  { %v2153_v23 = vmul.f32 %v4053_v16, %v2152_v22 }
0x1aa7   :  { %v2154_v24 = vadd.f32 %v4053_v16, %v2153_v23 }
0x1aa9   :  { %v2158_v27 = vsel %vm2157_vm8, %v4053_v16, %v2154_v24 }
0x1aaa   :  { %v2163_v30 = vsel %vm2160_vm9, %v2162_v57, %v2158_v27 }
0x1b09   :  { %v2179_v28 = vpop.permute.xlu0 %2178 }
0x1b0a   :  { %v2181_v31 = vmul.f32 %v2179_v28, %v2163_v30 }
0x1b0c   :  { %2183 = vrot.lane.b32.xlu2 %v2181_v31, %s4177_s14 }
0x1b11   :  { %v3810_v32 = vpop.permute.xlu0 %3809 }
0x1b12   :  { %v3812_v33 = vunpack.i.h.bf16 %v3810_v32  ;;  %v3811_v2 = vunpack.i.l.bf16 %v3810_v32 }
0x1b14   :  { %2269 = vmatpush.msra.mxu1 %v3811_v2 }
0x1b16   :  { %2270 = vmatpush.msra.mxu1 %v3812_v33 }
0x1b66   :  { %v2184_v34 = vpop.permute.xlu2 %2183 }
0x1b67   :  { %2187 = vst.msk [vmem:[#allocation4 + $0x9] sm:$0x1] %vm16_vm0, %v2184_v34  ;;  %3599 = vmatmul.msk.f32.vlgmr.msra.gmra.mxu0 %vm38_vm1, %v2184_v34  ;;  %3601 = vmatmul.msk.f32.vlgmr.msra.gmra.mxu1 %vm38_vm1, %v2184_v34 }
0x1b68   :  { %3603 = vmatmul.msk.f32.vlgmr.msra.gmra.mxu2 %vm38_vm1, %v2184_v34  ;;  %3604 = vmatmul.msk.f32.vlgmr.msra.gmra.mxu3 %vm38_vm1, %v2184_v34 }
0x1b69   :  { %2653 = vmatpush.msra.mxu0 %v4560_v56 }
0x1b6b   :  { %2654 = vmatpush.msra.mxu0 %v4555_v55 }
0x1be4   :  { %v2272_v35 = vpop.f32.mrf.mxu1  ;;  %v2224_v40 = vpop.f32.mrf.mxu0 }
0x1be5   :  { %2276 = vrot.lane.b32.xlu1 %v2272_v35, %s4181_s17  ;;  %v2227_v41 = vadd.f32 %v2224_v40, %v4595_v36 }
0x1be7   :  { %v3600_v42 = vmul.f32 -1.442695, %v2227_v41 }
0x1beb   :  { %v2322_v6 = vpop.f32.mrf.mxu2  ;;  %v2354_v0 = vpop.f32.mrf.mxu3 }
0x1bec   :  { %2326 = vrot.lane.b32.xlu2 %v2322_v6, %s4180_s16 }
0x1c46   :  { %v2327_v38 = vpop.permute.xlu2 %2326 }
0x1c47   :  { %v2329_v39 = vadd.f32 %v2327_v38, %v4595_v36 }
0x1c49   :  { %4054 = vtanh.f32 %v2329_v39 }
0x1c4a   :  { %4056 = vpow2.f32 %v3600_v42 }
0x1c4f   :  { %v4055_v1 = vpop.eup %4054 }
0x1c50   :  { %2383 = vrot.lane.b32.xlu0 %v4055_v1, %s4176_s13  ;;  %v4057_v29 = vpop.eup %4056 }
0x1c51   :  { %v2231_v43 = vadd.f32 1.0, %v4057_v29 }
0x1c53   :  { %4058 = vrcp.f32 %v2231_v43  ;;  %v2243_v50 = vand.u32 2147483648, %v2231_v43  ;;  %vm2237_vm11 = vweird.f32 %v2231_v43  ;;  %v2241_v51 = vand.u32 2147483647, %v2231_v43 }
0x1c55   :  { %v2244_v53 = vor.u32 1.1754944e-38, %v2243_v50  ;;  %vm2242_vm13 = vcmp.eq.f32.partialorder %v2241_v51, 8.507059e+37 }
0x1c57   :  { %v2277_v61 = vpop.permute.xlu1 %2276 }
0x1c58   :  { %2358 = vrot.lane.b32.xlu0 %v2354_v0, %s4182_s20  ;;  %v2279_v62 = vadd.f32 %v2277_v61, %v4595_v36 }
0x1c59   :  { %v4059_v45 = vpop.eup %4058 }
0x1c5a   :  { %v2233_v46 = vmul.f32 %v4059_v45, %v2231_v43  ;;  %vm2238_vm10 = vweird.f32 %v4059_v45  ;;  %v3602_v63 = vmul.f32 -1.442695, %v2279_v62  ;;  %v4628_v43 = vld [vmem:[%s4772_s0 + $0x1] sm:$0x1] }
0x1c5b   :  { %vm2239_vm12 = vmor %vm2237_vm11, %vm2238_vm10 }
0x1c5c   :  { %v2234_v47 = vsub.f32 1.0, %v2233_v46  ;;  %4060 = vpow2.f32 %v3602_v63 }
0x1c5e   :  { %v2235_v48 = vmul.f32 %v4059_v45, %v2234_v47 }
0x1c60   :  { %v2236_v49 = vadd.f32 %v4059_v45, %v2235_v48 }
0x1c62   :  { %v2240_v52 = vsel %vm2239_vm12, %v4059_v45, %v2236_v49  ;;  %v4061_v3 = vpop.eup %4060 }
0x1c63   :  { %v2245_v59 = vsel %vm2242_vm13, %v2244_v53, %v2240_v52  ;;  %v2283_v4 = vadd.f32 1.0, %v4061_v3 }
0x1c65   :  { %4062 = vrcp.f32 %v2283_v4  ;;  %v2295_v11 = vand.u32 2147483648, %v2283_v4  ;;  %vm2289_vm15 = vweird.f32 %v2283_v4  ;;  %v2293_v12 = vand.u32 2147483647, %v2283_v4 }
0x1c67   :  { %v2296_v13 = vor.u32 1.1754944e-38, %v2295_v11  ;;  %vm2294_vm3 = vcmp.eq.f32.partialorder %v2293_v12, 8.507059e+37 }
0x1c6b   :  { %v4063_v5 = vpop.eup %4062 }
0x1c6c   :  { %v2285_v37 = vmul.f32 %v4063_v5, %v2283_v4  ;;  %vm2290_vm14 = vweird.f32 %v4063_v5 }
0x1c6d   :  { %vm2291_vm2 = vmor %vm2289_vm15, %vm2290_vm14 }
0x1c6e   :  { %v2286_v7 = vsub.f32 1.0, %v2285_v37 }
0x1c70   :  { %v2287_v9 = vmul.f32 %v4063_v5, %v2286_v7 }
0x1c72   :  { %v2288_v10 = vadd.f32 %v4063_v5, %v2287_v9 }
0x1c74   :  { %v2292_v19 = vsel %vm2291_vm2, %v4063_v5, %v2288_v10 }
0x1c75   :  { %v2297_v14 = vsel %vm2294_vm3, %v2296_v13, %v2292_v19 }
0x1c76   :  { %v2381_v44 = vmul.f32 %v2297_v14, %v4575_v8 }
0x1cc2   :  { %v2384_v54 = vpop.permute.xlu0 %2383 }
0x1cc3   :  { %v2386_v60 = vmul.f32 %v2384_v54, %v2245_v59 }
0x1cc5   :  { %2388 = vrot.lane.b32.xlu2 %v2386_v60, %s4181_s17 }
0x1cca   :  { %v2359_v21 = vpop.permute.xlu0 %2358 }
0x1ccb   :  { %v2361_v18 = vadd.f32 %v2359_v21, %v4595_v36 }
0x1ccd   :  { %3819 = vrot.lane.b32.xlu2 %v4564_v58, %s4176_s13  ;;  %v3605_v17 = vmul.f32 -1.442695, %v2361_v18 }
0x1cd5   :  { %3829 = vrot.lane.b32.xlu2 %v4564_v58, %s4177_s14 }
0x1d1f   :  { %v2389_v15 = vpop.permute.xlu2 %2388 }
0x1d20   :  { %v4608_v16 = vadd.f32 %v2389_v15, %v2381_v44 }
0x1d22   :  { %4064 = vtanh.f32 %v4608_v16 }
0x1d23   :  { %4066 = vpow2.f32 %v3605_v17 }
0x1d27   :  { %v3820_v24 = vpop.permute.xlu2 %3819 }
0x1d28   :  { %v4065_v20 = vpop.eup %4064  ;;  %v3822_v8 = vunpack.i.h.bf16 %v3820_v24  ;;  %v3821_v25 = vunpack.i.l.bf16 %v3820_v24 }
0x1d29   :  { %2394 = vrot.lane.b32.xlu1 %v4065_v20, %s4180_s16  ;;  %v4067_v22 = vpop.eup %4066 }
0x1d2a   :  { %v2365_v23 = vadd.f32 1.0, %v4067_v22  ;;  %2535 = vmatpush.msrb.mxu2 %v3821_v25 }
0x1d2c   :  { %4068 = vrcp.f32 %v2365_v23  ;;  %2536 = vmatpush.msrb.mxu2 %v3822_v8  ;;  %v2377_v2 = vand.u32 2147483648, %v2365_v23  ;;  %vm2371_vm5 = vweird.f32 %v2365_v23  ;;  %v2375_v34 = vand.u32 2147483647, %v2365_v23 }
0x1d2e   :  { %v2378_v6 = vor.u32 1.1754944e-38, %v2377_v2  ;;  %vm2376_vm7 = vcmp.eq.f32.partialorder %v2375_v34, 8.507059e+37 }
0x1d2f   :  { %v3830_v27 = vpop.permute.xlu2 %3829 }
0x1d30   :  { %v3832_v57 = vunpack.i.h.bf16 %v3830_v27  ;;  %v3831_v28 = vunpack.i.l.bf16 %v3830_v27 }
0x1d31   :  { %3824 = vrot.lane.b32.xlu1 %v4564_v58, %s4178_s15 }
0x1d32   :  { %v4069_v26 = vpop.eup %4068  ;;  %2567 = vmatpush.msrb.mxu3 %v3831_v28 }
0x1d33   :  { %v2367_v30 = vmul.f32 %v4069_v26, %v2365_v23  ;;  %vm2372_vm4 = vweird.f32 %v4069_v26 }
0x1d34   :  { %2568 = vmatpush.msrb.mxu3 %v3832_v57  ;;  %vm2373_vm6 = vmor %vm2371_vm5, %vm2372_vm4 }
0x1d35   :  { %v2368_v31 = vsub.f32 1.0, %v2367_v30 }
0x1d37   :  { %v2369_v32 = vmul.f32 %v4069_v26, %v2368_v31 }
0x1d39   :  { %v2370_v33 = vadd.f32 %v4069_v26, %v2369_v32 }
0x1d3b   :  { %v2374_v35 = vsel %vm2373_vm6, %v4069_v26, %v2370_v33 }
0x1d3c   :  { %v2379_v36 = vsel %vm2376_vm7, %v2378_v6, %v2374_v35 }
0x1d9b   :  { %v2395_v38 = vpop.permute.xlu1 %2394 }
0x1d9c   :  { %v2397_v39 = vmul.f32 %v2395_v38, %v2379_v36 }
0x1d9e   :  { %2399 = vrot.lane.b32.xlu0 %v2397_v39, %s4177_s14 }
0x1da3   :  { %v3825_v1 = vpop.permute.xlu1 %3824 }
0x1da4   :  { %v3827_v0 = vunpack.i.h.bf16 %v3825_v1  ;;  %v3826_v40 = vunpack.i.l.bf16 %v3825_v1 }
0x1da6   :  { %2485 = vmatpush.msrb.mxu1 %v3826_v40 }
0x1da8   :  { %2486 = vmatpush.msrb.mxu1 %v3827_v0 }
0x1e10   :  { %v2400_v41 = vpop.permute.xlu0 %2399 }
0x1e11   :  { %2403 = vst.msk [vmem:[#allocation4 + $0xa] sm:$0x1] %vm16_vm0, %v2400_v41  ;;  %3607 = vmatmul.msk.f32.vlgmr.msrb.gmra.mxu0 %vm38_vm1, %v2400_v41  ;;  %3609 = vmatmul.msk.f32.vlgmr.msrb.gmra.mxu1 %vm38_vm1, %v2400_v41 }
0x1e12   :  { %3611 = vmatmul.msk.f32.vlgmr.msrb.gmra.mxu2 %vm38_vm1, %v2400_v41  ;;  %3612 = vmatmul.msk.f32.vlgmr.msrb.gmra.mxu3 %vm38_vm1, %v2400_v41 }
0x1e13   :  { %2869 = vmatpush.msrb.mxu0 %v4560_v56 }
0x1e15   :  { %2870 = vmatpush.msrb.mxu0 %v4555_v55 }
0x1e8e   :  { %v2488_v42 = vpop.f32.mrf.mxu1  ;;  %v2440_v49 = vpop.f32.mrf.mxu0 }
0x1e8f   :  { %2492 = vrot.lane.b32.xlu2 %v2488_v42, %s4181_s17  ;;  %v2443_v50 = vadd.f32 %v4628_v43, %v2440_v49 }
0x1e91   :  { %v3608_v51 = vmul.f32 -1.442695, %v2443_v50 }
0x1e95   :  { %v2538_v29 = vpop.f32.mrf.mxu2  ;;  %v2570_v48 = vpop.f32.mrf.mxu3 }
0x1e96   :  { %2542 = vrot.lane.b32.xlu0 %v2538_v29, %s4180_s16 }
0x1ee9   :  { %v2493_v10 = vpop.permute.xlu2 %2492 }
0x1eea   :  { %v2495_v11 = vadd.f32 %v4628_v43, %v2493_v10 }
0x1eec   :  { %v3610_v12 = vmul.f32 -1.442695, %v2495_v11 }
0x1f08   :  { %v2543_v45 = vpop.permute.xlu0 %2542 }
0x1f09   :  { %v2545_v46 = vadd.f32 %v4628_v43, %v2543_v45 }
0x1f0b   :  { %4070 = vtanh.f32 %v2545_v46 }
0x1f0c   :  { %4072 = vpow2.f32 %v3608_v51 }
0x1f11   :  { %v4071_v47 = vpop.eup %4070 }
0x1f12   :  { %2599 = vrot.lane.b32.xlu1 %v4071_v47, %s4176_s13  ;;  %v4073_v52 = vpop.eup %4072 }
0x1f13   :  { %v2447_v53 = vadd.f32 1.0, %v4073_v52 }
0x1f15   :  { %4074 = vrcp.f32 %v2447_v53  ;;  %v2459_v63 = vand.u32 2147483648, %v2447_v53  ;;  %vm2453_vm9 = vweird.f32 %v2447_v53  ;;  %v2457_v3 = vand.u32 2147483647, %v2447_v53 }
0x1f16   :  { %4076 = vpow2.f32 %v3610_v12 }
0x1f17   :  { %v2460_v5 = vor.u32 1.1754944e-38, %v2459_v63  ;;  %vm2458_vm11 = vcmp.eq.f32.partialorder %v2457_v3, 8.507059e+37 }
0x1f1a   :  { %2574 = vrot.lane.b32.xlu1 %v2570_v48, %s4182_s20 }
0x1f1b   :  { %v4075_v54 = vpop.eup %4074 }
0x1f1c   :  { %v2449_v59 = vmul.f32 %v4075_v54, %v2447_v53  ;;  %vm2454_vm8 = vweird.f32 %v4075_v54  ;;  %v4077_v19 = vpop.eup %4076  ;;  %v4661_v53 = vld [vmem:[%s4772_s0] sm:$0x1] }
0x1f1d   :  { %vm2455_vm10 = vmor %vm2453_vm9, %vm2454_vm8  ;;  %v2499_v13 = vadd.f32 1.0, %v4077_v19 }
0x1f1e   :  { %v2450_v60 = vsub.f32 1.0, %v2449_v59 }
0x1f1f   :  { %4078 = vrcp.f32 %v2499_v13  ;;  %v2511_v18 = vand.u32 2147483648, %v2499_v13  ;;  %vm2505_vm13 = vweird.f32 %v2499_v13  ;;  %v2509_v17 = vand.u32 2147483647, %v2499_v13 }
0x1f20   :  { %v2451_v61 = vmul.f32 %v4075_v54, %v2450_v60 }
0x1f21   :  { %v2512_v23 = vor.u32 1.1754944e-38, %v2511_v18  ;;  %vm2510_vm15 = vcmp.eq.f32.partialorder %v2509_v17, 8.507059e+37 }
0x1f22   :  { %v2452_v62 = vadd.f32 %v4075_v54, %v2451_v61 }
0x1f24   :  { %v2456_v4 = vsel %vm2455_vm10, %v4075_v54, %v2452_v62 }
0x1f25   :  { %v2461_v37 = vsel %vm2458_vm11, %v2460_v5, %v2456_v4  ;;  %v4079_v14 = vpop.eup %4078 }
0x1f26   :  { %v2501_v44 = vmul.f32 %v4079_v14, %v2499_v13  ;;  %vm2506_vm12 = vweird.f32 %v4079_v14 }
0x1f27   :  { %vm2507_vm14 = vmor %vm2505_vm13, %vm2506_vm12 }
0x1f28   :  { %v2502_v15 = vsub.f32 1.0, %v2501_v44 }
0x1f2a   :  { %v2503_v20 = vmul.f32 %v4079_v14, %v2502_v15 }
0x1f2c   :  { %v2504_v21 = vadd.f32 %v4079_v14, %v2503_v20 }
0x1f2e   :  { %v2508_v22 = vsel %vm2507_vm14, %v4079_v14, %v2504_v21 }
0x1f2f   :  { %v2513_v24 = vsel %vm2510_vm15, %v2512_v23, %v2508_v22 }
0x1f30   :  { %v2597_v8 = vmul.f32 %v2513_v24, %v4608_v16 }
0x1f84   :  { %v2600_v7 = vpop.permute.xlu1 %2599 }
0x1f85   :  { %v2602_v9 = vmul.f32 %v2600_v7, %v2461_v37 }
0x1f87   :  { %2604 = vrot.lane.b32.xlu0 %v2602_v9, %s4181_s17 }
0x1f8c   :  { %v2575_v57 = vpop.permute.xlu1 %2574 }
0x1f8d   :  { %v2577_v28 = vadd.f32 %v4628_v43, %v2575_v57 }
0x1f8f   :  { %3834 = vrot.lane.b32.xlu0 %v4564_v58, %s4176_s13  ;;  %v3613_v30 = vmul.f32 -1.442695, %v2577_v28 }
0x1f97   :  { %3844 = vrot.lane.b32.xlu0 %v4564_v58, %s4177_s14 }
0x1ff9   :  { %v2605_v25 = vpop.permute.xlu0 %2604 }
0x1ffa   :  { %v4641_v26 = vadd.f32 %v2605_v25, %v2597_v8 }
0x1ffc   :  { %4080 = vtanh.f32 %v4641_v26 }
0x1ffd   :  { %4082 = vpow2.f32 %v3613_v30 }
0x2001   :  { %v3835_v33 = vpop.permute.xlu0 %3834 }
0x2002   :  { %v4081_v27 = vpop.eup %4080  ;;  %v3837_v16 = vunpack.i.h.bf16 %v3835_v33  ;;  %v3836_v2 = vunpack.i.l.bf16 %v3835_v33 }
0x2003   :  { %2610 = vrot.lane.b32.xlu2 %v4081_v27, %s4180_s16  ;;  %v4083_v31 = vpop.eup %4082 }
0x2004   :  { %v2581_v32 = vadd.f32 1.0, %v4083_v31  ;;  %2751 = vmatpush.msra.mxu2 %v3836_v2 }
0x2006   :  { %4084 = vrcp.f32 %v2581_v32  ;;  %2752 = vmatpush.msra.mxu2 %v3837_v16  ;;  %v2593_v40 = vand.u32 2147483648, %v2581_v32  ;;  %vm2587_vm3 = vweird.f32 %v2581_v32  ;;  %v2591_v41 = vand.u32 2147483647, %v2581_v32 }
0x2008   :  { %v2594_v29 = vor.u32 1.1754944e-38, %v2593_v40  ;;  %vm2592_vm5 = vcmp.eq.f32.partialorder %v2591_v41, 8.507059e+37 }
0x2009   :  { %v3845_v35 = vpop.permute.xlu0 %3844 }
0x200a   :  { %v3847_v6 = vunpack.i.h.bf16 %v3845_v35  ;;  %v3846_v36 = vunpack.i.l.bf16 %v3845_v35 }
0x200b   :  { %3839 = vrot.lane.b32.xlu2 %v4564_v58, %s4178_s15 }
0x200c   :  { %v4085_v34 = vpop.eup %4084  ;;  %2783 = vmatpush.msra.mxu3 %v3846_v36 }
0x200d   :  { %v2583_v38 = vmul.f32 %v4085_v34, %v2581_v32  ;;  %vm2588_vm2 = vweird.f32 %v4085_v34 }
0x200e   :  { %2784 = vmatpush.msra.mxu3 %v3847_v6  ;;  %vm2589_vm4 = vmor %vm2587_vm3, %vm2588_vm2 }
0x200f   :  { %v2584_v39 = vsub.f32 1.0, %v2583_v38 }
0x2011   :  { %v2585_v1 = vmul.f32 %v4085_v34, %v2584_v39 }
0x2013   :  { %v2586_v0 = vadd.f32 %v4085_v34, %v2585_v1 }
0x2015   :  { %v2590_v42 = vsel %vm2589_vm4, %v4085_v34, %v2586_v0 }
0x2016   :  { %v2595_v45 = vsel %vm2592_vm5, %v2594_v29, %v2590_v42 }
0x205d   :  { %v2611_v43 = vpop.permute.xlu2 %2610 }
0x205e   :  { %v2613_v46 = vmul.f32 %v2611_v43, %v2595_v45 }
0x2060   :  { %2615 = vrot.lane.b32.xlu1 %v2613_v46, %s4177_s14 }
0x2065   :  { %v3840_v47 = vpop.permute.xlu2 %3839 }
0x2066   :  { %v3842_v48 = vunpack.i.h.bf16 %v3840_v47  ;;  %v3841_v49 = vunpack.i.l.bf16 %v3840_v47 }
0x2068   :  { %2701 = vmatpush.msra.mxu1 %v3841_v49 }
0x206a   :  { %2702 = vmatpush.msra.mxu1 %v3842_v48 }
0x20d2   :  { %v2616_v50 = vpop.permute.xlu1 %2615 }
0x20d3   :  { %2619 = vst.msk [vmem:[#allocation4 + $0xb] sm:$0x1] %vm16_vm0, %v2616_v50  ;;  %3614 = vmatmul.msk.f32.vlgmr.msra.gmra.mxu0 %vm38_vm1, %v2616_v50  ;;  %3616 = vmatmul.msk.f32.vlgmr.msra.gmra.mxu1 %vm38_vm1, %v2616_v50 }
0x20d4   :  { %3618 = vmatmul.msk.f32.vlgmr.msra.gmra.mxu2 %vm38_vm1, %v2616_v50  ;;  %3619 = vmatmul.msk.f32.vlgmr.msra.gmra.mxu3 %vm38_vm1, %v2616_v50 }
0x20d5   :  { %3085 = vmatpush.msra.mxu0 %v4560_v56 }
0x20d7   :  { %3086 = vmatpush.msra.mxu0 %v4555_v55 }
0x2150   :  { %v2704_v51 = vpop.f32.mrf.mxu1  ;;  %v2656_v55 = vpop.f32.mrf.mxu0 }
0x2151   :  { %2708 = vrot.lane.b32.xlu0 %v2704_v51, %s4181_s17  ;;  %v2659_v61 = vadd.f32 %v2656_v55, %v4661_v53 }
0x2153   :  { %v3615_v62 = vmul.f32 -1.442695, %v2659_v61 }
0x2157   :  { %v2754_v52 = vpop.f32.mrf.mxu2  ;;  %v2786_v56 = vpop.f32.mrf.mxu3 }
0x2158   :  { %2758 = vrot.lane.b32.xlu1 %v2754_v52, %s4180_s16 }
0x21c3   :  { %v2709_v15 = vpop.permute.xlu0 %2708 }
0x21c4   :  { %v2711_v20 = vadd.f32 %v2709_v15, %v4661_v53 }
0x21c6   :  { %v3617_v21 = vmul.f32 -1.442695, %v2711_v20 }
0x21ca   :  { %v2759_v54 = vpop.permute.xlu1 %2758 }
0x21cb   :  { %v2761_v59 = vadd.f32 %v2759_v54, %v4661_v53 }
0x21cd   :  { %4086 = vtanh.f32 %v2761_v59 }
0x21ce   :  { %4088 = vpow2.f32 %v3615_v62  ;;  %v4692_v62 = vld [vmem:[%s4772_s0 + $0x1] sm:$0x1] }
0x21d3   :  { %v4087_v60 = vpop.eup %4086 }
0x21d4   :  { %2815 = vrot.lane.b32.xlu2 %v4087_v60, %s4176_s13  ;;  %v4089_v63 = vpop.eup %4088 }
0x21d5   :  { %v2663_v3 = vadd.f32 1.0, %v4089_v63 }
0x21d7   :  { %4090 = vrcp.f32 %v2663_v3  ;;  %v2675_v10 = vand.u32 2147483648, %v2663_v3  ;;  %vm2669_vm7 = vweird.f32 %v2663_v3  ;;  %v2673_v11 = vand.u32 2147483647, %v2663_v3 }
0x21d8   :  { %4092 = vpow2.f32 %v3617_v21 }
0x21d9   :  { %v2676_v19 = vor.u32 1.1754944e-38, %v2675_v10  ;;  %vm2674_vm9 = vcmp.eq.f32.partialorder %v2673_v11, 8.507059e+37 }
0x21dc   :  { %2790 = vrot.lane.b32.xlu2 %v2786_v56, %s4182_s20 }
0x21dd   :  { %v4091_v4 = vpop.eup %4090 }
0x21de   :  { %v2665_v5 = vmul.f32 %v4091_v4, %v2663_v3  ;;  %vm2670_vm6 = vweird.f32 %v4091_v4  ;;  %v4093_v18 = vpop.eup %4092 }
0x21df   :  { %vm2671_vm8 = vmor %vm2669_vm7, %vm2670_vm6  ;;  %v2715_v17 = vadd.f32 1.0, %v4093_v18 }
0x21e0   :  { %v2666_v37 = vsub.f32 1.0, %v2665_v5 }
0x21e1   :  { %4094 = vrcp.f32 %v2715_v17  ;;  %v2727_v27 = vand.u32 2147483648, %v2715_v17  ;;  %vm2721_vm11 = vweird.f32 %v2715_v17  ;;  %v2725_v57 = vand.u32 2147483647, %v2715_v17 }
0x21e2   :  { %v2667_v7 = vmul.f32 %v4091_v4, %v2666_v37 }
0x21e3   :  { %v2728_v30 = vor.u32 1.1754944e-38, %v2727_v27  ;;  %vm2726_vm13 = vcmp.eq.f32.partialorder %v2725_v57, 8.507059e+37 }
0x21e4   :  { %v2668_v9 = vadd.f32 %v4091_v4, %v2667_v7 }
0x21e6   :  { %v2672_v12 = vsel %vm2671_vm8, %v4091_v4, %v2668_v9 }
0x21e7   :  { %v2677_v14 = vsel %vm2674_vm9, %v2676_v19, %v2672_v12  ;;  %v4095_v22 = vpop.eup %4094 }
0x21e8   :  { %v2717_v23 = vmul.f32 %v4095_v22, %v2715_v17  ;;  %vm2722_vm10 = vweird.f32 %v4095_v22 }
0x21e9   :  { %vm2723_vm12 = vmor %vm2721_vm11, %vm2722_vm10 }
0x21ea   :  { %v2718_v24 = vsub.f32 1.0, %v2717_v23 }
0x21ec   :  { %v2719_v8 = vmul.f32 %v4095_v22, %v2718_v24 }
0x21ee   :  { %v2720_v25 = vadd.f32 %v4095_v22, %v2719_v8 }
0x21f0   :  { %v2724_v28 = vsel %vm2723_vm12, %v4095_v22, %v2720_v25 }
0x21f1   :  { %v2729_v31 = vsel %vm2726_vm13, %v2728_v30, %v2724_v28 }
0x21f2   :  { %v2813_v32 = vmul.f32 %v2729_v31, %v4641_v26 }
0x222e   :  { %v2816_v13 = vpop.permute.xlu2 %2815 }
0x222f   :  { %v2818_v44 = vmul.f32 %v2816_v13, %v2677_v14 }
0x2231   :  { %2820 = vrot.lane.b32.xlu1 %v2818_v44, %s4181_s17 }
0x2236   :  { %v2791_v34 = vpop.permute.xlu2 %2790 }
0x2237   :  { %v2793_v35 = vadd.f32 %v2791_v34, %v4661_v53 }
0x2239   :  { %3849 = vrot.lane.b32.xlu1 %v4564_v58, %s4176_s13  ;;  %v3620_v6 = vmul.f32 -1.442695, %v2793_v35 }
0x2241   :  { %3859 = vrot.lane.b32.xlu1 %v4564_v58, %s4177_s14 }
0x22a3   :  { %v2821_v33 = vpop.permute.xlu1 %2820 }
0x22a4   :  { %v4674_v16 = vadd.f32 %v2821_v33, %v2813_v32 }
0x22a6   :  { %4096 = vtanh.f32 %v4674_v16 }
0x22a7   :  { %4098 = vpow2.f32 %v3620_v6 }
0x22ab   :  { %v3850_v39 = vpop.permute.xlu1 %3849 }
0x22ac   :  { %v4097_v2 = vpop.eup %4096  ;;  %v3852_v26 = vunpack.i.h.bf16 %v3850_v39  ;;  %v3851_v1 = vunpack.i.l.bf16 %v3850_v39 }
0x22ad   :  { %2826 = vrot.lane.b32.xlu0 %v4097_v2, %s4180_s16  ;;  %v4099_v36 = vpop.eup %4098 }
0x22ae   :  { %v2797_v38 = vadd.f32 1.0, %v4099_v36  ;;  %2967 = vmatpush.msrb.mxu2 %v3851_v1 }
0x22b0   :  { %4100 = vrcp.f32 %v2797_v38  ;;  %2968 = vmatpush.msrb.mxu2 %v3852_v26  ;;  %v2809_v47 = vand.u32 2147483648, %v2797_v38  ;;  %vm2803_vm15 = vweird.f32 %v2797_v38  ;;  %v2807_v48 = vand.u32 2147483647, %v2797_v38 }
0x22b2   :  { %v2810_v50 = vor.u32 1.1754944e-38, %v2809_v47  ;;  %vm2808_vm3 = vcmp.eq.f32.partialorder %v2807_v48, 8.507059e+37 }
0x22b3   :  { %v3860_v40 = vpop.permute.xlu1 %3859 }
0x22b4   :  { %v3862_v41 = vunpack.i.h.bf16 %v3860_v40  ;;  %v3861_v42 = vunpack.i.l.bf16 %v3860_v40 }
0x22b5   :  { %3854 = vrot.lane.b32.xlu0 %v4564_v58, %s4178_s15 }
0x22b6   :  { %v4101_v0 = vpop.eup %4100  ;;  %2999 = vmatpush.msrb.mxu3 %v3861_v42 }
0x22b7   :  { %v2799_v29 = vmul.f32 %v4101_v0, %v2797_v38  ;;  %vm2804_vm14 = vweird.f32 %v4101_v0 }
0x22b8   :  { %3000 = vmatpush.msrb.mxu3 %v3862_v41  ;;  %vm2805_vm2 = vmor %vm2803_vm15, %vm2804_vm14 }
0x22b9   :  { %v2800_v43 = vsub.f32 1.0, %v2799_v29 }
0x22bb   :  { %v2801_v45 = vmul.f32 %v4101_v0, %v2800_v43 }
0x22bd   :  { %v2802_v46 = vadd.f32 %v4101_v0, %v2801_v45 }
0x22bf   :  { %v2806_v49 = vsel %vm2805_vm2, %v4101_v0, %v2802_v46 }
0x22c0   :  { %v2811_v51 = vsel %vm2808_vm3, %v2810_v50, %v2806_v49 }
0x231f   :  { %v2827_v52 = vpop.permute.xlu0 %2826 }
0x2320   :  { %v2829_v53 = vmul.f32 %v2827_v52, %v2811_v51 }
0x2322   :  { %2831 = vrot.lane.b32.xlu2 %v2829_v53, %s4177_s14 }
0x2327   :  { %v3855_v54 = vpop.permute.xlu0 %3854 }
0x2328   :  { %v3857_v59 = vunpack.i.h.bf16 %v3855_v54  ;;  %v3856_v60 = vunpack.i.l.bf16 %v3855_v54 }
0x232a   :  { %2917 = vmatpush.msrb.mxu1 %v3856_v60 }
0x232c   :  { %2918 = vmatpush.msrb.mxu1 %v3857_v59 }
0x237c   :  { %v2832_v56 = vpop.permute.xlu2 %2831 }
0x237d   :  { %2835 = vst.msk [vmem:[#allocation4 + $0xc] sm:$0x1] %vm16_vm0, %v2832_v56  ;;  %3622 = vmatmul.msk.f32.vlgmr.msrb.gmra.mxu0 %vm38_vm1, %v2832_v56  ;;  %3624 = vmatmul.msk.f32.vlgmr.msrb.gmra.mxu1 %vm38_vm1, %v2832_v56 }
0x237e   :  { %3626 = vmatmul.msk.f32.vlgmr.msrb.gmra.mxu2 %vm38_vm1, %v2832_v56  ;;  %3627 = vmatmul.msk.f32.vlgmr.msrb.gmra.mxu3 %vm38_vm1, %v2832_v56 }
0x23fa   :  { %v2920_v55 = vpop.f32.mrf.mxu1  ;;  %v2872_v37 = vpop.f32.mrf.mxu0 }
0x23fb   :  { %2924 = vrot.lane.b32.xlu1 %v2920_v55, %s4181_s17  ;;  %v2875_v7 = vadd.f32 %v4692_v62, %v2872_v37 }
0x23fd   :  { %v3623_v9 = vmul.f32 -1.442695, %v2875_v7  ;;  %v4723_v7 = vld [vmem:[%s4772_s0] sm:$0x1] }
0x2401   :  { %v2970_v61 = vpop.f32.mrf.mxu2  ;;  %v3002_v5 = vpop.f32.mrf.mxu3 }
0x2402   :  { %2974 = vrot.lane.b32.xlu2 %v2970_v61, %s4180_s16 }
0x245c   :  { %v2975_v63 = vpop.permute.xlu2 %2974 }
0x245d   :  { %v2977_v3 = vadd.f32 %v4692_v62, %v2975_v63 }
0x245f   :  { %4102 = vtanh.f32 %v2977_v3 }
0x2460   :  { %4104 = vpow2.f32 %v3623_v9 }
0x2465   :  { %v4103_v4 = vpop.eup %4102 }
0x2466   :  { %3031 = vrot.lane.b32.xlu0 %v4103_v4, %s4176_s13  ;;  %v4105_v10 = vpop.eup %4104 }
0x2467   :  { %v2879_v11 = vadd.f32 1.0, %v4105_v10 }
0x2469   :  { %4106 = vrcp.f32 %v2879_v11  ;;  %v2891_v15 = vand.u32 2147483648, %v2879_v11  ;;  %vm2885_vm5 = vweird.f32 %v2879_v11  ;;  %v2889_v20 = vand.u32 2147483647, %v2879_v11 }
0x246b   :  { %v2892_v18 = vor.u32 1.1754944e-38, %v2891_v15  ;;  %vm2890_vm7 = vcmp.eq.f32.partialorder %v2889_v20, 8.507059e+37 }
0x246d   :  { %v2925_v24 = vpop.permute.xlu1 %2924 }
0x246e   :  { %3006 = vrot.lane.b32.xlu0 %v3002_v5, %s4182_s20  ;;  %v2927_v8 = vadd.f32 %v4692_v62, %v2925_v24 }
0x246f   :  { %v4107_v12 = vpop.eup %4106 }
0x2470   :  { %v2881_v19 = vmul.f32 %v4107_v12, %v2879_v11  ;;  %vm2886_vm4 = vweird.f32 %v4107_v12  ;;  %v3625_v25 = vmul.f32 -1.442695, %v2927_v8 }
0x2471   :  { %vm2887_vm6 = vmor %vm2885_vm5, %vm2886_vm4 }
0x2472   :  { %v2882_v13 = vsub.f32 1.0, %v2881_v19  ;;  %4108 = vpow2.f32 %v3625_v25 }
0x2474   :  { %v2883_v14 = vmul.f32 %v4107_v12, %v2882_v13 }
0x2476   :  { %v2884_v44 = vadd.f32 %v4107_v12, %v2883_v14 }
0x2478   :  { %v2888_v21 = vsel %vm2887_vm6, %v4107_v12, %v2884_v44  ;;  %v4109_v27 = vpop.eup %4108 }
0x2479   :  { %v2893_v17 = vsel %vm2890_vm7, %v2892_v18, %v2888_v21  ;;  %v2931_v57 = vadd.f32 1.0, %v4109_v27 }
0x247b   :  { %4110 = vrcp.f32 %v2931_v57  ;;  %v2943_v2 = vand.u32 2147483648, %v2931_v57  ;;  %vm2937_vm9 = vweird.f32 %v2931_v57  ;;  %v2941_v34 = vand.u32 2147483647, %v2931_v57 }
0x247d   :  { %v2944_v6 = vor.u32 1.1754944e-38, %v2943_v2  ;;  %vm2942_vm11 = vcmp.eq.f32.partialorder %v2941_v34, 8.507059e+37 }
0x2481   :  { %v4111_v28 = vpop.eup %4110 }
0x2482   :  { %v2933_v30 = vmul.f32 %v4111_v28, %v2931_v57  ;;  %vm2938_vm8 = vweird.f32 %v4111_v28 }
0x2483   :  { %vm2939_vm10 = vmor %vm2937_vm9, %vm2938_vm8 }
0x2484   :  { %v2934_v31 = vsub.f32 1.0, %v2933_v30 }
0x2486   :  { %v2935_v32 = vmul.f32 %v4111_v28, %v2934_v31 }
0x2488   :  { %v2936_v33 = vadd.f32 %v4111_v28, %v2935_v32 }
0x248a   :  { %v2940_v35 = vsel %vm2939_vm10, %v4111_v28, %v2936_v33 }
0x248b   :  { %v2945_v36 = vsel %vm2942_vm11, %v2944_v6, %v2940_v35  ;;  %v3283_v6 = vld [vmem:[%s4773_s1] sm:$0xff] }
0x248c   :  { %v3029_v38 = vmul.f32 %v2945_v36, %v4674_v16  ;;  %v3284_v36 = vld [vmem:[%s4773_s1 + $0x8] sm:$0xff] }
0x248d   :  { %3301 = vmatpush.msrb.mxu0 %v3284_v36 }
0x248f   :  { %3302 = vmatpush.msrb.mxu0 %v3283_v6 }
0x24d8   :  { %v3032_v22 = vpop.permute.xlu0 %3031 }
0x24d9   :  { %v3034_v23 = vmul.f32 %v3032_v22, %v2893_v17 }
0x24db   :  { %3036 = vrot.lane.b32.xlu2 %v3034_v23, %s4181_s17 }
0x24e0   :  { %v3007_v0 = vpop.permute.xlu0 %3006 }
0x24e1   :  { %v3009_v40 = vadd.f32 %v4692_v62, %v3007_v0 }
0x24e3   :  { %3864 = vrot.lane.b32.xlu2 %v4564_v58, %s4176_s13  ;;  %v3628_v41 = vmul.f32 -1.442695, %v3009_v40 }
0x24eb   :  { %3874 = vrot.lane.b32.xlu2 %v4564_v58, %s4177_s14 }
0x2535   :  { %v3037_v39 = vpop.permute.xlu2 %3036 }
0x2536   :  { %v4705_v26 = vadd.f32 %v3037_v39, %v3029_v38  ;;  %v3878_v38 = vpack.i.bf16 %v3283_v6, %v3284_v36 }
0x2538   :  { %4112 = vtanh.f32 %v4705_v26 }
0x2539   :  { %4114 = vpow2.f32 %v3628_v41 }
0x253d   :  { %v3865_v43 = vpop.permute.xlu2 %3864 }
0x253e   :  { %v4113_v1 = vpop.eup %4112  ;;  %v3867_v16 = vunpack.i.h.bf16 %v3865_v43  ;;  %v3866_v45 = vunpack.i.l.bf16 %v3865_v43 }
0x253f   :  { %3042 = vrot.lane.b32.xlu1 %v4113_v1, %s4180_s16  ;;  %v4115_v42 = vpop.eup %4114 }
0x2540   :  { %v3013_v29 = vadd.f32 1.0, %v4115_v42  ;;  %3183 = vmatpush.msra.mxu2 %v3866_v45 }
0x2542   :  { %4116 = vrcp.f32 %v3013_v29  ;;  %3184 = vmatpush.msra.mxu2 %v3867_v16  ;;  %v3025_v53 = vand.u32 2147483648, %v3013_v29  ;;  %vm3019_vm13 = vweird.f32 %v3013_v29  ;;  %v3023_v54 = vand.u32 2147483647, %v3013_v29 }
0x2544   :  { %v3026_v60 = vor.u32 1.1754944e-38, %v3025_v53  ;;  %vm3024_vm15 = vcmp.eq.f32.partialorder %v3023_v54, 8.507059e+37 }
0x2545   :  { %v3875_v47 = vpop.permute.xlu2 %3874 }
0x2546   :  { %v3877_v48 = vunpack.i.h.bf16 %v3875_v47  ;;  %v3876_v49 = vunpack.i.l.bf16 %v3875_v47 }
0x2547   :  { %3869 = vrot.lane.b32.xlu1 %v4564_v58, %s4178_s15 }
0x2548   :  { %v4117_v46 = vpop.eup %4116  ;;  %3215 = vmatpush.msra.mxu3 %v3876_v49 }
0x2549   :  { %v3015_v50 = vmul.f32 %v4117_v46, %v3013_v29  ;;  %vm3020_vm12 = vweird.f32 %v4117_v46 }
0x254a   :  { %3216 = vmatpush.msra.mxu3 %v3877_v48  ;;  %vm3021_vm14 = vmor %vm3019_vm13, %vm3020_vm12 }
0x254b   :  { %v3016_v58 = vsub.f32 1.0, %v3015_v50 }
0x254d   :  { %v3017_v51 = vmul.f32 %v4117_v46, %v3016_v58 }
0x254f   :  { %v3018_v52 = vadd.f32 %v4117_v46, %v3017_v51 }
0x2551   :  { %v3022_v59 = vsel %vm3021_vm14, %v4117_v46, %v3018_v52 }
0x2552   :  { %v3027_v55 = vsel %vm3024_vm15, %v3026_v60, %v3022_v59 }
0x25b1   :  { %v3043_v56 = vpop.permute.xlu1 %3042 }
0x25b2   :  { %v3045_v61 = vmul.f32 %v3043_v56, %v3027_v55 }
0x25b4   :  { %3047 = vrot.lane.b32.xlu0 %v3045_v61, %s4177_s14 }
0x25b9   :  { %v3870_v62 = vpop.permute.xlu1 %3869 }
0x25ba   :  { %v3872_v63 = vunpack.i.h.bf16 %v3870_v62  ;;  %v3871_v3 = vunpack.i.l.bf16 %v3870_v62 }
0x25bc   :  { %3133 = vmatpush.msra.mxu1 %v3871_v3 }
0x25be   :  { %3134 = vmatpush.msra.mxu1 %v3872_v63 }
0x2626   :  { %v3048_v4 = vpop.permute.xlu0 %3047 }
0x2627   :  { %3051 = vst.msk [vmem:[#allocation4 + $0xd] sm:$0x1] %vm16_vm0, %v3048_v4  ;;  %3629 = vmatmul.msk.f32.vlgmr.msra.gmra.mxu0 %vm38_vm1, %v3048_v4  ;;  %3631 = vmatmul.msk.f32.vlgmr.msra.gmra.mxu1 %vm38_vm1, %v3048_v4 }
0x2628   :  { %3633 = vmatmul.msk.f32.vlgmr.msra.gmra.mxu2 %vm38_vm1, %v3048_v4  ;;  %3634 = vmatmul.msk.f32.vlgmr.msra.gmra.mxu3 %vm38_vm1, %v3048_v4 }
0x26a4   :  { %v3136_v5 = vpop.f32.mrf.mxu1  ;;  %v3088_v19 = vpop.f32.mrf.mxu0 }
0x26a5   :  { %3140 = vrot.lane.b32.xlu2 %v3136_v5, %s4181_s17  ;;  %v3091_v13 = vadd.f32 %v3088_v19, %v4723_v7 }
0x26a7   :  { %v3630_v14 = vmul.f32 -1.442695, %v3091_v13 }
0x26ab   :  { %v3186_v37 = vpop.f32.mrf.mxu2  ;;  %v3218_v12 = vpop.f32.mrf.mxu3 }
0x26ac   :  { %3190 = vrot.lane.b32.xlu0 %v3186_v37, %s4180_s16 }
0x26ff   :  { %v3141_v30 = vpop.permute.xlu2 %3140 }
0x2700   :  { %v3143_v31 = vadd.f32 %v3141_v30, %v4723_v7 }
0x2702   :  { %v3632_v32 = vmul.f32 -1.442695, %v3143_v31 }
0x271e   :  { %v3191_v9 = vpop.permute.xlu0 %3190 }
0x271f   :  { %v3193_v10 = vadd.f32 %v3191_v9, %v4723_v7 }
0x2721   :  { %4118 = vtanh.f32 %v3193_v10 }
0x2722   :  { %4120 = vpow2.f32 %v3630_v14 }
0x2727   :  { %v4119_v11 = vpop.eup %4118 }
0x2728   :  { %3247 = vrot.lane.b32.xlu1 %v4119_v11, %s4176_s13  ;;  %v4121_v44 = vpop.eup %4120 }
0x2729   :  { %v3095_v15 = vadd.f32 1.0, %v4121_v44 }
0x272b   :  { %4122 = vrcp.f32 %v3095_v15  ;;  %v3107_v23 = vand.u32 2147483648, %v3095_v15  ;;  %vm3101_vm3 = vweird.f32 %v3095_v15  ;;  %v3105_v24 = vand.u32 2147483647, %v3095_v15 }
0x272c   :  { %4124 = vpow2.f32 %v3632_v32 }
0x272d   :  { %v3108_v25 = vor.u32 1.1754944e-38, %v3107_v23  ;;  %vm3106_vm5 = vcmp.eq.f32.partialorder %v3105_v24, 8.507059e+37 }
0x2730   :  { %3222 = vrot.lane.b32.xlu1 %v3218_v12, %s4182_s20 }
0x2731   :  { %v4123_v20 = vpop.eup %4122 }
0x2732   :  { %v3097_v21 = vmul.f32 %v4123_v20, %v3095_v15  ;;  %vm3102_vm2 = vweird.f32 %v4123_v20  ;;  %v4125_v33 = vpop.eup %4124  ;;  %v3636_v15 = vld [vmem:[%s4772_s0 + $0x1] sm:$0x1]  ;;  %s4183_s0 = smov [#allocation4]  }
0x2733   :  { %vm3103_vm4 = vmor %vm3101_vm3, %vm3102_vm2  ;;  %v3147_v2 = vadd.f32 1.0, %v4125_v33 }
0x2734   :  { %v3098_v18 = vsub.f32 1.0, %v3097_v21 }
0x2735   :  { %4126 = vrcp.f32 %v3147_v2  ;;  %v3159_v40 = vand.u32 2147483648, %v3147_v2  ;;  %vm3153_vm7 = vweird.f32 %v3147_v2  ;;  %v3157_v41 = vand.u32 2147483647, %v3147_v2 }
0x2736   :  { %v3099_v17 = vmul.f32 %v4123_v20, %v3098_v18 }
0x2737   :  { %v3160_v29 = vor.u32 1.1754944e-38, %v3159_v40  ;;  %vm3158_vm9 = vcmp.eq.f32.partialorder %v3157_v41, 8.507059e+37 }
0x2738   :  { %v3100_v22 = vadd.f32 %v4123_v20, %v3099_v17 }
0x273a   :  { %v3104_v8 = vsel %vm3103_vm4, %v4123_v20, %v3100_v22 }
0x273b   :  { %v3109_v57 = vsel %vm3106_vm5, %v3108_v25, %v3104_v8  ;;  %v4127_v34 = vpop.eup %4126 }
0x273c   :  { %v3149_v35 = vmul.f32 %v4127_v34, %v3147_v2  ;;  %vm3154_vm6 = vweird.f32 %v4127_v34 }
0x273d   :  { %vm3155_vm8 = vmor %vm3153_vm7, %vm3154_vm6 }
0x273e   :  { %v3150_v39 = vsub.f32 1.0, %v3149_v35 }
0x2740   :  { %v3151_v1 = vmul.f32 %v4127_v34, %v3150_v39 }
0x2742   :  { %v3152_v0 = vadd.f32 %v4127_v34, %v3151_v1 }
0x2744   :  { %v3156_v42 = vsel %vm3155_vm8, %v4127_v34, %v3152_v0 }
0x2745   :  { %v3161_v43 = vsel %vm3158_vm9, %v3160_v29, %v3156_v42 }
0x2746   :  { %v3245_v16 = vmul.f32 %v3161_v43, %v4705_v26 }
0x279a   :  { %v3248_v27 = vpop.permute.xlu1 %3247 }
0x279b   :  { %v3250_v28 = vmul.f32 %v3248_v27, %v3109_v57 }
0x279d   :  { %3252 = vrot.lane.b32.xlu0 %v3250_v28, %s4181_s17 }
0x27a2   :  { %v3223_v48 = vpop.permute.xlu1 %3222 }
0x27a3   :  { %v3225_v49 = vadd.f32 %v3223_v48, %v4723_v7 }
0x27a5   :  { %3879 = vrot.lane.b32.xlu0 %v3878_v38, %s4176_s13  ;;  %v3635_v50 = vmul.f32 -1.442695, %v3225_v49 }
0x27ad   :  { %3889 = vrot.lane.b32.xlu0 %v3878_v38, %s4177_s14 }
0x280f   :  { %v3253_v45 = vpop.permute.xlu0 %3252 }
0x2810   :  { %v4740_v46 = vadd.f32 %v3253_v45, %v3245_v16 }
0x2812   :  { %4128 = vtanh.f32 %v4740_v46 }
0x2813   :  { %4130 = vpow2.f32 %v3635_v50 }
0x2817   :  { %v3880_v55 = vpop.permute.xlu0 %3879 }
0x2818   :  { %v4129_v47 = vpop.eup %4128  ;;  %v3882_v61 = vunpack.i.h.bf16 %v3880_v55  ;;  %v3881_v62 = vunpack.i.l.bf16 %v3880_v55 }
0x2819   :  { %3258 = vrot.lane.b32.xlu2 %v4129_v47, %s4180_s16  ;;  %v4131_v58 = vpop.eup %4130 }
0x281a   :  { %v3229_v51 = vadd.f32 1.0, %v4131_v58  ;;  %3399 = vmatpush.msrb.mxu2 %v3881_v62 }
0x281c   :  { %4132 = vrcp.f32 %v3229_v51  ;;  %v3241_v60 = vand.u32 2147483648, %v3229_v51  ;;  %vm3235_vm11 = vweird.f32 %v3229_v51  ;;  %v3239_v56 = vand.u32 2147483647, %v3229_v51  ;;  %3400 = vmatpush.msrb.mxu2 %v3882_v61 }
0x281e   :  { %v3242_v3 = vor.u32 1.1754944e-38, %v3241_v60  ;;  %vm3240_vm13 = vcmp.eq.f32.partialorder %v3239_v56, 8.507059e+37 }
0x281f   :  { %v3890_v7 = vpop.permute.xlu0 %3889 }
0x2820   :  { %v3892_v9 = vunpack.i.h.bf16 %v3890_v7  ;;  %v3891_v10 = vunpack.i.l.bf16 %v3890_v7 }
0x2821   :  { %3884 = vrot.lane.b32.xlu2 %v3878_v38, %s4178_s15 }
0x2822   :  { %v4133_v52 = vpop.eup %4132  ;;  %3431 = vmatpush.msrb.mxu3 %v3891_v10 }
0x2823   :  { %v3231_v26 = vmul.f32 %v4133_v52, %v3229_v51  ;;  %vm3236_vm10 = vweird.f32 %v4133_v52 }
0x2824   :  { %vm3237_vm12 = vmor %vm3235_vm11, %vm3236_vm10  ;;  %3432 = vmatpush.msrb.mxu3 %v3892_v9 }
0x2825   :  { %v3232_v53 = vsub.f32 1.0, %v3231_v26 }
0x2827   :  { %v3233_v54 = vmul.f32 %v4133_v52, %v3232_v53 }
0x2829   :  { %v3234_v59 = vadd.f32 %v4133_v52, %v3233_v54 }
0x282b   :  { %v3238_v63 = vsel %vm3237_vm12, %v4133_v52, %v3234_v59 }
0x282c   :  { %v3243_v4 = vsel %vm3240_vm13, %v3242_v3, %v3238_v63 }
0x2873   :  { %v3259_v5 = vpop.permute.xlu2 %3258 }
0x2874   :  { %v3261_v37 = vmul.f32 %v3259_v5, %v3243_v4 }
0x2876   :  { %3263 = vrot.lane.b32.xlu1 %v3261_v37, %s4177_s14 }
0x287b   :  { %v3885_v11 = vpop.permute.xlu2 %3884 }
0x287c   :  { %v3887_v12 = vunpack.i.h.bf16 %v3885_v11  ;;  %v3886_v19 = vunpack.i.l.bf16 %v3885_v11 }
0x287e   :  { %3349 = vmatpush.msrb.mxu1 %v3886_v19 }
0x2880   :  { %3350 = vmatpush.msrb.mxu1 %v3887_v12 }
0x28e8   :  { %v3264_v13 = vpop.permute.xlu1 %3263 }
0x28e9   :  { %3267 = vst.msk [vmem:[#allocation4 + $0xe] sm:$0x1] %vm16_vm0, %v3264_v13  ;;  %3637 = vmatmul.msk.f32.vlgmr.msrb.gmra.mxu0 %vm38_vm1, %v3264_v13  ;;  %3639 = vmatmul.msk.f32.vlgmr.msrb.gmra.mxu1 %vm38_vm1, %v3264_v13 }
0x28ea   :  { %3641 = vmatmul.msk.f32.vlgmr.msrb.gmra.mxu2 %vm38_vm1, %v3264_v13  ;;  %3642 = vmatmul.msk.f32.vlgmr.msrb.gmra.mxu3 %vm38_vm1, %v3264_v13 }
0x2966   :  { %v3352_v14 = vpop.f32.mrf.mxu1  ;;  %v3304_v22 = vpop.f32.mrf.mxu0 }
0x2967   :  { %3356 = vrot.lane.b32.xlu0 %v3352_v14, %s4181_s17  ;;  %v3307_v23 = vadd.f32 %v3636_v15, %v3304_v22 }
0x2969   :  { %v3638_v24 = vmul.f32 -1.442695, %v3307_v23 }
0x296d   :  { %v3402_v44 = vpop.f32.mrf.mxu2  ;;  %v3434_v17 = vpop.f32.mrf.mxu3 }
0x296e   :  { %3406 = vrot.lane.b32.xlu1 %v3402_v44, %s4180_s16 }
0x29d9   :  { %v3357_v38 = vpop.permute.xlu0 %3356 }
0x29da   :  { %v3359_v39 = vadd.f32 %v3636_v15, %v3357_v38 }
0x29dc   :  { %v3640_v1 = vmul.f32 -1.442695, %v3359_v39 }
0x29e0   :  { %v3407_v20 = vpop.permute.xlu1 %3406 }
0x29e1   :  { %v3409_v21 = vadd.f32 %v3636_v15, %v3407_v20 }
0x29e3   :  { %4134 = vtanh.f32 %v3409_v21 }
0x29e4   :  { %4136 = vpow2.f32 %v3638_v24 }
0x29e9   :  { %v4135_v18 = vpop.eup %4134 }
0x29ea   :  { %3463 = vrot.lane.b32.xlu2 %v4135_v18, %s4176_s13  ;;  %v4137_v8 = vpop.eup %4136  ;;  %s3494_s13 = sshll.u32 %s4183_s0, 4  ;;  %s3495_s13 = int_to_ptr.vmem [resolvable:$true] %s3494_s13 }
0x29eb   :  { %v3311_v25 = vadd.f32 1.0, %v4137_v8 }
0x29ed   :  { %4138 = vrcp.f32 %v3311_v25  ;;  %v3323_v32 = vand.u32 2147483648, %v3311_v25  ;;  %vm3317_vm14 = vweird.f32 %v3311_v25  ;;  %v3321_v33 = vand.u32 2147483647, %v3311_v25 }
0x29ee   :  { %4140 = vpow2.f32 %v3640_v1 }
0x29ef   :  { %v3324_v34 = vor.u32 1.1754944e-38, %v3323_v32  ;;  %vm3322_vm2 = vcmp.eq.f32.partialorder %v3321_v33, 8.507059e+37 }
0x29f2   :  { %3438 = vrot.lane.b32.xlu2 %v3434_v17, %s4182_s20  ;;  %s3496_s20 = sshll.u32 %s4774_s2, 4  ;;  %s3497_s20 = int_to_ptr.hbm [resolvable:$true] %s3496_s20 }
0x29f3   :  { %v4139_v27 = vpop.eup %4138 }
0x29f4   :  { %v3313_v57 = vmul.f32 %v4139_v27, %v3311_v25  ;;  %vm3318_vm1 = vweird.f32 %v4139_v27  ;;  %v4141_v0 = vpop.eup %4140 }
0x29f5   :  { %vm3319_vm15 = vmor %vm3317_vm14, %vm3318_vm1  ;;  %v3363_v40 = vadd.f32 1.0, %v4141_v0 }
0x29f6   :  { %v3314_v28 = vsub.f32 1.0, %v3313_v57 }
0x29f7   :  { %4142 = vrcp.f32 %v3363_v40  ;;  %v3375_v45 = vand.u32 2147483648, %v3363_v40  ;;  %vm3369_vm4 = vweird.f32 %v3363_v40  ;;  %v3373_v47 = vand.u32 2147483647, %v3363_v40 }
0x29f8   :  { %v3315_v30 = vmul.f32 %v4139_v27, %v3314_v28 }
0x29f9   :  { %v3376_v49 = vor.u32 1.1754944e-38, %v3375_v45  ;;  %vm3374_vm6 = vcmp.eq.f32.partialorder %v3373_v47, 8.507059e+37 }
0x29fa   :  { %v3316_v31 = vadd.f32 %v4139_v27, %v3315_v30 }
0x29fc   :  { %v3320_v2 = vsel %vm3319_vm15, %v4139_v27, %v3316_v31 }
0x29fd   :  { %v3325_v35 = vsel %vm3322_vm2, %v3324_v34, %v3320_v2  ;;  %v4143_v41 = vpop.eup %4142 }
0x29fe   :  { %v3365_v42 = vmul.f32 %v4143_v41, %v3363_v40  ;;  %vm3370_vm3 = vweird.f32 %v4143_v41 }
0x29ff   :  { %vm3371_vm5 = vmor %vm3369_vm4, %vm3370_vm3 }
0x2a00   :  { %v3366_v29 = vsub.f32 1.0, %v3365_v42 }
0x2a02   :  { %v3367_v43 = vmul.f32 %v4143_v41, %v3366_v29 }
0x2a04   :  { %v3368_v16 = vadd.f32 %v4143_v41, %v3367_v43 }
0x2a06   :  { %v3372_v48 = vsel %vm3371_vm5, %v4143_v41, %v3368_v16 }
0x2a07   :  { %v3377_v50 = vsel %vm3374_vm6, %v3376_v49, %v3372_v48 }
0x2a08   :  { %v3461_v58 = vmul.f32 %v3377_v50, %v4740_v46 }
0x2a44   :  { %v3464_v6 = vpop.permute.xlu2 %3463 }
0x2a45   :  { %v3466_v36 = vmul.f32 %v3464_v6, %v3325_v35 }
0x2a47   :  { %3468 = vrot.lane.b32.xlu1 %v3466_v36, %s4181_s17 }
0x2a4c   :  { %v3439_v53 = vpop.permute.xlu2 %3438 }
0x2a4d   :  { %v3441_v54 = vadd.f32 %v3636_v15, %v3439_v53 }
0x2a4f   :  { %v3643_v59 = vmul.f32 -1.442695, %v3441_v54 }
0x2ab9   :  { %v3469_v51 = vpop.permute.xlu1 %3468 }
0x2aba   :  { %v3471_v52 = vadd.f32 %v3469_v51, %v3461_v58 }
0x2abc   :  { %4144 = vtanh.f32 %v3471_v52  ;;  %3486 = vrot.lane.b32.xlu2 %v3471_v52, %s4178_s15 }
0x2abd   :  { %4146 = vpow2.f32 %v3643_v59 }
0x2ac2   :  { %v4145_v26 = vpop.eup %4144 }
0x2ac3   :  { %3474 = vrot.lane.b32.xlu0 %v4145_v26, %s4180_s16  ;;  %v4147_v60 = vpop.eup %4146 }
0x2ac4   :  { %v3445_v56 = vadd.f32 1.0, %v4147_v60 }
0x2ac6   :  { %4148 = vrcp.f32 %v3445_v56  ;;  %v3457_v4 = vand.u32 2147483648, %v3445_v56  ;;  %vm3451_vm8 = vweird.f32 %v3445_v56  ;;  %v3455_v5 = vand.u32 2147483647, %v3445_v56 }
0x2ac8   :  { %v3458_v7 = vor.u32 1.1754944e-38, %v3457_v4  ;;  %vm3456_vm10 = vcmp.eq.f32.partialorder %v3455_v5, 8.507059e+37 }
0x2acc   :  { %v4149_v61 = vpop.eup %4148 }
0x2acd   :  { %v3447_v46 = vmul.f32 %v4149_v61, %v3445_v56  ;;  %vm3452_vm7 = vweird.f32 %v4149_v61 }
0x2ace   :  { %vm3453_vm9 = vmor %vm3451_vm8, %vm3452_vm7 }
0x2acf   :  { %v3448_v62 = vsub.f32 1.0, %v3447_v46 }
0x2ad1   :  { %v3449_v63 = vmul.f32 %v4149_v61, %v3448_v62 }
0x2ad3   :  { %v3450_v3 = vadd.f32 %v4149_v61, %v3449_v63 }
0x2ad5   :  { %v3454_v37 = vsel %vm3453_vm9, %v4149_v61, %v3450_v3 }
0x2ad6   :  { %v3459_v10 = vsel %vm3456_vm10, %v3458_v7, %v3454_v37 }
0x2b16   :  { %v3487_v55 = vpop.permute.xlu2 %3486 }
0x2b17   :  { %3489 = vst.msk [vmem:[#allocation3] sm:$0x1] %vm16_vm0, %v3487_v55 }
0x2b35   :  { %v3475_v9 = vpop.permute.xlu0 %3474 }
0x2b36   :  { %v3477_v11 = vmul.f32 %v3475_v9, %v3459_v10 }
0x2b38   :  { %3479 = vrot.lane.b32.xlu1 %v3477_v11, %s4177_s14 }
0x2baa   :  { %v3480_v12 = vpop.permute.xlu1 %3479 }
0x2bab   :  { %3483 = vst.msk [vmem:[#allocation4 + $0xf] sm:$0x1] %vm16_vm0, %v3480_v12 }
0x2bac   :  { %3484 = vst.msk [vmem:[#allocation2] sm:$0x1] %vm16_vm0, %v3480_v12  ;;  %3502 = dma.vmem_to_hbm [thread:$0]  %s3495_s13, 256, %s3497_s20, [#allocation5], %s4181_s17, %s4181_s17, %s4184_s12  }
0x2bad   :  { %4174 = dma.done.wait [#allocation5], 256  }
0x2bae   :  { %4175 = vsyncadd [#allocation5], 4294967040 }
0x2baf   :  { %3507 = vsyncpa [#allocation5], 1 }

</bundles_post_ra>
